<compile_context>
chip_gen: v5e
topology: v5e:2x2
jax: 0.10.0
libtpu: 0.0.40
codegen_flags: <defaults>
</compile_context>

<pallas_src>
import numpy as np
import jax
import jax.numpy as jnp
from jax.experimental import pallas as pl
from jax.experimental.pallas import tpu as pltpu

# ----------------------------------------------------------------------------
# Fixed geometry of the demo problem (input 16^3, as in the PyTorch module).
# ----------------------------------------------------------------------------
D_IN, C_IN = 16, 3
K1, S1, P1 = 4, 2, 1          # conv1
K2, S2, P2 = 4, 2, 1          # conv2
K4, S4, P4 = 3, 1, 1          # conv4
C1, C2 = 8, 8
D1 = (D_IN + 2 * P1 - K1) // S1 + 1          # 8  spatial after conv1
D2 = (D1 + 2 * P2 - K2) // S2 + 1            # 4  spatial after conv2 / conv4

L_IN = D_IN * D_IN * C_IN                    # 768  input lanes  (h, w, c)
L1 = D1 * D1 * C1                            # 512  conv1 lanes  (h1, w1, c1)
L2 = D2 * D2 * C2                            # 128  conv2 lanes  (h2, w2, c2)
DP_PAD = 20                                  # depth padded 16 -> 20 (1 front, 3 back)
MD, RD = DP_PAD // 4, 4                      # depth residue split: d_pad = 4*m + r


# ----------------------------------------------------------------------------
# The fused kernel: 11 MXU matmuls + static slices/concats + bias + clip.
# ----------------------------------------------------------------------------
def _encoder_kernel(x_ref, t1_ref, b1_ref, t2_ref, b2_ref, t4_ref, b4_ref, o_ref):
    f32 = jnp.float32

    # Six distinct depth slabs of this batch element: slab(q)[u] = input row at
    # padded depth d_pad = 4*u + q, all (h, w, c) lanes.
    slabs = {}

    def slab(q):
        if q not in slabs:
            slabs[q] = x_ref[0, q % 4][q // 4: q // 4 + 4, :]        # (4, 768)
        return slabs[q]

    # ---- conv1 + ReLU6 ------------------------------------------------------
    # Output half-row u of parity p is depth d1 = 2*u + p; depth tap kd reads
    # padded input depth 4*u + (2*p + kd).  H/W taps, stride and padding are
    # folded into the block-Toeplitz table t1[kd] (768 -> 512 lanes).
    acc_e = acc_o = None
    for kd in range(K1):
        lhs = jnp.concatenate([slab(kd), slab(kd + 2)], axis=0)      # (8, 768)
        part = jnp.dot(lhs, t1_ref[kd], preferred_element_type=f32)  # (8, 512)
        pe, po = part[0:4], part[4:8]
        acc_e = pe if acc_e is None else acc_e + pe
        acc_o = po if acc_o is None else acc_o + po
    y1e = jnp.clip(acc_e + b1_ref[...], 0.0, 6.0)                    # d1 = 0,2,4,6
    y1o = jnp.clip(acc_o + b1_ref[...], 0.0, 6.0)                    # d1 = 1,3,5,7

    # ---- conv2 + ReLU6 ------------------------------------------------------
    # Output depth d2 reads d1 = 2*d2 + kd2 - 1: per tap that is one of the
    # parity halves, shifted by one row at the edges (zero padded).
    zero1 = jnp.zeros((1, y1e.shape[1]), f32)
    conv2_in = (
        jnp.concatenate([zero1, y1o[0:3]], axis=0),                  # kd2 = 0
        y1e,                                                         # kd2 = 1
        y1o,                                                         # kd2 = 2
        jnp.concatenate([y1e[1:4], zero1], axis=0),                  # kd2 = 3
    )
    acc2 = None
    for kd2 in range(K2):
        part = jnp.dot(conv2_in[kd2], t2_ref[kd2], preferred_element_type=f32)
        acc2 = part if acc2 is None else acc2 + part
    y2 = jnp.clip(acc2 + b2_ref[...], 0.0, 6.0)                      # (4, 128)

    # ---- conv4 + ReLU6 ------------------------------------------------------
    zero2 = jnp.zeros((1, y2.shape[1]), f32)
    conv4_in = (
        jnp.concatenate([zero2, y2[0:3]], axis=0),                   # kd4 = 0
        y2,                                                          # kd4 = 1
        jnp.concatenate([y2[1:4], zero2], axis=0),                   # kd4 = 2
    )
    acc4 = None
    for kd4 in range(K4):
        part = jnp.dot(conv4_in[kd4], t4_ref[kd4], preferred_element_type=f32)
        acc4 = part if acc4 is None else acc4 + part
    o_ref[0] = jnp.clip(acc4 + b4_ref[...], 0.0, 6.0)                # (4, lout)


def _fused_encoder_call(x4, t1, b1, t2, b2, t4, b4):
    n = x4.shape[0]
    lout = t4.shape[2]

    def const_spec(shape):
        zeros = (0,) * len(shape)
        return pl.BlockSpec(shape, lambda b, z=zeros: z,
                            pipeline_mode=pl.Buffered(1))

    return pl.pallas_call(
        _encoder_kernel,
        out_shape=jax.ShapeDtypeStruct((n, D2, lout), jnp.float32),
        grid_spec=pltpu.PrefetchScalarGridSpec(
            num_scalar_prefetch=0,
            grid=(n,),
            in_specs=[
                pl.BlockSpec((1, RD, MD, L_IN), lambda b: (b, 0, 0, 0)),
                const_spec(t1.shape),
                const_spec(b1.shape),
                const_spec(t2.shape),
                const_spec(b2.shape),
                const_spec(t4.shape),
                const_spec(b4.shape),
            ],
            out_specs=pl.BlockSpec((1, D2, lout), lambda b: (b, 0, 0)),
        ),
        compiler_params=pltpu.CompilerParams(
            dimension_semantics=("parallel",),
            vmem_limit_bytes=32 * 1024 * 1024),
    )(x4, t1, b1, t2, b2, t4, b4)


# ----------------------------------------------------------------------------
# One-time host-side precompute of the block-Toeplitz weight tables + biases.
# ----------------------------------------------------------------------------
def _build_tables(params):
    wt1 = np.asarray(params["w1"], np.float32)      # (8, 3, 4, 4, 4)   OIDHW
    wt2 = np.asarray(params["w2"], np.float32)      # (8, 8, 4, 4, 4)
    wt4 = np.asarray(params["w4"], np.float32)      # (emb, 8, 3, 3, 3)
    emb = wt4.shape[0]
    c4p = ((emb + 7) // 8) * 8                      # D2*D2*c4p is a multiple of 128
    lout = D2 * D2 * c4p

    t1 = np.zeros((K1, L_IN, L1), np.float32)
    for kd in range(K1):
        for kh in range(K1):
            for kw in range(K1):
                blk = wt1[:, :, kd, kh, kw].T                        # (3, 8)
                for ho in range(D1):
                    hi = S1 * ho + kh - P1
                    if not 0 <= hi < D_IN:
                        continue
                    for wo in range(D1):
                        wi = S1 * wo + kw - P1
                        if not 0 <= wi < D_IN:
                            continue
                        t1[kd,
                           (hi * D_IN + wi) * C_IN:(hi * D_IN + wi + 1) * C_IN,
                           (ho * D1 + wo) * C1:(ho * D1 + wo + 1) * C1] = blk

    t2 = np.zeros((K2, L1, L2), np.float32)
    for kd in range(K2):
        for kh in range(K2):
            for kw in range(K2):
                blk = wt2[:, :, kd, kh, kw].T                        # (8, 8)
                for ho in range(D2):
                    hi = S2 * ho + kh - P2
                    if not 0 <= hi < D1:
                        continue
                    for wo in range(D2):
                        wi = S2 * wo + kw - P2
                        if not 0 <= wi < D1:
                            continue
                        t2[kd,
                           (hi * D1 + wi) * C1:(hi * D1 + wi + 1) * C1,
                           (ho * D2 + wo) * C2:(ho * D2 + wo + 1) * C2] = blk

    t4 = np.zeros((K4, L2, lout), np.float32)
    for kd in range(K4):
        for kh in range(K4):
            for kw in range(K4):
                blk = wt4[:, :, kd, kh, kw].T                        # (8, emb)
                for ho in range(D2):
                    hi = ho + kh - P4
                    if not 0 <= hi < D2:
                        continue
                    for wo in range(D2):
                        wi = wo + kw - P4
                        if not 0 <= wi < D2:
                            continue
                        t4[kd,
                           (hi * D2 + wi) * C2:(hi * D2 + wi + 1) * C2,
                           (ho * D2 + wo) * c4p:(ho * D2 + wo) * c4p + emb] = blk

    b1row = np.tile(np.asarray(params["b1"], np.float32), D1 * D1)[None, :]
    b2row = np.tile(np.asarray(params["b2"], np.float32), D2 * D2)[None, :]
    b4p = np.zeros((c4p,), np.float32)
    b4p[:emb] = np.asarray(params["b4"], np.float32)
    b4row = np.tile(b4p, D2 * D2)[None, :]

    return dict(t1=t1, t2=t2, t4=t4, b1=b1row, b2=b2row, b4=b4row,
                c4p=c4p, emb=emb)


def make_encoder_forward(params):
    tabs = _build_tables(params)
    emb, c4p = tabs["emb"], tabs["c4p"]
    t1 = jnp.asarray(tabs["t1"])
    t2 = jnp.asarray(tabs["t2"])
    t4 = jnp.asarray(tabs["t4"])
    b1 = jnp.asarray(tabs["b1"])
    b2 = jnp.asarray(tabs["b2"])
    b4 = jnp.asarray(tabs["b4"])

    @jax.jit
    def forward(x):
        n = x.shape[0]
        # Minimal per-call glue (<250 KiB): channels-last, fold (h, w, c) into
        # lanes, pad depth 16 -> 20 and split it into (residue, major) so every
        # depth tap inside the kernel is a static contiguous slice.
        xc = jnp.transpose(x, (0, 2, 3, 4, 1)).reshape(n, D_IN, L_IN)
        xc = jnp.pad(xc, ((0, 0), (P1, DP_PAD - D_IN - P1), (0, 0)))
        x4 = xc.reshape(n, MD, RD, L_IN).transpose(0, 2, 1, 3)       # (n, 4, 5, 768)

        out = _fused_encoder_call(x4, t1, b1, t2, b2, t4, b4)        # (n, 4, lout)
        out = out.reshape(n, D2, D2, D2, c4p)[..., :emb]
        return out.transpose(0, 4, 1, 2, 3)                          # NCDHW

    return forward


# ----------------------------------------------------------------------------
# Parameter init + pure-JAX reference (XLA conv) for a correctness cross-check.
# ----------------------------------------------------------------------------
def init_params(key, embedding_dim):
    ks = jax.random.split(key, 6)

    def winit(k, shape):
        fan_in = np.prod(shape[1:])
        return (jax.random.normal(k, shape, jnp.float32) / np.sqrt(fan_in)).astype(jnp.float32)

    return {
        "w1": winit(ks[0], (8, 3, 4, 4, 4)),
        "b1": 0.01 * jax.random.normal(ks[1], (8,), jnp.float32),
        "w2": winit(ks[2], (8, 8, 4, 4, 4)),
        "b2": 0.01 * jax.random.normal(ks[3], (8,), jnp.float32),
        "w4": winit(ks[4], (embedding_dim, 8, 3, 3, 3)),
        "b4": 0.01 * jax.random.normal(ks[5], (embedding_dim,), jnp.float32),
    }


def _reference_forward(x, params):
    def conv(x, w, b, stride, pad):
        y = jax.lax.conv_general_dilated(
            x, w, window_strides=(stride,) * 3, padding=[(pad, pad)] * 3,
            dimension_numbers=("NCDHW", "OIDHW", "NCDHW"))
        y = y + b[None, :, None, None, None]
        return jnp.clip(y, 0.0, 6.0)

    x = conv(x, params["w1"], params["b1"], 2, 1)
    x = conv(x, params["w2"], params["b2"], 2, 1)
    x = conv(x, params["w4"], params["b4"], 1, 1)
    return x


if __name__ == "__main__":
    embedding_dim = 16
    key = jax.random.PRNGKey(0)
    k_x, k_p = jax.random.split(key)

    # Input: NCDHW, (batch=2, channels=3, D=H=W=16)
    x = jax.random.normal(k_x, (2, 3, 16, 16, 16), jnp.float32)
    params = init_params(k_p, embedding_dim)

    fwd = make_encoder_forward(params)
    out = jax.block_until_ready(fwd(x))

    assert out.shape == (2, embedding_dim, 4, 4, 4), out.shape

    ref = jax.block_until_ready(_reference_forward(x, params))
    np.testing.assert_allclose(np.asarray(out), np.asarray(ref), atol=1e-3, rtol=1e-3)

    print("KERNEL_OK")
</pallas_src>

<mosaic_0001>
module attributes {stable_mosaic.version = 11 : i64} {
  func.func @_encoder_kernel(%arg0: i32, %arg1: memref<1x4x5x768xf32, #tpu.memory_space<vmem>>, %arg2: memref<4x768x512xf32, #tpu.memory_space<vmem>>, %arg3: memref<1x512xf32, #tpu.memory_space<vmem>>, %arg4: memref<4x512x128xf32, #tpu.memory_space<vmem>>, %arg5: memref<1x128xf32, #tpu.memory_space<vmem>>, %arg6: memref<3x128x256xf32, #tpu.memory_space<vmem>>, %arg7: memref<1x256xf32, #tpu.memory_space<vmem>>, %arg8: memref<1x4x256xf32, #tpu.memory_space<vmem>>) attributes {dimension_semantics = [#tpu.dimension_semantics<parallel>], iteration_bounds = array<i64: 2>, scalar_prefetch = 0 : i64, scratch_operands = 0 : i64, tpu.core_type = #tpu.core_type<tc>, window_params = [{transform_indices = @transform_0, window_bounds = array<i64: 1, 4, 5, 768>}, {pipeline_mode = #tpu.pipeline_mode<synchronous>, transform_indices = @transform_1, window_bounds = array<i64: 4, 768, 512>}, {pipeline_mode = #tpu.pipeline_mode<synchronous>, transform_indices = @transform_2, window_bounds = array<i64: 1, 512>}, {pipeline_mode = #tpu.pipeline_mode<synchronous>, transform_indices = @transform_3, window_bounds = array<i64: 4, 512, 128>}, {pipeline_mode = #tpu.pipeline_mode<synchronous>, transform_indices = @transform_4, window_bounds = array<i64: 1, 128>}, {pipeline_mode = #tpu.pipeline_mode<synchronous>, transform_indices = @transform_5, window_bounds = array<i64: 3, 128, 256>}, {pipeline_mode = #tpu.pipeline_mode<synchronous>, transform_indices = @transform_6, window_bounds = array<i64: 1, 256>}, {transform_indices = @transform_7, window_bounds = array<i64: 1, 4, 256>}]} {
    %c0 = arith.constant 0 : index
    %c0_0 = arith.constant 0 : index
    %c0_1 = arith.constant 0 : index
    %c0_2 = arith.constant 0 : index
    %0 = vector.load %arg1[%c0, %c0_0, %c0_1, %c0_2] : memref<1x4x5x768xf32, #tpu.memory_space<vmem>>, vector<1x1x5x768xf32>
    %1 = vector.shape_cast %0 : vector<1x1x5x768xf32> to vector<5x768xf32>
    %2 = vector.extract_strided_slice %1 {offsets = [0, 0], sizes = [4, 768], strides = [1, 1]} : vector<5x768xf32> to vector<4x768xf32>
    %c0_3 = arith.constant 0 : index
    %c2 = arith.constant 2 : index
    %c0_4 = arith.constant 0 : index
    %c0_5 = arith.constant 0 : index
    %3 = vector.load %arg1[%c0_3, %c2, %c0_4, %c0_5] : memref<1x4x5x768xf32, #tpu.memory_space<vmem>>, vector<1x1x5x768xf32>
    %4 = vector.shape_cast %3 : vector<1x1x5x768xf32> to vector<5x768xf32>
    %5 = vector.extract_strided_slice %4 {offsets = [0, 0], sizes = [4, 768], strides = [1, 1]} : vector<5x768xf32> to vector<4x768xf32>
    %6 = tpu.concatenate %2, %5 in 0 : vector<4x768xf32>, vector<4x768xf32> -> vector<8x768xf32>
    %c0_6 = arith.constant 0 : index
    %c0_7 = arith.constant 0 : index
    %c0_8 = arith.constant 0 : index
    %7 = vector.load %arg2[%c0_6, %c0_7, %c0_8] : memref<4x768x512xf32, #tpu.memory_space<vmem>>, vector<1x768x512xf32>
    %8 = vector.shape_cast %7 : vector<1x768x512xf32> to vector<768x512xf32>
    %cst = arith.constant dense<0.000000e+00> : vector<8x512xf32>
    %9 = tpu.matmul %6, %8, %cst {dimension_numbers = #tpu.dot_dimension_numbers<[1], [0], [0], [1], [0, 0, 1, 1], [], []>} : vector<8x768xf32>, vector<768x512xf32>, vector<8x512xf32> -> vector<8x512xf32>
    %10 = vector.extract_strided_slice %9 {offsets = [0, 0], sizes = [4, 512], strides = [1, 1]} : vector<8x512xf32> to vector<4x512xf32>
    %11 = vector.extract_strided_slice %9 {offsets = [4, 0], sizes = [4, 512], strides = [1, 1]} : vector<8x512xf32> to vector<4x512xf32>
    %c0_9 = arith.constant 0 : index
    %c1 = arith.constant 1 : index
    %c0_10 = arith.constant 0 : index
    %c0_11 = arith.constant 0 : index
    %12 = vector.load %arg1[%c0_9, %c1, %c0_10, %c0_11] : memref<1x4x5x768xf32, #tpu.memory_space<vmem>>, vector<1x1x5x768xf32>
    %13 = vector.shape_cast %12 : vector<1x1x5x768xf32> to vector<5x768xf32>
    %14 = vector.extract_strided_slice %13 {offsets = [0, 0], sizes = [4, 768], strides = [1, 1]} : vector<5x768xf32> to vector<4x768xf32>
    %c0_12 = arith.constant 0 : index
    %c3 = arith.constant 3 : index
    %c0_13 = arith.constant 0 : index
    %c0_14 = arith.constant 0 : index
    %15 = vector.load %arg1[%c0_12, %c3, %c0_13, %c0_14] : memref<1x4x5x768xf32, #tpu.memory_space<vmem>>, vector<1x1x5x768xf32>
    %16 = vector.shape_cast %15 : vector<1x1x5x768xf32> to vector<5x768xf32>
    %17 = vector.extract_strided_slice %16 {offsets = [0, 0], sizes = [4, 768], strides = [1, 1]} : vector<5x768xf32> to vector<4x768xf32>
    %18 = tpu.concatenate %14, %17 in 0 : vector<4x768xf32>, vector<4x768xf32> -> vector<8x768xf32>
    %c1_15 = arith.constant 1 : index
    %c0_16 = arith.constant 0 : index
    %c0_17 = arith.constant 0 : index
    %19 = vector.load %arg2[%c1_15, %c0_16, %c0_17] : memref<4x768x512xf32, #tpu.memory_space<vmem>>, vector<1x768x512xf32>
    %20 = vector.shape_cast %19 : vector<1x768x512xf32> to vector<768x512xf32>
    %cst_18 = arith.constant dense<0.000000e+00> : vector<8x512xf32>
    %21 = tpu.matmul %18, %20, %cst_18 {dimension_numbers = #tpu.dot_dimension_numbers<[1], [0], [0], [1], [0, 0, 1, 1], [], []>} : vector<8x768xf32>, vector<768x512xf32>, vector<8x512xf32> -> vector<8x512xf32>
    %22 = vector.extract_strided_slice %21 {offsets = [0, 0], sizes = [4, 512], strides = [1, 1]} : vector<8x512xf32> to vector<4x512xf32>
    %23 = vector.extract_strided_slice %21 {offsets = [4, 0], sizes = [4, 512], strides = [1, 1]} : vector<8x512xf32> to vector<4x512xf32>
    %24 = arith.addf %10, %22 : vector<4x512xf32>
    %25 = arith.addf %11, %23 : vector<4x512xf32>
    %c0_19 = arith.constant 0 : index
    %c0_20 = arith.constant 0 : index
    %c0_21 = arith.constant 0 : index
    %c0_22 = arith.constant 0 : index
    %26 = vector.load %arg1[%c0_19, %c0_20, %c0_21, %c0_22] : memref<1x4x5x768xf32, #tpu.memory_space<vmem>>, vector<1x1x5x768xf32>
    %27 = vector.shape_cast %26 : vector<1x1x5x768xf32> to vector<5x768xf32>
    %28 = vector.extract_strided_slice %27 {offsets = [1, 0], sizes = [4, 768], strides = [1, 1]} : vector<5x768xf32> to vector<4x768xf32>
    %29 = tpu.concatenate %5, %28 in 0 : vector<4x768xf32>, vector<4x768xf32> -> vector<8x768xf32>
    %c2_23 = arith.constant 2 : index
    %c0_24 = arith.constant 0 : index
    %c0_25 = arith.constant 0 : index
    %30 = vector.load %arg2[%c2_23, %c0_24, %c0_25] : memref<4x768x512xf32, #tpu.memory_space<vmem>>, vector<1x768x512xf32>
    %31 = vector.shape_cast %30 : vector<1x768x512xf32> to vector<768x512xf32>
    %cst_26 = arith.constant dense<0.000000e+00> : vector<8x512xf32>
    %32 = tpu.matmul %29, %31, %cst_26 {dimension_numbers = #tpu.dot_dimension_numbers<[1], [0], [0], [1], [0, 0, 1, 1], [], []>} : vector<8x768xf32>, vector<768x512xf32>, vector<8x512xf32> -> vector<8x512xf32>
    %33 = vector.extract_strided_slice %32 {offsets = [0, 0], sizes = [4, 512], strides = [1, 1]} : vector<8x512xf32> to vector<4x512xf32>
    %34 = vector.extract_strided_slice %32 {offsets = [4, 0], sizes = [4, 512], strides = [1, 1]} : vector<8x512xf32> to vector<4x512xf32>
    %35 = arith.addf %24, %33 : vector<4x512xf32>
    %36 = arith.addf %25, %34 : vector<4x512xf32>
    %c0_27 = arith.constant 0 : index
    %c1_28 = arith.constant 1 : index
    %c0_29 = arith.constant 0 : index
    %c0_30 = arith.constant 0 : index
    %37 = vector.load %arg1[%c0_27, %c1_28, %c0_29, %c0_30] : memref<1x4x5x768xf32, #tpu.memory_space<vmem>>, vector<1x1x5x768xf32>
    %38 = vector.shape_cast %37 : vector<1x1x5x768xf32> to vector<5x768xf32>
    %39 = vector.extract_strided_slice %38 {offsets = [1, 0], sizes = [4, 768], strides = [1, 1]} : vector<5x768xf32> to vector<4x768xf32>
    %40 = tpu.concatenate %17, %39 in 0 : vector<4x768xf32>, vector<4x768xf32> -> vector<8x768xf32>
    %c3_31 = arith.constant 3 : index
    %c0_32 = arith.constant 0 : index
    %c0_33 = arith.constant 0 : index
    %41 = vector.load %arg2[%c3_31, %c0_32, %c0_33] : memref<4x768x512xf32, #tpu.memory_space<vmem>>, vector<1x768x512xf32>
    %42 = vector.shape_cast %41 : vector<1x768x512xf32> to vector<768x512xf32>
    %cst_34 = arith.constant dense<0.000000e+00> : vector<8x512xf32>
    %43 = tpu.matmul %40, %42, %cst_34 {dimension_numbers = #tpu.dot_dimension_numbers<[1], [0], [0], [1], [0, 0, 1, 1], [], []>} : vector<8x768xf32>, vector<768x512xf32>, vector<8x512xf32> -> vector<8x512xf32>
    %44 = vector.extract_strided_slice %43 {offsets = [0, 0], sizes = [4, 512], strides = [1, 1]} : vector<8x512xf32> to vector<4x512xf32>
    %45 = vector.extract_strided_slice %43 {offsets = [4, 0], sizes = [4, 512], strides = [1, 1]} : vector<8x512xf32> to vector<4x512xf32>
    %46 = arith.addf %35, %44 : vector<4x512xf32>
    %47 = arith.addf %36, %45 : vector<4x512xf32>
    %c0_35 = arith.constant 0 : index
    %c0_36 = arith.constant 0 : index
    %48 = vector.load %arg3[%c0_35, %c0_36] : memref<1x512xf32, #tpu.memory_space<vmem>>, vector<1x512xf32>
    %49 = vector.broadcast %48 : vector<1x512xf32> to vector<4x512xf32>
    %50 = arith.addf %46, %49 : vector<4x512xf32>
    %cst_37 = arith.constant 0.000000e+00 : f32
    %cst_38 = arith.constant 6.000000e+00 : f32
    %51 = vector.broadcast %cst_37 : f32 to vector<4x512xf32>
    %52 = arith.maximumf %51, %50 : vector<4x512xf32>
    %53 = vector.broadcast %cst_38 : f32 to vector<4x512xf32>
    %54 = arith.minimumf %53, %52 : vector<4x512xf32>
    %c0_39 = arith.constant 0 : index
    %c0_40 = arith.constant 0 : index
    %55 = vector.load %arg3[%c0_39, %c0_40] : memref<1x512xf32, #tpu.memory_space<vmem>>, vector<1x512xf32>
    %56 = vector.broadcast %55 : vector<1x512xf32> to vector<4x512xf32>
    %57 = arith.addf %47, %56 : vector<4x512xf32>
    %cst_41 = arith.constant 0.000000e+00 : f32
    %cst_42 = arith.constant 6.000000e+00 : f32
    %58 = vector.broadcast %cst_41 : f32 to vector<4x512xf32>
    %59 = arith.maximumf %58, %57 : vector<4x512xf32>
    %60 = vector.broadcast %cst_42 : f32 to vector<4x512xf32>
    %61 = arith.minimumf %60, %59 : vector<4x512xf32>
    %cst_43 = arith.constant 0.000000e+00 : f32
    %62 = vector.broadcast %cst_43 : f32 to vector<1x512xf32>
    %63 = vector.extract_strided_slice %61 {offsets = [0, 0], sizes = [3, 512], strides = [1, 1]} : vector<4x512xf32> to vector<3x512xf32>
    %64 = tpu.concatenate %62, %63 in 0 : vector<1x512xf32>, vector<3x512xf32> -> vector<4x512xf32>
    %65 = vector.extract_strided_slice %54 {offsets = [1, 0], sizes = [3, 512], strides = [1, 1]} : vector<4x512xf32> to vector<3x512xf32>
    %66 = tpu.concatenate %65, %62 in 0 : vector<3x512xf32>, vector<1x512xf32> -> vector<4x512xf32>
    %c0_44 = arith.constant 0 : index
    %c0_45 = arith.constant 0 : index
    %c0_46 = arith.constant 0 : index
    %67 = vector.load %arg4[%c0_44, %c0_45, %c0_46] : memref<4x512x128xf32, #tpu.memory_space<vmem>>, vector<1x512x128xf32>
    %68 = vector.shape_cast %67 : vector<1x512x128xf32> to vector<512x128xf32>
    %cst_47 = arith.constant dense<0.000000e+00> : vector<4x128xf32>
    %69 = tpu.matmul %64, %68, %cst_47 {dimension_numbers = #tpu.dot_dimension_numbers<[1], [0], [0], [1], [0, 0, 1, 1], [], []>} : vector<4x512xf32>, vector<512x128xf32>, vector<4x128xf32> -> vector<4x128xf32>
    %c1_48 = arith.constant 1 : index
    %c0_49 = arith.constant 0 : index
    %c0_50 = arith.constant 0 : index
    %70 = vector.load %arg4[%c1_48, %c0_49, %c0_50] : memref<4x512x128xf32, #tpu.memory_space<vmem>>, vector<1x512x128xf32>
    %71 = vector.shape_cast %70 : vector<1x512x128xf32> to vector<512x128xf32>
    %cst_51 = arith.constant dense<0.000000e+00> : vector<4x128xf32>
    %72 = tpu.matmul %54, %71, %cst_51 {dimension_numbers = #tpu.dot_dimension_numbers<[1], [0], [0], [1], [0, 0, 1, 1], [], []>} : vector<4x512xf32>, vector<512x128xf32>, vector<4x128xf32> -> vector<4x128xf32>
    %73 = arith.addf %69, %72 : vector<4x128xf32>
    %c2_52 = arith.constant 2 : index
    %c0_53 = arith.constant 0 : index
    %c0_54 = arith.constant 0 : index
    %74 = vector.load %arg4[%c2_52, %c0_53, %c0_54] : memref<4x512x128xf32, #tpu.memory_space<vmem>>, vector<1x512x128xf32>
    %75 = vector.shape_cast %74 : vector<1x512x128xf32> to vector<512x128xf32>
    %cst_55 = arith.constant dense<0.000000e+00> : vector<4x128xf32>
    %76 = tpu.matmul %61, %75, %cst_55 {dimension_numbers = #tpu.dot_dimension_numbers<[1], [0], [0], [1], [0, 0, 1, 1], [], []>} : vector<4x512xf32>, vector<512x128xf32>, vector<4x128xf32> -> vector<4x128xf32>
    %77 = arith.addf %73, %76 : vector<4x128xf32>
    %c3_56 = arith.constant 3 : index
    %c0_57 = arith.constant 0 : index
    %c0_58 = arith.constant 0 : index
    %78 = vector.load %arg4[%c3_56, %c0_57, %c0_58] : memref<4x512x128xf32, #tpu.memory_space<vmem>>, vector<1x512x128xf32>
    %79 = vector.shape_cast %78 : vector<1x512x128xf32> to vector<512x128xf32>
    %cst_59 = arith.constant dense<0.000000e+00> : vector<4x128xf32>
    %80 = tpu.matmul %66, %79, %cst_59 {dimension_numbers = #tpu.dot_dimension_numbers<[1], [0], [0], [1], [0, 0, 1, 1], [], []>} : vector<4x512xf32>, vector<512x128xf32>, vector<4x128xf32> -> vector<4x128xf32>
    %81 = arith.addf %77, %80 : vector<4x128xf32>
    %c0_60 = arith.constant 0 : index
    %c0_61 = arith.constant 0 : index
    %82 = vector.load %arg5[%c0_60, %c0_61] : memref<1x128xf32, #tpu.memory_space<vmem>>, vector<1x128xf32>
    %83 = vector.broadcast %82 : vector<1x128xf32> to vector<4x128xf32>
    %84 = arith.addf %81, %83 : vector<4x128xf32>
    %cst_62 = arith.constant 0.000000e+00 : f32
    %cst_63 = arith.constant 6.000000e+00 : f32
    %85 = vector.broadcast %cst_62 : f32 to vector<4x128xf32>
    %86 = arith.maximumf %85, %84 : vector<4x128xf32>
    %87 = vector.broadcast %cst_63 : f32 to vector<4x128xf32>
    %88 = arith.minimumf %87, %86 : vector<4x128xf32>
    %cst_64 = arith.constant 0.000000e+00 : f32
    %89 = vector.broadcast %cst_64 : f32 to vector<1x128xf32>
    %90 = vector.extract_strided_slice %88 {offsets = [0, 0], sizes = [3, 128], strides = [1, 1]} : vector<4x128xf32> to vector<3x128xf32>
    %91 = tpu.concatenate %89, %90 in 0 : vector<1x128xf32>, vector<3x128xf32> -> vector<4x128xf32>
    %92 = vector.extract_strided_slice %88 {offsets = [1, 0], sizes = [3, 128], strides = [1, 1]} : vector<4x128xf32> to vector<3x128xf32>
    %93 = tpu.concatenate %92, %89 in 0 : vector<3x128xf32>, vector<1x128xf32> -> vector<4x128xf32>
    %c0_65 = arith.constant 0 : index
    %c0_66 = arith.constant 0 : index
    %c0_67 = arith.constant 0 : index
    %94 = vector.load %arg6[%c0_65, %c0_66, %c0_67] : memref<3x128x256xf32, #tpu.memory_space<vmem>>, vector<1x128x256xf32>
    %95 = vector.shape_cast %94 : vector<1x128x256xf32> to vector<128x256xf32>
    %cst_68 = arith.constant dense<0.000000e+00> : vector<4x256xf32>
    %96 = tpu.matmul %91, %95, %cst_68 {dimension_numbers = #tpu.dot_dimension_numbers<[1], [0], [0], [1], [0, 0, 1, 1], [], []>} : vector<4x128xf32>, vector<128x256xf32>, vector<4x256xf32> -> vector<4x256xf32>
    %c1_69 = arith.constant 1 : index
    %c0_70 = arith.constant 0 : index
    %c0_71 = arith.constant 0 : index
    %97 = vector.load %arg6[%c1_69, %c0_70, %c0_71] : memref<3x128x256xf32, #tpu.memory_space<vmem>>, vector<1x128x256xf32>
    %98 = vector.shape_cast %97 : vector<1x128x256xf32> to vector<128x256xf32>
    %cst_72 = arith.constant dense<0.000000e+00> : vector<4x256xf32>
    %99 = tpu.matmul %88, %98, %cst_72 {dimension_numbers = #tpu.dot_dimension_numbers<[1], [0], [0], [1], [0, 0, 1, 1], [], []>} : vector<4x128xf32>, vector<128x256xf32>, vector<4x256xf32> -> vector<4x256xf32>
    %100 = arith.addf %96, %99 : vector<4x256xf32>
    %c2_73 = arith.constant 2 : index
    %c0_74 = arith.constant 0 : index
    %c0_75 = arith.constant 0 : index
    %101 = vector.load %arg6[%c2_73, %c0_74, %c0_75] : memref<3x128x256xf32, #tpu.memory_space<vmem>>, vector<1x128x256xf32>
    %102 = vector.shape_cast %101 : vector<1x128x256xf32> to vector<128x256xf32>
    %cst_76 = arith.constant dense<0.000000e+00> : vector<4x256xf32>
    %103 = tpu.matmul %93, %102, %cst_76 {dimension_numbers = #tpu.dot_dimension_numbers<[1], [0], [0], [1], [0, 0, 1, 1], [], []>} : vector<4x128xf32>, vector<128x256xf32>, vector<4x256xf32> -> vector<4x256xf32>
    %104 = arith.addf %100, %103 : vector<4x256xf32>
    %c0_77 = arith.constant 0 : index
    %c0_78 = arith.constant 0 : index
    %105 = vector.load %arg7[%c0_77, %c0_78] : memref<1x256xf32, #tpu.memory_space<vmem>>, vector<1x256xf32>
    %106 = vector.broadcast %105 : vector<1x256xf32> to vector<4x256xf32>
    %107 = arith.addf %104, %106 : vector<4x256xf32>
    %cst_79 = arith.constant 0.000000e+00 : f32
    %cst_80 = arith.constant 6.000000e+00 : f32
    %108 = vector.broadcast %cst_79 : f32 to vector<4x256xf32>
    %109 = arith.maximumf %108, %107 : vector<4x256xf32>
    %110 = vector.broadcast %cst_80 : f32 to vector<4x256xf32>
    %111 = arith.minimumf %110, %109 : vector<4x256xf32>
    %c0_81 = arith.constant 0 : index
    %c0_82 = arith.constant 0 : index
    %c0_83 = arith.constant 0 : index
    %112 = vector.load %arg8[%c0_81, %c0_82, %c0_83] : memref<1x4x256xf32, #tpu.memory_space<vmem>>, vector<1x4x256xf32>
    %113 = vector.shape_cast %112 : vector<1x4x256xf32> to vector<4x256xf32>
    %114 = vector.shape_cast %111 : vector<4x256xf32> to vector<1x4x256xf32>
    tpu.vector_store %arg8[%c0_81, %c0_82, %c0_83], %114 {strides = array<i32>} : memref<1x4x256xf32, #tpu.memory_space<vmem>>, vector<1x4x256xf32>,
    return
  }
  func.func @transform_0(%arg0: i32) -> (i32, i32, i32, i32) {
    %c0_i32 = arith.constant 0 : i32
    %c0_i32_0 = arith.constant 0 : i32
    %c0_i32_1 = arith.constant 0 : i32
    %c0_i32_2 = arith.constant 0 : i32
    return %arg0, %c0_i32, %c0_i32_0, %c0_i32_1 : i32, i32, i32, i32
  }
  func.func @transform_1(%arg0: i32) -> (i32, i32, i32) {
    %c0_i32 = arith.constant 0 : i32
    %c0_i32_0 = arith.constant 0 : i32
    %c0_i32_1 = arith.constant 0 : i32
    %c0_i32_2 = arith.constant 0 : i32
    return %c0_i32, %c0_i32_0, %c0_i32_1 : i32, i32, i32
  }
  func.func @transform_2(%arg0: i32) -> (i32, i32) {
    %c0_i32 = arith.constant 0 : i32
    %c0_i32_0 = arith.constant 0 : i32
    %c0_i32_1 = arith.constant 0 : i32
    return %c0_i32, %c0_i32_0 : i32, i32
  }
  func.func @transform_3(%arg0: i32) -> (i32, i32, i32) {
    %c0_i32 = arith.constant 0 : i32
    %c0_i32_0 = arith.constant 0 : i32
    %c0_i32_1 = arith.constant 0 : i32
    %c0_i32_2 = arith.constant 0 : i32
    return %c0_i32, %c0_i32_0, %c0_i32_1 : i32, i32, i32
  }
  func.func @transform_4(%arg0: i32) -> (i32, i32) {
    %c0_i32 = arith.constant 0 : i32
    %c0_i32_0 = arith.constant 0 : i32
    %c0_i32_1 = arith.constant 0 : i32
    return %c0_i32, %c0_i32_0 : i32, i32
  }
  func.func @transform_5(%arg0: i32) -> (i32, i32, i32) {
    %c0_i32 = arith.constant 0 : i32
    %c0_i32_0 = arith.constant 0 : i32
    %c0_i32_1 = arith.constant 0 : i32
    %c0_i32_2 = arith.constant 0 : i32
    return %c0_i32, %c0_i32_0, %c0_i32_1 : i32, i32, i32
  }
  func.func @transform_6(%arg0: i32) -> (i32, i32) {
    %c0_i32 = arith.constant 0 : i32
    %c0_i32_0 = arith.constant 0 : i32
    %c0_i32_1 = arith.constant 0 : i32
    return %c0_i32, %c0_i32_0 : i32, i32
  }
  func.func @transform_7(%arg0: i32) -> (i32, i32, i32) {
    %c0_i32 = arith.constant 0 : i32
    %c0_i32_0 = arith.constant 0 : i32
    %c0_i32_1 = arith.constant 0 : i32
    return %arg0, %c0_i32, %c0_i32_0 : i32, i32, i32
  }
}

</mosaic_0001>

<bundles_post_ra>
// kernel: forward.1
= control target key start
LH: loop header
LB: loop body
LE: loop exit
PB: predicated region body
PF: predicated region fallthrough
CT: control target
= control target key end

     0   :  { %12 = vsyncpa [#allocation3], 0  ;;  %s5862_s0 = inlined_call_operand.vmem [shape: f32[2,4,5,768], index: 0, kind: input, shape index: {}]   ;;  %s5863_s1 = inlined_call_operand.hbm [shape: f32[4,768,512], index: 1, kind: input, shape index: {}]   ;;  %s5864_s2 = inlined_call_operand.hbm [shape: f32[1,512], index: 2, kind: input, shape index: {}]   ;;  %s5865_s3 = inlined_call_operand.hbm [shape: f32[4,512,128], index: 3, kind: input, shape index: {}]   ;;  %s5866_s4 = inlined_call_operand.hbm [shape: f32[1,128], index: 4, kind: input, shape index: {}]   ;;  %s5867_s5 = inlined_call_operand.hbm [shape: f32[3,128,256], index: 5, kind: input, shape index: {}]   ;;  %s5868_s6 = inlined_call_operand.hbm [shape: f32[1,256], index: 6, kind: input, shape index: {}]   ;;  %s5869_s7 = inlined_call_operand.vmem [shape: f32[2,4,256], index: 7, kind: output, shape index: {}]  }
   0x1   :  { %13 = vsyncpa [#allocation5], 0 }
   0x2   :  { %14 = vsyncpa [#allocation8], 0 }
   0x3   :  { %15 = vsyncpa [#allocation11], 0  ;;  %s5392_s24 = smov 0  }
   0x4 LB: > { %s230_s27 = sshll.u32 %s5864_s2, 4  ;;  %s5401_s28 = sadd.s32 4294967295, %s5338_s24   ;;  %s5338_s24 = sphi %s5392_s24, %s21_s24   ;;  %s231_s27 = int_to_ptr.hbm [resolvable:$true] %s230_s27 }
   0x5   : > { %p4978_p0 = scmp.ge.s32.totalorder %s5338_s24, 1  ;;  %p204_p1 = scmp.lt.s32.totalorder %s5338_s24, 3 }
   0x6   : > { %p5079_p2 = scmp.eq.s32.totalorder %s5401_s28, 0  ;;  %s5340_s30 = smov [#allocation4]  }
   0x7   : > { %p5406_p3 = pnand %p4978_p0, %p204_p1  ;;  %s232_s8 = sshll.u32 %s5340_s30, 4  ;;  %s233_s8 = int_to_ptr.vmem [resolvable:$true] %s232_s8 }
   0x8   : > { %s256_s11 = sshll.u32 %s5866_s4, 4  ;;  %s215_s14 = sshll.u32 %s5863_s1, 4  ;;  %s257_s11 = int_to_ptr.hbm [resolvable:$true] %s256_s11  ;;  %s216_s14 = int_to_ptr.hbm [resolvable:$true] %s215_s14 }
   0x9   : > { %p5060_p4 = pneg %p5406_p3  ;;  %s5341_s16 = smov [#allocation7]  }
   0xa   : > { %s258_s17 = sshll.u32 %s5341_s16, 4  ;;  %s5342_s18 = smov [#allocation2]   ;;  %s259_s17 = int_to_ptr.vmem [resolvable:$true] %s258_s17 }
   0xb   : > { %p5420_p5 = pnand %p5079_p2, %p5060_p4  ;;  %s217_s19 = sshll.u32 %s5342_s18, 4  ;;  %s218_s19 = int_to_ptr.vmem [resolvable:$true] %s217_s19 }
   0xc   : > { %s5343_s20 = smov 512   ;;  %s5344_s21 = smov 32  }
   0xd   : > { %5066 = dma.hbm_to_vmem [thread:$0]  (!%p5420_p5), %s231_s27, 64, %s233_s8, [#allocation5]  }
   0xe   : > { %5072 = dma.hbm_to_vmem [thread:$0]  (!%p5420_p5), %s257_s11, 16, %s259_s17, [#allocation8]  }
   0xf   : > { %5063 = dma.hbm_to_vmem [thread:$0]  (!%p5420_p5), %s216_s14, 196608, %s218_s19, [#allocation3], %s5343_s20, %s5343_s20, %s5344_s21  }
  0x10   : > { %s241_s25 = sshll.u32 %s5865_s3, 4  ;;  %s5345_s26 = smov [#allocation6]   ;;  %s242_s25 = int_to_ptr.hbm [resolvable:$true] %s241_s25 }
  0x11   : > { %s243_s30 = sshll.u32 %s5345_s26, 4  ;;  %s267_s9 = sshll.u32 %s5867_s5, 4  ;;  %s244_s30 = int_to_ptr.vmem [resolvable:$true] %s243_s30  ;;  %s268_s9 = int_to_ptr.hbm [resolvable:$true] %s267_s9 }
  0x12   : > { %s5346_s10 = smov 128   ;;  %s5347_s11 = smov 8  }
  0x13   : > { %5069 = dma.hbm_to_vmem [thread:$0]  (!%p5420_p5), %s242_s25, 32768, %s244_s30, [#allocation5], %s5346_s10, %s5346_s10, %s5347_s11  }
  0x14   : > { %s5348_s12 = smov [#allocation9]   ;;  %s5349_s14 = smov 256  }
  0x15   : > { %s269_s13 = sshll.u32 %s5348_s12, 4  ;;  %s5350_s16 = smov 16   ;;  %s270_s13 = int_to_ptr.vmem [resolvable:$true] %s269_s13 }
  0x16   : > { %5075 = dma.hbm_to_vmem [thread:$0]  (!%p5420_p5), %s268_s9, 12288, %s270_s13, [#allocation8], %s5349_s14, %s5349_s14, %s5350_s16  }
  0x17   : > { %s282_s19 = sshll.u32 %s5868_s6, 4  ;;  %s5351_s20 = smov [#allocation10]   ;;  %s283_s19 = int_to_ptr.hbm [resolvable:$true] %s282_s19 }
  0x18   : > { %s284_s21 = sshll.u32 %s5351_s20, 4  ;;  %305 = sbr.rel (%p5406_p3) target bundleno = 1456 (0x5b0), region = 48  ;;  %s285_s21 = int_to_ptr.vmem [resolvable:$true] %s284_s21 }
  0x19   : > { %5078 = dma.hbm_to_vmem [thread:$0]  (!%p5420_p5), %s283_s19, 32, %s285_s21, [#allocation11]  }
  0x1d   : > { %5321 = dma.done.wait (%p5079_p2), [#allocation3], 196608  }
  0x1e   : > { %5323 = vsyncadd (%p5079_p2), [#allocation3], 4294770688 }
  0x1f   : > { %5325 = dma.done.wait (%p5079_p2), [#allocation5], 32832  }
  0x20   : > { %5327 = vsyncadd (%p5079_p2), [#allocation5], 4294934464 }
  0x21   : > { %5329 = dma.done.wait (%p5079_p2), [#allocation8], 12304  }
  0x22   : > { %5331 = vsyncadd (%p5079_p2), [#allocation8], 4294954992 }
  0x23   : > { %5333 = dma.done.wait (%p5079_p2), [#allocation11], 32  }
  0x24   : > { %5335 = vsyncadd (%p5079_p2), [#allocation11], 4294967264  ;;  %v471_v0 = vld [vmem:[#allocation2 + $0x1e0] sm:$0xff]  ;;  %p363_p6 = scmp.lt.s32.totalorder %s5401_s28, 1  ;;  %vm404_vm0 = vcmask 1043456   ;;  %vm4002_vm1 = vcmask 1040384  }
  0x25   : > { %v535_v1 = vld [vmem:[#allocation2 + $0x3e0] sm:$0xff]  ;;  %795 = vmatpush.msra.mxu0 %v471_v0  ;;  %vm5810_vm2 = vmneg %vm4002_vm1  ;;  %vm4015_vm3 = vcmask 1042432  }
  0x26   : > { %v599_v2 = vld [vmem:[#allocation2 + $0x5e0] sm:$0xff]  ;;  %815 = vmatpush.msra.mxu1 %v535_v1  ;;  %v472_v1 = vld [vmem:[#allocation2 + $0x1e8] sm:$0xff]  ;;  %s5875_s28 = smov (!%p363_p6, %s5401_s28), 1 }
  0x27   : > { %v467_v3 = vld [vmem:[#allocation2 + $0x1c0] sm:$0xff]  ;;  %835 = vmatpush.msra.mxu2 %v599_v2  ;;  %s5035_s29 = smul.u32 192, %s5875_s28  ;;  %s5034_s25 = sshll.u32 %s5875_s28, 3 }
  0x28   : > { %v531_v4 = vld [vmem:[#allocation2 + $0x3c0] sm:$0xff]  ;;  %796 = vmatpush.msra.mxu0 %v467_v3  ;;  %s372_s27 = scalar_lea.vmem %s5869_s7, %s5034_s25 }
  0x29   : > { %v595_v5 = vld [vmem:[#allocation2 + $0x5c0] sm:$0xff]  ;;  %816 = vmatpush.msra.mxu1 %v531_v4  ;;  %s5473_s23 = scalar_lea.vmem %s5862_s0, %s5035_s29 }
  0x2a   : > { %v663_v6 = vld [vmem:[#allocation2 + $0x7e0] sm:$0xff]  ;;  %836 = vmatpush.msra.mxu2 %v595_v5  ;;  %v468_v5 = vld [vmem:[#allocation2 + $0x1c8] sm:$0xff] }
  0x2b   : > { %v463_v7 = vld [vmem:[#allocation2 + $0x1a0] sm:$0xff]  ;;  %855 = vmatpush.msra.mxu3 %v663_v6  ;;  %v536_v6 = vld [vmem:[#allocation2 + $0x3e8] sm:$0xff] }
  0x2c   : > { %v527_v8 = vld [vmem:[#allocation2 + $0x3a0] sm:$0xff]  ;;  %797 = vmatpush.msra.mxu0 %v463_v7 }
  0x2d   : > { %v591_v9 = vld [vmem:[#allocation2 + $0x5a0] sm:$0xff]  ;;  %817 = vmatpush.msra.mxu1 %v527_v8 }
  0x2e   : > { %v659_v10 = vld [vmem:[#allocation2 + $0x7c0] sm:$0xff]  ;;  %837 = vmatpush.msra.mxu2 %v591_v9  ;;  %v464_v9 = vld [vmem:[#allocation2 + $0x1a8] sm:$0xff] }
  0x2f   : > { %v459_v11 = vld [vmem:[#allocation2 + $0x180] sm:$0xff]  ;;  %856 = vmatpush.msra.mxu3 %v659_v10  ;;  %v532_v10 = vld [vmem:[#allocation2 + $0x3c8] sm:$0xff] }
  0x30   : > { %v523_v12 = vld [vmem:[#allocation2 + $0x380] sm:$0xff]  ;;  %798 = vmatpush.msra.mxu0 %v459_v11 }
  0x31   : > { %v587_v13 = vld [vmem:[#allocation2 + $0x580] sm:$0xff]  ;;  %818 = vmatpush.msra.mxu1 %v523_v12 }
  0x32   : > { %v655_v14 = vld [vmem:[#allocation2 + $0x7a0] sm:$0xff]  ;;  %838 = vmatpush.msra.mxu2 %v587_v13  ;;  %v460_v13 = vld [vmem:[#allocation2 + $0x188] sm:$0xff] }
  0x33   : > { %v455_v15 = vld [vmem:[#allocation2 + $0x160] sm:$0xff]  ;;  %857 = vmatpush.msra.mxu3 %v655_v14  ;;  %v528_v14 = vld [vmem:[#allocation2 + $0x3a8] sm:$0xff] }
  0x34   : > { %v519_v16 = vld [vmem:[#allocation2 + $0x360] sm:$0xff]  ;;  %799 = vmatpush.msra.mxu0 %v455_v15 }
  0x35   : > { %v583_v17 = vld [vmem:[#allocation2 + $0x560] sm:$0xff]  ;;  %819 = vmatpush.msra.mxu1 %v519_v16 }
  0x36   : > { %v651_v18 = vld [vmem:[#allocation2 + $0x780] sm:$0xff]  ;;  %839 = vmatpush.msra.mxu2 %v583_v17  ;;  %v456_v17 = vld [vmem:[#allocation2 + $0x168] sm:$0xff] }
  0x37   : > { %v451_v19 = vld [vmem:[#allocation2 + $0x140] sm:$0xff]  ;;  %858 = vmatpush.msra.mxu3 %v651_v18  ;;  %v524_v18 = vld [vmem:[#allocation2 + $0x388] sm:$0xff] }
  0x38   : > { %v515_v20 = vld [vmem:[#allocation2 + $0x340] sm:$0xff]  ;;  %800 = vmatpush.msra.mxu0 %v451_v19 }
  0x39   : > { %v579_v21 = vld [vmem:[#allocation2 + $0x540] sm:$0xff]  ;;  %820 = vmatpush.msra.mxu1 %v515_v20 }
  0x3a   : > { %v647_v22 = vld [vmem:[#allocation2 + $0x760] sm:$0xff]  ;;  %840 = vmatpush.msra.mxu2 %v579_v21  ;;  %v452_v21 = vld [vmem:[#allocation2 + $0x148] sm:$0xff] }
  0x3b   : > { %v447_v23 = vld [vmem:[#allocation2 + $0x120] sm:$0xff]  ;;  %859 = vmatpush.msra.mxu3 %v647_v22  ;;  %v520_v22 = vld [vmem:[#allocation2 + $0x368] sm:$0xff] }
  0x3c   : > { %v511_v24 = vld [vmem:[#allocation2 + $0x320] sm:$0xff]  ;;  %801 = vmatpush.msra.mxu0 %v447_v23 }
  0x3d   : > { %v575_v25 = vld [vmem:[#allocation2 + $0x520] sm:$0xff]  ;;  %821 = vmatpush.msra.mxu1 %v511_v24 }
  0x3e   : > { %v643_v26 = vld [vmem:[#allocation2 + $0x740] sm:$0xff]  ;;  %841 = vmatpush.msra.mxu2 %v575_v25  ;;  %v448_v25 = vld [vmem:[#allocation2 + $0x128] sm:$0xff] }
  0x3f   : > { %v443_v27 = vld [vmem:[#allocation2 + $0x100] sm:$0xff]  ;;  %860 = vmatpush.msra.mxu3 %v643_v26  ;;  %v516_v26 = vld [vmem:[#allocation2 + $0x348] sm:$0xff] }
  0x40   : > { %v507_v28 = vld [vmem:[#allocation2 + $0x300] sm:$0xff]  ;;  %802 = vmatpush.msra.mxu0 %v443_v27 }
  0x41   : > { %v571_v29 = vld [vmem:[#allocation2 + $0x500] sm:$0xff]  ;;  %822 = vmatpush.msra.mxu1 %v507_v28 }
  0x42   : > { %v639_v30 = vld [vmem:[#allocation2 + $0x720] sm:$0xff]  ;;  %842 = vmatpush.msra.mxu2 %v571_v29  ;;  %v444_v29 = vld [vmem:[#allocation2 + $0x108] sm:$0xff] }
  0x43   : > { %v439_v31 = vld [vmem:[#allocation2 + $0xe0] sm:$0xff]  ;;  %861 = vmatpush.msra.mxu3 %v639_v30  ;;  %v512_v30 = vld [vmem:[#allocation2 + $0x328] sm:$0xff] }
  0x44   : > { %v503_v32 = vld [vmem:[#allocation2 + $0x2e0] sm:$0xff]  ;;  %803 = vmatpush.msra.mxu0 %v439_v31 }
  0x45   : > { %v567_v33 = vld [vmem:[#allocation2 + $0x4e0] sm:$0xff]  ;;  %823 = vmatpush.msra.mxu1 %v503_v32 }
  0x46   : > { %v635_v34 = vld [vmem:[#allocation2 + $0x700] sm:$0xff]  ;;  %843 = vmatpush.msra.mxu2 %v567_v33  ;;  %v440_v33 = vld [vmem:[#allocation2 + $0xe8] sm:$0xff] }
  0x47   : > { %v435_v35 = vld [vmem:[#allocation2 + $0xc0] sm:$0xff]  ;;  %862 = vmatpush.msra.mxu3 %v635_v34  ;;  %v508_v34 = vld [vmem:[#allocation2 + $0x308] sm:$0xff] }
  0x48   : > { %v499_v36 = vld [vmem:[#allocation2 + $0x2c0] sm:$0xff]  ;;  %804 = vmatpush.msra.mxu0 %v435_v35 }
  0x49   : > { %v563_v37 = vld [vmem:[#allocation2 + $0x4c0] sm:$0xff]  ;;  %824 = vmatpush.msra.mxu1 %v499_v36 }
  0x4a   : > { %v631_v38 = vld [vmem:[#allocation2 + $0x6e0] sm:$0xff]  ;;  %844 = vmatpush.msra.mxu2 %v563_v37  ;;  %v436_v37 = vld [vmem:[#allocation2 + $0xc8] sm:$0xff] }
  0x4b   : > { %v431_v39 = vld [vmem:[#allocation2 + $0xa0] sm:$0xff]  ;;  %863 = vmatpush.msra.mxu3 %v631_v38  ;;  %v504_v38 = vld [vmem:[#allocation2 + $0x2e8] sm:$0xff] }
  0x4c   : > { %v495_v40 = vld [vmem:[#allocation2 + $0x2a0] sm:$0xff]  ;;  %805 = vmatpush.msra.mxu0 %v431_v39 }
  0x4d   : > { %v559_v41 = vld [vmem:[#allocation2 + $0x4a0] sm:$0xff]  ;;  %825 = vmatpush.msra.mxu1 %v495_v40 }
  0x4e   : > { %v627_v42 = vld [vmem:[#allocation2 + $0x6c0] sm:$0xff]  ;;  %845 = vmatpush.msra.mxu2 %v559_v41  ;;  %v432_v41 = vld [vmem:[#allocation2 + $0xa8] sm:$0xff] }
  0x4f   : > { %v427_v43 = vld [vmem:[#allocation2 + $0x80] sm:$0xff]  ;;  %864 = vmatpush.msra.mxu3 %v627_v42  ;;  %v500_v42 = vld [vmem:[#allocation2 + $0x2c8] sm:$0xff] }
  0x50   : > { %v491_v44 = vld [vmem:[#allocation2 + $0x280] sm:$0xff]  ;;  %806 = vmatpush.msra.mxu0 %v427_v43 }
  0x51   : > { %v555_v45 = vld [vmem:[#allocation2 + $0x480] sm:$0xff]  ;;  %826 = vmatpush.msra.mxu1 %v491_v44 }
  0x52   : > { %v623_v46 = vld [vmem:[#allocation2 + $0x6a0] sm:$0xff]  ;;  %846 = vmatpush.msra.mxu2 %v555_v45  ;;  %v428_v45 = vld [vmem:[#allocation2 + $0x88] sm:$0xff] }
  0x53   : > { %v423_v47 = vld [vmem:[#allocation2 + $0x60] sm:$0xff]  ;;  %865 = vmatpush.msra.mxu3 %v623_v46  ;;  %v496_v46 = vld [vmem:[#allocation2 + $0x2a8] sm:$0xff] }
  0x54   : > { %v487_v48 = vld [vmem:[#allocation2 + $0x260] sm:$0xff]  ;;  %807 = vmatpush.msra.mxu0 %v423_v47  ;;  %v4998_v47 = vld [vmem:[%s5473_s23 + $0x70] sm:$0x1f] }
  0x55   : > { %v551_v49 = vld [vmem:[#allocation2 + $0x460] sm:$0xff]  ;;  %827 = vmatpush.msra.mxu1 %v487_v48 }
  0x56   : > { %v619_v50 = vld [vmem:[#allocation2 + $0x680] sm:$0xff]  ;;  %847 = vmatpush.msra.mxu2 %v551_v49 }
  0x57   : > { %v419_v51 = vld [vmem:[#allocation2 + $0x40] sm:$0xff]  ;;  %866 = vmatpush.msra.mxu3 %v619_v50  ;;  %v424_v50 = vld [vmem:[#allocation2 + $0x68] sm:$0xff] }
  0x58   : > { %v483_v52 = vld [vmem:[#allocation2 + $0x240] sm:$0xff]  ;;  %808 = vmatpush.msra.mxu0 %v419_v51  ;;  %v492_v51 = vld [vmem:[#allocation2 + $0x288] sm:$0xff] }
  0x59   : > { %v547_v53 = vld [vmem:[#allocation2 + $0x440] sm:$0xff]  ;;  %828 = vmatpush.msra.mxu1 %v483_v52 }
  0x5a   : > { %v615_v54 = vld [vmem:[#allocation2 + $0x660] sm:$0xff]  ;;  %848 = vmatpush.msra.mxu2 %v547_v53 }
  0x5b   : > { %v415_v55 = vld [vmem:[#allocation2 + $0x20] sm:$0xff]  ;;  %867 = vmatpush.msra.mxu3 %v615_v54 }
  0x5c   : > { %v479_v56 = vld [vmem:[#allocation2 + $0x220] sm:$0xff]  ;;  %809 = vmatpush.msra.mxu0 %v415_v55  ;;  %v394_v55 = vrot.slane %v4998_v47, 4  ;;  %v576_v47 = vld [vmem:[#allocation2 + $0x528] sm:$0xff] }
  0x5d   : > { %v543_v57 = vld [vmem:[#allocation2 + $0x420] sm:$0xff]  ;;  %829 = vmatpush.msra.mxu1 %v479_v56  ;;  %v4997_v56 = vld [vmem:[%s5473_s23 + $0x68] sm:$0x1f] }
  0x5e   : > { %v611_v58 = vld [vmem:[#allocation2 + $0x640] sm:$0xff]  ;;  %849 = vmatpush.msra.mxu2 %v543_v57  ;;  %v4999_v57 = vld [vmem:[%s5473_s23 + $0x78] sm:$0x1f] }
  0x5f   : > { %v411_v59 = vld [vmem:[#allocation2] sm:$0xff]  ;;  %868 = vmatpush.msra.mxu3 %v611_v58  ;;  %v420_v58 = vld [vmem:[#allocation2 + $0x48] sm:$0xff] }
  0x60   : > { %v475_v60 = vld [vmem:[#allocation2 + $0x200] sm:$0xff]  ;;  %810 = vmatpush.msra.mxu0 %v411_v59  ;;  %v488_v59 = vld [vmem:[#allocation2 + $0x268] sm:$0xff] }
  0x61   : > { %v539_v61 = vld [vmem:[#allocation2 + $0x400] sm:$0xff]  ;;  %830 = vmatpush.msra.mxu1 %v475_v60  ;;  %v375_v60 = vld [vmem:[%s5473_s23 + $0x10] sm:$0x1f] }
  0x62   : > { %v607_v62 = vld [vmem:[#allocation2 + $0x620] sm:$0xff]  ;;  %850 = vmatpush.msra.mxu2 %v539_v61 }
  0x63   : > { %v727_v63 = vld [vmem:[#allocation2 + $0x9e0] sm:$0xff]  ;;  %869 = vmatpush.msra.mxu3 %v607_v62 }
  0x64   : > { %v791_v0 = vld [vmem:[#allocation2 + $0xbe0] sm:$0xff]  ;;  %875 = vmatpush.msrb.mxu0 %v727_v63  ;;  %915 = vmatpush.msrb.mxu2 %v472_v1  ;;  %v484_v1 = vld [vmem:[#allocation2 + $0x248] sm:$0xff] }
  0x65   : > { %v603_v2 = vld [vmem:[#allocation2 + $0x600] sm:$0xff]  ;;  %895 = vmatpush.msrb.mxu1 %v791_v0  ;;  %v416_v0 = vld [vmem:[#allocation2 + $0x28] sm:$0xff] }
  0x66   : > { %v723_v3 = vld [vmem:[#allocation2 + $0x9c0] sm:$0xff]  ;;  %870 = vmatpush.msra.mxu3 %v603_v2  ;;  %916 = vmatpush.msrb.mxu2 %v468_v5  ;;  %v5482_v5 = vsel %vm404_vm0, %v375_v60, %v394_v55  ;;  %v568_v55 = vld [vmem:[#allocation2 + $0x4e8] sm:$0xff] }
  0x67   : > { %v787_v4 = vld [vmem:[#allocation2 + $0xbc0] sm:$0xff]  ;;  %876 = vmatpush.msrb.mxu0 %v723_v3  ;;  %v393_v3 = vrot.slane %v4997_v56, 4  ;;  %851 = vmatmul.f32.vlgmr.msra.gmra.mxu2 %v5482_v5  ;;  %v632_v56 = vld [vmem:[#allocation2 + $0x6e8] sm:$0xff] }
  0x68   : > { %v719_v7 = vld [vmem:[#allocation2 + $0x9a0] sm:$0xff]  ;;  %896 = vmatpush.msrb.mxu1 %v787_v4  ;;  %935 = vmatpush.msrb.mxu3 %v536_v6  ;;  %v395_v4 = vrot.slane %v4999_v57, 4  ;;  %v696_v57 = vld [vmem:[#allocation2 + $0x8e8] sm:$0xff] }
  0x69   : > { %v783_v8 = vld [vmem:[#allocation2 + $0xba0] sm:$0xff]  ;;  %877 = vmatpush.msrb.mxu0 %v719_v7  ;;  %917 = vmatpush.msrb.mxu2 %v464_v9  ;;  %v374_v7 = vld [vmem:[%s5473_s23 + $0x8] sm:$0x1f] }
  0x6a   : > { %v715_v11 = vld [vmem:[#allocation2 + $0x980] sm:$0xff]  ;;  %897 = vmatpush.msrb.mxu1 %v783_v8  ;;  %936 = vmatpush.msrb.mxu3 %v532_v10  ;;  %v376_v8 = vld [vmem:[%s5473_s23 + $0x18] sm:$0x1f]  ;;  %v412_v10 = vld [vmem:[#allocation2 + $0x8] sm:$0xff] }
  0x6b   : > { %v779_v12 = vld [vmem:[#allocation2 + $0xb80] sm:$0xff]  ;;  %878 = vmatpush.msrb.mxu0 %v715_v11  ;;  %918 = vmatpush.msrb.mxu2 %v460_v13  ;;  %v480_v11 = vld [vmem:[#allocation2 + $0x228] sm:$0xff]  ;;  %v5491_v13 = vsel %vm404_vm0, %v374_v7, %v393_v3 }
  0x6c   : > { %v711_v15 = vld [vmem:[#allocation2 + $0x960] sm:$0xff]  ;;  %898 = vmatpush.msrb.mxu1 %v779_v12  ;;  %937 = vmatpush.msrb.mxu3 %v528_v14  ;;  %v5494_v14 = vsel %vm404_vm0, %v376_v8, %v395_v4  ;;  %v628_v60 = vld [vmem:[#allocation2 + $0x6c8] sm:$0xff] }
  0x6d   : > { %v775_v16 = vld [vmem:[#allocation2 + $0xb60] sm:$0xff]  ;;  %879 = vmatpush.msrb.mxu0 %v711_v15  ;;  %919 = vmatpush.msrb.mxu2 %v456_v17  ;;  %v600_v15 = vld [vmem:[#allocation2 + $0x5e8] sm:$0xff] }
  0x6e   : > { %v707_v19 = vld [vmem:[#allocation2 + $0x940] sm:$0xff]  ;;  %899 = vmatpush.msrb.mxu1 %v775_v16  ;;  %938 = vmatpush.msrb.mxu3 %v524_v18  ;;  %v664_v16 = vld [vmem:[#allocation2 + $0x7e8] sm:$0xff] }
  0x6f   : > { %v771_v20 = vld [vmem:[#allocation2 + $0xb40] sm:$0xff]  ;;  %880 = vmatpush.msrb.mxu0 %v707_v19  ;;  %920 = vmatpush.msrb.mxu2 %v452_v21  ;;  %v728_v17 = vld [vmem:[#allocation2 + $0x9e8] sm:$0xff] }
  0x70   : > { %v703_v23 = vld [vmem:[#allocation2 + $0x920] sm:$0xff]  ;;  %900 = vmatpush.msrb.mxu1 %v771_v20  ;;  %939 = vmatpush.msrb.mxu3 %v520_v22  ;;  %v476_v18 = vld [vmem:[#allocation2 + $0x208] sm:$0xff] }
  0x71   : > { %v767_v24 = vld [vmem:[#allocation2 + $0xb20] sm:$0xff]  ;;  %881 = vmatpush.msrb.mxu0 %v703_v23  ;;  %921 = vmatpush.msrb.mxu2 %v448_v25  ;;  %v596_v20 = vld [vmem:[#allocation2 + $0x5c8] sm:$0xff] }
  0x72   : > { %v699_v27 = vld [vmem:[#allocation2 + $0x900] sm:$0xff]  ;;  %901 = vmatpush.msrb.mxu1 %v767_v24  ;;  %940 = vmatpush.msrb.mxu3 %v516_v26  ;;  %v660_v21 = vld [vmem:[#allocation2 + $0x7c8] sm:$0xff] }
  0x73   : > { %v763_v28 = vld [vmem:[#allocation2 + $0xb00] sm:$0xff]  ;;  %882 = vmatpush.msrb.mxu0 %v699_v27  ;;  %922 = vmatpush.msrb.mxu2 %v444_v29  ;;  %v724_v22 = vld [vmem:[#allocation2 + $0x9c8] sm:$0xff] }
  0x74   : > { %v695_v31 = vld [vmem:[#allocation2 + $0x8e0] sm:$0xff]  ;;  %902 = vmatpush.msrb.mxu1 %v763_v28  ;;  %941 = vmatpush.msrb.mxu3 %v512_v30  ;;  %v792_v23 = vld [vmem:[#allocation2 + $0xbe8] sm:$0xff] }
  0x75   : > { %v759_v32 = vld [vmem:[#allocation2 + $0xae0] sm:$0xff]  ;;  %883 = vmatpush.msrb.mxu0 %v695_v31  ;;  %923 = vmatpush.msrb.mxu2 %v440_v33  ;;  %v5001_v24 = vld [vmem:[%s5473_s23 + $0x88] sm:$0x1f] }
  0x76   : > { %v691_v35 = vld [vmem:[#allocation2 + $0x8c0] sm:$0xff]  ;;  %903 = vmatpush.msrb.mxu1 %v759_v32  ;;  %942 = vmatpush.msrb.mxu3 %v508_v34  ;;  %v592_v25 = vld [vmem:[#allocation2 + $0x5a8] sm:$0xff]  ;;  %v397_v33 = vrot.slane %v5001_v24, 4 }
  0x77   : > { %v755_v36 = vld [vmem:[#allocation2 + $0xac0] sm:$0xff]  ;;  %884 = vmatpush.msrb.mxu0 %v691_v35  ;;  %924 = vmatpush.msrb.mxu2 %v436_v37  ;;  %v656_v26 = vld [vmem:[#allocation2 + $0x7a8] sm:$0xff] }
  0x78   : > { %v687_v39 = vld [vmem:[#allocation2 + $0x8a0] sm:$0xff]  ;;  %904 = vmatpush.msrb.mxu1 %v755_v36  ;;  %943 = vmatpush.msrb.mxu3 %v504_v38  ;;  %v720_v27 = vld [vmem:[#allocation2 + $0x9a8] sm:$0xff] }
  0x79   : > { %v751_v40 = vld [vmem:[#allocation2 + $0xaa0] sm:$0xff]  ;;  %885 = vmatpush.msrb.mxu0 %v687_v39  ;;  %925 = vmatpush.msrb.mxu2 %v432_v41  ;;  %v788_v29 = vld [vmem:[#allocation2 + $0xbc8] sm:$0xff] }
  0x7a   : > { %v683_v43 = vld [vmem:[#allocation2 + $0x880] sm:$0xff]  ;;  %905 = vmatpush.msrb.mxu1 %v751_v40  ;;  %944 = vmatpush.msrb.mxu3 %v500_v42  ;;  %v588_v31 = vld [vmem:[#allocation2 + $0x588] sm:$0xff] }
  0x7b   : > { %v747_v44 = vld [vmem:[#allocation2 + $0xa80] sm:$0xff]  ;;  %886 = vmatpush.msrb.mxu0 %v683_v43  ;;  %926 = vmatpush.msrb.mxu2 %v428_v45  ;;  %v652_v32 = vld [vmem:[#allocation2 + $0x788] sm:$0xff] }
  0x7c   : > { %v679_v48 = vld [vmem:[#allocation2 + $0x860] sm:$0xff]  ;;  %906 = vmatpush.msrb.mxu1 %v747_v44  ;;  %945 = vmatpush.msrb.mxu3 %v496_v46  ;;  %v716_v34 = vld [vmem:[#allocation2 + $0x988] sm:$0xff] }
  0x7d   : > { %v743_v49 = vld [vmem:[#allocation2 + $0xa60] sm:$0xff]  ;;  %887 = vmatpush.msrb.mxu0 %v679_v48  ;;  %927 = vmatpush.msrb.mxu2 %v424_v50  ;;  %v784_v35 = vld [vmem:[#allocation2 + $0xba8] sm:$0xff] }
  0x7e   : > { %v675_v52 = vld [vmem:[#allocation2 + $0x840] sm:$0xff]  ;;  %907 = vmatpush.msrb.mxu1 %v743_v49  ;;  %946 = vmatpush.msrb.mxu3 %v492_v51  ;;  %v378_v36 = vld [vmem:[%s5473_s23 + $0x28] sm:$0x1f] }
  0x7f   : > { %v4996_v53 = vld [vmem:[%s5473_s23 + $0x60] sm:$0x1f]  ;;  %888 = vmatpush.msrb.mxu0 %v675_v52  ;;  %928 = vmatpush.msrb.mxu2 %v420_v58  ;;  %v648_v38 = vld [vmem:[#allocation2 + $0x768] sm:$0xff]  ;;  %v5507_v42 = vsel %vm404_vm0, %v378_v36, %v397_v33  ;;  %v597_v33 = vld [vmem:[#allocation2 + $0x5d0] sm:$0xff] }
  0x80   : > { %v739_v54 = vld [vmem:[#allocation2 + $0xa40] sm:$0xff]  ;;  %v392_v63 = vrot.slane %v4996_v53, 4  ;;  %947 = vmatpush.msrb.mxu3 %v488_v59  ;;  %831 = vmatmul.f32.vlgmr.msra.gmra.mxu1 %v5491_v13  ;;  %v584_v39 = vld [vmem:[#allocation2 + $0x568] sm:$0xff]  ;;  %v529_v36 = vld [vmem:[#allocation2 + $0x3b0] sm:$0xff] }
  0x81   : > { %v671_v61 = vld [vmem:[#allocation2 + $0x820] sm:$0xff]  ;;  %908 = vmatpush.msrb.mxu1 %v739_v54  ;;  %929 = vmatpush.msrb.mxu2 %v416_v0  ;;  %v712_v40 = vld [vmem:[#allocation2 + $0x968] sm:$0xff] }
  0x82   : > { %v735_v62 = vld [vmem:[#allocation2 + $0xa20] sm:$0xff]  ;;  %889 = vmatpush.msrb.mxu0 %v671_v61  ;;  %948 = vmatpush.msrb.mxu3 %v484_v1  ;;  %v780_v41 = vld [vmem:[#allocation2 + $0xb88] sm:$0xff] }
  0x83   : > { %v373_v2 = vld [vmem:[%s5473_s23] sm:$0x1f]  ;;  %909 = vmatpush.msrb.mxu1 %v735_v62  ;;  %930 = vmatpush.msrb.mxu2 %v412_v10  ;;  %v580_v43 = vld [vmem:[#allocation2 + $0x548] sm:$0xff] }
  0x84   : > { %v667_v6 = vld [vmem:[#allocation2 + $0x800] sm:$0xff]  ;;  %v5487_v12 = vsel %vm404_vm0, %v373_v2, %v392_v63  ;;  %949 = vmatpush.msrb.mxu3 %v480_v11  ;;  %v644_v44 = vld [vmem:[#allocation2 + $0x748] sm:$0xff] }
  0x85   : > { %v731_v9 = vld [vmem:[#allocation2 + $0xa00] sm:$0xff]  ;;  %890 = vmatpush.msrb.mxu0 %v667_v6  ;;  %871 = vmatmul.f32.vlgmr.msra.gmra.mxu3 %v5494_v14  ;;  %v708_v45 = vld [vmem:[#allocation2 + $0x948] sm:$0xff] }
  0x86   : > { %910 = vmatpush.msrb.mxu1 %v731_v9  ;;  %811 = vmatmul.f32.vlgmr.msra.gmra.mxu0 %v5487_v12  ;;  %v5000_v19 = vld [vmem:[%s5473_s23 + $0x80] sm:$0x1f]  ;;  %v776_v46 = vld [vmem:[#allocation2 + $0xb68] sm:$0xff] }
  0x87   : > { %955 = vmatpush.msra.mxu0 %v600_v15  ;;  %995 = vmatpush.msra.mxu2 %v728_v17  ;;  %v396_v28 = vrot.slane %v5000_v19, 4  ;;  %v377_v30 = vld [vmem:[%s5473_s23 + $0x20] sm:$0x1f]  ;;  %v640_v48 = vld [vmem:[#allocation2 + $0x728] sm:$0xff] }
  0x88   : > { %975 = vmatpush.msra.mxu1 %v664_v16  ;;  %950 = vmatpush.msrb.mxu3 %v476_v18  ;;  %v704_v49 = vld [vmem:[#allocation2 + $0x928] sm:$0xff] }
  0x89   : > { %956 = vmatpush.msra.mxu0 %v596_v20  ;;  %996 = vmatpush.msra.mxu2 %v724_v22  ;;  %v5504_v37 = vsel %vm404_vm0, %v377_v30, %v396_v28  ;;  %v772_v50 = vld [vmem:[#allocation2 + $0xb48] sm:$0xff]  ;;  %v537_v28 = vld [vmem:[#allocation2 + $0x3f0] sm:$0xff] }
  0x8a   : > { %976 = vmatpush.msra.mxu1 %v660_v21  ;;  %1015 = vmatpush.msra.mxu3 %v792_v23  ;;  %v572_v51 = vld [vmem:[#allocation2 + $0x508] sm:$0xff] }
  0x8b   : > { %957 = vmatpush.msra.mxu0 %v592_v25  ;;  %997 = vmatpush.msra.mxu2 %v720_v27  ;;  %v636_v52 = vld [vmem:[#allocation2 + $0x708] sm:$0xff]  ;;  %v473_v27 = vld [vmem:[#allocation2 + $0x1f0] sm:$0xff] }
  0x8c   : > { %977 = vmatpush.msra.mxu1 %v656_v26  ;;  %1016 = vmatpush.msra.mxu3 %v788_v29  ;;  %v700_v53 = vld [vmem:[#allocation2 + $0x908] sm:$0xff]  ;;  %v601_v29 = vld [vmem:[#allocation2 + $0x5f0] sm:$0xff] }
  0x8d   : > { %958 = vmatpush.msra.mxu0 %v588_v31  ;;  %998 = vmatpush.msra.mxu2 %v716_v34  ;;  %v768_v54 = vld [vmem:[#allocation2 + $0xb28] sm:$0xff]  ;;  %v469_v31 = vld [vmem:[#allocation2 + $0x1d0] sm:$0xff] }
  0x8e   : > { %978 = vmatpush.msra.mxu1 %v652_v32  ;;  %1017 = vmatpush.msra.mxu3 %v784_v35  ;;  %v764_v58 = vld [vmem:[#allocation2 + $0xb08] sm:$0xff]  ;;  %v533_v32 = vld [vmem:[#allocation2 + $0x3d0] sm:$0xff] }
  0x8f   : > { %891 = vmatmul.f32.vlgmr.msrb.gmra.mxu0 %v5504_v37  ;;  %999 = vmatpush.msra.mxu2 %v712_v40  ;;  %v564_v59 = vld [vmem:[#allocation2 + $0x4c8] sm:$0xff]  ;;  %v665_v34 = vld [vmem:[#allocation2 + $0x7f0] sm:$0xff] }
  0x90   : > { %979 = vmatpush.msra.mxu1 %v648_v38  ;;  %959 = vmatpush.msra.mxu0 %v584_v39  ;;  %v692_v61 = vld [vmem:[#allocation2 + $0x8c8] sm:$0xff]  ;;  %v465_v35 = vld [vmem:[#allocation2 + $0x1b0] sm:$0xff] }
  0x91   : > { %1018 = vmatpush.msra.mxu3 %v780_v41  ;;  %911 = vmatmul.f32.vlgmr.msrb.gmra.mxu1 %v5507_v42  ;;  %v760_v62 = vld [vmem:[#allocation2 + $0xae8] sm:$0xff]  ;;  %v593_v38 = vld [vmem:[#allocation2 + $0x5b0] sm:$0xff] }
  0x92   : > { %960 = vmatpush.msra.mxu0 %v580_v43  ;;  %980 = vmatpush.msra.mxu1 %v644_v44  ;;  %v560_v63 = vld [vmem:[#allocation2 + $0x4a8] sm:$0xff]  ;;  %v661_v39 = vld [vmem:[#allocation2 + $0x7d0] sm:$0xff] }
  0x93   : > { %1000 = vmatpush.msra.mxu2 %v708_v45  ;;  %1019 = vmatpush.msra.mxu3 %v776_v46  ;;  %v624_v0 = vld [vmem:[#allocation2 + $0x6a8] sm:$0xff]  ;;  %v461_v40 = vld [vmem:[#allocation2 + $0x190] sm:$0xff] }
  0x94   : > { %961 = vmatpush.msra.mxu0 %v576_v47  ;;  %981 = vmatpush.msra.mxu1 %v640_v48  ;;  %v688_v1 = vld [vmem:[#allocation2 + $0x8a8] sm:$0xff]  ;;  %v525_v41 = vld [vmem:[#allocation2 + $0x390] sm:$0xff] }
  0x95   : > { %1001 = vmatpush.msra.mxu2 %v704_v49  ;;  %1020 = vmatpush.msra.mxu3 %v772_v50  ;;  %v756_v2 = vld [vmem:[#allocation2 + $0xac8] sm:$0xff]  ;;  %v589_v43 = vld [vmem:[#allocation2 + $0x590] sm:$0xff] }
  0x96   : > { %962 = vmatpush.msra.mxu0 %v572_v51  ;;  %982 = vmatpush.msra.mxu1 %v636_v52  ;;  %v556_v3 = vld [vmem:[#allocation2 + $0x488] sm:$0xff]  ;;  %v657_v44 = vld [vmem:[#allocation2 + $0x7b0] sm:$0xff] }
  0x97   : > { %1002 = vmatpush.msra.mxu2 %v700_v53  ;;  %1021 = vmatpush.msra.mxu3 %v768_v54  ;;  %v620_v4 = vld [vmem:[#allocation2 + $0x688] sm:$0xff]  ;;  %v457_v45 = vld [vmem:[#allocation2 + $0x170] sm:$0xff] }
  0x98   : > { %963 = vmatpush.msra.mxu0 %v568_v55  ;;  %983 = vmatpush.msra.mxu1 %v632_v56  ;;  %v684_v6 = vld [vmem:[#allocation2 + $0x888] sm:$0xff]  ;;  %v521_v46 = vld [vmem:[#allocation2 + $0x370] sm:$0xff] }
  0x99   : > { %1003 = vmatpush.msra.mxu2 %v696_v57  ;;  %1022 = vmatpush.msra.mxu3 %v764_v58  ;;  %v752_v7 = vld [vmem:[#allocation2 + $0xaa8] sm:$0xff]  ;;  %v585_v47 = vld [vmem:[#allocation2 + $0x570] sm:$0xff] }
  0x9a   : > { %964 = vmatpush.msra.mxu0 %v564_v59  ;;  %984 = vmatpush.msra.mxu1 %v628_v60  ;;  %v552_v8 = vld [vmem:[#allocation2 + $0x468] sm:$0xff]  ;;  %v653_v48 = vld [vmem:[#allocation2 + $0x790] sm:$0xff] }
  0x9b   : > { %1004 = vmatpush.msra.mxu2 %v692_v61  ;;  %1023 = vmatpush.msra.mxu3 %v760_v62  ;;  %v616_v9 = vld [vmem:[#allocation2 + $0x668] sm:$0xff]  ;;  %v453_v49 = vld [vmem:[#allocation2 + $0x150] sm:$0xff] }
  0x9c   : > { %965 = vmatpush.msra.mxu0 %v560_v63  ;;  %985 = vmatpush.msra.mxu1 %v624_v0  ;;  %v680_v10 = vld [vmem:[#allocation2 + $0x868] sm:$0xff]  ;;  %v517_v50 = vld [vmem:[#allocation2 + $0x350] sm:$0xff] }
  0x9d   : > { %1005 = vmatpush.msra.mxu2 %v688_v1  ;;  %1024 = vmatpush.msra.mxu3 %v756_v2  ;;  %v748_v11 = vld [vmem:[#allocation2 + $0xa88] sm:$0xff]  ;;  %v581_v51 = vld [vmem:[#allocation2 + $0x550] sm:$0xff] }
  0x9e   : > { %966 = vmatpush.msra.mxu0 %v556_v3  ;;  %986 = vmatpush.msra.mxu1 %v620_v4  ;;  %v548_v15 = vld [vmem:[#allocation2 + $0x448] sm:$0xff]  ;;  %v649_v52 = vld [vmem:[#allocation2 + $0x770] sm:$0xff] }
  0x9f   : > { %1006 = vmatpush.msra.mxu2 %v684_v6  ;;  %1025 = vmatpush.msra.mxu3 %v752_v7  ;;  %v612_v16 = vld [vmem:[#allocation2 + $0x648] sm:$0xff]  ;;  %v449_v53 = vld [vmem:[#allocation2 + $0x130] sm:$0xff] }
  0xa0   : > { %967 = vmatpush.msra.mxu0 %v552_v8  ;;  %987 = vmatpush.msra.mxu1 %v616_v9  ;;  %v676_v17 = vld [vmem:[#allocation2 + $0x848] sm:$0xff]  ;;  %v513_v54 = vld [vmem:[#allocation2 + $0x330] sm:$0xff] }
  0xa1   : > { %v744_v18 = vld [vmem:[#allocation2 + $0xa68] sm:$0xff]  ;;  %1007 = vmatpush.msra.mxu2 %v680_v10  ;;  %1026 = vmatpush.msra.mxu3 %v748_v11  ;;  %v577_v55 = vld [vmem:[#allocation2 + $0x530] sm:$0xff] }
  0xa2   : > { %v544_v19 = vld [vmem:[#allocation2 + $0x428] sm:$0xff]  ;;  %968 = vmatpush.msra.mxu0 %v548_v15  ;;  %988 = vmatpush.msra.mxu1 %v612_v16  ;;  %v645_v56 = vld [vmem:[#allocation2 + $0x750] sm:$0xff] }
  0xa3   : > { %v608_v20 = vld [vmem:[#allocation2 + $0x628] sm:$0xff]  ;;  %1008 = vmatpush.msra.mxu2 %v676_v17  ;;  %1027 = vmatpush.msra.mxu3 %v744_v18  ;;  %v445_v57 = vld [vmem:[#allocation2 + $0x110] sm:$0xff] }
  0xa4   : > { %v672_v21 = vld [vmem:[#allocation2 + $0x828] sm:$0xff]  ;;  %969 = vmatpush.msra.mxu0 %v544_v19  ;;  %989 = vmatpush.msra.mxu1 %v608_v20  ;;  %v509_v58 = vld [vmem:[#allocation2 + $0x310] sm:$0xff] }
  0xa5   : > { %v740_v22 = vld [vmem:[#allocation2 + $0xa48] sm:$0xff]  ;;  %1009 = vmatpush.msra.mxu2 %v672_v21  ;;  %951 = vmatmul.f32.vlgmr.msrb.gmra.mxu3 %v5491_v13  ;;  %v573_v59 = vld [vmem:[#allocation2 + $0x510] sm:$0xff] }
  0xa6   : > { %v540_v23 = vld [vmem:[#allocation2 + $0x408] sm:$0xff]  ;;  %1028 = vmatpush.msra.mxu3 %v740_v22  ;;  %931 = vmatmul.f32.vlgmr.msrb.gmra.mxu2 %v5487_v12  ;;  %v641_v60 = vld [vmem:[#allocation2 + $0x730] sm:$0xff] }
  0xa7   : > { %v604_v24 = vld [vmem:[#allocation2 + $0x608] sm:$0xff]  ;;  %970 = vmatpush.msra.mxu0 %v540_v23  ;;  %v441_v61 = vld [vmem:[#allocation2 + $0xf0] sm:$0xff] }
  0xa8   : > { %v668_v25 = vld [vmem:[#allocation2 + $0x808] sm:$0xff]  ;;  %990 = vmatpush.msra.mxu1 %v604_v24  ;;  %971 = vmatmul.f32.vlgmr.msra.gmra.mxu0 %v5482_v5  ;;  %v505_v62 = vld [vmem:[#allocation2 + $0x2f0] sm:$0xff] }
  0xa9   : > { %v736_v26 = vld [vmem:[#allocation2 + $0xa28] sm:$0xff]  ;;  %1010 = vmatpush.msra.mxu2 %v668_v25  ;;  %1035 = vmatpush.msrb.mxu0 %v473_v27  ;;  %v569_v63 = vld [vmem:[#allocation2 + $0x4f0] sm:$0xff] }
  0xaa   : > { %v732_v30 = vld [vmem:[#allocation2 + $0xa08] sm:$0xff]  ;;  %1029 = vmatpush.msra.mxu3 %v736_v26  ;;  %1055 = vmatpush.msrb.mxu1 %v537_v28  ;;  %v637_v0 = vld [vmem:[#allocation2 + $0x710] sm:$0xff] }
  0xab   : > { %1075 = vmatpush.msrb.mxu2 %v601_v29  ;;  %1036 = vmatpush.msrb.mxu0 %v469_v31  ;;  %v437_v1 = vld [vmem:[#allocation2 + $0xd0] sm:$0xff] }
  0xac   : > { %1030 = vmatpush.msra.mxu3 %v732_v30  ;;  %1056 = vmatpush.msrb.mxu1 %v533_v32  ;;  %v501_v2 = vld [vmem:[#allocation2 + $0x2d0] sm:$0xff] }
  0xad   : > { %1076 = vmatpush.msrb.mxu2 %v597_v33  ;;  %1037 = vmatpush.msrb.mxu0 %v465_v35  ;;  %v565_v3 = vld [vmem:[#allocation2 + $0x4d0] sm:$0xff]  ;;  %v474_v35 = vld [vmem:[#allocation2 + $0x1f8] sm:$0xff] }
  0xae   : > { %1095 = vmatpush.msrb.mxu3 %v665_v34  ;;  %1057 = vmatpush.msrb.mxu1 %v529_v36  ;;  %v633_v4 = vld [vmem:[#allocation2 + $0x6f0] sm:$0xff] }
  0xaf   : > { %1077 = vmatpush.msrb.mxu2 %v593_v38  ;;  %1038 = vmatpush.msrb.mxu0 %v461_v40  ;;  %v433_v6 = vld [vmem:[#allocation2 + $0xb0] sm:$0xff]  ;;  %v470_v40 = vld [vmem:[#allocation2 + $0x1d8] sm:$0xff] }
  0xb0   : > { %1096 = vmatpush.msrb.mxu3 %v661_v39  ;;  %1011 = vmatmul.f32.vlgmr.msra.gmra.mxu2 %v5504_v37  ;;  %v497_v7 = vld [vmem:[#allocation2 + $0x2b0] sm:$0xff] }
  0xb1   : > { %1058 = vmatpush.msrb.mxu1 %v525_v41  ;;  %1078 = vmatpush.msrb.mxu2 %v589_v43  ;;  %v561_v8 = vld [vmem:[#allocation2 + $0x4b0] sm:$0xff]  ;;  %v538_v41 = vld [vmem:[#allocation2 + $0x3f8] sm:$0xff] }
  0xb2   : > { %1097 = vmatpush.msrb.mxu3 %v657_v44  ;;  %1039 = vmatpush.msrb.mxu0 %v457_v45  ;;  %v629_v9 = vld [vmem:[#allocation2 + $0x6d0] sm:$0xff]  ;;  %v466_v45 = vld [vmem:[#allocation2 + $0x1b8] sm:$0xff] }
  0xb3   : > { %1031 = vmatmul.f32.vlgmr.msra.gmra.mxu3 %v5507_v42  ;;  %1059 = vmatpush.msrb.mxu1 %v521_v46  ;;  %v429_v10 = vld [vmem:[#allocation2 + $0x90] sm:$0xff]  ;;  %v534_v46 = vld [vmem:[#allocation2 + $0x3d8] sm:$0xff] }
  0xb4   : > { %1079 = vmatpush.msrb.mxu2 %v585_v47  ;;  %1098 = vmatpush.msrb.mxu3 %v653_v48  ;;  %v493_v11 = vld [vmem:[#allocation2 + $0x290] sm:$0xff] }
  0xb5   : > { %991 = vmatmul.f32.vlgmr.msra.gmra.mxu1 %v5494_v14  ;;  %1040 = vmatpush.msrb.mxu0 %v453_v49  ;;  %v557_v15 = vld [vmem:[#allocation2 + $0x490] sm:$0xff]  ;;  %v462_v49 = vld [vmem:[#allocation2 + $0x198] sm:$0xff] }
  0xb6   : > { %1060 = vmatpush.msrb.mxu1 %v517_v50  ;;  %1080 = vmatpush.msrb.mxu2 %v581_v51  ;;  %v625_v16 = vld [vmem:[#allocation2 + $0x6b0] sm:$0xff]  ;;  %v530_v50 = vld [vmem:[#allocation2 + $0x3b8] sm:$0xff] }
  0xb7   : > { %1099 = vmatpush.msrb.mxu3 %v649_v52  ;;  %1041 = vmatpush.msrb.mxu0 %v449_v53  ;;  %v425_v17 = vld [vmem:[#allocation2 + $0x70] sm:$0xff]  ;;  %v458_v53 = vld [vmem:[#allocation2 + $0x178] sm:$0xff] }
  0xb8   : > { %1061 = vmatpush.msrb.mxu1 %v513_v54  ;;  %1081 = vmatpush.msrb.mxu2 %v577_v55  ;;  %v489_v18 = vld [vmem:[#allocation2 + $0x270] sm:$0xff]  ;;  %v526_v54 = vld [vmem:[#allocation2 + $0x398] sm:$0xff] }
  0xb9   : > { %1100 = vmatpush.msrb.mxu3 %v645_v56  ;;  %1042 = vmatpush.msrb.mxu0 %v445_v57  ;;  %v553_v19 = vld [vmem:[#allocation2 + $0x470] sm:$0xff]  ;;  %v454_v57 = vld [vmem:[#allocation2 + $0x158] sm:$0xff] }
  0xba   : > { %1062 = vmatpush.msrb.mxu1 %v509_v58  ;;  %1082 = vmatpush.msrb.mxu2 %v573_v59  ;;  %v621_v20 = vld [vmem:[#allocation2 + $0x690] sm:$0xff]  ;;  %v522_v58 = vld [vmem:[#allocation2 + $0x378] sm:$0xff] }
  0xbb   : > { %1101 = vmatpush.msrb.mxu3 %v641_v60  ;;  %1043 = vmatpush.msrb.mxu0 %v441_v61  ;;  %v421_v21 = vld [vmem:[#allocation2 + $0x50] sm:$0xff]  ;;  %v450_v61 = vld [vmem:[#allocation2 + $0x138] sm:$0xff] }
  0xbc   : > { %1063 = vmatpush.msrb.mxu1 %v505_v62  ;;  %1083 = vmatpush.msrb.mxu2 %v569_v63  ;;  %v485_v22 = vld [vmem:[#allocation2 + $0x250] sm:$0xff]  ;;  %v518_v62 = vld [vmem:[#allocation2 + $0x358] sm:$0xff] }
  0xbd   : > { %1102 = vmatpush.msrb.mxu3 %v637_v0  ;;  %1044 = vmatpush.msrb.mxu0 %v437_v1  ;;  %v549_v23 = vld [vmem:[#allocation2 + $0x450] sm:$0xff]  ;;  %v446_v1 = vld [vmem:[#allocation2 + $0x118] sm:$0xff] }
  0xbe   : > { %1064 = vmatpush.msrb.mxu1 %v501_v2  ;;  %1084 = vmatpush.msrb.mxu2 %v565_v3  ;;  %v617_v24 = vld [vmem:[#allocation2 + $0x670] sm:$0xff]  ;;  %v514_v2 = vld [vmem:[#allocation2 + $0x338] sm:$0xff] }
  0xbf   : > { %1103 = vmatpush.msrb.mxu3 %v633_v4  ;;  %1045 = vmatpush.msrb.mxu0 %v433_v6  ;;  %v417_v25 = vld [vmem:[#allocation2 + $0x30] sm:$0xff]  ;;  %v442_v6 = vld [vmem:[#allocation2 + $0xf8] sm:$0xff] }
  0xc0   : > { %1065 = vmatpush.msrb.mxu1 %v497_v7  ;;  %1085 = vmatpush.msrb.mxu2 %v561_v8  ;;  %v481_v26 = vld [vmem:[#allocation2 + $0x230] sm:$0xff]  ;;  %v510_v7 = vld [vmem:[#allocation2 + $0x318] sm:$0xff] }
  0xc1   : > { %1104 = vmatpush.msrb.mxu3 %v629_v9  ;;  %1046 = vmatpush.msrb.mxu0 %v429_v10  ;;  %v545_v27 = vld [vmem:[#allocation2 + $0x430] sm:$0xff]  ;;  %v438_v10 = vld [vmem:[#allocation2 + $0xd8] sm:$0xff] }
  0xc2   : > { %1066 = vmatpush.msrb.mxu1 %v493_v11  ;;  %1086 = vmatpush.msrb.mxu2 %v557_v15  ;;  %v613_v28 = vld [vmem:[#allocation2 + $0x650] sm:$0xff]  ;;  %v506_v11 = vld [vmem:[#allocation2 + $0x2f8] sm:$0xff] }
  0xc3   : > { %1105 = vmatpush.msrb.mxu3 %v625_v16  ;;  %1047 = vmatpush.msrb.mxu0 %v425_v17  ;;  %v413_v29 = vld [vmem:[#allocation2 + $0x10] sm:$0xff]  ;;  %v434_v17 = vld [vmem:[#allocation2 + $0xb8] sm:$0xff] }
  0xc4   : > { %1067 = vmatpush.msrb.mxu1 %v489_v18  ;;  %1087 = vmatpush.msrb.mxu2 %v553_v19  ;;  %v477_v30 = vld [vmem:[#allocation2 + $0x210] sm:$0xff]  ;;  %v502_v18 = vld [vmem:[#allocation2 + $0x2d8] sm:$0xff] }
  0xc5   : > { %1106 = vmatpush.msrb.mxu3 %v621_v20  ;;  %1048 = vmatpush.msrb.mxu0 %v421_v21  ;;  %v541_v31 = vld [vmem:[#allocation2 + $0x410] sm:$0xff]  ;;  %v430_v21 = vld [vmem:[#allocation2 + $0x98] sm:$0xff] }
  0xc6   : > { %1068 = vmatpush.msrb.mxu1 %v485_v22  ;;  %1088 = vmatpush.msrb.mxu2 %v549_v23  ;;  %v609_v32 = vld [vmem:[#allocation2 + $0x630] sm:$0xff]  ;;  %v498_v22 = vld [vmem:[#allocation2 + $0x2b8] sm:$0xff] }
  0xc7   : > { %1107 = vmatpush.msrb.mxu3 %v617_v24  ;;  %1049 = vmatpush.msrb.mxu0 %v417_v25  ;;  %v729_v33 = vld [vmem:[#allocation2 + $0x9f0] sm:$0xff]  ;;  %v426_v25 = vld [vmem:[#allocation2 + $0x78] sm:$0xff] }
  0xc8   : > { %1069 = vmatpush.msrb.mxu1 %v481_v26  ;;  %1089 = vmatpush.msrb.mxu2 %v545_v27  ;;  %v793_v34 = vld [vmem:[#allocation2 + $0xbf0] sm:$0xff]  ;;  %v494_v26 = vld [vmem:[#allocation2 + $0x298] sm:$0xff] }
  0xc9   : > { %1108 = vmatpush.msrb.mxu3 %v613_v28  ;;  %1050 = vmatpush.msrb.mxu0 %v413_v29  ;;  %v605_v36 = vld [vmem:[#allocation2 + $0x610] sm:$0xff]  ;;  %v422_v29 = vld [vmem:[#allocation2 + $0x58] sm:$0xff] }
  0xca   : > { %1070 = vmatpush.msrb.mxu1 %v477_v30  ;;  %1090 = vmatpush.msrb.mxu2 %v541_v31  ;;  %v725_v38 = vld [vmem:[#allocation2 + $0x9d0] sm:$0xff]  ;;  %v490_v30 = vld [vmem:[#allocation2 + $0x278] sm:$0xff] }
  0xcb   : > { %1109 = vmatpush.msrb.mxu3 %v609_v32  ;;  %v789_v39 = vld [vmem:[#allocation2 + $0xbd0] sm:$0xff]  ;;  %1115 = vmatpush.msra.mxu0 %v729_v33  ;;  %v418_v33 = vld [vmem:[#allocation2 + $0x38] sm:$0xff] }
  0xcc   : > { %1135 = vmatpush.msra.mxu1 %v793_v34  ;;  %1155 = vmatpush.msra.mxu2 %v474_v35  ;;  %v721_v43 = vld [vmem:[#allocation2 + $0x9b0] sm:$0xff]  ;;  %v486_v34 = vld [vmem:[#allocation2 + $0x258] sm:$0xff] }
  0xcd   : > { %1110 = vmatpush.msrb.mxu3 %v605_v36  ;;  %v785_v44 = vld [vmem:[#allocation2 + $0xbb0] sm:$0xff]  ;;  %1116 = vmatpush.msra.mxu0 %v725_v38  ;;  %v414_v38 = vld [vmem:[#allocation2 + $0x18] sm:$0xff] }
  0xce   : > { %1136 = vmatpush.msra.mxu1 %v789_v39  ;;  %1156 = vmatpush.msra.mxu2 %v470_v40  ;;  %v717_v47 = vld [vmem:[#allocation2 + $0x990] sm:$0xff]  ;;  %v482_v39 = vld [vmem:[#allocation2 + $0x238] sm:$0xff] }
  0xcf   : > { %1175 = vmatpush.msra.mxu3 %v538_v41  ;;  %v781_v48 = vld [vmem:[#allocation2 + $0xb90] sm:$0xff]  ;;  %1117 = vmatpush.msra.mxu0 %v721_v43  ;;  %v602_v40 = vld [vmem:[#allocation2 + $0x5f8] sm:$0xff] }
  0xd0   : > { %1137 = vmatpush.msra.mxu1 %v785_v44  ;;  %1157 = vmatpush.msra.mxu2 %v466_v45  ;;  %v713_v51 = vld [vmem:[#allocation2 + $0x970] sm:$0xff]  ;;  %v666_v41 = vld [vmem:[#allocation2 + $0x7f8] sm:$0xff] }
  0xd1   : > { %1176 = vmatpush.msra.mxu3 %v534_v46  ;;  %v777_v52 = vld [vmem:[#allocation2 + $0xb70] sm:$0xff]  ;;  %1118 = vmatpush.msra.mxu0 %v717_v47  ;;  %v730_v43 = vld [vmem:[#allocation2 + $0x9f8] sm:$0xff] }
  0xd2   : > { %1138 = vmatpush.msra.mxu1 %v781_v48  ;;  %1158 = vmatpush.msra.mxu2 %v462_v49  ;;  %v709_v55 = vld [vmem:[#allocation2 + $0x950] sm:$0xff]  ;;  %v478_v44 = vld [vmem:[#allocation2 + $0x218] sm:$0xff] }
  0xd3   : > { %1177 = vmatpush.msra.mxu3 %v530_v50  ;;  %v773_v56 = vld [vmem:[#allocation2 + $0xb50] sm:$0xff]  ;;  %1119 = vmatpush.msra.mxu0 %v713_v51  ;;  %v598_v45 = vld [vmem:[#allocation2 + $0x5d8] sm:$0xff] }
  0xd4   : > { %1139 = vmatpush.msra.mxu1 %v777_v52  ;;  %1159 = vmatpush.msra.mxu2 %v458_v53  ;;  %v705_v59 = vld [vmem:[#allocation2 + $0x930] sm:$0xff]  ;;  %v662_v46 = vld [vmem:[#allocation2 + $0x7d8] sm:$0xff] }
  0xd5   : > { %1178 = vmatpush.msra.mxu3 %v526_v54  ;;  %v769_v60 = vld [vmem:[#allocation2 + $0xb30] sm:$0xff]  ;;  %1120 = vmatpush.msra.mxu0 %v709_v55  ;;  %v726_v47 = vld [vmem:[#allocation2 + $0x9d8] sm:$0xff] }
  0xd6   : > { %1140 = vmatpush.msra.mxu1 %v773_v56  ;;  %1160 = vmatpush.msra.mxu2 %v454_v57  ;;  %v701_v63 = vld [vmem:[#allocation2 + $0x910] sm:$0xff]  ;;  %v794_v48 = vld [vmem:[#allocation2 + $0xbf8] sm:$0xff] }
  0xd7   : > { %1179 = vmatpush.msra.mxu3 %v522_v58  ;;  %v765_v0 = vld [vmem:[#allocation2 + $0xb10] sm:$0xff]  ;;  %1121 = vmatpush.msra.mxu0 %v705_v59  ;;  %v594_v49 = vld [vmem:[#allocation2 + $0x5b8] sm:$0xff] }
  0xd8   : > { %1141 = vmatpush.msra.mxu1 %v769_v60  ;;  %1161 = vmatpush.msra.mxu2 %v450_v61  ;;  %v697_v3 = vld [vmem:[#allocation2 + $0x8f0] sm:$0xff]  ;;  %v658_v50 = vld [vmem:[#allocation2 + $0x7b8] sm:$0xff] }
  0xd9   : > { %1180 = vmatpush.msra.mxu3 %v518_v62  ;;  %v761_v4 = vld [vmem:[#allocation2 + $0xaf0] sm:$0xff]  ;;  %1122 = vmatpush.msra.mxu0 %v701_v63  ;;  %v722_v51 = vld [vmem:[#allocation2 + $0x9b8] sm:$0xff] }
  0xda   : > { %1142 = vmatpush.msra.mxu1 %v765_v0  ;;  %1162 = vmatpush.msra.mxu2 %v446_v1  ;;  %v693_v8 = vld [vmem:[#allocation2 + $0x8d0] sm:$0xff]  ;;  %v790_v52 = vld [vmem:[#allocation2 + $0xbd8] sm:$0xff] }
  0xdb   : > { %1181 = vmatpush.msra.mxu3 %v514_v2  ;;  %v757_v9 = vld [vmem:[#allocation2 + $0xad0] sm:$0xff]  ;;  %1123 = vmatpush.msra.mxu0 %v697_v3  ;;  %v590_v53 = vld [vmem:[#allocation2 + $0x598] sm:$0xff] }
  0xdc   : > { %1143 = vmatpush.msra.mxu1 %v761_v4  ;;  %1163 = vmatpush.msra.mxu2 %v442_v6  ;;  %v689_v15 = vld [vmem:[#allocation2 + $0x8b0] sm:$0xff]  ;;  %v654_v54 = vld [vmem:[#allocation2 + $0x798] sm:$0xff] }
  0xdd   : > { %1182 = vmatpush.msra.mxu3 %v510_v7  ;;  %v753_v16 = vld [vmem:[#allocation2 + $0xab0] sm:$0xff]  ;;  %1124 = vmatpush.msra.mxu0 %v693_v8  ;;  %v718_v55 = vld [vmem:[#allocation2 + $0x998] sm:$0xff] }
  0xde   : > { %1144 = vmatpush.msra.mxu1 %v757_v9  ;;  %1164 = vmatpush.msra.mxu2 %v438_v10  ;;  %v685_v19 = vld [vmem:[#allocation2 + $0x890] sm:$0xff]  ;;  %v786_v56 = vld [vmem:[#allocation2 + $0xbb8] sm:$0xff] }
  0xdf   : > { %1183 = vmatpush.msra.mxu3 %v506_v11  ;;  %v749_v20 = vld [vmem:[#allocation2 + $0xa90] sm:$0xff]  ;;  %1125 = vmatpush.msra.mxu0 %v689_v15  ;;  %v650_v57 = vld [vmem:[#allocation2 + $0x778] sm:$0xff] }
  0xe0   : > { %1145 = vmatpush.msra.mxu1 %v753_v16  ;;  %1165 = vmatpush.msra.mxu2 %v434_v17  ;;  %v681_v23 = vld [vmem:[#allocation2 + $0x870] sm:$0xff]  ;;  %v586_v58 = vld [vmem:[#allocation2 + $0x578] sm:$0xff] }
  0xe1   : > { %1184 = vmatpush.msra.mxu3 %v502_v18  ;;  %v745_v24 = vld [vmem:[#allocation2 + $0xa70] sm:$0xff]  ;;  %1126 = vmatpush.msra.mxu0 %v685_v19  ;;  %v714_v59 = vld [vmem:[#allocation2 + $0x978] sm:$0xff] }
  0xe2   : > { %1146 = vmatpush.msra.mxu1 %v749_v20  ;;  %1166 = vmatpush.msra.mxu2 %v430_v21  ;;  %v677_v27 = vld [vmem:[#allocation2 + $0x850] sm:$0xff]  ;;  %v782_v60 = vld [vmem:[#allocation2 + $0xb98] sm:$0xff] }
  0xe3   : > { %1185 = vmatpush.msra.mxu3 %v498_v22  ;;  %v741_v28 = vld [vmem:[#allocation2 + $0xa50] sm:$0xff]  ;;  %1127 = vmatpush.msra.mxu0 %v681_v23  ;;  %v582_v61 = vld [vmem:[#allocation2 + $0x558] sm:$0xff] }
  0xe4   : > { %1147 = vmatpush.msra.mxu1 %v745_v24  ;;  %1167 = vmatpush.msra.mxu2 %v426_v25  ;;  %v673_v31 = vld [vmem:[#allocation2 + $0x830] sm:$0xff]  ;;  %v646_v62 = vld [vmem:[#allocation2 + $0x758] sm:$0xff] }
  0xe5   : > { %1186 = vmatpush.msra.mxu3 %v494_v26  ;;  %v737_v32 = vld [vmem:[#allocation2 + $0xa30] sm:$0xff]  ;;  %1128 = vmatpush.msra.mxu0 %v677_v27  ;;  %v710_v63 = vld [vmem:[#allocation2 + $0x958] sm:$0xff] }
  0xe6   : > { %1148 = vmatpush.msra.mxu1 %v741_v28  ;;  %1168 = vmatpush.msra.mxu2 %v422_v29  ;;  %v669_v35 = vld [vmem:[#allocation2 + $0x810] sm:$0xff]  ;;  %v778_v0 = vld [vmem:[#allocation2 + $0xb78] sm:$0xff] }
  0xe7   : > { %1187 = vmatpush.msra.mxu3 %v490_v30  ;;  %1129 = vmatpush.msra.mxu0 %v673_v31  ;;  %v733_v36 = vld [vmem:[#allocation2 + $0xa10] sm:$0xff]  ;;  %v578_v1 = vld [vmem:[#allocation2 + $0x538] sm:$0xff] }
  0xe8   : > { %1149 = vmatpush.msra.mxu1 %v737_v32  ;;  %1169 = vmatpush.msra.mxu2 %v418_v33  ;;  %v642_v2 = vld [vmem:[#allocation2 + $0x738] sm:$0xff] }
  0xe9   : > { %1188 = vmatpush.msra.mxu3 %v486_v34  ;;  %1091 = vmatmul.f32.vlgmr.msrb.gmra.mxu2 %v5482_v5  ;;  %v706_v3 = vld [vmem:[#allocation2 + $0x938] sm:$0xff] }
  0xea   : > { %1130 = vmatpush.msra.mxu0 %v669_v35  ;;  %1150 = vmatpush.msra.mxu1 %v733_v36  ;;  %v774_v4 = vld [vmem:[#allocation2 + $0xb58] sm:$0xff] }
  0xeb   : > { %1170 = vmatpush.msra.mxu2 %v414_v38  ;;  %1189 = vmatpush.msra.mxu3 %v482_v39  ;;  %v574_v6 = vld [vmem:[#allocation2 + $0x518] sm:$0xff] }
  0xec   : > { %1051 = vmatmul.f32.vlgmr.msrb.gmra.mxu0 %v5487_v12  ;;  %1071 = vmatmul.f32.vlgmr.msrb.gmra.mxu1 %v5491_v13  ;;  %v638_v7 = vld [vmem:[#allocation2 + $0x718] sm:$0xff] }
  0xed   : > { %1111 = vmatmul.f32.vlgmr.msrb.gmra.mxu3 %v5494_v14  ;;  %1195 = vmatpush.msrb.mxu0 %v602_v40  ;;  %v702_v8 = vld [vmem:[#allocation2 + $0x918] sm:$0xff] }
  0xee   : > { %1215 = vmatpush.msrb.mxu1 %v666_v41  ;;  %1235 = vmatpush.msrb.mxu2 %v730_v43  ;;  %v770_v9 = vld [vmem:[#allocation2 + $0xb38] sm:$0xff] }
  0xef   : > { %1190 = vmatpush.msra.mxu3 %v478_v44  ;;  %1196 = vmatpush.msrb.mxu0 %v598_v45  ;;  %v570_v10 = vld [vmem:[#allocation2 + $0x4f8] sm:$0xff] }
  0xf0   : > { %1216 = vmatpush.msrb.mxu1 %v662_v46  ;;  %1236 = vmatpush.msrb.mxu2 %v726_v47  ;;  %v634_v11 = vld [vmem:[#allocation2 + $0x6f8] sm:$0xff]  ;;  %v1374_v47 = vld [vmem:[#allocation2 + $0xde0] sm:$0xff] }
  0xf1   : > { %1255 = vmatpush.msrb.mxu3 %v794_v48  ;;  %1197 = vmatpush.msrb.mxu0 %v594_v49  ;;  %v698_v15 = vld [vmem:[#allocation2 + $0x8f8] sm:$0xff]  ;;  %v1438_v48 = vld [vmem:[#allocation2 + $0xfe0] sm:$0xff] }
  0xf2   : > { %1217 = vmatpush.msrb.mxu1 %v658_v50  ;;  %1237 = vmatpush.msrb.mxu2 %v722_v51  ;;  %v766_v16 = vld [vmem:[#allocation2 + $0xb18] sm:$0xff]  ;;  %v1502_v49 = vld [vmem:[#allocation2 + $0x11e0] sm:$0xff] }
  0xf3   : > { %1256 = vmatpush.msrb.mxu3 %v790_v52  ;;  %1198 = vmatpush.msrb.mxu0 %v590_v53  ;;  %v566_v17 = vld [vmem:[#allocation2 + $0x4d8] sm:$0xff]  ;;  %v1370_v51 = vld [vmem:[#allocation2 + $0xdc0] sm:$0xff] }
  0xf4   : > { %1218 = vmatpush.msrb.mxu1 %v654_v54  ;;  %1238 = vmatpush.msrb.mxu2 %v718_v55  ;;  %v630_v18 = vld [vmem:[#allocation2 + $0x6d8] sm:$0xff]  ;;  %v1434_v52 = vld [vmem:[#allocation2 + $0xfc0] sm:$0xff] }
  0xf5   : > { %1257 = vmatpush.msrb.mxu3 %v786_v56  ;;  %1131 = vmatmul.f32.vlgmr.msra.gmra.mxu0 %v5504_v37  ;;  %v694_v19 = vld [vmem:[#allocation2 + $0x8d8] sm:$0xff]  ;;  %v1498_v53 = vld [vmem:[#allocation2 + $0x11c0] sm:$0xff] }
  0xf6   : > { %1219 = vmatpush.msrb.mxu1 %v650_v57  ;;  %1199 = vmatpush.msrb.mxu0 %v586_v58  ;;  %v762_v20 = vld [vmem:[#allocation2 + $0xaf8] sm:$0xff]  ;;  %v1566_v54 = vld [vmem:[#allocation2 + $0x13e0] sm:$0xff] }
  0xf7   : > { %1239 = vmatpush.msrb.mxu2 %v714_v59  ;;  %1258 = vmatpush.msrb.mxu3 %v782_v60  ;;  %v562_v21 = vld [vmem:[#allocation2 + $0x4b8] sm:$0xff]  ;;  %v1366_v55 = vld [vmem:[#allocation2 + $0xda0] sm:$0xff] }
  0xf8   : > { %1151 = vmatmul.f32.vlgmr.msra.gmra.mxu1 %v5507_v42  ;;  %1200 = vmatpush.msrb.mxu0 %v582_v61  ;;  %v626_v22 = vld [vmem:[#allocation2 + $0x6b8] sm:$0xff]  ;;  %v1430_v56 = vld [vmem:[#allocation2 + $0xfa0] sm:$0xff] }
  0xf9   : > { %1220 = vmatpush.msrb.mxu1 %v646_v62  ;;  %1240 = vmatpush.msrb.mxu2 %v710_v63  ;;  %v690_v23 = vld [vmem:[#allocation2 + $0x8b8] sm:$0xff]  ;;  %v1562_v57 = vld [vmem:[#allocation2 + $0x13c0] sm:$0xff] }
  0xfa   : > { %1259 = vmatpush.msrb.mxu3 %v778_v0  ;;  %1201 = vmatpush.msrb.mxu0 %v578_v1  ;;  %v758_v24 = vld [vmem:[#allocation2 + $0xad8] sm:$0xff]  ;;  %v1362_v58 = vld [vmem:[#allocation2 + $0xd80] sm:$0xff] }
  0xfb   : > { %1221 = vmatpush.msrb.mxu1 %v642_v2  ;;  %1241 = vmatpush.msrb.mxu2 %v706_v3  ;;  %v558_v25 = vld [vmem:[#allocation2 + $0x498] sm:$0xff]  ;;  %v1426_v59 = vld [vmem:[#allocation2 + $0xf80] sm:$0xff] }
  0xfc   : > { %1260 = vmatpush.msrb.mxu3 %v774_v4  ;;  %1202 = vmatpush.msrb.mxu0 %v574_v6  ;;  %v622_v26 = vld [vmem:[#allocation2 + $0x698] sm:$0xff]  ;;  %v1490_v60 = vld [vmem:[#allocation2 + $0x1180] sm:$0xff] }
  0xfd   : > { %1222 = vmatpush.msrb.mxu1 %v638_v7  ;;  %1242 = vmatpush.msrb.mxu2 %v702_v8  ;;  %v686_v27 = vld [vmem:[#allocation2 + $0x898] sm:$0xff]  ;;  %v1358_v61 = vld [vmem:[#allocation2 + $0xd60] sm:$0xff] }
  0xfe   : > { %1261 = vmatpush.msrb.mxu3 %v770_v9  ;;  %1203 = vmatpush.msrb.mxu0 %v570_v10  ;;  %v754_v28 = vld [vmem:[#allocation2 + $0xab8] sm:$0xff]  ;;  %v1422_v62 = vld [vmem:[#allocation2 + $0xf60] sm:$0xff] }
  0xff   : > { %1223 = vmatpush.msrb.mxu1 %v634_v11  ;;  %1243 = vmatpush.msrb.mxu2 %v698_v15  ;;  %v554_v29 = vld [vmem:[#allocation2 + $0x478] sm:$0xff]  ;;  %v1486_v63 = vld [vmem:[#allocation2 + $0x1160] sm:$0xff] }
 0x100   : > { %1262 = vmatpush.msrb.mxu3 %v766_v16  ;;  %1204 = vmatpush.msrb.mxu0 %v566_v17  ;;  %v618_v30 = vld [vmem:[#allocation2 + $0x678] sm:$0xff]  ;;  %v1554_v0 = vld [vmem:[#allocation2 + $0x1380] sm:$0xff] }
 0x101   : > { %1224 = vmatpush.msrb.mxu1 %v630_v18  ;;  %1244 = vmatpush.msrb.mxu2 %v694_v19  ;;  %v682_v31 = vld [vmem:[#allocation2 + $0x878] sm:$0xff]  ;;  %v1354_v1 = vld [vmem:[#allocation2 + $0xd40] sm:$0xff] }
 0x102   : > { %1263 = vmatpush.msrb.mxu3 %v762_v20  ;;  %1205 = vmatpush.msrb.mxu0 %v562_v21  ;;  %v750_v32 = vld [vmem:[#allocation2 + $0xa98] sm:$0xff]  ;;  %v1418_v2 = vld [vmem:[#allocation2 + $0xf40] sm:$0xff] }
 0x103   : > { %1225 = vmatpush.msrb.mxu1 %v626_v22  ;;  %1245 = vmatpush.msrb.mxu2 %v690_v23  ;;  %v550_v33 = vld [vmem:[#allocation2 + $0x458] sm:$0xff]  ;;  %v1482_v3 = vld [vmem:[#allocation2 + $0x1140] sm:$0xff] }
 0x104   : > { %1264 = vmatpush.msrb.mxu3 %v758_v24  ;;  %1206 = vmatpush.msrb.mxu0 %v558_v25  ;;  %v614_v34 = vld [vmem:[#allocation2 + $0x658] sm:$0xff]  ;;  %v1550_v4 = vld [vmem:[#allocation2 + $0x1360] sm:$0xff] }
 0x105   : > { %1226 = vmatpush.msrb.mxu1 %v622_v26  ;;  %1246 = vmatpush.msrb.mxu2 %v686_v27  ;;  %v678_v35 = vld [vmem:[#allocation2 + $0x858] sm:$0xff]  ;;  %v1414_v6 = vld [vmem:[#allocation2 + $0xf20] sm:$0xff] }
 0x106   : > { %1265 = vmatpush.msrb.mxu3 %v754_v28  ;;  %1207 = vmatpush.msrb.mxu0 %v554_v29  ;;  %v746_v36 = vld [vmem:[#allocation2 + $0xa78] sm:$0xff]  ;;  %v1478_v7 = vld [vmem:[#allocation2 + $0x1120] sm:$0xff] }
 0x107   : > { %1227 = vmatpush.msrb.mxu1 %v618_v30  ;;  %1247 = vmatpush.msrb.mxu2 %v682_v31  ;;  %v546_v38 = vld [vmem:[#allocation2 + $0x438] sm:$0xff]  ;;  %v1546_v8 = vld [vmem:[#allocation2 + $0x1340] sm:$0xff] }
 0x108   : > { %1266 = vmatpush.msrb.mxu3 %v750_v32  ;;  %v610_v39 = vld [vmem:[#allocation2 + $0x638] sm:$0xff]  ;;  %1208 = vmatpush.msrb.mxu0 %v550_v33  ;;  %v1474_v9 = vld [vmem:[#allocation2 + $0x1100] sm:$0xff] }
 0x109   : > { %1228 = vmatpush.msrb.mxu1 %v614_v34  ;;  %v674_v40 = vld [vmem:[#allocation2 + $0x838] sm:$0xff]  ;;  %1248 = vmatpush.msrb.mxu2 %v678_v35  ;;  %v1542_v10 = vld [vmem:[#allocation2 + $0x1320] sm:$0xff] }
 0x10a   : > { %v742_v41 = vld [vmem:[#allocation2 + $0xa58] sm:$0xff]  ;;  %1267 = vmatpush.msrb.mxu3 %v746_v36  ;;  %1209 = vmatpush.msrb.mxu0 %v546_v38  ;;  %v1342_v11 = vld [vmem:[#allocation2 + $0xce0] sm:$0xff] }
 0x10b   : > { %v542_v43 = vld [vmem:[#allocation2 + $0x418] sm:$0xff]  ;;  %1229 = vmatpush.msrb.mxu1 %v610_v39  ;;  %1249 = vmatpush.msrb.mxu2 %v674_v40  ;;  %v1406_v15 = vld [vmem:[#allocation2 + $0xee0] sm:$0xff] }
 0x10c   : > { %v606_v44 = vld [vmem:[#allocation2 + $0x618] sm:$0xff]  ;;  %1268 = vmatpush.msrb.mxu3 %v742_v41  ;;  %1171 = vmatmul.f32.vlgmr.msra.gmra.mxu2 %v5487_v12  ;;  %v1494_v12 = vld [vmem:[#allocation2 + $0x11a0] sm:$0xff] }
 0x10d   : > { %v670_v45 = vld [vmem:[#allocation2 + $0x818] sm:$0xff]  ;;  %1210 = vmatpush.msrb.mxu0 %v542_v43  ;;  %1230 = vmatpush.msrb.mxu1 %v606_v44  ;;  %v1538_v16 = vld [vmem:[#allocation2 + $0x1300] sm:$0xff] }
 0x10e   : > { %v738_v46 = vld [vmem:[#allocation2 + $0xa38] sm:$0xff]  ;;  %1250 = vmatpush.msrb.mxu2 %v670_v45  ;;  %1191 = vmatmul.f32.vlgmr.msra.gmra.mxu3 %v5491_v13  ;;  %v1558_v13 = vld [vmem:[#allocation2 + $0x13a0] sm:$0xff] }
 0x10f   : > { %v734_v50 = vld [vmem:[#allocation2 + $0xa18] sm:$0xff]  ;;  %1269 = vmatpush.msrb.mxu3 %v738_v46  ;;  %1698 = vmatpush.msra.mxu0 %v1374_v47  ;;  %v1338_v17 = vld [vmem:[#allocation2 + $0xcc0] sm:$0xff] }
 0x110   : > { %1718 = vmatpush.msra.mxu1 %v1438_v48  ;;  %1738 = vmatpush.msra.mxu2 %v1502_v49  ;;  %v1402_v18 = vld [vmem:[#allocation2 + $0xec0] sm:$0xff]  ;;  %v1375_v49 = vld [vmem:[#allocation2 + $0xde8] sm:$0xff] }
 0x111   : > { %1270 = vmatpush.msrb.mxu3 %v734_v50  ;;  %1699 = vmatpush.msra.mxu0 %v1370_v51  ;;  %v1466_v19 = vld [vmem:[#allocation2 + $0x10c0] sm:$0xff] }
 0x112   : > { %1719 = vmatpush.msra.mxu1 %v1434_v52  ;;  %1739 = vmatpush.msra.mxu2 %v1498_v53  ;;  %v1534_v20 = vld [vmem:[#allocation2 + $0x12e0] sm:$0xff]  ;;  %v1371_v53 = vld [vmem:[#allocation2 + $0xdc8] sm:$0xff] }
 0x113   : > { %1758 = vmatpush.msra.mxu3 %v1566_v54  ;;  %1700 = vmatpush.msra.mxu0 %v1366_v55  ;;  %v1334_v21 = vld [vmem:[#allocation2 + $0xca0] sm:$0xff]  ;;  %v1439_v54 = vld [vmem:[#allocation2 + $0xfe8] sm:$0xff] }
 0x114   : > { %1720 = vmatpush.msra.mxu1 %v1430_v56  ;;  %1740 = vmatpush.msra.mxu2 %v1494_v12  ;;  %v1398_v22 = vld [vmem:[#allocation2 + $0xea0] sm:$0xff]  ;;  %v1367_v12 = vld [vmem:[#allocation2 + $0xda8] sm:$0xff] }
 0x115   : > { %1759 = vmatpush.msra.mxu3 %v1562_v57  ;;  %1251 = vmatmul.f32.vlgmr.msrb.gmra.mxu2 %v5504_v37  ;;  %v1350_v37 = vld [vmem:[#allocation2 + $0xd20] sm:$0xff]  ;;  %v1435_v57 = vld [vmem:[#allocation2 + $0xfc8] sm:$0xff] }
 0x116   : > { %1701 = vmatpush.msra.mxu0 %v1362_v58  ;;  %1721 = vmatpush.msra.mxu1 %v1426_v59  ;;  %v1462_v23 = vld [vmem:[#allocation2 + $0x10a0] sm:$0xff] }
 0x117   : > { %1741 = vmatpush.msra.mxu2 %v1490_v60  ;;  %1760 = vmatpush.msra.mxu3 %v1558_v13  ;;  %v1530_v24 = vld [vmem:[#allocation2 + $0x12c0] sm:$0xff]  ;;  %v1363_v60 = vld [vmem:[#allocation2 + $0xd88] sm:$0xff] }
 0x118   : > { %1211 = vmatmul.f32.vlgmr.msrb.gmra.mxu0 %v5482_v5  ;;  %1271 = vmatmul.f32.vlgmr.msrb.gmra.mxu3 %v5507_v42  ;;  %v1346_v5 = vld [vmem:[#allocation2 + $0xd00] sm:$0xff]  ;;  %v1431_v13 = vld [vmem:[#allocation2 + $0xfa8] sm:$0xff] }
 0x119   : > { %1702 = vmatpush.msra.mxu0 %v1358_v61  ;;  %1722 = vmatpush.msra.mxu1 %v1422_v62  ;;  %v1410_v42 = vld [vmem:[#allocation2 + $0xf00] sm:$0xff] }
 0x11a   : > { %1742 = vmatpush.msra.mxu2 %v1486_v63  ;;  %1761 = vmatpush.msra.mxu3 %v1554_v0  ;;  %v1330_v25 = vld [vmem:[#allocation2 + $0xc80] sm:$0xff]  ;;  %v1359_v63 = vld [vmem:[#allocation2 + $0xd68] sm:$0xff] }
 0x11b   : > { %1231 = vmatmul.f32.vlgmr.msrb.gmra.mxu1 %v5494_v14  ;;  %1703 = vmatpush.msra.mxu0 %v1354_v1  ;;  %v1470_v14 = vld [vmem:[#allocation2 + $0x10e0] sm:$0xff]  ;;  %v1427_v0 = vld [vmem:[#allocation2 + $0xf88] sm:$0xff] }
 0x11c   : > { %1723 = vmatpush.msra.mxu1 %v1418_v2  ;;  %1743 = vmatpush.msra.mxu2 %v1482_v3  ;;  %v1394_v26 = vld [vmem:[#allocation2 + $0xe80] sm:$0xff]  ;;  %v1355_v3 = vld [vmem:[#allocation2 + $0xd48] sm:$0xff] }
 0x11d   : > { %1762 = vmatpush.msra.mxu3 %v1550_v4  ;;  %1704 = vmatpush.msra.mxu0 %v1350_v37  ;;  %v1458_v27 = vld [vmem:[#allocation2 + $0x1080] sm:$0xff]  ;;  %v1423_v4 = vld [vmem:[#allocation2 + $0xf68] sm:$0xff] }
 0x11e   : > { %1724 = vmatpush.msra.mxu1 %v1414_v6  ;;  %1744 = vmatpush.msra.mxu2 %v1478_v7  ;;  %v1526_v28 = vld [vmem:[#allocation2 + $0x12a0] sm:$0xff]  ;;  %v1351_v7 = vld [vmem:[#allocation2 + $0xd28] sm:$0xff] }
 0x11f   : > { %1763 = vmatpush.msra.mxu3 %v1546_v8  ;;  %1705 = vmatpush.msra.mxu0 %v1346_v5  ;;  %v1326_v29 = vld [vmem:[#allocation2 + $0xc60] sm:$0xff]  ;;  %v1419_v8 = vld [vmem:[#allocation2 + $0xf48] sm:$0xff] }
 0x120   : > { %1725 = vmatpush.msra.mxu1 %v1410_v42  ;;  %1745 = vmatpush.msra.mxu2 %v1474_v9  ;;  %v1390_v30 = vld [vmem:[#allocation2 + $0xe60] sm:$0xff]  ;;  %v1347_v9 = vld [vmem:[#allocation2 + $0xd08] sm:$0xff] }
 0x121   : > { %1764 = vmatpush.msra.mxu3 %v1542_v10  ;;  %1706 = vmatpush.msra.mxu0 %v1342_v11  ;;  %v1454_v31 = vld [vmem:[#allocation2 + $0x1060] sm:$0xff]  ;;  %v1415_v10 = vld [vmem:[#allocation2 + $0xf28] sm:$0xff] }
 0x122   : > { %1726 = vmatpush.msra.mxu1 %v1406_v15  ;;  %1746 = vmatpush.msra.mxu2 %v1470_v14  ;;  %v1522_v32 = vld [vmem:[#allocation2 + $0x1280] sm:$0xff] }
 0x123   : > { %1765 = vmatpush.msra.mxu3 %v1538_v16  ;;  %1707 = vmatpush.msra.mxu0 %v1338_v17  ;;  %v1322_v33 = vld [vmem:[#allocation2 + $0xc40] sm:$0xff]  ;;  %v1343_v16 = vld [vmem:[#allocation2 + $0xce8] sm:$0xff] }
 0x124   : > { %1727 = vmatpush.msra.mxu1 %v1402_v18  ;;  %1747 = vmatpush.msra.mxu2 %v1466_v19  ;;  %v1386_v34 = vld [vmem:[#allocation2 + $0xe40] sm:$0xff]  ;;  %v1411_v17 = vld [vmem:[#allocation2 + $0xf08] sm:$0xff]  ;;  %v5008_v18 = vld [vmem:[%s5473_s23 + $0x90] sm:$0x1f] }
 0x125   : > { %1766 = vmatpush.msra.mxu3 %v1534_v20  ;;  %1708 = vmatpush.msra.mxu0 %v1334_v21  ;;  %v1450_v35 = vld [vmem:[#allocation2 + $0x1040] sm:$0xff] }
 0x126   : > { %1728 = vmatpush.msra.mxu1 %v1398_v22  ;;  %1748 = vmatpush.msra.mxu2 %v1462_v23  ;;  %v1518_v36 = vld [vmem:[#allocation2 + $0x1260] sm:$0xff]  ;;  %v5011_v22 = vld [vmem:[%s5473_s23 + $0xa8] sm:$0x1f] }
 0x127   : > { %1767 = vmatpush.msra.mxu3 %v1530_v24  ;;  %1709 = vmatpush.msra.mxu0 %v1330_v25  ;;  %v1318_v38 = vld [vmem:[#allocation2 + $0xc20] sm:$0xff]  ;;  %v1339_v23 = vld [vmem:[#allocation2 + $0xcc8] sm:$0xff] }
 0x128   : > { %1729 = vmatpush.msra.mxu1 %v1394_v26  ;;  %1749 = vmatpush.msra.mxu2 %v1458_v27  ;;  %v1382_v39 = vld [vmem:[#allocation2 + $0xe20] sm:$0xff]  ;;  %v1407_v24 = vld [vmem:[#allocation2 + $0xee8] sm:$0xff] }
 0x129   : > { %1768 = vmatpush.msra.mxu3 %v1526_v28  ;;  %1710 = vmatpush.msra.mxu0 %v1326_v29  ;;  %v1446_v40 = vld [vmem:[#allocation2 + $0x1020] sm:$0xff]  ;;  %v1295_v28 = vrot.slane %v5008_v18, 4  ;;  %v5009_v29 = vld [vmem:[%s5473_s23 + $0x98] sm:$0x1f]  ;;  %v1555_v18 = vld [vmem:[#allocation2 + $0x1388] sm:$0xff] }
 0x12a   : > { %1730 = vmatpush.msra.mxu1 %v1390_v30  ;;  %1750 = vmatpush.msra.mxu2 %v1454_v31  ;;  %v1514_v41 = vld [vmem:[#allocation2 + $0x1240] sm:$0xff]  ;;  %v1335_v30 = vld [vmem:[#allocation2 + $0xca8] sm:$0xff] }
 0x12b   : > { %1769 = vmatpush.msra.mxu3 %v1522_v32  ;;  %1711 = vmatpush.msra.mxu0 %v1322_v33  ;;  %v1314_v43 = vld [vmem:[#allocation2 + $0xc00] sm:$0xff]  ;;  %v1403_v31 = vld [vmem:[#allocation2 + $0xec8] sm:$0xff]  ;;  %v5002_v32 = vld [vmem:[%s5473_s23 + $0x30] sm:$0x1f]  ;;  %v1298_v33 = vrot.slane %v5011_v22, 4 }
 0x12c   : > { %1731 = vmatpush.msra.mxu1 %v1386_v34  ;;  %1751 = vmatpush.msra.mxu2 %v1450_v35  ;;  %v1378_v44 = vld [vmem:[#allocation2 + $0xe00] sm:$0xff]  ;;  %v1551_v22 = vld [vmem:[#allocation2 + $0x1368] sm:$0xff] }
 0x12d   : > { %1770 = vmatpush.msra.mxu3 %v1518_v36  ;;  %1712 = vmatpush.msra.mxu0 %v1318_v38  ;;  %v1442_v45 = vld [vmem:[#allocation2 + $0x1000] sm:$0xff]  ;;  %v5005_v36 = vld [vmem:[%s5473_s23 + $0x48] sm:$0x1f] }
 0x12e   : > { %1732 = vmatpush.msra.mxu1 %v1382_v39  ;;  %v1510_v46 = vld [vmem:[#allocation2 + $0x1220] sm:$0xff]  ;;  %1752 = vmatpush.msra.mxu2 %v1446_v40  ;;  %v1331_v39 = vld [vmem:[#allocation2 + $0xc88] sm:$0xff]  ;;  %v1296_v40 = vrot.slane %v5009_v29, 4 }
 0x12f   : > { %1771 = vmatpush.msra.mxu3 %v1514_v41  ;;  %v1630_v47 = vld [vmem:[#allocation2 + $0x15e0] sm:$0xff]  ;;  %1713 = vmatpush.msra.mxu0 %v1314_v43  ;;  %v1399_v41 = vld [vmem:[#allocation2 + $0xea8] sm:$0xff]  ;;  %v5540_v43 = vsel %vm404_vm0, %v5002_v32, %v1295_v28 }
 0x130   : > { %v1694_v48 = vld [vmem:[#allocation2 + $0x17e0] sm:$0xff]  ;;  %1733 = vmatpush.msra.mxu1 %v1378_v44  ;;  %1753 = vmatpush.msra.mxu2 %v1442_v45  ;;  %v5003_v44 = vld [vmem:[%s5473_s23 + $0x38] sm:$0x1f]  ;;  %v5545_v45 = vsel %vm404_vm0, %v5005_v36, %v1298_v33  ;;  %v1679_v28 = vld [vmem:[#allocation2 + $0x1768] sm:$0xff] }
 0x131   : > { %v1506_v50 = vld [vmem:[#allocation2 + $0x1200] sm:$0xff]  ;;  %1772 = vmatpush.msra.mxu3 %v1510_v46  ;;  %1778 = vmatpush.msrb.mxu0 %v1630_v47  ;;  %v1479_v29 = vld [vmem:[#allocation2 + $0x1128] sm:$0xff] }
 0x132   : > { %v1626_v51 = vld [vmem:[#allocation2 + $0x15c0] sm:$0xff]  ;;  %1798 = vmatpush.msrb.mxu1 %v1694_v48  ;;  %1818 = vmatpush.msrb.mxu2 %v1375_v49  ;;  %v1327_v48 = vld [vmem:[#allocation2 + $0xc68] sm:$0xff] }
 0x133   : > { %v1690_v52 = vld [vmem:[#allocation2 + $0x17c0] sm:$0xff]  ;;  %1773 = vmatpush.msra.mxu3 %v1506_v50  ;;  %1779 = vmatpush.msrb.mxu0 %v1626_v51  ;;  %v1395_v49 = vld [vmem:[#allocation2 + $0xe88] sm:$0xff]  ;;  %v5549_v50 = vsel %vm404_vm0, %v5003_v44, %v1296_v40  ;;  %v5012_v51 = vld [vmem:[%s5473_s23 + $0xb0] sm:$0x1f] }
 0x134   : > { %v1622_v55 = vld [vmem:[#allocation2 + $0x15a0] sm:$0xff]  ;;  %1799 = vmatpush.msrb.mxu1 %v1690_v52  ;;  %1819 = vmatpush.msrb.mxu2 %v1371_v53  ;;  %v1675_v32 = vld [vmem:[#allocation2 + $0x1748] sm:$0xff] }
 0x135   : > { %v1686_v56 = vld [vmem:[#allocation2 + $0x17a0] sm:$0xff]  ;;  %1838 = vmatpush.msrb.mxu3 %v1439_v54  ;;  %1780 = vmatpush.msrb.mxu0 %v1622_v55  ;;  %v1323_v54 = vld [vmem:[#allocation2 + $0xc48] sm:$0xff] }
 0x136   : > { %v1618_v58 = vld [vmem:[#allocation2 + $0x1580] sm:$0xff]  ;;  %1800 = vmatpush.msrb.mxu1 %v1686_v56  ;;  %1820 = vmatpush.msrb.mxu2 %v1367_v12  ;;  %v1391_v55 = vld [vmem:[#allocation2 + $0xe68] sm:$0xff]  ;;  %v5013_v56 = vld [vmem:[%s5473_s23 + $0xb8] sm:$0x1f] }
 0x137   : > { %v1682_v59 = vld [vmem:[#allocation2 + $0x1780] sm:$0xff]  ;;  %1839 = vmatpush.msrb.mxu3 %v1435_v57  ;;  %1781 = vmatpush.msrb.mxu0 %v1618_v58  ;;  %v1299_v58 = vrot.slane %v5012_v51, 4  ;;  %v1475_v33 = vld [vmem:[#allocation2 + $0x1108] sm:$0xff] }
 0x138   : > { %v1614_v61 = vld [vmem:[#allocation2 + $0x1560] sm:$0xff]  ;;  %1801 = vmatpush.msrb.mxu1 %v1682_v59  ;;  %1821 = vmatpush.msrb.mxu2 %v1363_v60  ;;  %v1319_v59 = vld [vmem:[#allocation2 + $0xc28] sm:$0xff] }
 0x139   : > { %v1678_v62 = vld [vmem:[#allocation2 + $0x1760] sm:$0xff]  ;;  %1840 = vmatpush.msrb.mxu3 %v1431_v13  ;;  %1782 = vmatpush.msrb.mxu0 %v1614_v61  ;;  %v1387_v60 = vld [vmem:[#allocation2 + $0xe48] sm:$0xff]  ;;  %v5006_v13 = vld [vmem:[%s5473_s23 + $0x50] sm:$0x1f] }
 0x13a   : > { %v1610_v1 = vld [vmem:[#allocation2 + $0x1540] sm:$0xff]  ;;  %1802 = vmatpush.msrb.mxu1 %v1678_v62  ;;  %1822 = vmatpush.msrb.mxu2 %v1359_v63  ;;  %v1300_v63 = vrot.slane %v5013_v56, 4  ;;  %v1603_v36 = vld [vmem:[#allocation2 + $0x1508] sm:$0xff] }
 0x13b   : > { %v1674_v2 = vld [vmem:[#allocation2 + $0x1740] sm:$0xff]  ;;  %1841 = vmatpush.msrb.mxu3 %v1427_v0  ;;  %1783 = vmatpush.msrb.mxu0 %v1610_v1  ;;  %v1315_v0 = vld [vmem:[#allocation2 + $0xc08] sm:$0xff] }
 0x13c   : > { %v1606_v37 = vld [vmem:[#allocation2 + $0x1520] sm:$0xff]  ;;  %1803 = vmatpush.msrb.mxu1 %v1674_v2  ;;  %1823 = vmatpush.msrb.mxu2 %v1355_v3  ;;  %v1383_v1 = vld [vmem:[#allocation2 + $0xe28] sm:$0xff]  ;;  %v5007_v2 = vld [vmem:[%s5473_s23 + $0x58] sm:$0x1f]  ;;  %v5558_v3 = vsel %vm404_vm0, %v5006_v13, %v1299_v58 }
 0x13d   : > { %v1670_v6 = vld [vmem:[#allocation2 + $0x1720] sm:$0xff]  ;;  %1842 = vmatpush.msrb.mxu3 %v1423_v4  ;;  %1784 = vmatpush.msrb.mxu0 %v1606_v37  ;;  %v1567_v4 = vld [vmem:[#allocation2 + $0x13e8] sm:$0xff] }
 0x13e   : > { %v1602_v5 = vld [vmem:[#allocation2 + $0x1500] sm:$0xff]  ;;  %1804 = vmatpush.msrb.mxu1 %v1670_v6  ;;  %1824 = vmatpush.msrb.mxu2 %v1351_v7  ;;  %v1503_v37 = vld [vmem:[#allocation2 + $0x11e8] sm:$0xff] }
 0x13f   : > { %v1666_v42 = vld [vmem:[#allocation2 + $0x1700] sm:$0xff]  ;;  %1843 = vmatpush.msrb.mxu3 %v1419_v8  ;;  %1785 = vmatpush.msrb.mxu0 %v1602_v5  ;;  %v1631_v6 = vld [vmem:[#allocation2 + $0x15e8] sm:$0xff]  ;;  %v5561_v8 = vsel %vm404_vm0, %v5007_v2, %v1300_v63 }
 0x140   : > { %v5010_v11 = vld [vmem:[%s5473_s23 + $0xa0] sm:$0x1f]  ;;  %1805 = vmatpush.msrb.mxu1 %v1666_v42  ;;  %1825 = vmatpush.msrb.mxu2 %v1347_v9  ;;  %v1379_v7 = vld [vmem:[#allocation2 + $0xe08] sm:$0xff] }
 0x141   : > { %v1598_v15 = vld [vmem:[#allocation2 + $0x14e0] sm:$0xff]  ;;  %1844 = vmatpush.msrb.mxu3 %v1415_v10  ;;  %v1297_v21 = vrot.slane %v5010_v11, 4  ;;  %1714 = vmatmul.f32.vlgmr.msra.gmra.mxu0 %v5540_v43  ;;  %v1499_v5 = vld [vmem:[#allocation2 + $0x11c8] sm:$0xff] }
 0x142   : > { %v1662_v14 = vld [vmem:[#allocation2 + $0x16e0] sm:$0xff]  ;;  %1786 = vmatpush.msrb.mxu0 %v1598_v15  ;;  %1826 = vmatpush.msrb.mxu2 %v1343_v16  ;;  %v1563_v42 = vld [vmem:[#allocation2 + $0x13c8] sm:$0xff] }
 0x143   : > { %v1594_v19 = vld [vmem:[#allocation2 + $0x14c0] sm:$0xff]  ;;  %1806 = vmatpush.msrb.mxu1 %v1662_v14  ;;  %1845 = vmatpush.msrb.mxu3 %v1411_v17  ;;  %v1627_v9 = vld [vmem:[#allocation2 + $0x15c8] sm:$0xff] }
 0x144   : > { %v1658_v20 = vld [vmem:[#allocation2 + $0x16c0] sm:$0xff]  ;;  %1787 = vmatpush.msrb.mxu0 %v1594_v19  ;;  %1827 = vmatpush.msrb.mxu2 %v1339_v23  ;;  %v1695_v10 = vld [vmem:[#allocation2 + $0x17e8] sm:$0xff] }
 0x145   : > { %v5004_v25 = vld [vmem:[%s5473_s23 + $0x40] sm:$0x1f]  ;;  %1807 = vmatpush.msrb.mxu1 %v1658_v20  ;;  %1846 = vmatpush.msrb.mxu3 %v1407_v24  ;;  %v1495_v11 = vld [vmem:[#allocation2 + $0x11a8] sm:$0xff] }
 0x146   : > { %v1590_v26 = vld [vmem:[#allocation2 + $0x14a0] sm:$0xff]  ;;  %v5536_v34 = vsel %vm404_vm0, %v5004_v25, %v1297_v21  ;;  %1828 = vmatpush.msrb.mxu2 %v1335_v30  ;;  %1774 = vmatmul.f32.vlgmr.msra.gmra.mxu3 %v5545_v45  ;;  %v1559_v15 = vld [vmem:[#allocation2 + $0x13a8] sm:$0xff] }
 0x147   : > { %v1654_v27 = vld [vmem:[#allocation2 + $0x16a0] sm:$0xff]  ;;  %1788 = vmatpush.msrb.mxu0 %v1590_v26  ;;  %1847 = vmatpush.msrb.mxu3 %v1403_v31  ;;  %v1623_v14 = vld [vmem:[#allocation2 + $0x15a8] sm:$0xff] }
 0x148   : > { %v1586_v35 = vld [vmem:[#allocation2 + $0x1480] sm:$0xff]  ;;  %1808 = vmatpush.msrb.mxu1 %v1654_v27  ;;  %1754 = vmatmul.f32.vlgmr.msra.gmra.mxu2 %v5536_v34  ;;  %v1691_v16 = vld [vmem:[#allocation2 + $0x17c8] sm:$0xff] }
 0x149   : > { %v1650_v38 = vld [vmem:[#allocation2 + $0x1680] sm:$0xff]  ;;  %1789 = vmatpush.msrb.mxu0 %v1586_v35  ;;  %1829 = vmatpush.msrb.mxu2 %v1331_v39  ;;  %v1491_v17 = vld [vmem:[#allocation2 + $0x1188] sm:$0xff] }
 0x14a   : > { %v1582_v46 = vld [vmem:[#allocation2 + $0x1460] sm:$0xff]  ;;  %1809 = vmatpush.msrb.mxu1 %v1650_v38  ;;  %1848 = vmatpush.msrb.mxu3 %v1399_v41  ;;  %v1619_v19 = vld [vmem:[#allocation2 + $0x1588] sm:$0xff] }
 0x14b   : > { %v1646_v47 = vld [vmem:[#allocation2 + $0x1660] sm:$0xff]  ;;  %1790 = vmatpush.msrb.mxu0 %v1582_v46  ;;  %1830 = vmatpush.msrb.mxu2 %v1327_v48  ;;  %v1687_v20 = vld [vmem:[#allocation2 + $0x17a8] sm:$0xff] }
 0x14c   : > { %v1578_v52 = vld [vmem:[#allocation2 + $0x1440] sm:$0xff]  ;;  %1810 = vmatpush.msrb.mxu1 %v1646_v47  ;;  %1849 = vmatpush.msrb.mxu3 %v1395_v49  ;;  %v1487_v21 = vld [vmem:[#allocation2 + $0x1168] sm:$0xff] }
 0x14d   : > { %v1642_v53 = vld [vmem:[#allocation2 + $0x1640] sm:$0xff]  ;;  %1734 = vmatmul.f32.vlgmr.msra.gmra.mxu1 %v5549_v50  ;;  %1791 = vmatpush.msrb.mxu0 %v1578_v52  ;;  %v1615_v23 = vld [vmem:[#allocation2 + $0x1568] sm:$0xff] }
 0x14e   : > { %v1574_v12 = vld [vmem:[#allocation2 + $0x1420] sm:$0xff]  ;;  %1811 = vmatpush.msrb.mxu1 %v1642_v53  ;;  %1831 = vmatpush.msrb.mxu2 %v1323_v54  ;;  %v1683_v24 = vld [vmem:[#allocation2 + $0x1788] sm:$0xff] }
 0x14f   : > { %v1638_v57 = vld [vmem:[#allocation2 + $0x1620] sm:$0xff]  ;;  %1850 = vmatpush.msrb.mxu3 %v1391_v55  ;;  %1792 = vmatpush.msrb.mxu0 %v1574_v12  ;;  %v1483_v25 = vld [vmem:[#allocation2 + $0x1148] sm:$0xff]  ;;  %v5565_v12 = vpop.f32.mrf.mxu0 }
 0x150   : > { %v1570_v61 = vld [vmem:[#allocation2 + $0x1400] sm:$0xff]  ;;  %1812 = vmatpush.msrb.mxu1 %v1638_v57  ;;  %1832 = vmatpush.msrb.mxu2 %v1319_v59  ;;  %v1547_v26 = vld [vmem:[#allocation2 + $0x1348] sm:$0xff] }
 0x151   : > { %v1634_v62 = vld [vmem:[#allocation2 + $0x1600] sm:$0xff]  ;;  %1851 = vmatpush.msrb.mxu3 %v1387_v60  ;;  %1793 = vmatpush.msrb.mxu0 %v1570_v61  ;;  %v1611_v27 = vld [vmem:[#allocation2 + $0x1548] sm:$0xff]  ;;  %v5567_v61 = vpop.f32.mrf.mxu1 }
 0x152   : > { %1813 = vmatpush.msrb.mxu1 %v1634_v62  ;;  %1833 = vmatpush.msrb.mxu2 %v1315_v0  ;;  %v1543_v30 = vld [vmem:[#allocation2 + $0x1328] sm:$0xff] }
 0x153   : > { %1852 = vmatpush.msrb.mxu3 %v1383_v1  ;;  %1794 = vmatmul.f32.vlgmr.msrb.gmra.mxu0 %v5558_v3  ;;  %v1607_v31 = vld [vmem:[#allocation2 + $0x1528] sm:$0xff]  ;;  %v5570_v1 = vpop.f32.mrf.mxu2 }
 0x154   : > { %1878 = vmatpush.msra.mxu1 %v1567_v4  ;;  %1858 = vmatpush.msra.mxu0 %v1503_v37  ;;  %v1539_v35 = vld [vmem:[#allocation2 + $0x1308] sm:$0xff] }
 0x155   : > { %1898 = vmatpush.msra.mxu2 %v1631_v6  ;;  %1853 = vmatpush.msrb.mxu3 %v1379_v7  ;;  %v1671_v38 = vld [vmem:[#allocation2 + $0x1728] sm:$0xff] }
 0x156   : > { %1814 = vmatmul.f32.vlgmr.msrb.gmra.mxu1 %v5561_v8  ;;  %1859 = vmatpush.msra.mxu0 %v1499_v5  ;;  %v1471_v39 = vld [vmem:[#allocation2 + $0x10e8] sm:$0xff] }
 0x157   : > { %1879 = vmatpush.msra.mxu1 %v1563_v42  ;;  %1899 = vmatpush.msra.mxu2 %v1627_v9  ;;  %v1535_v40 = vld [vmem:[#allocation2 + $0x12e8] sm:$0xff]  ;;  %v5573_v42 = vpop.f32.mrf.mxu3 }
 0x158   : > { %1918 = vmatpush.msra.mxu3 %v1695_v10  ;;  %1860 = vmatpush.msra.mxu0 %v1495_v11  ;;  %v1599_v41 = vld [vmem:[#allocation2 + $0x14e8] sm:$0xff] }
 0x159   : > { %1880 = vmatpush.msra.mxu1 %v1559_v15  ;;  %1900 = vmatpush.msra.mxu2 %v1623_v14  ;;  %v1667_v44 = vld [vmem:[#allocation2 + $0x1708] sm:$0xff]  ;;  %v5575_v14 = vpop.f32.mrf.mxu0 }
 0x15a   : > { %1919 = vmatpush.msra.mxu3 %v1691_v16  ;;  %1861 = vmatpush.msra.mxu0 %v1491_v17  ;;  %v1467_v46 = vld [vmem:[#allocation2 + $0x10c8] sm:$0xff]  ;;  %v1376_v16 = vld [vmem:[#allocation2 + $0xdf0] sm:$0xff] }
 0x15b   : > { %1881 = vmatpush.msra.mxu1 %v1555_v18  ;;  %1901 = vmatpush.msra.mxu2 %v1619_v19  ;;  %v1531_v47 = vld [vmem:[#allocation2 + $0x12c8] sm:$0xff]  ;;  %v1440_v17 = vld [vmem:[#allocation2 + $0xff0] sm:$0xff] }
 0x15c   : > { %1920 = vmatpush.msra.mxu3 %v1687_v20  ;;  %1862 = vmatpush.msra.mxu0 %v1487_v21  ;;  %v1595_v48 = vld [vmem:[#allocation2 + $0x14c8] sm:$0xff]  ;;  %v1504_v18 = vld [vmem:[#allocation2 + $0x11f0] sm:$0xff]  ;;  %v5577_v20 = vpop.f32.mrf.mxu1  ;;  %v5579_v21 = vpop.f32.mrf.mxu2 }
 0x15d   : > { %1882 = vmatpush.msra.mxu1 %v1551_v22  ;;  %1902 = vmatpush.msra.mxu2 %v1615_v23  ;;  %v1663_v49 = vld [vmem:[#allocation2 + $0x16e8] sm:$0xff]  ;;  %v1372_v22 = vld [vmem:[#allocation2 + $0xdd0] sm:$0xff] }
 0x15e   : > { %1921 = vmatpush.msra.mxu3 %v1683_v24  ;;  %1863 = vmatpush.msra.mxu0 %v1483_v25  ;;  %v1463_v51 = vld [vmem:[#allocation2 + $0x10a8] sm:$0xff]  ;;  %v1436_v23 = vld [vmem:[#allocation2 + $0xfd0] sm:$0xff] }
 0x15f   : > { %1883 = vmatpush.msra.mxu1 %v1547_v26  ;;  %1903 = vmatpush.msra.mxu2 %v1611_v27  ;;  %v1527_v52 = vld [vmem:[#allocation2 + $0x12a8] sm:$0xff]  ;;  %v1500_v24 = vld [vmem:[#allocation2 + $0x11d0] sm:$0xff]  ;;  %v5583_v26 = vpop.f32.mrf.mxu3 }
 0x160   : > { %1922 = vmatpush.msra.mxu3 %v1679_v28  ;;  %1864 = vmatpush.msra.mxu0 %v1479_v29  ;;  %v1591_v53 = vld [vmem:[#allocation2 + $0x14a8] sm:$0xff]  ;;  %v1568_v25 = vld [vmem:[#allocation2 + $0x13f0] sm:$0xff] }
 0x161   : > { %1884 = vmatpush.msra.mxu1 %v1543_v30  ;;  %1904 = vmatpush.msra.mxu2 %v1607_v31  ;;  %v1659_v54 = vld [vmem:[#allocation2 + $0x16c8] sm:$0xff]  ;;  %v1368_v27 = vld [vmem:[#allocation2 + $0xdb0] sm:$0xff]  ;;  %v5586_v31 = vpop.f32.mrf.mxu0 }
 0x162   : > { %1923 = vmatpush.msra.mxu3 %v1675_v32  ;;  %1865 = vmatpush.msra.mxu0 %v1475_v33  ;;  %v1459_v55 = vld [vmem:[#allocation2 + $0x1088] sm:$0xff]  ;;  %v1432_v28 = vld [vmem:[#allocation2 + $0xfb0] sm:$0xff] }
 0x163   : > { %1885 = vmatpush.msra.mxu1 %v1539_v35  ;;  %1905 = vmatpush.msra.mxu2 %v1603_v36  ;;  %v1523_v56 = vld [vmem:[#allocation2 + $0x1288] sm:$0xff]  ;;  %v1496_v29 = vld [vmem:[#allocation2 + $0x11b0] sm:$0xff] }
 0x164   : > { %1924 = vmatpush.msra.mxu3 %v1671_v38  ;;  %1866 = vmatpush.msra.mxu0 %v1471_v39  ;;  %v1587_v57 = vld [vmem:[#allocation2 + $0x1488] sm:$0xff]  ;;  %v1564_v30 = vld [vmem:[#allocation2 + $0x13d0] sm:$0xff] }
 0x165   : > { %1886 = vmatpush.msra.mxu1 %v1535_v40  ;;  %1906 = vmatpush.msra.mxu2 %v1599_v41  ;;  %v1655_v58 = vld [vmem:[#allocation2 + $0x16a8] sm:$0xff]  ;;  %v1364_v32 = vld [vmem:[#allocation2 + $0xd90] sm:$0xff]  ;;  %v5589_v40 = vpop.f32.mrf.mxu1 }
 0x166   : > { %1925 = vmatpush.msra.mxu3 %v1667_v44  ;;  %1867 = vmatpush.msra.mxu0 %v1467_v46  ;;  %v1455_v59 = vld [vmem:[#allocation2 + $0x1068] sm:$0xff]  ;;  %v1428_v33 = vld [vmem:[#allocation2 + $0xf90] sm:$0xff] }
 0x167   : > { %1887 = vmatpush.msra.mxu1 %v1531_v47  ;;  %1907 = vmatpush.msra.mxu2 %v1595_v48  ;;  %v1519_v60 = vld [vmem:[#allocation2 + $0x1268] sm:$0xff]  ;;  %v1492_v35 = vld [vmem:[#allocation2 + $0x1190] sm:$0xff]  ;;  %v5591_v48 = vpop.f32.mrf.mxu2 }
 0x168   : > { %1926 = vmatpush.msra.mxu3 %v1663_v49  ;;  %1868 = vmatpush.msra.mxu0 %v1463_v51  ;;  %v1583_v13 = vld [vmem:[#allocation2 + $0x1468] sm:$0xff]  ;;  %v1560_v36 = vld [vmem:[#allocation2 + $0x13b0] sm:$0xff] }
 0x169   : > { %1888 = vmatpush.msra.mxu1 %v1527_v52  ;;  %1908 = vmatpush.msra.mxu2 %v1591_v53  ;;  %v1651_v62 = vld [vmem:[#allocation2 + $0x1688] sm:$0xff]  ;;  %v1360_v38 = vld [vmem:[#allocation2 + $0xd70] sm:$0xff] }
 0x16a   : > { %1927 = vmatpush.msra.mxu3 %v1659_v54  ;;  %1869 = vmatpush.msra.mxu0 %v1459_v55  ;;  %v1451_v63 = vld [vmem:[#allocation2 + $0x1048] sm:$0xff]  ;;  %v1424_v39 = vld [vmem:[#allocation2 + $0xf70] sm:$0xff] }
 0x16b   : > { %1889 = vmatpush.msra.mxu1 %v1523_v56  ;;  %1909 = vmatpush.msra.mxu2 %v1587_v57  ;;  %v1515_v0 = vld [vmem:[#allocation2 + $0x1248] sm:$0xff]  ;;  %v1488_v41 = vld [vmem:[#allocation2 + $0x1170] sm:$0xff]  ;;  %v5593_v56 = vpop.f32.mrf.mxu3  ;;  %v5595_v57 = vpop.f32.mrf.mxu0 }
 0x16c   : > { %1928 = vmatpush.msra.mxu3 %v1655_v58  ;;  %1834 = vmatmul.f32.vlgmr.msrb.gmra.mxu2 %v5540_v43  ;;  %v1579_v2 = vld [vmem:[#allocation2 + $0x1448] sm:$0xff]  ;;  %v1556_v44 = vld [vmem:[#allocation2 + $0x1390] sm:$0xff] }
 0x16d   : > { %1870 = vmatpush.msra.mxu0 %v1455_v59  ;;  %1890 = vmatpush.msra.mxu1 %v1519_v60  ;;  %v1647_v4 = vld [vmem:[#allocation2 + $0x1668] sm:$0xff]  ;;  %v1356_v46 = vld [vmem:[#allocation2 + $0xd50] sm:$0xff] }
 0x16e   : > { %1910 = vmatpush.msra.mxu2 %v1583_v13  ;;  %1929 = vmatpush.msra.mxu3 %v1651_v62  ;;  %v1447_v37 = vld [vmem:[#allocation2 + $0x1028] sm:$0xff]  ;;  %v1420_v47 = vld [vmem:[#allocation2 + $0xf50] sm:$0xff] }
 0x16f   : > { %1871 = vmatpush.msra.mxu0 %v1451_v63  ;;  %v1511_v6 = vld [vmem:[#allocation2 + $0x1228] sm:$0xff]  ;;  %1854 = vmatmul.f32.vlgmr.msrb.gmra.mxu3 %v5549_v50  ;;  %v1484_v49 = vld [vmem:[#allocation2 + $0x1150] sm:$0xff] }
 0x170   : > { %1891 = vmatpush.msra.mxu1 %v1515_v0  ;;  %v1575_v7 = vld [vmem:[#allocation2 + $0x1428] sm:$0xff]  ;;  %1911 = vmatpush.msra.mxu2 %v1579_v2  ;;  %v1552_v51 = vld [vmem:[#allocation2 + $0x1370] sm:$0xff]  ;;  %v5597_v0 = vpop.f32.mrf.mxu1 }
 0x171   : > { %v1643_v5 = vld [vmem:[#allocation2 + $0x1648] sm:$0xff]  ;;  %1930 = vmatpush.msra.mxu3 %v1647_v4  ;;  %1872 = vmatpush.msra.mxu0 %v1447_v37  ;;  %v1352_v52 = vld [vmem:[#allocation2 + $0xd30] sm:$0xff] }
 0x172   : > { %v1443_v9 = vld [vmem:[#allocation2 + $0x1008] sm:$0xff]  ;;  %1892 = vmatpush.msra.mxu1 %v1511_v6  ;;  %1912 = vmatpush.msra.mxu2 %v1575_v7  ;;  %v1416_v53 = vld [vmem:[#allocation2 + $0xf30] sm:$0xff]  ;;  %v5599_v7 = vpop.f32.mrf.mxu2 }
 0x173   : > { %v1507_v10 = vld [vmem:[#allocation2 + $0x1208] sm:$0xff]  ;;  %1931 = vmatpush.msra.mxu3 %v1643_v5  ;;  %1873 = vmatpush.msra.mxu0 %v1443_v9  ;;  %v1480_v54 = vld [vmem:[#allocation2 + $0x1130] sm:$0xff] }
 0x174   : > { %v1571_v11 = vld [vmem:[#allocation2 + $0x1408] sm:$0xff]  ;;  %1893 = vmatpush.msra.mxu1 %v1507_v10  ;;  %1874 = vmatmul.f32.vlgmr.msra.gmra.mxu0 %v5536_v34  ;;  %v1548_v55 = vld [vmem:[#allocation2 + $0x1350] sm:$0xff] }
 0x175   : > { %v1639_v15 = vld [vmem:[#allocation2 + $0x1628] sm:$0xff]  ;;  %1913 = vmatpush.msra.mxu2 %v1571_v11  ;;  %1938 = vmatpush.msrb.mxu0 %v1376_v16  ;;  %v1348_v58 = vld [vmem:[#allocation2 + $0xd10] sm:$0xff] }
 0x176   : > { %1932 = vmatpush.msra.mxu3 %v1639_v15  ;;  %v1635_v19 = vld [vmem:[#allocation2 + $0x1608] sm:$0xff]  ;;  %1914 = vmatmul.f32.vlgmr.msra.gmra.mxu2 %v5558_v3  ;;  %v1412_v59 = vld [vmem:[#allocation2 + $0xf10] sm:$0xff] }
 0x177   : > { %1958 = vmatpush.msrb.mxu1 %v1440_v17  ;;  %1978 = vmatpush.msrb.mxu2 %v1504_v18  ;;  %v1476_v60 = vld [vmem:[#allocation2 + $0x1110] sm:$0xff]  ;;  %v5601_v17 = vpop.f32.mrf.mxu3 }
 0x178   : > { %1933 = vmatpush.msra.mxu3 %v1635_v19  ;;  %1939 = vmatpush.msrb.mxu0 %v1372_v22  ;;  %v1544_v13 = vld [vmem:[#allocation2 + $0x1330] sm:$0xff] }
 0x179   : > { %1934 = vmatmul.f32.vlgmr.msra.gmra.mxu3 %v5561_v8  ;;  %1959 = vmatpush.msrb.mxu1 %v1436_v23  ;;  %v1344_v62 = vld [vmem:[#allocation2 + $0xcf0] sm:$0xff] }
 0x17a   : > { %1979 = vmatpush.msrb.mxu2 %v1500_v24  ;;  %1998 = vmatpush.msrb.mxu3 %v1568_v25  ;;  %v1408_v63 = vld [vmem:[#allocation2 + $0xef0] sm:$0xff]  ;;  %v5603_v24 = vpop.f32.mrf.mxu0 }
 0x17b   : > { %1894 = vmatmul.f32.vlgmr.msra.gmra.mxu1 %v5545_v45  ;;  %1940 = vmatpush.msrb.mxu0 %v1368_v27  ;;  %v1472_v2 = vld [vmem:[#allocation2 + $0x10f0] sm:$0xff] }
 0x17c   : > { %1960 = vmatpush.msrb.mxu1 %v1432_v28  ;;  %1980 = vmatpush.msrb.mxu2 %v1496_v29  ;;  %v1540_v4 = vld [vmem:[#allocation2 + $0x1310] sm:$0xff] }
 0x17d   : > { %1999 = vmatpush.msrb.mxu3 %v1564_v30  ;;  %1941 = vmatpush.msrb.mxu0 %v1364_v32  ;;  %v1340_v37 = vld [vmem:[#allocation2 + $0xcd0] sm:$0xff] }
 0x17e   : > { %1961 = vmatpush.msrb.mxu1 %v1428_v33  ;;  %1981 = vmatpush.msrb.mxu2 %v1492_v35  ;;  %v1404_v6 = vld [vmem:[#allocation2 + $0xed0] sm:$0xff]  ;;  %v5605_v33 = vpop.f32.mrf.mxu1 }
 0x17f   : > { %2000 = vmatpush.msrb.mxu3 %v1560_v36  ;;  %1942 = vmatpush.msrb.mxu0 %v1360_v38  ;;  %v1468_v5 = vld [vmem:[#allocation2 + $0x10d0] sm:$0xff] }
 0x180   : > { %1962 = vmatpush.msrb.mxu1 %v1424_v39  ;;  %1982 = vmatpush.msrb.mxu2 %v1488_v41  ;;  %v1536_v9 = vld [vmem:[#allocation2 + $0x12f0] sm:$0xff] }
 0x181   : > { %2001 = vmatpush.msrb.mxu3 %v1556_v44  ;;  %1943 = vmatpush.msrb.mxu0 %v1356_v46  ;;  %v1336_v10 = vld [vmem:[#allocation2 + $0xcb0] sm:$0xff] }
 0x182   : > { %1963 = vmatpush.msrb.mxu1 %v1420_v47  ;;  %1983 = vmatpush.msrb.mxu2 %v1484_v49  ;;  %v1400_v11 = vld [vmem:[#allocation2 + $0xeb0] sm:$0xff] }
 0x183   : > { %2002 = vmatpush.msrb.mxu3 %v1552_v51  ;;  %1944 = vmatpush.msrb.mxu0 %v1352_v52  ;;  %v1464_v15 = vld [vmem:[#allocation2 + $0x10b0] sm:$0xff] }
 0x184   : > { %1964 = vmatpush.msrb.mxu1 %v1416_v53  ;;  %1984 = vmatpush.msrb.mxu2 %v1480_v54  ;;  %v1532_v16 = vld [vmem:[#allocation2 + $0x12d0] sm:$0xff] }
 0x185   : > { %2003 = vmatpush.msrb.mxu3 %v1548_v55  ;;  %1945 = vmatpush.msrb.mxu0 %v1348_v58  ;;  %v1332_v18 = vld [vmem:[#allocation2 + $0xc90] sm:$0xff] }
 0x186   : > { %1965 = vmatpush.msrb.mxu1 %v1412_v59  ;;  %1985 = vmatpush.msrb.mxu2 %v1476_v60  ;;  %v1396_v19 = vld [vmem:[#allocation2 + $0xe90] sm:$0xff]  ;;  %v1377_v60 = vld [vmem:[#allocation2 + $0xdf8] sm:$0xff] }
 0x187   : > { %2004 = vmatpush.msrb.mxu3 %v1544_v13  ;;  %1946 = vmatpush.msrb.mxu0 %v1344_v62  ;;  %v1460_v22 = vld [vmem:[#allocation2 + $0x1090] sm:$0xff] }
 0x188   : > { %1966 = vmatpush.msrb.mxu1 %v1408_v63  ;;  %1986 = vmatpush.msrb.mxu2 %v1472_v2  ;;  %v1528_v23 = vld [vmem:[#allocation2 + $0x12b0] sm:$0xff] }
 0x189   : > { %2005 = vmatpush.msrb.mxu3 %v1540_v4  ;;  %1947 = vmatpush.msrb.mxu0 %v1340_v37  ;;  %v1328_v25 = vld [vmem:[#allocation2 + $0xc70] sm:$0xff]  ;;  %v1373_v4 = vld [vmem:[#allocation2 + $0xdd8] sm:$0xff] }
 0x18a   : > { %1967 = vmatpush.msrb.mxu1 %v1404_v6  ;;  %1987 = vmatpush.msrb.mxu2 %v1468_v5  ;;  %v1392_v27 = vld [vmem:[#allocation2 + $0xe70] sm:$0xff]  ;;  %v1441_v37 = vld [vmem:[#allocation2 + $0xff8] sm:$0xff] }
 0x18b   : > { %2006 = vmatpush.msrb.mxu3 %v1536_v9  ;;  %1948 = vmatpush.msrb.mxu0 %v1336_v10  ;;  %v1456_v28 = vld [vmem:[#allocation2 + $0x1070] sm:$0xff] }
 0x18c   : > { %1968 = vmatpush.msrb.mxu1 %v1400_v11  ;;  %1988 = vmatpush.msrb.mxu2 %v1464_v15  ;;  %v1524_v29 = vld [vmem:[#allocation2 + $0x1290] sm:$0xff]  ;;  %v1369_v15 = vld [vmem:[#allocation2 + $0xdb8] sm:$0xff] }
 0x18d   : > { %2007 = vmatpush.msrb.mxu3 %v1532_v16  ;;  %1949 = vmatpush.msrb.mxu0 %v1332_v18  ;;  %v1324_v30 = vld [vmem:[#allocation2 + $0xc50] sm:$0xff]  ;;  %v1437_v16 = vld [vmem:[#allocation2 + $0xfd8] sm:$0xff] }
 0x18e   : > { %1969 = vmatpush.msrb.mxu1 %v1396_v19  ;;  %1989 = vmatpush.msrb.mxu2 %v1460_v22  ;;  %v1388_v32 = vld [vmem:[#allocation2 + $0xe50] sm:$0xff] }
 0x18f   : > { %2008 = vmatpush.msrb.mxu3 %v1528_v23  ;;  %1950 = vmatpush.msrb.mxu0 %v1328_v25  ;;  %v1452_v35 = vld [vmem:[#allocation2 + $0x1050] sm:$0xff]  ;;  %v1172_v38 = vpop.f32.mrf.mxu2  ;;  %v1365_v23 = vld [vmem:[#allocation2 + $0xd98] sm:$0xff] }
 0x190   : > { %1970 = vmatpush.msrb.mxu1 %v1392_v27  ;;  %v1520_v36 = vld [vmem:[#allocation2 + $0x1270] sm:$0xff]  ;;  %1990 = vmatpush.msrb.mxu2 %v1456_v28  ;;  %v1433_v25 = vld [vmem:[#allocation2 + $0xfb8] sm:$0xff] }
 0x191   : > { %2009 = vmatpush.msrb.mxu3 %v1524_v29  ;;  %v1320_v39 = vld [vmem:[#allocation2 + $0xc30] sm:$0xff]  ;;  %1951 = vmatpush.msrb.mxu0 %v1324_v30  ;;  %v1192_v51 = vpop.f32.mrf.mxu3 }
 0x192   : > { %v1384_v41 = vld [vmem:[#allocation2 + $0xe30] sm:$0xff]  ;;  %1971 = vmatpush.msrb.mxu1 %v1388_v32  ;;  %1991 = vmatpush.msrb.mxu2 %v1452_v35  ;;  %v1193_v54 = vadd.f32 %v1192_v51, %v1172_v38  ;;  %v1361_v32 = vld [vmem:[#allocation2 + $0xd78] sm:$0xff] }
 0x193   : > { %v1448_v44 = vld [vmem:[#allocation2 + $0x1030] sm:$0xff]  ;;  %2010 = vmatpush.msrb.mxu3 %v1520_v36  ;;  %1952 = vmatpush.msrb.mxu0 %v1320_v39  ;;  %v1429_v35 = vld [vmem:[#allocation2 + $0xf98] sm:$0xff] }
 0x194   : > { %v1516_v46 = vld [vmem:[#allocation2 + $0x1250] sm:$0xff]  ;;  %1972 = vmatpush.msrb.mxu1 %v1384_v41  ;;  %1992 = vmatpush.msrb.mxu2 %v1448_v44  ;;  %v1357_v39 = vld [vmem:[#allocation2 + $0xd58] sm:$0xff] }
 0x195   : > { %v1316_v47 = vld [vmem:[#allocation2 + $0xc10] sm:$0xff]  ;;  %2011 = vmatpush.msrb.mxu3 %v1516_v46  ;;  %v1212_v59 = vpop.f32.mrf.mxu0  ;;  %v1425_v41 = vld [vmem:[#allocation2 + $0xf78] sm:$0xff] }
 0x196   : > { %v1380_v49 = vld [vmem:[#allocation2 + $0xe10] sm:$0xff]  ;;  %1953 = vmatpush.msrb.mxu0 %v1316_v47  ;;  %v1213_v62 = vadd.f32 %v1212_v59, %v1193_v54  ;;  %v1353_v47 = vld [vmem:[#allocation2 + $0xd38] sm:$0xff] }
 0x197   : > { %v1444_v52 = vld [vmem:[#allocation2 + $0x1010] sm:$0xff]  ;;  %1973 = vmatpush.msrb.mxu1 %v1380_v49  ;;  %v1421_v49 = vld [vmem:[#allocation2 + $0xf58] sm:$0xff]  ;;  %1954 = vmatmul.f32.vlgmr.msrb.gmra.mxu0 %v5540_v43 }
 0x198   : > { %v1512_v53 = vld [vmem:[#allocation2 + $0x1230] sm:$0xff]  ;;  %1993 = vmatpush.msrb.mxu2 %v1444_v52  ;;  %v1232_v6 = vpop.f32.mrf.mxu1  ;;  %v1252_v11 = vpop.f32.mrf.mxu2  ;;  %v1417_v54 = vld [vmem:[#allocation2 + $0xf38] sm:$0xff]  ;;  %1974 = vmatmul.f32.vlgmr.msrb.gmra.mxu1 %v5549_v50 }
 0x199   : > { %v1632_v55 = vld [vmem:[#allocation2 + $0x15f0] sm:$0xff]  ;;  %2012 = vmatpush.msrb.mxu3 %v1512_v53  ;;  %v1233_v10 = vadd.f32 %v1232_v6, %v1213_v62  ;;  %v1349_v53 = vld [vmem:[#allocation2 + $0xd18] sm:$0xff]  ;;  %1994 = vmatmul.f32.vlgmr.msrb.gmra.mxu2 %v5536_v34 }
 0x19a   : > { %v1696_v58 = vld [vmem:[#allocation2 + $0x17f0] sm:$0xff]  ;;  %2018 = vmatpush.msra.mxu0 %v1632_v55  ;;  %2058 = vmatpush.msra.mxu2 %v1377_v60  ;;  %v1345_v59 = vld [vmem:[#allocation2 + $0xcf8] sm:$0xff] }
 0x19b   : > { %v1508_v13 = vld [vmem:[#allocation2 + $0x1210] sm:$0xff]  ;;  %2038 = vmatpush.msra.mxu1 %v1696_v58  ;;  %v1253_v22 = vadd.f32 %v1252_v11, %v1233_v10  ;;  %v1272_v27 = vpop.f32.mrf.mxu3  ;;  %v1413_v60 = vld [vmem:[#allocation2 + $0xf18] sm:$0xff] }
 0x19c   : > { %v1628_v63 = vld [vmem:[#allocation2 + $0x15d0] sm:$0xff]  ;;  %2013 = vmatpush.msrb.mxu3 %v1508_v13  ;;  %2059 = vmatpush.msra.mxu2 %v1373_v4  ;;  %v1337_v6 = vld [vmem:[#allocation2 + $0xcb8] sm:$0xff] }
 0x19d   : > { %v1692_v2 = vld [vmem:[#allocation2 + $0x17d0] sm:$0xff]  ;;  %2019 = vmatpush.msra.mxu0 %v1628_v63  ;;  %v5607_v30 = vadd.f32 %v1272_v27, %v1253_v22  ;;  %v1341_v63 = vld [vmem:[#allocation2 + $0xcd8] sm:$0xff]  ;;  %2014 = vmatmul.f32.vlgmr.msrb.gmra.mxu3 %v5545_v45 }
 0x19e   : > { %v1624_v5 = vld [vmem:[#allocation2 + $0x15b0] sm:$0xff]  ;;  %2039 = vmatpush.msra.mxu1 %v1692_v2  ;;  %2078 = vmatpush.msra.mxu3 %v1441_v37  ;;  %v1409_v2 = vld [vmem:[#allocation2 + $0xef8] sm:$0xff] }
 0x19f   : > { %v1688_v9 = vld [vmem:[#allocation2 + $0x17b0] sm:$0xff]  ;;  %2020 = vmatpush.msra.mxu0 %v1624_v5  ;;  %2060 = vmatpush.msra.mxu2 %v1369_v15  ;;  %v1405_v5 = vld [vmem:[#allocation2 + $0xed8] sm:$0xff] }
 0x1a0   : > { %v1620_v18 = vld [vmem:[#allocation2 + $0x1590] sm:$0xff]  ;;  %2040 = vmatpush.msra.mxu1 %v1688_v9  ;;  %2079 = vmatpush.msra.mxu3 %v1437_v16  ;;  %v1333_v11 = vld [vmem:[#allocation2 + $0xc98] sm:$0xff] }
 0x1a1   : > { %v1684_v19 = vld [vmem:[#allocation2 + $0x1790] sm:$0xff]  ;;  %2021 = vmatpush.msra.mxu0 %v1620_v18  ;;  %2061 = vmatpush.msra.mxu2 %v1365_v23  ;;  %v1401_v15 = vld [vmem:[#allocation2 + $0xeb8] sm:$0xff] }
 0x1a2   : > { %v1616_v28 = vld [vmem:[#allocation2 + $0x1570] sm:$0xff]  ;;  %2041 = vmatpush.msra.mxu1 %v1684_v19  ;;  %2080 = vmatpush.msra.mxu3 %v1433_v25  ;;  %v1329_v19 = vld [vmem:[#allocation2 + $0xc78] sm:$0xff] }
 0x1a3   : > { %v1680_v29 = vld [vmem:[#allocation2 + $0x1770] sm:$0xff]  ;;  %2022 = vmatpush.msra.mxu0 %v1616_v28  ;;  %2062 = vmatpush.msra.mxu2 %v1361_v32  ;;  %v1397_v22 = vld [vmem:[#allocation2 + $0xe98] sm:$0xff] }
 0x1a4   : > { %v1612_v36 = vld [vmem:[#allocation2 + $0x1550] sm:$0xff]  ;;  %2042 = vmatpush.msra.mxu1 %v1680_v29  ;;  %2081 = vmatpush.msra.mxu3 %v1429_v35  ;;  %v1325_v27 = vld [vmem:[#allocation2 + $0xc58] sm:$0xff] }
 0x1a5   : > { %v1676_v38 = vld [vmem:[#allocation2 + $0x1750] sm:$0xff]  ;;  %2023 = vmatpush.msra.mxu0 %v1612_v36  ;;  %2063 = vmatpush.msra.mxu2 %v1357_v39  ;;  %v1393_v28 = vld [vmem:[#allocation2 + $0xe78] sm:$0xff] }
 0x1a6   : > { %v1608_v44 = vld [vmem:[#allocation2 + $0x1530] sm:$0xff]  ;;  %2043 = vmatpush.msra.mxu1 %v1676_v38  ;;  %2082 = vmatpush.msra.mxu3 %v1425_v41  ;;  %v1321_v35 = vld [vmem:[#allocation2 + $0xc38] sm:$0xff] }
 0x1a7   : > { %v1672_v46 = vld [vmem:[#allocation2 + $0x1730] sm:$0xff]  ;;  %2024 = vmatpush.msra.mxu0 %v1608_v44  ;;  %2064 = vmatpush.msra.mxu2 %v1353_v47  ;;  %v1389_v36 = vld [vmem:[#allocation2 + $0xe58] sm:$0xff] }
 0x1a8   : > { %v1604_v51 = vld [vmem:[#allocation2 + $0x1510] sm:$0xff]  ;;  %2044 = vmatpush.msra.mxu1 %v1672_v46  ;;  %2083 = vmatpush.msra.mxu3 %v1421_v49  ;;  %v1317_v41 = vld [vmem:[#allocation2 + $0xc18] sm:$0xff] }
 0x1a9   : > { %v1668_v52 = vld [vmem:[#allocation2 + $0x1710] sm:$0xff]  ;;  %2025 = vmatpush.msra.mxu0 %v1604_v51  ;;  %2065 = vmatpush.msra.mxu2 %v1349_v53  ;;  %v1385_v44 = vld [vmem:[#allocation2 + $0xe38] sm:$0xff] }
 0x1aa   : > { %v1600_v55 = vld [vmem:[#allocation2 + $0x14f0] sm:$0xff]  ;;  %2045 = vmatpush.msra.mxu1 %v1668_v52  ;;  %2084 = vmatpush.msra.mxu3 %v1417_v54  ;;  %v1569_v46 = vld [vmem:[#allocation2 + $0x13f8] sm:$0xff] }
 0x1ab   : > { %v1664_v58 = vld [vmem:[#allocation2 + $0x16f0] sm:$0xff]  ;;  %2026 = vmatpush.msra.mxu0 %v1600_v55  ;;  %2066 = vmatpush.msra.mxu2 %v1345_v59  ;;  %v1505_v47 = vld [vmem:[#allocation2 + $0x11f8] sm:$0xff] }
 0x1ac   : > { %v1596_v13 = vld [vmem:[#allocation2 + $0x14d0] sm:$0xff]  ;;  %2046 = vmatpush.msra.mxu1 %v1664_v58  ;;  %2085 = vmatpush.msra.mxu3 %v1413_v60  ;;  %v1633_v49 = vld [vmem:[#allocation2 + $0x15f8] sm:$0xff] }
 0x1ad   : > { %v1660_v62 = vld [vmem:[#allocation2 + $0x16d0] sm:$0xff]  ;;  %2027 = vmatpush.msra.mxu0 %v1596_v13  ;;  %2067 = vmatpush.msra.mxu2 %v1341_v63  ;;  %v1381_v51 = vld [vmem:[#allocation2 + $0xe18] sm:$0xff] }
 0x1ae   : > { %v1592_v4 = vld [vmem:[#allocation2 + $0x14b0] sm:$0xff]  ;;  %2047 = vmatpush.msra.mxu1 %v1660_v62  ;;  %2086 = vmatpush.msra.mxu3 %v1409_v2  ;;  %v1501_v52 = vld [vmem:[#allocation2 + $0x11d8] sm:$0xff] }
 0x1af   : > { %v1656_v37 = vld [vmem:[#allocation2 + $0x16b0] sm:$0xff]  ;;  %2028 = vmatpush.msra.mxu0 %v1592_v4  ;;  %2068 = vmatpush.msra.mxu2 %v1337_v6  ;;  %v1565_v53 = vld [vmem:[#allocation2 + $0x13d8] sm:$0xff] }
 0x1b0   : > { %v1588_v9 = vld [vmem:[#allocation2 + $0x1490] sm:$0xff]  ;;  %2048 = vmatpush.msra.mxu1 %v1656_v37  ;;  %2087 = vmatpush.msra.mxu3 %v1405_v5  ;;  %v1629_v54 = vld [vmem:[#allocation2 + $0x15d8] sm:$0xff] }
 0x1b1   : > { %v1652_v10 = vld [vmem:[#allocation2 + $0x1690] sm:$0xff]  ;;  %2029 = vmatpush.msra.mxu0 %v1588_v9  ;;  %2069 = vmatpush.msra.mxu2 %v1333_v11  ;;  %v1697_v55 = vld [vmem:[#allocation2 + $0x17f8] sm:$0xff] }
 0x1b2   : > { %v1584_v16 = vld [vmem:[#allocation2 + $0x1470] sm:$0xff]  ;;  %2049 = vmatpush.msra.mxu1 %v1652_v10  ;;  %2088 = vmatpush.msra.mxu3 %v1401_v15  ;;  %v1497_v58 = vld [vmem:[#allocation2 + $0x11b8] sm:$0xff] }
 0x1b3   : > { %v1648_v18 = vld [vmem:[#allocation2 + $0x1670] sm:$0xff]  ;;  %2030 = vmatpush.msra.mxu0 %v1584_v16  ;;  %2070 = vmatpush.msra.mxu2 %v1329_v19  ;;  %v1561_v59 = vld [vmem:[#allocation2 + $0x13b8] sm:$0xff] }
 0x1b4   : > { %v1580_v23 = vld [vmem:[#allocation2 + $0x1450] sm:$0xff]  ;;  %2050 = vmatpush.msra.mxu1 %v1648_v18  ;;  %2089 = vmatpush.msra.mxu3 %v1397_v22  ;;  %v1625_v60 = vld [vmem:[#allocation2 + $0x15b8] sm:$0xff] }
 0x1b5   : > { %v1644_v25 = vld [vmem:[#allocation2 + $0x1650] sm:$0xff]  ;;  %2031 = vmatpush.msra.mxu0 %v1580_v23  ;;  %2071 = vmatpush.msra.mxu2 %v1325_v27  ;;  %v1693_v13 = vld [vmem:[#allocation2 + $0x17d8] sm:$0xff] }
 0x1b6   : > { %v1576_v29 = vld [vmem:[#allocation2 + $0x1430] sm:$0xff]  ;;  %2051 = vmatpush.msra.mxu1 %v1644_v25  ;;  %2090 = vmatpush.msra.mxu3 %v1393_v28  ;;  %v1493_v62 = vld [vmem:[#allocation2 + $0x1198] sm:$0xff] }
 0x1b7   : > { %v1640_v32 = vld [vmem:[#allocation2 + $0x1630] sm:$0xff]  ;;  %2032 = vmatpush.msra.mxu0 %v1576_v29  ;;  %2072 = vmatpush.msra.mxu2 %v1321_v35  ;;  %v1557_v63 = vld [vmem:[#allocation2 + $0x1398] sm:$0xff] }
 0x1b8   : > { %v1572_v38 = vld [vmem:[#allocation2 + $0x1410] sm:$0xff]  ;;  %2052 = vmatpush.msra.mxu1 %v1640_v32  ;;  %2091 = vmatpush.msra.mxu3 %v1389_v36  ;;  %v1621_v2 = vld [vmem:[#allocation2 + $0x1598] sm:$0xff] }
 0x1b9   : > { %v1636_v39 = vld [vmem:[#allocation2 + $0x1610] sm:$0xff]  ;;  %2033 = vmatpush.msra.mxu0 %v1572_v38  ;;  %2073 = vmatpush.msra.mxu2 %v1317_v41  ;;  %v1689_v4 = vld [vmem:[#allocation2 + $0x17b8] sm:$0xff] }
 0x1ba   : > { %2053 = vmatpush.msra.mxu1 %v1636_v39  ;;  %2092 = vmatpush.msra.mxu3 %v1385_v44  ;;  %v1489_v37 = vld [vmem:[#allocation2 + $0x1178] sm:$0xff] }
 0x1bb   : > { %2034 = vmatmul.f32.vlgmr.msra.gmra.mxu0 %v5558_v3  ;;  %2138 = vmatpush.msrb.mxu2 %v1633_v49  ;;  %v1553_v6 = vld [vmem:[#allocation2 + $0x1378] sm:$0xff] }
 0x1bc   : > { %2118 = vmatpush.msrb.mxu1 %v1569_v46  ;;  %2098 = vmatpush.msrb.mxu0 %v1505_v47  ;;  %v1617_v5 = vld [vmem:[#allocation2 + $0x1578] sm:$0xff] }
 0x1bd   : > { %2093 = vmatpush.msra.mxu3 %v1381_v51  ;;  %2054 = vmatmul.f32.vlgmr.msra.gmra.mxu1 %v5561_v8  ;;  %v1685_v9 = vld [vmem:[#allocation2 + $0x1798] sm:$0xff] }
 0x1be   : > { %2099 = vmatpush.msrb.mxu0 %v1501_v52  ;;  %2119 = vmatpush.msrb.mxu1 %v1565_v53  ;;  %v1485_v10 = vld [vmem:[#allocation2 + $0x1158] sm:$0xff]  ;;  %v1715_v32 = vpop.f32.mrf.mxu0 }
 0x1bf   : > { %2139 = vmatpush.msrb.mxu2 %v1629_v54  ;;  %2158 = vmatpush.msrb.mxu3 %v1697_v55  ;;  %v1549_v11 = vld [vmem:[#allocation2 + $0x1358] sm:$0xff] }
 0x1c0   : > { %2100 = vmatpush.msrb.mxu0 %v1497_v58  ;;  %2120 = vmatpush.msrb.mxu1 %v1561_v59  ;;  %v1613_v15 = vld [vmem:[#allocation2 + $0x1558] sm:$0xff] }
 0x1c1   : > { %2140 = vmatpush.msrb.mxu2 %v1625_v60  ;;  %2159 = vmatpush.msrb.mxu3 %v1693_v13  ;;  %v1681_v16 = vld [vmem:[#allocation2 + $0x1778] sm:$0xff] }
 0x1c2   : > { %2101 = vmatpush.msrb.mxu0 %v1493_v62  ;;  %2121 = vmatpush.msrb.mxu1 %v1557_v63  ;;  %v1481_v18 = vld [vmem:[#allocation2 + $0x1138] sm:$0xff] }
 0x1c3   : > { %2141 = vmatpush.msrb.mxu2 %v1621_v2  ;;  %2160 = vmatpush.msrb.mxu3 %v1689_v4  ;;  %v1545_v19 = vld [vmem:[#allocation2 + $0x1338] sm:$0xff] }
 0x1c4   : > { %2102 = vmatpush.msrb.mxu0 %v1489_v37  ;;  %2122 = vmatpush.msrb.mxu1 %v1553_v6  ;;  %v1609_v22 = vld [vmem:[#allocation2 + $0x1538] sm:$0xff] }
 0x1c5   : > { %2142 = vmatpush.msrb.mxu2 %v1617_v5  ;;  %2161 = vmatpush.msrb.mxu3 %v1685_v9  ;;  %v1677_v23 = vld [vmem:[#allocation2 + $0x1758] sm:$0xff] }
 0x1c6   : > { %2103 = vmatpush.msrb.mxu0 %v1485_v10  ;;  %2123 = vmatpush.msrb.mxu1 %v1549_v11  ;;  %v1477_v25 = vld [vmem:[#allocation2 + $0x1118] sm:$0xff] }
 0x1c7   : > { %2143 = vmatpush.msrb.mxu2 %v1613_v15  ;;  %2162 = vmatpush.msrb.mxu3 %v1681_v16  ;;  %v1541_v27 = vld [vmem:[#allocation2 + $0x1318] sm:$0xff] }
 0x1c8   : > { %2104 = vmatpush.msrb.mxu0 %v1481_v18  ;;  %2124 = vmatpush.msrb.mxu1 %v1545_v19  ;;  %v1605_v28 = vld [vmem:[#allocation2 + $0x1518] sm:$0xff] }
 0x1c9   : > { %v1673_v29 = vld [vmem:[#allocation2 + $0x1738] sm:$0xff]  ;;  %2144 = vmatpush.msrb.mxu2 %v1609_v22  ;;  %2163 = vmatpush.msrb.mxu3 %v1677_v23  ;;  %v1775_v62 = vpop.f32.mrf.mxu3 }
 0x1ca   : > { %v1473_v35 = vld [vmem:[#allocation2 + $0x10f8] sm:$0xff]  ;;  %2105 = vmatpush.msrb.mxu0 %v1477_v25  ;;  %2125 = vmatpush.msrb.mxu1 %v1541_v27  ;;  %v1735_v46 = vpop.f32.mrf.mxu1 }
 0x1cb   : > { %v1537_v36 = vld [vmem:[#allocation2 + $0x12f8] sm:$0xff]  ;;  %2145 = vmatpush.msrb.mxu2 %v1605_v28  ;;  %2164 = vmatpush.msrb.mxu3 %v1673_v29  ;;  %v1736_v51 = vadd.f32 %v1735_v46, %v1715_v32  ;;  %v1755_v52 = vpop.f32.mrf.mxu2  ;;  %v2327_v46 = vld [vmem:[#allocation2 + $0x1bc0] sm:$0xff] }
 0x1cc   : > { %v1601_v38 = vld [vmem:[#allocation2 + $0x14f8] sm:$0xff]  ;;  %2106 = vmatpush.msrb.mxu0 %v1473_v35  ;;  %2126 = vmatpush.msrb.mxu1 %v1537_v36 }
 0x1cd   : > { %v1669_v39 = vld [vmem:[#allocation2 + $0x1718] sm:$0xff]  ;;  %2146 = vmatpush.msrb.mxu2 %v1601_v38  ;;  %v1756_v59 = vadd.f32 %v1755_v52, %v1736_v51  ;;  %2094 = vmatmul.f32.vlgmr.msra.gmra.mxu3 %v5549_v50  ;;  %v2267_v38 = vld [vmem:[#allocation2 + $0x19e0] sm:$0xff] }
 0x1ce   : > { %v1469_v41 = vld [vmem:[#allocation2 + $0x10d8] sm:$0xff]  ;;  %2165 = vmatpush.msrb.mxu3 %v1669_v39  ;;  %2074 = vmatmul.f32.vlgmr.msra.gmra.mxu2 %v5540_v43  ;;  %v2331_v39 = vld [vmem:[#allocation2 + $0x1be0] sm:$0xff] }
 0x1cf   : > { %v1533_v44 = vld [vmem:[#allocation2 + $0x12d8] sm:$0xff]  ;;  %2107 = vmatpush.msrb.mxu0 %v1469_v41  ;;  %v1776_v4 = vadd.f32 %v1775_v62, %v1756_v59  ;;  %v2395_v41 = vld [vmem:[#allocation2 + $0x1de0] sm:$0xff] }
 0x1d0   : > { %v1597_v47 = vld [vmem:[#allocation2 + $0x14d8] sm:$0xff]  ;;  %2127 = vmatpush.msrb.mxu1 %v1533_v44  ;;  %v1795_v9 = vpop.f32.mrf.mxu0  ;;  %v2263_v44 = vld [vmem:[#allocation2 + $0x19c0] sm:$0xff] }
 0x1d1   : > { %v1665_v49 = vld [vmem:[#allocation2 + $0x16f8] sm:$0xff]  ;;  %2147 = vmatpush.msrb.mxu2 %v1597_v47  ;;  %v1796_v15 = vadd.f32 %v1795_v9, %v1776_v4  ;;  %v2391_v47 = vld [vmem:[#allocation2 + $0x1dc0] sm:$0xff] }
 0x1d2   : > { %v1465_v53 = vld [vmem:[#allocation2 + $0x10b8] sm:$0xff]  ;;  %2166 = vmatpush.msrb.mxu3 %v1665_v49  ;;  %v2459_v49 = vld [vmem:[#allocation2 + $0x1fe0] sm:$0xff] }
 0x1d3   : > { %v1529_v54 = vld [vmem:[#allocation2 + $0x12b8] sm:$0xff]  ;;  %2108 = vmatpush.msrb.mxu0 %v1465_v53  ;;  %v1815_v18 = vpop.f32.mrf.mxu1  ;;  %v2259_v51 = vld [vmem:[#allocation2 + $0x19a0] sm:$0xff] }
 0x1d4   : > { %v1593_v55 = vld [vmem:[#allocation2 + $0x14b8] sm:$0xff]  ;;  %2128 = vmatpush.msrb.mxu1 %v1529_v54  ;;  %v5616_v23 = vadd.f32 %v1815_v18, %v1796_v15  ;;  %v2323_v52 = vld [vmem:[#allocation2 + $0x1ba0] sm:$0xff] }
 0x1d5   : > { %v1661_v58 = vld [vmem:[#allocation2 + $0x16d8] sm:$0xff]  ;;  %2148 = vmatpush.msrb.mxu2 %v1593_v55  ;;  %v2387_v53 = vld [vmem:[#allocation2 + $0x1da0] sm:$0xff] }
 0x1d6   : > { %v1461_v60 = vld [vmem:[#allocation2 + $0x1098] sm:$0xff]  ;;  %2167 = vmatpush.msrb.mxu3 %v1661_v58  ;;  %v2455_v54 = vld [vmem:[#allocation2 + $0x1fc0] sm:$0xff] }
 0x1d7   : > { %v1525_v13 = vld [vmem:[#allocation2 + $0x1298] sm:$0xff]  ;;  %2109 = vmatpush.msrb.mxu0 %v1461_v60  ;;  %v2319_v55 = vld [vmem:[#allocation2 + $0x1b80] sm:$0xff] }
 0x1d8   : > { %v1589_v63 = vld [vmem:[#allocation2 + $0x1498] sm:$0xff]  ;;  %2129 = vmatpush.msrb.mxu1 %v1525_v13  ;;  %v2383_v58 = vld [vmem:[#allocation2 + $0x1d80] sm:$0xff] }
 0x1d9   : > { %v1657_v2 = vld [vmem:[#allocation2 + $0x16b8] sm:$0xff]  ;;  %2149 = vmatpush.msrb.mxu2 %v1589_v63  ;;  %v2451_v59 = vld [vmem:[#allocation2 + $0x1fa0] sm:$0xff] }
 0x1da   : > { %v1457_v37 = vld [vmem:[#allocation2 + $0x1078] sm:$0xff]  ;;  %2168 = vmatpush.msrb.mxu3 %v1657_v2  ;;  %v2379_v60 = vld [vmem:[#allocation2 + $0x1d60] sm:$0xff] }
 0x1db   : > { %v1521_v6 = vld [vmem:[#allocation2 + $0x1278] sm:$0xff]  ;;  %2110 = vmatpush.msrb.mxu0 %v1457_v37  ;;  %v2447_v13 = vld [vmem:[#allocation2 + $0x1f80] sm:$0xff] }
 0x1dc   : > { %v1585_v5 = vld [vmem:[#allocation2 + $0x1478] sm:$0xff]  ;;  %2130 = vmatpush.msrb.mxu1 %v1521_v6  ;;  %v2247_v62 = vld [vmem:[#allocation2 + $0x1940] sm:$0xff] }
 0x1dd   : > { %v1653_v10 = vld [vmem:[#allocation2 + $0x1698] sm:$0xff]  ;;  %2150 = vmatpush.msrb.mxu2 %v1585_v5  ;;  %v2311_v63 = vld [vmem:[#allocation2 + $0x1b40] sm:$0xff] }
 0x1de   : > { %v1453_v11 = vld [vmem:[#allocation2 + $0x1058] sm:$0xff]  ;;  %2169 = vmatpush.msrb.mxu3 %v1653_v10  ;;  %v2443_v2 = vld [vmem:[#allocation2 + $0x1f60] sm:$0xff] }
 0x1df   : > { %v1517_v16 = vld [vmem:[#allocation2 + $0x1258] sm:$0xff]  ;;  %2111 = vmatpush.msrb.mxu0 %v1453_v11  ;;  %v2243_v4 = vld [vmem:[#allocation2 + $0x1920] sm:$0xff] }
 0x1e0   : > { %v1581_v19 = vld [vmem:[#allocation2 + $0x1458] sm:$0xff]  ;;  %2131 = vmatpush.msrb.mxu1 %v1517_v16  ;;  %v2307_v37 = vld [vmem:[#allocation2 + $0x1b20] sm:$0xff] }
 0x1e1   : > { %v1649_v22 = vld [vmem:[#allocation2 + $0x1678] sm:$0xff]  ;;  %2151 = vmatpush.msrb.mxu2 %v1581_v19  ;;  %v2371_v6 = vld [vmem:[#allocation2 + $0x1d20] sm:$0xff] }
 0x1e2   : > { %v1449_v25 = vld [vmem:[#allocation2 + $0x1038] sm:$0xff]  ;;  %2170 = vmatpush.msrb.mxu3 %v1649_v22  ;;  %v2439_v5 = vld [vmem:[#allocation2 + $0x1f40] sm:$0xff] }
 0x1e3   : > { %v1513_v27 = vld [vmem:[#allocation2 + $0x1238] sm:$0xff]  ;;  %2112 = vmatpush.msrb.mxu0 %v1449_v25  ;;  %v2239_v9 = vld [vmem:[#allocation2 + $0x1900] sm:$0xff] }
 0x1e4   : > { %v1577_v28 = vld [vmem:[#allocation2 + $0x1438] sm:$0xff]  ;;  %2132 = vmatpush.msrb.mxu1 %v1513_v27  ;;  %v2303_v10 = vld [vmem:[#allocation2 + $0x1b00] sm:$0xff] }
 0x1e5   : > { %v1645_v29 = vld [vmem:[#allocation2 + $0x1658] sm:$0xff]  ;;  %2152 = vmatpush.msrb.mxu2 %v1577_v28  ;;  %v2367_v11 = vld [vmem:[#allocation2 + $0x1d00] sm:$0xff] }
 0x1e6   : > { %v1445_v43 = vld [vmem:[#allocation2 + $0x1018] sm:$0xff]  ;;  %2171 = vmatpush.msrb.mxu3 %v1645_v29  ;;  %v2435_v15 = vld [vmem:[#allocation2 + $0x1f20] sm:$0xff] }
 0x1e7   : > { %v1509_v32 = vld [vmem:[#allocation2 + $0x1218] sm:$0xff]  ;;  %2113 = vmatpush.msrb.mxu0 %v1445_v43  ;;  %v2235_v16 = vld [vmem:[#allocation2 + $0x18e0] sm:$0xff] }
 0x1e8   : > { %v1573_v35 = vld [vmem:[#allocation2 + $0x1418] sm:$0xff]  ;;  %2133 = vmatpush.msrb.mxu1 %v1509_v32  ;;  %2114 = vmatmul.f32.vlgmr.msrb.gmra.mxu0 %v5536_v34  ;;  %v2251_v34 = vld [vmem:[#allocation2 + $0x1960] sm:$0xff] }
 0x1e9   : > { %v1641_v36 = vld [vmem:[#allocation2 + $0x1638] sm:$0xff]  ;;  %2153 = vmatpush.msrb.mxu2 %v1573_v35  ;;  %2591 = vmatpush.msra.mxu0 %v2267_v38  ;;  %v2299_v18 = vld [vmem:[#allocation2 + $0x1ae0] sm:$0xff] }
 0x1ea   : > { %2172 = vmatpush.msrb.mxu3 %v1641_v36  ;;  %v1637_v50 = vld [vmem:[#allocation2 + $0x1618] sm:$0xff]  ;;  %2154 = vmatmul.f32.vlgmr.msrb.gmra.mxu2 %v5558_v3  ;;  %v2255_v3 = vld [vmem:[#allocation2 + $0x1980] sm:$0xff] }
 0x1eb   : > { %2611 = vmatpush.msra.mxu1 %v2331_v39  ;;  %2631 = vmatpush.msra.mxu2 %v2395_v41  ;;  %v2363_v19 = vld [vmem:[#allocation2 + $0x1ce0] sm:$0xff] }
 0x1ec   : > { %2173 = vmatpush.msrb.mxu3 %v1637_v50  ;;  %2592 = vmatpush.msra.mxu0 %v2263_v44  ;;  %v2431_v22 = vld [vmem:[#allocation2 + $0x1f00] sm:$0xff] }
 0x1ed   : > { %2174 = vmatmul.f32.vlgmr.msrb.gmra.mxu3 %v5561_v8  ;;  %2612 = vmatpush.msra.mxu1 %v2327_v46  ;;  %v2315_v8 = vld [vmem:[#allocation2 + $0x1b60] sm:$0xff] }
 0x1ee   : > { %2632 = vmatpush.msra.mxu2 %v2391_v47  ;;  %2651 = vmatpush.msra.mxu3 %v2459_v49  ;;  %v2231_v25 = vld [vmem:[#allocation2 + $0x18c0] sm:$0xff] }
 0x1ef   : > { %2134 = vmatmul.f32.vlgmr.msrb.gmra.mxu1 %v5545_v45  ;;  %2593 = vmatpush.msra.mxu0 %v2259_v51  ;;  %v2375_v45 = vld [vmem:[#allocation2 + $0x1d40] sm:$0xff]  ;;  %v1835_v38 = vpop.f32.mrf.mxu2 }
 0x1f0   : > { %2613 = vmatpush.msra.mxu1 %v2323_v52  ;;  %2633 = vmatpush.msra.mxu2 %v2387_v53  ;;  %v2295_v27 = vld [vmem:[#allocation2 + $0x1ac0] sm:$0xff] }
 0x1f1   : > { %2652 = vmatpush.msra.mxu3 %v2455_v54  ;;  %2594 = vmatpush.msra.mxu0 %v2255_v3  ;;  %v2359_v28 = vld [vmem:[#allocation2 + $0x1cc0] sm:$0xff] }
 0x1f2   : > { %2614 = vmatpush.msra.mxu1 %v2319_v55  ;;  %2634 = vmatpush.msra.mxu2 %v2383_v58  ;;  %v2427_v29 = vld [vmem:[#allocation2 + $0x1ee0] sm:$0xff]  ;;  %v1855_v49 = vpop.f32.mrf.mxu3  ;;  %v1875_v55 = vpop.f32.mrf.mxu0 }
 0x1f3   : > { %2653 = vmatpush.msra.mxu3 %v2451_v59  ;;  %2595 = vmatpush.msra.mxu0 %v2251_v34  ;;  %v2227_v43 = vld [vmem:[#allocation2 + $0x18a0] sm:$0xff]  ;;  %v1856_v53 = vadd.f32 %v1855_v49, %v1835_v38 }
 0x1f4   : > { %2615 = vmatpush.msra.mxu1 %v2315_v8  ;;  %2635 = vmatpush.msra.mxu2 %v2379_v60  ;;  %v2291_v32 = vld [vmem:[#allocation2 + $0x1aa0] sm:$0xff] }
 0x1f5   : > { %2654 = vmatpush.msra.mxu3 %v2447_v13  ;;  %2596 = vmatpush.msra.mxu0 %v2247_v62  ;;  %v2355_v35 = vld [vmem:[#allocation2 + $0x1ca0] sm:$0xff]  ;;  %v1876_v34 = vadd.f32 %v1875_v55, %v1856_v53  ;;  %v2316_v53 = vld [vmem:[#allocation2 + $0x1b68] sm:$0xff] }
 0x1f6   : > { %2616 = vmatpush.msra.mxu1 %v2311_v63  ;;  %2636 = vmatpush.msra.mxu2 %v2375_v45  ;;  %v2423_v36 = vld [vmem:[#allocation2 + $0x1ec0] sm:$0xff]  ;;  %v2244_v55 = vld [vmem:[#allocation2 + $0x1928] sm:$0xff] }
 0x1f7   : > { %2655 = vmatpush.msra.mxu3 %v2443_v2  ;;  %2597 = vmatpush.msra.mxu0 %v2243_v4  ;;  %v2223_v39 = vld [vmem:[#allocation2 + $0x1880] sm:$0xff] }
 0x1f8   : > { %2617 = vmatpush.msra.mxu1 %v2307_v37  ;;  %2637 = vmatpush.msra.mxu2 %v2371_v6  ;;  %v2287_v41 = vld [vmem:[#allocation2 + $0x1a80] sm:$0xff]  ;;  %v1895_v63 = vpop.f32.mrf.mxu1 }
 0x1f9   : > { %2656 = vmatpush.msra.mxu3 %v2439_v5  ;;  %2598 = vmatpush.msra.mxu0 %v2239_v9  ;;  %v2351_v50 = vld [vmem:[#allocation2 + $0x1c80] sm:$0xff]  ;;  %v1896_v4 = vadd.f32 %v1895_v63, %v1876_v34  ;;  %v1915_v37 = vpop.f32.mrf.mxu2  ;;  %v2236_v63 = vld [vmem:[#allocation2 + $0x18e8] sm:$0xff] }
 0x1fa   : > { %2618 = vmatpush.msra.mxu1 %v2303_v10  ;;  %2638 = vmatpush.msra.mxu2 %v2367_v11  ;;  %v2419_v44 = vld [vmem:[#allocation2 + $0x1ea0] sm:$0xff] }
 0x1fb   : > { %2657 = vmatpush.msra.mxu3 %v2435_v15  ;;  %2599 = vmatpush.msra.mxu0 %v2235_v16  ;;  %v2219_v46 = vld [vmem:[#allocation2 + $0x1860] sm:$0xff]  ;;  %v1916_v11 = vadd.f32 %v1915_v37, %v1896_v4  ;;  %v2268_v15 = vld [vmem:[#allocation2 + $0x19e8] sm:$0xff] }
 0x1fc   : > { %2619 = vmatpush.msra.mxu1 %v2299_v18  ;;  %2639 = vmatpush.msra.mxu2 %v2363_v19  ;;  %v2283_v47 = vld [vmem:[#allocation2 + $0x1a60] sm:$0xff]  ;;  %v1935_v18 = vpop.f32.mrf.mxu3 }
 0x1fd   : > { %2658 = vmatpush.msra.mxu3 %v2431_v22  ;;  %2600 = vmatpush.msra.mxu0 %v2231_v25  ;;  %v2347_v51 = vld [vmem:[#allocation2 + $0x1c60] sm:$0xff]  ;;  %v5623_v25 = vadd.f32 %v1935_v18, %v1916_v11  ;;  %v5114_v18 = vld [vmem:[%s5473_s23 + $0x18] sm:$0x1f] }
 0x1fe   : > { %2620 = vmatpush.msra.mxu1 %v2295_v27  ;;  %2640 = vmatpush.msra.mxu2 %v2359_v28  ;;  %v2415_v52 = vld [vmem:[#allocation2 + $0x1e80] sm:$0xff]  ;;  %v2264_v27 = vld [vmem:[#allocation2 + $0x19c8] sm:$0xff] }
 0x1ff   : > { %2659 = vmatpush.msra.mxu3 %v2427_v29  ;;  %2601 = vmatpush.msra.mxu0 %v2227_v43  ;;  %v2215_v54 = vld [vmem:[#allocation2 + $0x1840] sm:$0xff]  ;;  %v2332_v28 = vld [vmem:[#allocation2 + $0x1be8] sm:$0xff] }
 0x200   : > { %2621 = vmatpush.msra.mxu1 %v2291_v32  ;;  %2641 = vmatpush.msra.mxu2 %v2355_v35  ;;  %v2279_v3 = vld [vmem:[#allocation2 + $0x1a40] sm:$0xff]  ;;  %v2260_v32 = vld [vmem:[#allocation2 + $0x19a8] sm:$0xff] }
 0x201   : > { %2660 = vmatpush.msra.mxu3 %v2423_v36  ;;  %2602 = vmatpush.msra.mxu0 %v2223_v39  ;;  %v2343_v58 = vld [vmem:[#allocation2 + $0x1c40] sm:$0xff]  ;;  %v2328_v35 = vld [vmem:[#allocation2 + $0x1bc8] sm:$0xff] }
 0x202   : > { %2622 = vmatpush.msra.mxu1 %v2287_v41  ;;  %2642 = vmatpush.msra.mxu2 %v2351_v50  ;;  %v2411_v59 = vld [vmem:[#allocation2 + $0x1e60] sm:$0xff]  ;;  %v2256_v39 = vld [vmem:[#allocation2 + $0x1988] sm:$0xff] }
 0x203   : > { %2661 = vmatpush.msra.mxu3 %v2419_v44  ;;  %2603 = vmatpush.msra.mxu0 %v2219_v46  ;;  %v2211_v8 = vld [vmem:[#allocation2 + $0x1820] sm:$0xff]  ;;  %v2324_v41 = vld [vmem:[#allocation2 + $0x1ba8] sm:$0xff] }
 0x204   : > { %2623 = vmatpush.msra.mxu1 %v2283_v47  ;;  %2643 = vmatpush.msra.mxu2 %v2347_v51  ;;  %v2275_v60 = vld [vmem:[#allocation2 + $0x1a20] sm:$0xff]  ;;  %v2252_v46 = vld [vmem:[#allocation2 + $0x1968] sm:$0xff] }
 0x205   : > { %2662 = vmatpush.msra.mxu3 %v2415_v52  ;;  %2604 = vmatpush.msra.mxu0 %v2215_v54  ;;  %v2339_v13 = vld [vmem:[#allocation2 + $0x1c20] sm:$0xff]  ;;  %v2320_v47 = vld [vmem:[#allocation2 + $0x1b88] sm:$0xff] }
 0x206   : > { %2624 = vmatpush.msra.mxu1 %v2279_v3  ;;  %v2407_v62 = vld [vmem:[#allocation2 + $0x1e40] sm:$0xff]  ;;  %2644 = vmatpush.msra.mxu2 %v2343_v58  ;;  %v2248_v52 = vld [vmem:[#allocation2 + $0x1948] sm:$0xff] }
 0x207   : > { %2663 = vmatpush.msra.mxu3 %v2411_v59  ;;  %v2207_v45 = vld [vmem:[#allocation2 + $0x1800] sm:$0xff]  ;;  %2605 = vmatpush.msra.mxu0 %v2211_v8  ;;  %v2312_v58 = vld [vmem:[#allocation2 + $0x1b48] sm:$0xff] }
 0x208   : > { %v2271_v2 = vld [vmem:[#allocation2 + $0x1a00] sm:$0xff]  ;;  %2625 = vmatpush.msra.mxu1 %v2275_v60  ;;  %2645 = vmatpush.msra.mxu2 %v2339_v13  ;;  %v2240_v8 = vld [vmem:[#allocation2 + $0x1908] sm:$0xff] }
 0x209   : > { %v2335_v6 = vld [vmem:[#allocation2 + $0x1c00] sm:$0xff]  ;;  %2664 = vmatpush.msra.mxu3 %v2407_v62  ;;  %2606 = vmatpush.msra.mxu0 %v2207_v45  ;;  %v2308_v60 = vld [vmem:[#allocation2 + $0x1b28] sm:$0xff] }
 0x20a   : > { %v2403_v5 = vld [vmem:[#allocation2 + $0x1e20] sm:$0xff]  ;;  %2626 = vmatpush.msra.mxu1 %v2271_v2  ;;  %2646 = vmatpush.msra.mxu2 %v2335_v6  ;;  %v2304_v45 = vld [vmem:[#allocation2 + $0x1b08] sm:$0xff]  ;;  %v5112_v2 = vld [vmem:[%s5473_s23 + $0x10] sm:$0x1f] }
 0x20b   : > { %v2523_v9 = vld [vmem:[#allocation2 + $0x21e0] sm:$0xff]  ;;  %2665 = vmatpush.msra.mxu3 %v2403_v5  ;;  %v2190_v4 = vrot.slane %v5112_v2, 5  ;;  %v2232_v5 = vld [vmem:[#allocation2 + $0x18c8] sm:$0xff] }
 0x20c   : > { %v2587_v10 = vld [vmem:[#allocation2 + $0x23e0] sm:$0xff]  ;;  %2671 = vmatpush.msrb.mxu0 %v2523_v9  ;;  %2711 = vmatpush.msrb.mxu2 %v2268_v15  ;;  %v2300_v9 = vld [vmem:[#allocation2 + $0x1ae8] sm:$0xff] }
 0x20d   : > { %v2399_v16 = vld [vmem:[#allocation2 + $0x1e00] sm:$0xff]  ;;  %2691 = vmatpush.msrb.mxu1 %v2587_v10 }
 0x20e   : > { %v2519_v19 = vld [vmem:[#allocation2 + $0x21c0] sm:$0xff]  ;;  %2666 = vmatpush.msra.mxu3 %v2399_v16  ;;  %2712 = vmatpush.msrb.mxu2 %v2264_v27  ;;  %v2296_v27 = vld [vmem:[#allocation2 + $0x1ac8] sm:$0xff] }
 0x20f   : > { %v2583_v22 = vld [vmem:[#allocation2 + $0x23c0] sm:$0xff]  ;;  %2672 = vmatpush.msrb.mxu0 %v2519_v19  ;;  %v2191_v19 = vrot.slane %v5114_v18, 5  ;;  %v2272_v18 = vld [vmem:[#allocation2 + $0x1a08] sm:$0xff] }
 0x210   : > { %v2515_v29 = vld [vmem:[#allocation2 + $0x21a0] sm:$0xff]  ;;  %2692 = vmatpush.msrb.mxu1 %v2583_v22  ;;  %2731 = vmatpush.msrb.mxu3 %v2332_v28  ;;  %v2228_v22 = vld [vmem:[#allocation2 + $0x18a8] sm:$0xff]  ;;  %v5115_v28 = vld [vmem:[%s5473_s23 + $0x70] sm:$0x1f] }
 0x211   : > { %v2579_v43 = vld [vmem:[#allocation2 + $0x23a0] sm:$0xff]  ;;  %2673 = vmatpush.msrb.mxu0 %v2515_v29  ;;  %2713 = vmatpush.msrb.mxu2 %v2260_v32  ;;  %v5630_v29 = vsel %vm404_vm0, %v5115_v28, %v2190_v4  ;;  %v5116_v32 = vld [vmem:[%s5473_s23 + $0x8] sm:$0x1f] }
 0x212   : > { %v2511_v36 = vld [vmem:[#allocation2 + $0x2180] sm:$0xff]  ;;  %2693 = vmatpush.msrb.mxu1 %v2579_v43  ;;  %2732 = vmatpush.msrb.mxu3 %v2328_v35  ;;  %v2189_v35 = vrot.slane %v5116_v32, 5  ;;  %v2456_v28 = vld [vmem:[#allocation2 + $0x1fc8] sm:$0xff] }
 0x213   : > { %v2575_v38 = vld [vmem:[#allocation2 + $0x2380] sm:$0xff]  ;;  %2674 = vmatpush.msrb.mxu0 %v2511_v36  ;;  %2714 = vmatpush.msrb.mxu2 %v2256_v39  ;;  %v2292_v39 = vld [vmem:[#allocation2 + $0x1aa8] sm:$0xff] }
 0x214   : > { %v2507_v50 = vld [vmem:[#allocation2 + $0x2160] sm:$0xff]  ;;  %2694 = vmatpush.msrb.mxu1 %v2575_v38  ;;  %2733 = vmatpush.msrb.mxu3 %v2324_v41  ;;  %v2224_v38 = vld [vmem:[#allocation2 + $0x1888] sm:$0xff] }
 0x215   : > { %v2571_v44 = vld [vmem:[#allocation2 + $0x2360] sm:$0xff]  ;;  %2675 = vmatpush.msrb.mxu0 %v2507_v50  ;;  %2715 = vmatpush.msrb.mxu2 %v2252_v46  ;;  %v2588_v32 = vld [vmem:[#allocation2 + $0x23e8] sm:$0xff] }
 0x216   : > { %v2503_v49 = vld [vmem:[#allocation2 + $0x2140] sm:$0xff]  ;;  %2695 = vmatpush.msrb.mxu1 %v2571_v44  ;;  %2734 = vmatpush.msrb.mxu3 %v2320_v47  ;;  %v5118_v44 = vld [vmem:[%s5473_s23 + $0x78] sm:$0x1f] }
 0x217   : > { %v2567_v51 = vld [vmem:[#allocation2 + $0x2340] sm:$0xff]  ;;  %2676 = vmatpush.msrb.mxu0 %v2503_v49  ;;  %2716 = vmatpush.msrb.mxu2 %v2248_v52  ;;  %v5640_v46 = vsel %vm404_vm0, %v5118_v44, %v2191_v19  ;;  %v2288_v52 = vld [vmem:[#allocation2 + $0x1a88] sm:$0xff] }
 0x218   : > { %v2499_v54 = vld [vmem:[#allocation2 + $0x2120] sm:$0xff]  ;;  %2696 = vmatpush.msrb.mxu1 %v2567_v51  ;;  %2735 = vmatpush.msrb.mxu3 %v2316_v53  ;;  %v2220_v51 = vld [vmem:[#allocation2 + $0x1868] sm:$0xff] }
 0x219   : > { %v2563_v3 = vld [vmem:[#allocation2 + $0x2320] sm:$0xff]  ;;  %2677 = vmatpush.msrb.mxu0 %v2499_v54  ;;  %2717 = vmatpush.msrb.mxu2 %v2244_v55  ;;  %v5119_v53 = vld [vmem:[%s5473_s23 + $0x68] sm:$0x1f] }
 0x21a   : > { %v2495_v59 = vld [vmem:[#allocation2 + $0x2100] sm:$0xff]  ;;  %2697 = vmatpush.msrb.mxu1 %v2563_v3  ;;  %2736 = vmatpush.msrb.mxu3 %v2312_v58  ;;  %v5645_v54 = vsel %vm404_vm0, %v5119_v53, %v2189_v35  ;;  %v2216_v58 = vld [vmem:[#allocation2 + $0x1848] sm:$0xff] }
 0x21b   : > { %v2559_v34 = vld [vmem:[#allocation2 + $0x2300] sm:$0xff]  ;;  %2678 = vmatpush.msrb.mxu0 %v2495_v59  ;;  %2718 = vmatpush.msrb.mxu2 %v2240_v8  ;;  %v2284_v59 = vld [vmem:[#allocation2 + $0x1a68] sm:$0xff] }
 0x21c   : > { %v2491_v13 = vld [vmem:[#allocation2 + $0x20e0] sm:$0xff]  ;;  %2698 = vmatpush.msrb.mxu1 %v2559_v34  ;;  %2737 = vmatpush.msrb.mxu3 %v2308_v60  ;;  %v5123_v19 = vld [vmem:[%s5473_s23 + $0x88] sm:$0x1f] }
 0x21d   : > { %v2555_v62 = vld [vmem:[#allocation2 + $0x22e0] sm:$0xff]  ;;  %2679 = vmatpush.msrb.mxu0 %v2491_v13  ;;  %2719 = vmatpush.msrb.mxu2 %v2236_v63  ;;  %v2280_v63 = vld [vmem:[#allocation2 + $0x1a48] sm:$0xff] }
 0x21e   : > { %v2487_v37 = vld [vmem:[#allocation2 + $0x20c0] sm:$0xff]  ;;  %2699 = vmatpush.msrb.mxu1 %v2555_v62  ;;  %2738 = vmatpush.msrb.mxu3 %v2304_v45  ;;  %v2212_v62 = vld [vmem:[#allocation2 + $0x1828] sm:$0xff] }
 0x21f   : > { %v2551_v6 = vld [vmem:[#allocation2 + $0x22c0] sm:$0xff]  ;;  %2680 = vmatpush.msrb.mxu0 %v2487_v37  ;;  %2720 = vmatpush.msrb.mxu2 %v2232_v5  ;;  %v5121_v45 = vld [vmem:[%s5473_s23 + $0x28] sm:$0x1f] }
 0x220   : > { %v5113_v10 = vld [vmem:[%s5473_s23] sm:$0x1f]  ;;  %2700 = vmatpush.msrb.mxu1 %v2551_v6  ;;  %2739 = vmatpush.msrb.mxu3 %v2300_v9  ;;  %v2193_v2 = vrot.slane %v5121_v45, 5  ;;  %v2208_v6 = vld [vmem:[#allocation2 + $0x1808] sm:$0xff] }
 0x221   : > { %v2188_v11 = vrot.slane %v5113_v10, 5  ;;  %v2483_v15 = vld [vmem:[#allocation2 + $0x20a0] sm:$0xff]  ;;  %2721 = vmatpush.msrb.mxu2 %v2228_v22  ;;  %2667 = vmatmul.f32.vlgmr.msra.gmra.mxu3 %v5640_v46  ;;  %v2276_v5 = vld [vmem:[#allocation2 + $0x1a28] sm:$0xff] }
 0x222   : > { %v2547_v16 = vld [vmem:[#allocation2 + $0x22a0] sm:$0xff]  ;;  %2681 = vmatpush.msrb.mxu0 %v2483_v15  ;;  %2740 = vmatpush.msrb.mxu3 %v2296_v27  ;;  %v2396_v15 = vld [vmem:[#allocation2 + $0x1de8] sm:$0xff]  ;;  %v5657_v22 = vsel %vm404_vm0, %v5123_v19, %v2193_v2 }
 0x223   : > { %v2479_v43 = vld [vmem:[#allocation2 + $0x2080] sm:$0xff]  ;;  %2701 = vmatpush.msrb.mxu1 %v2547_v16  ;;  %2647 = vmatmul.f32.vlgmr.msra.gmra.mxu2 %v5630_v29  ;;  %v2524_v16 = vld [vmem:[#allocation2 + $0x21e8] sm:$0xff] }
 0x224   : > { %v2543_v36 = vld [vmem:[#allocation2 + $0x2280] sm:$0xff]  ;;  %2682 = vmatpush.msrb.mxu0 %v2479_v43  ;;  %2722 = vmatpush.msrb.mxu2 %v2224_v38  ;;  %v2392_v27 = vld [vmem:[#allocation2 + $0x1dc8] sm:$0xff] }
 0x225   : > { %v5117_v41 = vld [vmem:[%s5473_s23 + $0x60] sm:$0x1f]  ;;  %2702 = vmatpush.msrb.mxu1 %v2543_v36  ;;  %2741 = vmatpush.msrb.mxu3 %v2292_v39  ;;  %v2520_v43 = vld [vmem:[#allocation2 + $0x21c8] sm:$0xff] }
 0x226   : > { %v5635_v50 = vsel %vm404_vm0, %v5117_v41, %v2188_v11  ;;  %v2475_v47 = vld [vmem:[#allocation2 + $0x2060] sm:$0xff]  ;;  %2723 = vmatpush.msrb.mxu2 %v2220_v51  ;;  %2627 = vmatmul.f32.vlgmr.msra.gmra.mxu1 %v5645_v54  ;;  %v2460_v11 = vld [vmem:[#allocation2 + $0x1fe8] sm:$0xff] }
 0x227   : > { %v2539_v49 = vld [vmem:[#allocation2 + $0x2260] sm:$0xff]  ;;  %2607 = vmatmul.f32.vlgmr.msra.gmra.mxu0 %v5635_v50  ;;  %2742 = vmatpush.msrb.mxu3 %v2288_v52  ;;  %v2388_v35 = vld [vmem:[#allocation2 + $0x1da8] sm:$0xff] }
 0x228   : > { %2683 = vmatpush.msrb.mxu0 %v2475_v47  ;;  %v2471_v3 = vld [vmem:[#allocation2 + $0x2040] sm:$0xff]  ;;  %2703 = vmatpush.msrb.mxu1 %v2539_v49  ;;  %v2452_v36 = vld [vmem:[#allocation2 + $0x1fa8] sm:$0xff] }
 0x229   : > { %v2535_v55 = vld [vmem:[#allocation2 + $0x2240] sm:$0xff]  ;;  %2724 = vmatpush.msrb.mxu2 %v2216_v58  ;;  %2743 = vmatpush.msrb.mxu3 %v2284_v59  ;;  %v2516_v38 = vld [vmem:[#allocation2 + $0x21a8] sm:$0xff] }
 0x22a   : > { %v5120_v34 = vld [vmem:[%s5473_s23 + $0x20] sm:$0x1f]  ;;  %2684 = vmatpush.msrb.mxu0 %v2471_v3  ;;  %2704 = vmatpush.msrb.mxu1 %v2535_v55  ;;  %v2584_v39 = vld [vmem:[#allocation2 + $0x23c8] sm:$0xff] }
 0x22b   : > { %v2192_v8 = vrot.slane %v5120_v34, 5  ;;  %v2467_v60 = vld [vmem:[#allocation2 + $0x2020] sm:$0xff]  ;;  %2725 = vmatpush.msrb.mxu2 %v2212_v62  ;;  %2744 = vmatpush.msrb.mxu3 %v2280_v63  ;;  %v2384_v41 = vld [vmem:[#allocation2 + $0x1d88] sm:$0xff] }
 0x22c   : > { %v2531_v13 = vld [vmem:[#allocation2 + $0x2220] sm:$0xff]  ;;  %2685 = vmatpush.msrb.mxu0 %v2467_v60  ;;  %v2448_v44 = vld [vmem:[#allocation2 + $0x1f88] sm:$0xff] }
 0x22d   : > { %v2463_v4 = vld [vmem:[#allocation2 + $0x2000] sm:$0xff]  ;;  %2705 = vmatpush.msrb.mxu1 %v2531_v13  ;;  %2726 = vmatpush.msrb.mxu2 %v2208_v6  ;;  %v2512_v47 = vld [vmem:[#allocation2 + $0x2188] sm:$0xff] }
 0x22e   : > { %v2527_v37 = vld [vmem:[#allocation2 + $0x2200] sm:$0xff]  ;;  %2686 = vmatpush.msrb.mxu0 %v2463_v4  ;;  %2745 = vmatpush.msrb.mxu3 %v2276_v5  ;;  %v2580_v49 = vld [vmem:[#allocation2 + $0x23a8] sm:$0xff] }
 0x22f   : > { %v5122_v9 = vld [vmem:[%s5473_s23 + $0x80] sm:$0x1f]  ;;  %2706 = vmatpush.msrb.mxu1 %v2527_v37  ;;  %2791 = vmatpush.msra.mxu2 %v2524_v16  ;;  %v2380_v51 = vld [vmem:[#allocation2 + $0x1d68] sm:$0xff]  ;;  %v1955_v37 = vpop.f32.mrf.mxu0 }
 0x230   : > { %v5653_v10 = vsel %vm404_vm0, %v5122_v9, %v2192_v8  ;;  %2751 = vmatpush.msra.mxu0 %v2396_v15  ;;  %2746 = vmatpush.msrb.mxu3 %v2272_v18  ;;  %v2444_v52 = vld [vmem:[#allocation2 + $0x1f68] sm:$0xff]  ;;  %v1975_v18 = vpop.f32.mrf.mxu1 }
 0x231   : > { %2687 = vmatmul.f32.vlgmr.msrb.gmra.mxu0 %v5653_v10  ;;  %2771 = vmatpush.msra.mxu1 %v2460_v11  ;;  %v2508_v53 = vld [vmem:[#allocation2 + $0x2168] sm:$0xff] }
 0x232   : > { %2707 = vmatmul.f32.vlgmr.msrb.gmra.mxu1 %v5657_v22  ;;  %2752 = vmatpush.msra.mxu0 %v2392_v27  ;;  %v2576_v3 = vld [vmem:[#allocation2 + $0x2388] sm:$0xff] }
 0x233   : > { %2772 = vmatpush.msra.mxu1 %v2456_v28  ;;  %2792 = vmatpush.msra.mxu2 %v2520_v43  ;;  %v2376_v55 = vld [vmem:[#allocation2 + $0x1d48] sm:$0xff]  ;;  %v1976_v28 = vadd.f32 %v1975_v18, %v1955_v37  ;;  %v1995_v43 = vpop.f32.mrf.mxu2  ;;  %v2333_v18 = vld [vmem:[#allocation2 + $0x1bf0] sm:$0xff] }
 0x234   : > { %2811 = vmatpush.msra.mxu3 %v2588_v32  ;;  %2753 = vmatpush.msra.mxu0 %v2388_v35  ;;  %v2440_v58 = vld [vmem:[#allocation2 + $0x1f48] sm:$0xff] }
 0x235   : > { %2773 = vmatpush.msra.mxu1 %v2452_v36  ;;  %2793 = vmatpush.msra.mxu2 %v2516_v38  ;;  %v2504_v59 = vld [vmem:[#allocation2 + $0x2148] sm:$0xff] }
 0x236   : > { %2812 = vmatpush.msra.mxu3 %v2584_v39  ;;  %2754 = vmatpush.msra.mxu0 %v2384_v41  ;;  %v2572_v34 = vld [vmem:[#allocation2 + $0x2368] sm:$0xff]  ;;  %v1996_v39 = vadd.f32 %v1995_v43, %v1976_v28  ;;  %v2265_v28 = vld [vmem:[#allocation2 + $0x19d0] sm:$0xff] }
 0x237   : > { %2774 = vmatpush.msra.mxu1 %v2448_v44  ;;  %2794 = vmatpush.msra.mxu2 %v2512_v47  ;;  %v2372_v8 = vld [vmem:[#allocation2 + $0x1d28] sm:$0xff]  ;;  %v2015_v47 = vpop.f32.mrf.mxu3  ;;  %v2329_v43 = vld [vmem:[#allocation2 + $0x1bd0] sm:$0xff] }
 0x238   : > { %2813 = vmatpush.msra.mxu3 %v2580_v49  ;;  %2755 = vmatpush.msra.mxu0 %v2380_v51  ;;  %v2436_v60 = vld [vmem:[#allocation2 + $0x1f28] sm:$0xff] }
 0x239   : > { %2775 = vmatpush.msra.mxu1 %v2444_v52  ;;  %2795 = vmatpush.msra.mxu2 %v2508_v53  ;;  %v2500_v13 = vld [vmem:[#allocation2 + $0x2128] sm:$0xff]  ;;  %v2016_v52 = vadd.f32 %v2015_v47, %v1996_v39  ;;  %v2389_v39 = vld [vmem:[#allocation2 + $0x1db0] sm:$0xff] }
 0x23a   : > { %2814 = vmatpush.msra.mxu3 %v2576_v3  ;;  %2756 = vmatpush.msra.mxu0 %v2376_v55  ;;  %v2568_v62 = vld [vmem:[#allocation2 + $0x2348] sm:$0xff]  ;;  %v2321_v47 = vld [vmem:[#allocation2 + $0x1b90] sm:$0xff] }
 0x23b   : > { %2776 = vmatpush.msra.mxu1 %v2440_v58  ;;  %2796 = vmatpush.msra.mxu2 %v2504_v59  ;;  %v2368_v63 = vld [vmem:[#allocation2 + $0x1d08] sm:$0xff]  ;;  %v2035_v58 = vpop.f32.mrf.mxu0 }
 0x23c   : > { %2815 = vmatpush.msra.mxu3 %v2572_v34  ;;  %v2432_v45 = vld [vmem:[#allocation2 + $0x1f08] sm:$0xff]  ;;  %2757 = vmatpush.msra.mxu0 %v2372_v8  ;;  %v2036_v8 = vadd.f32 %v2035_v58, %v2016_v52  ;;  %v2253_v52 = vld [vmem:[#allocation2 + $0x1970] sm:$0xff] }
 0x23d   : > { %2777 = vmatpush.msra.mxu1 %v2436_v60  ;;  %v2496_v2 = vld [vmem:[#allocation2 + $0x2108] sm:$0xff]  ;;  %2797 = vmatpush.msra.mxu2 %v2500_v13  ;;  %v2055_v13 = vpop.f32.mrf.mxu1  ;;  %v2249_v58 = vld [vmem:[#allocation2 + $0x1950] sm:$0xff] }
 0x23e   : > { %v2564_v4 = vld [vmem:[#allocation2 + $0x2328] sm:$0xff]  ;;  %2816 = vmatpush.msra.mxu3 %v2568_v62  ;;  %2758 = vmatpush.msra.mxu0 %v2368_v63 }
 0x23f   : > { %v2364_v6 = vld [vmem:[#allocation2 + $0x1ce8] sm:$0xff]  ;;  %2778 = vmatpush.msra.mxu1 %v2432_v45  ;;  %2798 = vmatpush.msra.mxu2 %v2496_v2  ;;  %v5662_v45 = vadd.f32 %v2055_v13, %v2036_v8  ;;  %v2445_v8 = vld [vmem:[#allocation2 + $0x1f70] sm:$0xff] }
 0x240   : > { %v2428_v5 = vld [vmem:[#allocation2 + $0x1ee8] sm:$0xff]  ;;  %2817 = vmatpush.msra.mxu3 %v2564_v4  ;;  %2759 = vmatpush.msra.mxu0 %v2364_v6  ;;  %v2309_v13 = vld [vmem:[#allocation2 + $0x1b30] sm:$0xff] }
 0x241   : > { %v2492_v9 = vld [vmem:[#allocation2 + $0x20e8] sm:$0xff]  ;;  %2779 = vmatpush.msra.mxu1 %v2428_v5  ;;  %2727 = vmatmul.f32.vlgmr.msrb.gmra.mxu2 %v5635_v50 }
 0x242   : > { %v2560_v11 = vld [vmem:[#allocation2 + $0x2308] sm:$0xff]  ;;  %2799 = vmatpush.msra.mxu2 %v2492_v9  ;;  %2747 = vmatmul.f32.vlgmr.msrb.gmra.mxu3 %v5645_v54 }
 0x243   : > { %v2360_v15 = vld [vmem:[#allocation2 + $0x1cc8] sm:$0xff]  ;;  %2818 = vmatpush.msra.mxu3 %v2560_v11 }
 0x244   : > { %v2424_v16 = vld [vmem:[#allocation2 + $0x1ec8] sm:$0xff]  ;;  %2760 = vmatpush.msra.mxu0 %v2360_v15 }
 0x245   : > { %v2488_v19 = vld [vmem:[#allocation2 + $0x20c8] sm:$0xff]  ;;  %2780 = vmatpush.msra.mxu1 %v2424_v16  ;;  %v2269_v16 = vld [vmem:[#allocation2 + $0x19f0] sm:$0xff] }
 0x246   : > { %v2556_v27 = vld [vmem:[#allocation2 + $0x22e8] sm:$0xff]  ;;  %2800 = vmatpush.msra.mxu2 %v2488_v19  ;;  %v2397_v19 = vld [vmem:[#allocation2 + $0x1df0] sm:$0xff] }
 0x247   : > { %v2356_v32 = vld [vmem:[#allocation2 + $0x1ca8] sm:$0xff]  ;;  %2819 = vmatpush.msra.mxu3 %v2556_v27 }
 0x248   : > { %v2420_v35 = vld [vmem:[#allocation2 + $0x1ea8] sm:$0xff]  ;;  %2761 = vmatpush.msra.mxu0 %v2356_v32  ;;  %v2393_v32 = vld [vmem:[#allocation2 + $0x1dd0] sm:$0xff] }
 0x249   : > { %v2484_v36 = vld [vmem:[#allocation2 + $0x20a8] sm:$0xff]  ;;  %2781 = vmatpush.msra.mxu1 %v2420_v35  ;;  %v2461_v35 = vld [vmem:[#allocation2 + $0x1ff0] sm:$0xff] }
 0x24a   : > { %v2552_v38 = vld [vmem:[#allocation2 + $0x22c8] sm:$0xff]  ;;  %2801 = vmatpush.msra.mxu2 %v2484_v36  ;;  %v2261_v36 = vld [vmem:[#allocation2 + $0x19b0] sm:$0xff] }
 0x24b   : > { %v2352_v41 = vld [vmem:[#allocation2 + $0x1c88] sm:$0xff]  ;;  %2820 = vmatpush.msra.mxu3 %v2552_v38  ;;  %v2325_v38 = vld [vmem:[#allocation2 + $0x1bb0] sm:$0xff] }
 0x24c   : > { %v2416_v44 = vld [vmem:[#allocation2 + $0x1e88] sm:$0xff]  ;;  %2762 = vmatpush.msra.mxu0 %v2352_v41  ;;  %v2457_v41 = vld [vmem:[#allocation2 + $0x1fd0] sm:$0xff] }
 0x24d   : > { %v2480_v49 = vld [vmem:[#allocation2 + $0x2088] sm:$0xff]  ;;  %2782 = vmatpush.msra.mxu1 %v2416_v44  ;;  %v2257_v44 = vld [vmem:[#allocation2 + $0x1990] sm:$0xff] }
 0x24e   : > { %v2548_v51 = vld [vmem:[#allocation2 + $0x22a8] sm:$0xff]  ;;  %2802 = vmatpush.msra.mxu2 %v2480_v49  ;;  %v2385_v49 = vld [vmem:[#allocation2 + $0x1d90] sm:$0xff] }
 0x24f   : > { %v2348_v53 = vld [vmem:[#allocation2 + $0x1c68] sm:$0xff]  ;;  %2821 = vmatpush.msra.mxu3 %v2548_v51  ;;  %v2453_v51 = vld [vmem:[#allocation2 + $0x1fb0] sm:$0xff] }
 0x250   : > { %v2412_v3 = vld [vmem:[#allocation2 + $0x1e68] sm:$0xff]  ;;  %2763 = vmatpush.msra.mxu0 %v2348_v53  ;;  %v2317_v53 = vld [vmem:[#allocation2 + $0x1b70] sm:$0xff] }
 0x251   : > { %v2476_v55 = vld [vmem:[#allocation2 + $0x2068] sm:$0xff]  ;;  %2783 = vmatpush.msra.mxu1 %v2412_v3  ;;  %v2381_v3 = vld [vmem:[#allocation2 + $0x1d70] sm:$0xff] }
 0x252   : > { %v2544_v59 = vld [vmem:[#allocation2 + $0x2288] sm:$0xff]  ;;  %2803 = vmatpush.msra.mxu2 %v2476_v55  ;;  %v2449_v55 = vld [vmem:[#allocation2 + $0x1f90] sm:$0xff] }
 0x253   : > { %v2344_v34 = vld [vmem:[#allocation2 + $0x1c48] sm:$0xff]  ;;  %2822 = vmatpush.msra.mxu3 %v2544_v59  ;;  %v2313_v59 = vld [vmem:[#allocation2 + $0x1b50] sm:$0xff] }
 0x254   : > { %v2408_v60 = vld [vmem:[#allocation2 + $0x1e48] sm:$0xff]  ;;  %2764 = vmatpush.msra.mxu0 %v2344_v34  ;;  %v2377_v34 = vld [vmem:[#allocation2 + $0x1d50] sm:$0xff] }
 0x255   : > { %v2472_v62 = vld [vmem:[#allocation2 + $0x2048] sm:$0xff]  ;;  %2784 = vmatpush.msra.mxu1 %v2408_v60  ;;  %v2245_v60 = vld [vmem:[#allocation2 + $0x1930] sm:$0xff] }
 0x256   : > { %v2540_v63 = vld [vmem:[#allocation2 + $0x2268] sm:$0xff]  ;;  %2804 = vmatpush.msra.mxu2 %v2472_v62  ;;  %v2373_v62 = vld [vmem:[#allocation2 + $0x1d30] sm:$0xff] }
 0x257   : > { %v2340_v2 = vld [vmem:[#allocation2 + $0x1c28] sm:$0xff]  ;;  %2823 = vmatpush.msra.mxu3 %v2540_v63  ;;  %v2441_v63 = vld [vmem:[#allocation2 + $0x1f50] sm:$0xff] }
 0x258   : > { %v2404_v4 = vld [vmem:[#allocation2 + $0x1e28] sm:$0xff]  ;;  %2765 = vmatpush.msra.mxu0 %v2340_v2  ;;  %v2241_v2 = vld [vmem:[#allocation2 + $0x1910] sm:$0xff] }
 0x259   : > { %v2468_v37 = vld [vmem:[#allocation2 + $0x2028] sm:$0xff]  ;;  %2785 = vmatpush.msra.mxu1 %v2404_v4  ;;  %v2305_v4 = vld [vmem:[#allocation2 + $0x1b10] sm:$0xff] }
 0x25a   : > { %v2536_v6 = vld [vmem:[#allocation2 + $0x2248] sm:$0xff]  ;;  %2805 = vmatpush.msra.mxu2 %v2468_v37  ;;  %v2369_v37 = vld [vmem:[#allocation2 + $0x1d10] sm:$0xff] }
 0x25b   : > { %v2336_v5 = vld [vmem:[#allocation2 + $0x1c08] sm:$0xff]  ;;  %2824 = vmatpush.msra.mxu3 %v2536_v6  ;;  %v2437_v6 = vld [vmem:[#allocation2 + $0x1f30] sm:$0xff] }
 0x25c   : > { %v2400_v9 = vld [vmem:[#allocation2 + $0x1e08] sm:$0xff]  ;;  %2766 = vmatpush.msra.mxu0 %v2336_v5  ;;  %v2237_v5 = vld [vmem:[#allocation2 + $0x18f0] sm:$0xff] }
 0x25d   : > { %v2464_v11 = vld [vmem:[#allocation2 + $0x2008] sm:$0xff]  ;;  %2786 = vmatpush.msra.mxu1 %v2400_v9  ;;  %2767 = vmatmul.f32.vlgmr.msra.gmra.mxu0 %v5630_v29  ;;  %v2301_v9 = vld [vmem:[#allocation2 + $0x1af0] sm:$0xff] }
 0x25e   : > { %v2532_v15 = vld [vmem:[#allocation2 + $0x2228] sm:$0xff]  ;;  %2806 = vmatpush.msra.mxu2 %v2464_v11  ;;  %2831 = vmatpush.msrb.mxu0 %v2269_v16  ;;  %v2365_v11 = vld [vmem:[#allocation2 + $0x1cf0] sm:$0xff] }
 0x25f   : > { %2825 = vmatpush.msra.mxu3 %v2532_v15  ;;  %v2528_v27 = vld [vmem:[#allocation2 + $0x2208] sm:$0xff]  ;;  %2807 = vmatmul.f32.vlgmr.msra.gmra.mxu2 %v5653_v10  ;;  %v2433_v15 = vld [vmem:[#allocation2 + $0x1f10] sm:$0xff] }
 0x260   : > { %2851 = vmatpush.msrb.mxu1 %v2333_v18  ;;  %2871 = vmatpush.msrb.mxu2 %v2397_v19  ;;  %v2233_v16 = vld [vmem:[#allocation2 + $0x18d0] sm:$0xff] }
 0x261   : > { %2826 = vmatpush.msra.mxu3 %v2528_v27  ;;  %2832 = vmatpush.msrb.mxu0 %v2265_v28  ;;  %v2297_v18 = vld [vmem:[#allocation2 + $0x1ad0] sm:$0xff] }
 0x262   : > { %2827 = vmatmul.f32.vlgmr.msra.gmra.mxu3 %v5657_v22  ;;  %2852 = vmatpush.msrb.mxu1 %v2329_v43  ;;  %v2361_v19 = vld [vmem:[#allocation2 + $0x1cd0] sm:$0xff] }
 0x263   : > { %2872 = vmatpush.msrb.mxu2 %v2393_v32  ;;  %2891 = vmatpush.msrb.mxu3 %v2461_v35  ;;  %v2429_v27 = vld [vmem:[#allocation2 + $0x1ef0] sm:$0xff] }
 0x264   : > { %2787 = vmatmul.f32.vlgmr.msra.gmra.mxu1 %v5640_v46  ;;  %2833 = vmatpush.msrb.mxu0 %v2261_v36  ;;  %v2229_v28 = vld [vmem:[#allocation2 + $0x18b0] sm:$0xff]  ;;  %v2075_v36 = vpop.f32.mrf.mxu2 }
 0x265   : > { %2853 = vmatpush.msrb.mxu1 %v2325_v38  ;;  %2873 = vmatpush.msrb.mxu2 %v2389_v39  ;;  %v2293_v43 = vld [vmem:[#allocation2 + $0x1ab0] sm:$0xff] }
 0x266   : > { %2892 = vmatpush.msrb.mxu3 %v2457_v41  ;;  %2834 = vmatpush.msrb.mxu0 %v2257_v44  ;;  %v2357_v32 = vld [vmem:[#allocation2 + $0x1cb0] sm:$0xff] }
 0x267   : > { %2854 = vmatpush.msrb.mxu1 %v2321_v47  ;;  %2874 = vmatpush.msrb.mxu2 %v2385_v49  ;;  %v2425_v35 = vld [vmem:[#allocation2 + $0x1ed0] sm:$0xff] }
 0x268   : > { %2893 = vmatpush.msrb.mxu3 %v2453_v51  ;;  %2835 = vmatpush.msrb.mxu0 %v2253_v52  ;;  %v2225_v38 = vld [vmem:[#allocation2 + $0x1890] sm:$0xff]  ;;  %v2095_v51 = vpop.f32.mrf.mxu3 }
 0x269   : > { %2855 = vmatpush.msrb.mxu1 %v2317_v53  ;;  %2875 = vmatpush.msrb.mxu2 %v2381_v3  ;;  %v2289_v39 = vld [vmem:[#allocation2 + $0x1a90] sm:$0xff]  ;;  %v2096_v3 = vadd.f32 %v2095_v51, %v2075_v36  ;;  %v2330_v51 = vld [vmem:[#allocation2 + $0x1bd8] sm:$0xff] }
 0x26a   : > { %2894 = vmatpush.msrb.mxu3 %v2449_v55  ;;  %2836 = vmatpush.msrb.mxu0 %v2249_v58  ;;  %v2353_v41 = vld [vmem:[#allocation2 + $0x1c90] sm:$0xff] }
 0x26b   : > { %2856 = vmatpush.msrb.mxu1 %v2313_v59  ;;  %2876 = vmatpush.msrb.mxu2 %v2377_v34  ;;  %v2421_v44 = vld [vmem:[#allocation2 + $0x1eb0] sm:$0xff]  ;;  %v2115_v59 = vpop.f32.mrf.mxu0 }
 0x26c   : > { %2895 = vmatpush.msrb.mxu3 %v2445_v8  ;;  %2837 = vmatpush.msrb.mxu0 %v2245_v60  ;;  %v2221_v47 = vld [vmem:[#allocation2 + $0x1870] sm:$0xff]  ;;  %v2116_v60 = vadd.f32 %v2115_v59, %v2096_v3  ;;  %v2258_v3 = vld [vmem:[#allocation2 + $0x1998] sm:$0xff] }
 0x26d   : > { %2857 = vmatpush.msrb.mxu1 %v2309_v13  ;;  %2877 = vmatpush.msrb.mxu2 %v2373_v62  ;;  %v2285_v49 = vld [vmem:[#allocation2 + $0x1a70] sm:$0xff] }
 0x26e   : > { %2896 = vmatpush.msrb.mxu3 %v2441_v63  ;;  %2838 = vmatpush.msrb.mxu0 %v2241_v2  ;;  %v2349_v52 = vld [vmem:[#allocation2 + $0x1c70] sm:$0xff] }
 0x26f   : > { %2858 = vmatpush.msrb.mxu1 %v2305_v4  ;;  %2878 = vmatpush.msrb.mxu2 %v2369_v37  ;;  %v2417_v53 = vld [vmem:[#allocation2 + $0x1e90] sm:$0xff]  ;;  %v2135_v4 = vpop.f32.mrf.mxu1 }
 0x270   : > { %2897 = vmatpush.msrb.mxu3 %v2437_v6  ;;  %2839 = vmatpush.msrb.mxu0 %v2237_v5  ;;  %v2217_v55 = vld [vmem:[#allocation2 + $0x1850] sm:$0xff]  ;;  %v2136_v5 = vadd.f32 %v2135_v4, %v2116_v60  ;;  %v2246_v4 = vld [vmem:[#allocation2 + $0x1938] sm:$0xff] }
 0x271   : > { %2859 = vmatpush.msrb.mxu1 %v2301_v9  ;;  %2879 = vmatpush.msrb.mxu2 %v2365_v11  ;;  %v2281_v58 = vld [vmem:[#allocation2 + $0x1a50] sm:$0xff]  ;;  %v2155_v9 = vpop.f32.mrf.mxu2 }
 0x272   : > { %2898 = vmatpush.msrb.mxu3 %v2433_v15  ;;  %2840 = vmatpush.msrb.mxu0 %v2233_v16  ;;  %v2345_v34 = vld [vmem:[#allocation2 + $0x1c50] sm:$0xff] }
 0x273   : > { %2860 = vmatpush.msrb.mxu1 %v2297_v18  ;;  %2880 = vmatpush.msrb.mxu2 %v2361_v19  ;;  %v2413_v8 = vld [vmem:[#allocation2 + $0x1e70] sm:$0xff]  ;;  %v2156_v19 = vadd.f32 %v2155_v9, %v2136_v5  ;;  %v2242_v9 = vld [vmem:[#allocation2 + $0x1918] sm:$0xff] }
 0x274   : > { %2899 = vmatpush.msrb.mxu3 %v2429_v27  ;;  %2841 = vmatpush.msrb.mxu0 %v2229_v28  ;;  %v2213_v13 = vld [vmem:[#allocation2 + $0x1830] sm:$0xff]  ;;  %v2270_v27 = vld [vmem:[#allocation2 + $0x19f8] sm:$0xff] }
 0x275   : > { %2861 = vmatpush.msrb.mxu1 %v2293_v43  ;;  %2881 = vmatpush.msrb.mxu2 %v2357_v32  ;;  %v2277_v62 = vld [vmem:[#allocation2 + $0x1a30] sm:$0xff]  ;;  %v2175_v43 = vpop.f32.mrf.mxu3 }
 0x276   : > { %2900 = vmatpush.msrb.mxu3 %v2425_v35  ;;  %2842 = vmatpush.msrb.mxu0 %v2225_v38  ;;  %v2341_v63 = vld [vmem:[#allocation2 + $0x1c30] sm:$0xff]  ;;  %v2176_v36 = vadd.f32 %v2175_v43, %v2156_v19  ;;  %v2266_v38 = vld [vmem:[#allocation2 + $0x19d8] sm:$0xff] }
 0x277   : > { %2862 = vmatpush.msrb.mxu1 %v2289_v39  ;;  %2882 = vmatpush.msrb.mxu2 %v2353_v41  ;;  %v2409_v2 = vld [vmem:[#allocation2 + $0x1e50] sm:$0xff]  ;;  %v2334_v39 = vld [vmem:[#allocation2 + $0x1bf8] sm:$0xff] }
 0x278   : > { %2901 = vmatpush.msrb.mxu3 %v2421_v44  ;;  %2843 = vmatpush.msrb.mxu0 %v2221_v47  ;;  %v2209_v37 = vld [vmem:[#allocation2 + $0x1810] sm:$0xff]  ;;  %v5670_v47 = vadd.f32 %v2176_v36, %v5607_v30  ;;  %v2254_v30 = vld [vmem:[#allocation2 + $0x1978] sm:$0xff] }
 0x279   : > { %2863 = vmatpush.msrb.mxu1 %v2285_v49  ;;  %2883 = vmatpush.msrb.mxu2 %v2349_v52  ;;  %v2273_v6 = vld [vmem:[#allocation2 + $0x1a10] sm:$0xff]  ;;  %v2262_v49 = vld [vmem:[#allocation2 + $0x19b8] sm:$0xff] }
 0x27a   : > { %2902 = vmatpush.msrb.mxu3 %v2417_v53  ;;  %2844 = vmatpush.msrb.mxu0 %v2217_v55  ;;  %v2337_v11 = vld [vmem:[#allocation2 + $0x1c10] sm:$0xff]  ;;  %v2326_v55 = vld [vmem:[#allocation2 + $0x1bb8] sm:$0xff] }
 0x27b   : > { %2864 = vmatpush.msrb.mxu1 %v2281_v58  ;;  %2884 = vmatpush.msrb.mxu2 %v2345_v34  ;;  %v2405_v15 = vld [vmem:[#allocation2 + $0x1e30] sm:$0xff]  ;;  %v2322_v34 = vld [vmem:[#allocation2 + $0x1b98] sm:$0xff] }
 0x27c   : > { %2903 = vmatpush.msrb.mxu3 %v2413_v8  ;;  %2845 = vmatpush.msrb.mxu0 %v2213_v13  ;;  %v2525_v16 = vld [vmem:[#allocation2 + $0x21f0] sm:$0xff]  ;;  %v2250_v13 = vld [vmem:[#allocation2 + $0x1958] sm:$0xff] }
 0x27d   : > { %2865 = vmatpush.msrb.mxu1 %v2277_v62  ;;  %2885 = vmatpush.msrb.mxu2 %v2341_v63  ;;  %v2589_v18 = vld [vmem:[#allocation2 + $0x23f0] sm:$0xff]  ;;  %v2318_v62 = vld [vmem:[#allocation2 + $0x1b78] sm:$0xff] }
 0x27e   : > { %2904 = vmatpush.msrb.mxu3 %v2409_v2  ;;  %2846 = vmatpush.msrb.mxu0 %v2209_v37  ;;  %v2401_v28 = vld [vmem:[#allocation2 + $0x1e10] sm:$0xff]  ;;  %v2314_v37 = vld [vmem:[#allocation2 + $0x1b58] sm:$0xff] }
 0x27f   : > { %2866 = vmatpush.msrb.mxu1 %v2273_v6  ;;  %2886 = vmatpush.msrb.mxu2 %v2337_v11  ;;  %v2521_v32 = vld [vmem:[#allocation2 + $0x21d0] sm:$0xff]  ;;  %v2310_v11 = vld [vmem:[#allocation2 + $0x1b38] sm:$0xff] }
 0x280   : > { %2905 = vmatpush.msrb.mxu3 %v2405_v15  ;;  %v2585_v35 = vld [vmem:[#allocation2 + $0x23d0] sm:$0xff]  ;;  %2911 = vmatpush.msra.mxu0 %v2525_v16  ;;  %v2306_v19 = vld [vmem:[#allocation2 + $0x1b18] sm:$0xff] }
 0x281   : > { %2931 = vmatpush.msra.mxu1 %v2589_v18  ;;  %2951 = vmatpush.msra.mxu2 %v2270_v27  ;;  %v2517_v41 = vld [vmem:[#allocation2 + $0x21b0] sm:$0xff]  ;;  %v2238_v18 = vld [vmem:[#allocation2 + $0x18f8] sm:$0xff] }
 0x282   : > { %2906 = vmatpush.msrb.mxu3 %v2401_v28  ;;  %v2581_v44 = vld [vmem:[#allocation2 + $0x23b0] sm:$0xff]  ;;  %2912 = vmatpush.msra.mxu0 %v2521_v32  ;;  %v2234_v43 = vld [vmem:[#allocation2 + $0x18d8] sm:$0xff] }
 0x283   : > { %2932 = vmatpush.msra.mxu1 %v2585_v35  ;;  %2952 = vmatpush.msra.mxu2 %v2266_v38  ;;  %v2513_v52 = vld [vmem:[#allocation2 + $0x2190] sm:$0xff]  ;;  %v2302_v32 = vld [vmem:[#allocation2 + $0x1af8] sm:$0xff] }
 0x284   : > { %2971 = vmatpush.msra.mxu3 %v2334_v39  ;;  %v2577_v53 = vld [vmem:[#allocation2 + $0x2390] sm:$0xff]  ;;  %2913 = vmatpush.msra.mxu0 %v2517_v41  ;;  %v2230_v38 = vld [vmem:[#allocation2 + $0x18b8] sm:$0xff] }
 0x285   : > { %2933 = vmatpush.msra.mxu1 %v2581_v44  ;;  %2953 = vmatpush.msra.mxu2 %v2262_v49  ;;  %v2509_v58 = vld [vmem:[#allocation2 + $0x2170] sm:$0xff]  ;;  %v2298_v39 = vld [vmem:[#allocation2 + $0x1ad8] sm:$0xff] }
 0x286   : > { %2972 = vmatpush.msra.mxu3 %v2330_v51  ;;  %v2573_v59 = vld [vmem:[#allocation2 + $0x2370] sm:$0xff]  ;;  %2914 = vmatpush.msra.mxu0 %v2513_v52  ;;  %v2226_v49 = vld [vmem:[#allocation2 + $0x1898] sm:$0xff] }
 0x287   : > { %2934 = vmatpush.msra.mxu1 %v2577_v53  ;;  %2954 = vmatpush.msra.mxu2 %v2258_v3  ;;  %v2505_v8 = vld [vmem:[#allocation2 + $0x2150] sm:$0xff]  ;;  %v2294_v51 = vld [vmem:[#allocation2 + $0x1ab8] sm:$0xff] }
 0x288   : > { %2973 = vmatpush.msra.mxu3 %v2326_v55  ;;  %v2569_v60 = vld [vmem:[#allocation2 + $0x2350] sm:$0xff]  ;;  %2915 = vmatpush.msra.mxu0 %v2509_v58  ;;  %v2222_v3 = vld [vmem:[#allocation2 + $0x1878] sm:$0xff] }
 0x289   : > { %2935 = vmatpush.msra.mxu1 %v2573_v59  ;;  %2955 = vmatpush.msra.mxu2 %v2254_v30  ;;  %v2501_v63 = vld [vmem:[#allocation2 + $0x2130] sm:$0xff]  ;;  %v2290_v55 = vld [vmem:[#allocation2 + $0x1a98] sm:$0xff] }
 0x28a   : > { %2974 = vmatpush.msra.mxu3 %v2322_v34  ;;  %v2565_v2 = vld [vmem:[#allocation2 + $0x2330] sm:$0xff]  ;;  %2916 = vmatpush.msra.mxu0 %v2505_v8  ;;  %v2218_v30 = vld [vmem:[#allocation2 + $0x1858] sm:$0xff] }
 0x28b   : > { %2936 = vmatpush.msra.mxu1 %v2569_v60  ;;  %2956 = vmatpush.msra.mxu2 %v2250_v13  ;;  %v2497_v6 = vld [vmem:[#allocation2 + $0x2110] sm:$0xff]  ;;  %v2286_v34 = vld [vmem:[#allocation2 + $0x1a78] sm:$0xff] }
 0x28c   : > { %2975 = vmatpush.msra.mxu3 %v2318_v62  ;;  %v2561_v5 = vld [vmem:[#allocation2 + $0x2310] sm:$0xff]  ;;  %2917 = vmatpush.msra.mxu0 %v2501_v63  ;;  %v2214_v13 = vld [vmem:[#allocation2 + $0x1838] sm:$0xff] }
 0x28d   : > { %2937 = vmatpush.msra.mxu1 %v2565_v2  ;;  %2957 = vmatpush.msra.mxu2 %v2246_v4  ;;  %v2493_v15 = vld [vmem:[#allocation2 + $0x20f0] sm:$0xff]  ;;  %v2282_v62 = vld [vmem:[#allocation2 + $0x1a58] sm:$0xff] }
 0x28e   : > { %2976 = vmatpush.msra.mxu3 %v2314_v37  ;;  %v2557_v16 = vld [vmem:[#allocation2 + $0x22f0] sm:$0xff]  ;;  %2918 = vmatpush.msra.mxu0 %v2497_v6  ;;  %v2210_v4 = vld [vmem:[#allocation2 + $0x1818] sm:$0xff] }
 0x28f   : > { %2938 = vmatpush.msra.mxu1 %v2561_v5  ;;  %2958 = vmatpush.msra.mxu2 %v2242_v9  ;;  %v2489_v27 = vld [vmem:[#allocation2 + $0x20d0] sm:$0xff]  ;;  %v2278_v37 = vld [vmem:[#allocation2 + $0x1a38] sm:$0xff] }
 0x290   : > { %2977 = vmatpush.msra.mxu3 %v2310_v11  ;;  %v2553_v28 = vld [vmem:[#allocation2 + $0x22d0] sm:$0xff]  ;;  %2919 = vmatpush.msra.mxu0 %v2493_v15  ;;  %v2462_v6 = vld [vmem:[#allocation2 + $0x1ff8] sm:$0xff] }
 0x291   : > { %2939 = vmatpush.msra.mxu1 %v2557_v16  ;;  %2959 = vmatpush.msra.mxu2 %v2238_v18  ;;  %v2485_v35 = vld [vmem:[#allocation2 + $0x20b0] sm:$0xff]  ;;  %v2398_v5 = vld [vmem:[#allocation2 + $0x1df8] sm:$0xff] }
 0x292   : > { %2978 = vmatpush.msra.mxu3 %v2306_v19  ;;  %v2549_v36 = vld [vmem:[#allocation2 + $0x22b0] sm:$0xff]  ;;  %2920 = vmatpush.msra.mxu0 %v2489_v27  ;;  %v2526_v9 = vld [vmem:[#allocation2 + $0x21f8] sm:$0xff] }
 0x293   : > { %2940 = vmatpush.msra.mxu1 %v2553_v28  ;;  %2960 = vmatpush.msra.mxu2 %v2234_v43  ;;  %v2481_v41 = vld [vmem:[#allocation2 + $0x2090] sm:$0xff]  ;;  %v2274_v11 = vld [vmem:[#allocation2 + $0x1a18] sm:$0xff] }
 0x294   : > { %2979 = vmatpush.msra.mxu3 %v2302_v32  ;;  %2921 = vmatpush.msra.mxu0 %v2485_v35  ;;  %v2545_v44 = vld [vmem:[#allocation2 + $0x2290] sm:$0xff]  ;;  %v2394_v15 = vld [vmem:[#allocation2 + $0x1dd8] sm:$0xff] }
 0x295   : > { %2941 = vmatpush.msra.mxu1 %v2549_v36  ;;  %2961 = vmatpush.msra.mxu2 %v2230_v38  ;;  %v2477_v52 = vld [vmem:[#allocation2 + $0x2070] sm:$0xff]  ;;  %v2458_v16 = vld [vmem:[#allocation2 + $0x1fd8] sm:$0xff] }
 0x296   : > { %2980 = vmatpush.msra.mxu3 %v2298_v39  ;;  %2887 = vmatmul.f32.vlgmr.msrb.gmra.mxu2 %v5630_v29  ;;  %v2541_v53 = vld [vmem:[#allocation2 + $0x2270] sm:$0xff]  ;;  %v2522_v18 = vld [vmem:[#allocation2 + $0x21d8] sm:$0xff] }
 0x297   : > { %2922 = vmatpush.msra.mxu0 %v2481_v41  ;;  %2942 = vmatpush.msra.mxu1 %v2545_v44  ;;  %v2473_v58 = vld [vmem:[#allocation2 + $0x2050] sm:$0xff]  ;;  %v2590_v19 = vld [vmem:[#allocation2 + $0x23f8] sm:$0xff] }
 0x298   : > { %2962 = vmatpush.msra.mxu2 %v2226_v49  ;;  %2981 = vmatpush.msra.mxu3 %v2294_v51  ;;  %v2537_v59 = vld [vmem:[#allocation2 + $0x2250] sm:$0xff]  ;;  %v2390_v27 = vld [vmem:[#allocation2 + $0x1db8] sm:$0xff] }
 0x299   : > { %2847 = vmatmul.f32.vlgmr.msrb.gmra.mxu0 %v5635_v50  ;;  %2907 = vmatmul.f32.vlgmr.msrb.gmra.mxu3 %v5640_v46  ;;  %v2469_v8 = vld [vmem:[#allocation2 + $0x2030] sm:$0xff]  ;;  %v2454_v28 = vld [vmem:[#allocation2 + $0x1fb8] sm:$0xff] }
 0x29a   : > { %2923 = vmatpush.msra.mxu0 %v2477_v52  ;;  %2943 = vmatpush.msra.mxu1 %v2541_v53  ;;  %v2533_v60 = vld [vmem:[#allocation2 + $0x2230] sm:$0xff]  ;;  %v2518_v43 = vld [vmem:[#allocation2 + $0x21b8] sm:$0xff] }
 0x29b   : > { %2963 = vmatpush.msra.mxu2 %v2222_v3  ;;  %2982 = vmatpush.msra.mxu3 %v2290_v55  ;;  %v2465_v63 = vld [vmem:[#allocation2 + $0x2010] sm:$0xff]  ;;  %v2586_v32 = vld [vmem:[#allocation2 + $0x23d8] sm:$0xff] }
 0x29c   : > { %2867 = vmatmul.f32.vlgmr.msrb.gmra.mxu1 %v5645_v54  ;;  %2924 = vmatpush.msra.mxu0 %v2473_v58  ;;  %v2529_v2 = vld [vmem:[#allocation2 + $0x2210] sm:$0xff]  ;;  %v2386_v35 = vld [vmem:[#allocation2 + $0x1d98] sm:$0xff] }
 0x29d   : > { %2944 = vmatpush.msra.mxu1 %v2537_v59  ;;  %2964 = vmatpush.msra.mxu2 %v2218_v30  ;;  %v2450_v36 = vld [vmem:[#allocation2 + $0x1f98] sm:$0xff] }
 0x29e   : > { %2983 = vmatpush.msra.mxu3 %v2286_v34  ;;  %2925 = vmatpush.msra.mxu0 %v2469_v8  ;;  %v2514_v38 = vld [vmem:[#allocation2 + $0x2198] sm:$0xff] }
 0x29f   : > { %2945 = vmatpush.msra.mxu1 %v2533_v60  ;;  %2965 = vmatpush.msra.mxu2 %v2214_v13  ;;  %v2582_v39 = vld [vmem:[#allocation2 + $0x23b8] sm:$0xff] }
 0x2a0   : > { %2984 = vmatpush.msra.mxu3 %v2282_v62  ;;  %2926 = vmatpush.msra.mxu0 %v2465_v63  ;;  %v2382_v41 = vld [vmem:[#allocation2 + $0x1d78] sm:$0xff] }
 0x2a1   : > { %2946 = vmatpush.msra.mxu1 %v2529_v2  ;;  %2966 = vmatpush.msra.mxu2 %v2210_v4  ;;  %v2446_v44 = vld [vmem:[#allocation2 + $0x1f78] sm:$0xff] }
 0x2a2   : > { %2985 = vmatpush.msra.mxu3 %v2278_v37  ;;  %2927 = vmatmul.f32.vlgmr.msra.gmra.mxu0 %v5653_v10  ;;  %v2510_v49 = vld [vmem:[#allocation2 + $0x2178] sm:$0xff] }
 0x2a3   : > { %3011 = vmatpush.msrb.mxu1 %v2462_v6  ;;  %2991 = vmatpush.msrb.mxu0 %v2398_v5  ;;  %v2578_v51 = vld [vmem:[#allocation2 + $0x2398] sm:$0xff] }
 0x2a4   : > { %3031 = vmatpush.msrb.mxu2 %v2526_v9  ;;  %2986 = vmatpush.msra.mxu3 %v2274_v11  ;;  %v2378_v52 = vld [vmem:[#allocation2 + $0x1d58] sm:$0xff] }
 0x2a5   : > { %2947 = vmatmul.f32.vlgmr.msra.gmra.mxu1 %v5657_v22  ;;  %2992 = vmatpush.msrb.mxu0 %v2394_v15  ;;  %v2442_v53 = vld [vmem:[#allocation2 + $0x1f58] sm:$0xff] }
 0x2a6   : > { %3012 = vmatpush.msrb.mxu1 %v2458_v16  ;;  %3032 = vmatpush.msrb.mxu2 %v2522_v18  ;;  %v2506_v3 = vld [vmem:[#allocation2 + $0x2158] sm:$0xff] }
 0x2a7   : > { %3051 = vmatpush.msrb.mxu3 %v2590_v19  ;;  %2993 = vmatpush.msrb.mxu0 %v2390_v27  ;;  %v2574_v55 = vld [vmem:[#allocation2 + $0x2378] sm:$0xff] }
 0x2a8   : > { %3013 = vmatpush.msrb.mxu1 %v2454_v28  ;;  %3033 = vmatpush.msrb.mxu2 %v2518_v43  ;;  %v2374_v58 = vld [vmem:[#allocation2 + $0x1d38] sm:$0xff] }
 0x2a9   : > { %3052 = vmatpush.msrb.mxu3 %v2586_v32  ;;  %2994 = vmatpush.msrb.mxu0 %v2386_v35  ;;  %v2438_v59 = vld [vmem:[#allocation2 + $0x1f38] sm:$0xff] }
 0x2aa   : > { %3014 = vmatpush.msrb.mxu1 %v2450_v36  ;;  %3034 = vmatpush.msrb.mxu2 %v2514_v38  ;;  %v2502_v30 = vld [vmem:[#allocation2 + $0x2138] sm:$0xff] }
 0x2ab   : > { %3053 = vmatpush.msrb.mxu3 %v2582_v39  ;;  %2995 = vmatpush.msrb.mxu0 %v2382_v41  ;;  %v2570_v34 = vld [vmem:[#allocation2 + $0x2358] sm:$0xff] }
 0x2ac   : > { %3015 = vmatpush.msrb.mxu1 %v2446_v44  ;;  %3035 = vmatpush.msrb.mxu2 %v2510_v49  ;;  %v2370_v8 = vld [vmem:[#allocation2 + $0x1d18] sm:$0xff] }
 0x2ad   : > { %3054 = vmatpush.msrb.mxu3 %v2578_v51  ;;  %2996 = vmatpush.msrb.mxu0 %v2378_v52  ;;  %v2434_v60 = vld [vmem:[#allocation2 + $0x1f18] sm:$0xff] }
 0x2ae   : > { %3016 = vmatpush.msrb.mxu1 %v2442_v53  ;;  %3036 = vmatpush.msrb.mxu2 %v2506_v3  ;;  %v2498_v13 = vld [vmem:[#allocation2 + $0x2118] sm:$0xff] }
 0x2af   : > { %3055 = vmatpush.msrb.mxu3 %v2574_v55  ;;  %2997 = vmatpush.msrb.mxu0 %v2374_v58  ;;  %v2566_v62 = vld [vmem:[#allocation2 + $0x2338] sm:$0xff] }
 0x2b0   : > { %3017 = vmatpush.msrb.mxu1 %v2438_v59  ;;  %3037 = vmatpush.msrb.mxu2 %v2502_v30  ;;  %v2366_v63 = vld [vmem:[#allocation2 + $0x1cf8] sm:$0xff] }
 0x2b1   : > { %3056 = vmatpush.msrb.mxu3 %v2570_v34  ;;  %v2430_v2 = vld [vmem:[#allocation2 + $0x1ef8] sm:$0xff]  ;;  %2998 = vmatpush.msrb.mxu0 %v2370_v8  ;;  %v3160_v34 = vld [vmem:[#allocation2 + $0x25e0] sm:$0xff] }
 0x2b2   : > { %3018 = vmatpush.msrb.mxu1 %v2434_v60  ;;  %v2494_v4 = vld [vmem:[#allocation2 + $0x20f8] sm:$0xff]  ;;  %3038 = vmatpush.msrb.mxu2 %v2498_v13  ;;  %v3224_v8 = vld [vmem:[#allocation2 + $0x27e0] sm:$0xff] }
 0x2b3   : > { %v2562_v37 = vld [vmem:[#allocation2 + $0x2318] sm:$0xff]  ;;  %3057 = vmatpush.msrb.mxu3 %v2566_v62  ;;  %2999 = vmatpush.msrb.mxu0 %v2366_v63  ;;  %v3288_v60 = vld [vmem:[#allocation2 + $0x29e0] sm:$0xff] }
 0x2b4   : > { %v2362_v6 = vld [vmem:[#allocation2 + $0x1cd8] sm:$0xff]  ;;  %3019 = vmatpush.msrb.mxu1 %v2430_v2  ;;  %3039 = vmatpush.msrb.mxu2 %v2494_v4  ;;  %v3156_v13 = vld [vmem:[#allocation2 + $0x25c0] sm:$0xff] }
 0x2b5   : > { %v2426_v5 = vld [vmem:[#allocation2 + $0x1ed8] sm:$0xff]  ;;  %3058 = vmatpush.msrb.mxu3 %v2562_v37  ;;  %3000 = vmatpush.msrb.mxu0 %v2362_v6  ;;  %v3220_v62 = vld [vmem:[#allocation2 + $0x27c0] sm:$0xff] }
 0x2b6   : > { %v2490_v9 = vld [vmem:[#allocation2 + $0x20d8] sm:$0xff]  ;;  %3020 = vmatpush.msrb.mxu1 %v2426_v5  ;;  %2967 = vmatmul.f32.vlgmr.msra.gmra.mxu2 %v5635_v50  ;;  %v3284_v63 = vld [vmem:[#allocation2 + $0x29c0] sm:$0xff] }
 0x2b7   : > { %v2558_v11 = vld [vmem:[#allocation2 + $0x22f8] sm:$0xff]  ;;  %3040 = vmatpush.msrb.mxu2 %v2490_v9  ;;  %2987 = vmatmul.f32.vlgmr.msra.gmra.mxu3 %v5645_v54  ;;  %v3352_v2 = vld [vmem:[#allocation2 + $0x2be0] sm:$0xff] }
 0x2b8   : > { %v2358_v15 = vld [vmem:[#allocation2 + $0x1cb8] sm:$0xff]  ;;  %3059 = vmatpush.msrb.mxu3 %v2558_v11  ;;  %v3152_v4 = vld [vmem:[#allocation2 + $0x25a0] sm:$0xff] }
 0x2b9   : > { %v2422_v16 = vld [vmem:[#allocation2 + $0x1eb8] sm:$0xff]  ;;  %3001 = vmatpush.msrb.mxu0 %v2358_v15  ;;  %v3216_v37 = vld [vmem:[#allocation2 + $0x27a0] sm:$0xff] }
 0x2ba   : > { %v2486_v18 = vld [vmem:[#allocation2 + $0x20b8] sm:$0xff]  ;;  %3021 = vmatpush.msrb.mxu1 %v2422_v16  ;;  %v3280_v6 = vld [vmem:[#allocation2 + $0x29a0] sm:$0xff] }
 0x2bb   : > { %v2554_v19 = vld [vmem:[#allocation2 + $0x22d8] sm:$0xff]  ;;  %3041 = vmatpush.msrb.mxu2 %v2486_v18  ;;  %v3348_v5 = vld [vmem:[#allocation2 + $0x2bc0] sm:$0xff] }
 0x2bc   : > { %v2354_v27 = vld [vmem:[#allocation2 + $0x1c98] sm:$0xff]  ;;  %3060 = vmatpush.msrb.mxu3 %v2554_v19  ;;  %v3212_v9 = vld [vmem:[#allocation2 + $0x2780] sm:$0xff] }
 0x2bd   : > { %v2418_v28 = vld [vmem:[#allocation2 + $0x1e98] sm:$0xff]  ;;  %3002 = vmatpush.msrb.mxu0 %v2354_v27  ;;  %v3276_v11 = vld [vmem:[#allocation2 + $0x2980] sm:$0xff] }
 0x2be   : > { %v2482_v43 = vld [vmem:[#allocation2 + $0x2098] sm:$0xff]  ;;  %3022 = vmatpush.msrb.mxu1 %v2418_v28  ;;  %v3344_v15 = vld [vmem:[#allocation2 + $0x2ba0] sm:$0xff] }
 0x2bf   : > { %v2550_v32 = vld [vmem:[#allocation2 + $0x22b8] sm:$0xff]  ;;  %3042 = vmatpush.msrb.mxu2 %v2482_v43  ;;  %v3272_v16 = vld [vmem:[#allocation2 + $0x2960] sm:$0xff] }
 0x2c0   : > { %v2350_v35 = vld [vmem:[#allocation2 + $0x1c78] sm:$0xff]  ;;  %3061 = vmatpush.msrb.mxu3 %v2550_v32  ;;  %v3340_v18 = vld [vmem:[#allocation2 + $0x2b80] sm:$0xff] }
 0x2c1   : > { %v2414_v36 = vld [vmem:[#allocation2 + $0x1e78] sm:$0xff]  ;;  %3003 = vmatpush.msrb.mxu0 %v2350_v35  ;;  %v3140_v19 = vld [vmem:[#allocation2 + $0x2540] sm:$0xff] }
 0x2c2   : > { %v2478_v38 = vld [vmem:[#allocation2 + $0x2078] sm:$0xff]  ;;  %3023 = vmatpush.msrb.mxu1 %v2414_v36  ;;  %v3204_v27 = vld [vmem:[#allocation2 + $0x2740] sm:$0xff] }
 0x2c3   : > { %v2546_v39 = vld [vmem:[#allocation2 + $0x2298] sm:$0xff]  ;;  %3043 = vmatpush.msrb.mxu2 %v2478_v38  ;;  %v3336_v28 = vld [vmem:[#allocation2 + $0x2b60] sm:$0xff] }
 0x2c4   : > { %v2346_v41 = vld [vmem:[#allocation2 + $0x1c58] sm:$0xff]  ;;  %3062 = vmatpush.msrb.mxu3 %v2546_v39  ;;  %v3136_v43 = vld [vmem:[#allocation2 + $0x2520] sm:$0xff] }
 0x2c5   : > { %v2410_v44 = vld [vmem:[#allocation2 + $0x1e58] sm:$0xff]  ;;  %3004 = vmatpush.msrb.mxu0 %v2346_v41  ;;  %v3200_v32 = vld [vmem:[#allocation2 + $0x2720] sm:$0xff] }
 0x2c6   : > { %v2474_v49 = vld [vmem:[#allocation2 + $0x2058] sm:$0xff]  ;;  %3024 = vmatpush.msrb.mxu1 %v2410_v44  ;;  %v3264_v35 = vld [vmem:[#allocation2 + $0x2920] sm:$0xff] }
 0x2c7   : > { %v2542_v51 = vld [vmem:[#allocation2 + $0x2278] sm:$0xff]  ;;  %3044 = vmatpush.msrb.mxu2 %v2474_v49  ;;  %v3332_v36 = vld [vmem:[#allocation2 + $0x2b40] sm:$0xff] }
 0x2c8   : > { %v2342_v52 = vld [vmem:[#allocation2 + $0x1c38] sm:$0xff]  ;;  %3063 = vmatpush.msrb.mxu3 %v2542_v51  ;;  %v3132_v38 = vld [vmem:[#allocation2 + $0x2500] sm:$0xff] }
 0x2c9   : > { %v2406_v53 = vld [vmem:[#allocation2 + $0x1e38] sm:$0xff]  ;;  %3005 = vmatpush.msrb.mxu0 %v2342_v52  ;;  %v3196_v39 = vld [vmem:[#allocation2 + $0x2700] sm:$0xff] }
 0x2ca   : > { %v2470_v3 = vld [vmem:[#allocation2 + $0x2038] sm:$0xff]  ;;  %3025 = vmatpush.msrb.mxu1 %v2406_v53  ;;  %v3260_v41 = vld [vmem:[#allocation2 + $0x2900] sm:$0xff] }
 0x2cb   : > { %v2538_v55 = vld [vmem:[#allocation2 + $0x2258] sm:$0xff]  ;;  %3045 = vmatpush.msrb.mxu2 %v2470_v3  ;;  %v3328_v44 = vld [vmem:[#allocation2 + $0x2b20] sm:$0xff] }
 0x2cc   : > { %v2338_v58 = vld [vmem:[#allocation2 + $0x1c18] sm:$0xff]  ;;  %3064 = vmatpush.msrb.mxu3 %v2538_v55  ;;  %v3128_v49 = vld [vmem:[#allocation2 + $0x24e0] sm:$0xff] }
 0x2cd   : > { %v2402_v59 = vld [vmem:[#allocation2 + $0x1e18] sm:$0xff]  ;;  %3006 = vmatpush.msrb.mxu0 %v2338_v58  ;;  %v3192_v51 = vld [vmem:[#allocation2 + $0x26e0] sm:$0xff] }
 0x2ce   : > { %v2466_v50 = vld [vmem:[#allocation2 + $0x2018] sm:$0xff]  ;;  %3026 = vmatpush.msrb.mxu1 %v2402_v59  ;;  %3007 = vmatmul.f32.vlgmr.msrb.gmra.mxu0 %v5630_v29  ;;  %v3144_v29 = vld [vmem:[#allocation2 + $0x2560] sm:$0xff] }
 0x2cf   : > { %v2534_v30 = vld [vmem:[#allocation2 + $0x2238] sm:$0xff]  ;;  %3046 = vmatpush.msrb.mxu2 %v2466_v50  ;;  %3484 = vmatpush.msra.mxu0 %v3160_v34  ;;  %v3256_v52 = vld [vmem:[#allocation2 + $0x28e0] sm:$0xff] }
 0x2d0   : > { %3065 = vmatpush.msrb.mxu3 %v2534_v30  ;;  %v2530_v54 = vld [vmem:[#allocation2 + $0x2218] sm:$0xff]  ;;  %3047 = vmatmul.f32.vlgmr.msrb.gmra.mxu2 %v5653_v10  ;;  %v3148_v10 = vld [vmem:[#allocation2 + $0x2580] sm:$0xff] }
 0x2d1   : > { %3504 = vmatpush.msra.mxu1 %v3224_v8  ;;  %3524 = vmatpush.msra.mxu2 %v3288_v60  ;;  %v3324_v53 = vld [vmem:[#allocation2 + $0x2b00] sm:$0xff] }
 0x2d2   : > { %3066 = vmatpush.msrb.mxu3 %v2530_v54  ;;  %3485 = vmatpush.msra.mxu0 %v3156_v13  ;;  %v3124_v3 = vld [vmem:[#allocation2 + $0x24c0] sm:$0xff] }
 0x2d3   : > { %3067 = vmatmul.f32.vlgmr.msrb.gmra.mxu3 %v5657_v22  ;;  %3505 = vmatpush.msra.mxu1 %v3220_v62  ;;  %v3208_v22 = vld [vmem:[#allocation2 + $0x2760] sm:$0xff] }
 0x2d4   : > { %3525 = vmatpush.msra.mxu2 %v3284_v63  ;;  %3544 = vmatpush.msra.mxu3 %v3352_v2  ;;  %v3188_v55 = vld [vmem:[#allocation2 + $0x26c0] sm:$0xff] }
 0x2d5   : > { %3027 = vmatmul.f32.vlgmr.msrb.gmra.mxu1 %v5640_v46  ;;  %3486 = vmatpush.msra.mxu0 %v3152_v4  ;;  %v3268_v46 = vld [vmem:[#allocation2 + $0x2940] sm:$0xff] }
 0x2d6   : > { %3506 = vmatpush.msra.mxu1 %v3216_v37  ;;  %3526 = vmatpush.msra.mxu2 %v3280_v6  ;;  %v3252_v58 = vld [vmem:[#allocation2 + $0x28c0] sm:$0xff] }
 0x2d7   : > { %3545 = vmatpush.msra.mxu3 %v3348_v5  ;;  %3487 = vmatpush.msra.mxu0 %v3148_v10  ;;  %v3320_v59 = vld [vmem:[#allocation2 + $0x2ae0] sm:$0xff] }
 0x2d8   : > { %3507 = vmatpush.msra.mxu1 %v3212_v9  ;;  %3527 = vmatpush.msra.mxu2 %v3276_v11  ;;  %v3120_v50 = vld [vmem:[#allocation2 + $0x24a0] sm:$0xff] }
 0x2d9   : > { %3546 = vmatpush.msra.mxu3 %v3344_v15  ;;  %3488 = vmatpush.msra.mxu0 %v3144_v29  ;;  %v3184_v30 = vld [vmem:[#allocation2 + $0x26a0] sm:$0xff] }
 0x2da   : > { %3508 = vmatpush.msra.mxu1 %v3208_v22  ;;  %3528 = vmatpush.msra.mxu2 %v3272_v16  ;;  %v3248_v34 = vld [vmem:[#allocation2 + $0x28a0] sm:$0xff] }
 0x2db   : > { %3547 = vmatpush.msra.mxu3 %v3340_v18  ;;  %3489 = vmatpush.msra.mxu0 %v3140_v19  ;;  %v3316_v8 = vld [vmem:[#allocation2 + $0x2ac0] sm:$0xff] }
 0x2dc   : > { %3509 = vmatpush.msra.mxu1 %v3204_v27  ;;  %3529 = vmatpush.msra.mxu2 %v3268_v46  ;;  %v3116_v60 = vld [vmem:[#allocation2 + $0x2480] sm:$0xff] }
 0x2dd   : > { %3548 = vmatpush.msra.mxu3 %v3336_v28  ;;  %3490 = vmatpush.msra.mxu0 %v3136_v43  ;;  %v3180_v54 = vld [vmem:[#allocation2 + $0x2680] sm:$0xff]  ;;  %v3161_v43 = vld [vmem:[#allocation2 + $0x25e8] sm:$0xff] }
 0x2de   : > { %3510 = vmatpush.msra.mxu1 %v3200_v32  ;;  %3530 = vmatpush.msra.mxu2 %v3264_v35  ;;  %v3244_v13 = vld [vmem:[#allocation2 + $0x2880] sm:$0xff] }
 0x2df   : > { %3549 = vmatpush.msra.mxu3 %v3332_v36  ;;  %3491 = vmatpush.msra.mxu0 %v3132_v38  ;;  %v3312_v62 = vld [vmem:[#allocation2 + $0x2aa0] sm:$0xff]  ;;  %v3157_v38 = vld [vmem:[#allocation2 + $0x25c8] sm:$0xff] }
 0x2e0   : > { %3511 = vmatpush.msra.mxu1 %v3196_v39  ;;  %3531 = vmatpush.msra.mxu2 %v3260_v41  ;;  %v3112_v63 = vld [vmem:[#allocation2 + $0x2460] sm:$0xff]  ;;  %v3225_v39 = vld [vmem:[#allocation2 + $0x27e8] sm:$0xff] }
 0x2e1   : > { %3550 = vmatpush.msra.mxu3 %v3328_v44  ;;  %3492 = vmatpush.msra.mxu0 %v3128_v49  ;;  %v3176_v2 = vld [vmem:[#allocation2 + $0x2660] sm:$0xff]  ;;  %v3153_v49 = vld [vmem:[#allocation2 + $0x25a8] sm:$0xff] }
 0x2e2   : > { %3512 = vmatpush.msra.mxu1 %v3192_v51  ;;  %3532 = vmatpush.msra.mxu2 %v3256_v52  ;;  %v3240_v4 = vld [vmem:[#allocation2 + $0x2860] sm:$0xff]  ;;  %v3221_v51 = vld [vmem:[#allocation2 + $0x27c8] sm:$0xff] }
 0x2e3   : > { %3551 = vmatpush.msra.mxu3 %v3324_v53  ;;  %3493 = vmatpush.msra.mxu0 %v3124_v3  ;;  %v3308_v37 = vld [vmem:[#allocation2 + $0x2a80] sm:$0xff]  ;;  %v3149_v3 = vld [vmem:[#allocation2 + $0x2588] sm:$0xff] }
 0x2e4   : > { %3513 = vmatpush.msra.mxu1 %v3188_v55  ;;  %3533 = vmatpush.msra.mxu2 %v3252_v58  ;;  %v3108_v6 = vld [vmem:[#allocation2 + $0x2440] sm:$0xff]  ;;  %v3217_v55 = vld [vmem:[#allocation2 + $0x27a8] sm:$0xff] }
 0x2e5   : > { %3552 = vmatpush.msra.mxu3 %v3320_v59  ;;  %3494 = vmatpush.msra.mxu0 %v3120_v50  ;;  %v3172_v5 = vld [vmem:[#allocation2 + $0x2640] sm:$0xff]  ;;  %v3145_v50 = vld [vmem:[#allocation2 + $0x2568] sm:$0xff] }
 0x2e6   : > { %3514 = vmatpush.msra.mxu1 %v3184_v30  ;;  %3534 = vmatpush.msra.mxu2 %v3248_v34  ;;  %v3236_v10 = vld [vmem:[#allocation2 + $0x2840] sm:$0xff]  ;;  %v3213_v30 = vld [vmem:[#allocation2 + $0x2788] sm:$0xff] }
 0x2e7   : > { %3553 = vmatpush.msra.mxu3 %v3316_v8  ;;  %3495 = vmatpush.msra.mxu0 %v3116_v60  ;;  %v3304_v9 = vld [vmem:[#allocation2 + $0x2a60] sm:$0xff]  ;;  %v3141_v60 = vld [vmem:[#allocation2 + $0x2548] sm:$0xff] }
 0x2e8   : > { %3515 = vmatpush.msra.mxu1 %v3180_v54  ;;  %3535 = vmatpush.msra.mxu2 %v3244_v13  ;;  %v3104_v11 = vld [vmem:[#allocation2 + $0x2420] sm:$0xff]  ;;  %v3209_v54 = vld [vmem:[#allocation2 + $0x2768] sm:$0xff] }
 0x2e9   : > { %3554 = vmatpush.msra.mxu3 %v3312_v62  ;;  %3496 = vmatpush.msra.mxu0 %v3112_v63  ;;  %v3168_v15 = vld [vmem:[#allocation2 + $0x2620] sm:$0xff]  ;;  %v3137_v63 = vld [vmem:[#allocation2 + $0x2528] sm:$0xff] }
 0x2ea   : > { %3516 = vmatpush.msra.mxu1 %v3176_v2  ;;  %3536 = vmatpush.msra.mxu2 %v3240_v4  ;;  %v3232_v29 = vld [vmem:[#allocation2 + $0x2820] sm:$0xff]  ;;  %v3205_v2 = vld [vmem:[#allocation2 + $0x2748] sm:$0xff] }
 0x2eb   : > { %3555 = vmatpush.msra.mxu3 %v3308_v37  ;;  %3497 = vmatpush.msra.mxu0 %v3108_v6  ;;  %v3300_v22 = vld [vmem:[#allocation2 + $0x2a40] sm:$0xff]  ;;  %v3133_v6 = vld [vmem:[#allocation2 + $0x2508] sm:$0xff] }
 0x2ec   : > { %3517 = vmatpush.msra.mxu1 %v3172_v5  ;;  %3537 = vmatpush.msra.mxu2 %v3236_v10  ;;  %v3100_v16 = vld [vmem:[#allocation2 + $0x2400] sm:$0xff]  ;;  %v3201_v5 = vld [vmem:[#allocation2 + $0x2728] sm:$0xff] }
 0x2ed   : > { %3556 = vmatpush.msra.mxu3 %v3304_v9  ;;  %v3164_v18 = vld [vmem:[#allocation2 + $0x2600] sm:$0xff]  ;;  %3498 = vmatpush.msra.mxu0 %v3104_v11  ;;  %v3129_v11 = vld [vmem:[#allocation2 + $0x24e8] sm:$0xff] }
 0x2ee   : > { %3518 = vmatpush.msra.mxu1 %v3168_v15  ;;  %v3228_v19 = vld [vmem:[#allocation2 + $0x2800] sm:$0xff]  ;;  %3538 = vmatpush.msra.mxu2 %v3232_v29  ;;  %v3197_v15 = vld [vmem:[#allocation2 + $0x2708] sm:$0xff] }
 0x2ef   : > { %v3296_v27 = vld [vmem:[#allocation2 + $0x2a20] sm:$0xff]  ;;  %3557 = vmatpush.msra.mxu3 %v3300_v22  ;;  %3499 = vmatpush.msra.mxu0 %v3100_v16 }
 0x2f0   : > { %v3416_v46 = vld [vmem:[#allocation2 + $0x2de0] sm:$0xff]  ;;  %3519 = vmatpush.msra.mxu1 %v3164_v18  ;;  %3539 = vmatpush.msra.mxu2 %v3228_v19  ;;  %v3125_v19 = vld [vmem:[#allocation2 + $0x24c8] sm:$0xff] }
 0x2f1   : > { %v3480_v28 = vld [vmem:[#allocation2 + $0x2fe0] sm:$0xff]  ;;  %3558 = vmatpush.msra.mxu3 %v3296_v27  ;;  %3564 = vmatpush.msrb.mxu0 %v3416_v46  ;;  %v3193_v27 = vld [vmem:[#allocation2 + $0x26e8] sm:$0xff]  ;;  %v5125_v46 = vld [vmem:[%s5473_s23 + $0x30] sm:$0x1f] }
 0x2f2   : > { %v3292_v32 = vld [vmem:[#allocation2 + $0x2a00] sm:$0xff]  ;;  %3584 = vmatpush.msrb.mxu1 %v3480_v28  ;;  %3604 = vmatpush.msrb.mxu2 %v3161_v43  ;;  %v3081_v28 = vrot.slane %v5125_v46, 5 }
 0x2f3   : > { %v3412_v35 = vld [vmem:[#allocation2 + $0x2dc0] sm:$0xff]  ;;  %3559 = vmatpush.msra.mxu3 %v3292_v32 }
 0x2f4   : > { %v3476_v36 = vld [vmem:[#allocation2 + $0x2fc0] sm:$0xff]  ;;  %3565 = vmatpush.msrb.mxu0 %v3412_v35  ;;  %3605 = vmatpush.msrb.mxu2 %v3157_v38  ;;  %v5126_v35 = vld [vmem:[%s5473_s23 + $0x48] sm:$0x1f] }
 0x2f5   : > { %v3408_v41 = vld [vmem:[#allocation2 + $0x2da0] sm:$0xff]  ;;  %3585 = vmatpush.msrb.mxu1 %v3476_v36  ;;  %3624 = vmatpush.msrb.mxu3 %v3225_v39  ;;  %v3084_v36 = vrot.slane %v5126_v35, 5  ;;  %v3121_v38 = vld [vmem:[#allocation2 + $0x24a8] sm:$0xff] }
 0x2f6   : > { %v3472_v44 = vld [vmem:[#allocation2 + $0x2fa0] sm:$0xff]  ;;  %3566 = vmatpush.msrb.mxu0 %v3408_v41  ;;  %3606 = vmatpush.msrb.mxu2 %v3153_v49  ;;  %v3189_v39 = vld [vmem:[#allocation2 + $0x26c8] sm:$0xff] }
 0x2f7   : > { %v3404_v52 = vld [vmem:[#allocation2 + $0x2d80] sm:$0xff]  ;;  %3586 = vmatpush.msrb.mxu1 %v3472_v44  ;;  %3625 = vmatpush.msrb.mxu3 %v3221_v51  ;;  %v5128_v51 = vld [vmem:[%s5473_s23 + $0x38] sm:$0x1f] }
 0x2f8   : > { %v3468_v53 = vld [vmem:[#allocation2 + $0x2f80] sm:$0xff]  ;;  %3567 = vmatpush.msrb.mxu0 %v3404_v52  ;;  %3607 = vmatpush.msrb.mxu2 %v3149_v3  ;;  %v3082_v52 = vrot.slane %v5128_v51, 5  ;;  %v3117_v3 = vld [vmem:[#allocation2 + $0x2488] sm:$0xff] }
 0x2f9   : > { %v3400_v58 = vld [vmem:[#allocation2 + $0x2d60] sm:$0xff]  ;;  %3587 = vmatpush.msrb.mxu1 %v3468_v53  ;;  %3626 = vmatpush.msrb.mxu3 %v3217_v55  ;;  %v5692_v55 = vpop.f32.mrf.mxu0 }
 0x2fa   : > { %v3464_v59 = vld [vmem:[#allocation2 + $0x2f60] sm:$0xff]  ;;  %3568 = vmatpush.msrb.mxu0 %v3400_v58  ;;  %3608 = vmatpush.msrb.mxu2 %v3145_v50  ;;  %v3185_v58 = vld [vmem:[#allocation2 + $0x26a8] sm:$0xff] }
 0x2fb   : > { %v3396_v34 = vld [vmem:[#allocation2 + $0x2d40] sm:$0xff]  ;;  %3588 = vmatpush.msrb.mxu1 %v3464_v59  ;;  %3627 = vmatpush.msrb.mxu3 %v3213_v30  ;;  %v5129_v59 = vld [vmem:[%s5473_s23 + $0x90] sm:$0x1f]  ;;  %v5130_v30 = vld [vmem:[%s5473_s23 + $0xa8] sm:$0x1f] }
 0x2fc   : > { %v3460_v8 = vld [vmem:[#allocation2 + $0x2f40] sm:$0xff]  ;;  %3569 = vmatpush.msrb.mxu0 %v3396_v34  ;;  %3609 = vmatpush.msrb.mxu2 %v3141_v60  ;;  %v5696_v50 = vsel %vm404_vm0, %v5129_v59, %v3081_v28  ;;  %v5701_v34 = vsel %vm404_vm0, %v5130_v30, %v3084_v36  ;;  %v5134_v36 = vld [vmem:[%s5473_s23 + $0xb0] sm:$0x1f]  ;;  %v3285_v59 = vld [vmem:[#allocation2 + $0x29c8] sm:$0xff] }
 0x2fd   : > { %v3392_v13 = vld [vmem:[#allocation2 + $0x2d20] sm:$0xff]  ;;  %3589 = vmatpush.msrb.mxu1 %v3460_v8  ;;  %3628 = vmatpush.msrb.mxu3 %v3209_v54  ;;  %v3113_v54 = vld [vmem:[#allocation2 + $0x2468] sm:$0xff] }
 0x2fe   : > { %v3456_v62 = vld [vmem:[#allocation2 + $0x2f20] sm:$0xff]  ;;  %3570 = vmatpush.msrb.mxu0 %v3392_v13  ;;  %3610 = vmatpush.msrb.mxu2 %v3137_v63  ;;  %v5703_v13 = vpop.f32.mrf.mxu1  ;;  %v5131_v63 = vld [vmem:[%s5473_s23 + $0x98] sm:$0x1f]  ;;  %v3349_v30 = vld [vmem:[#allocation2 + $0x2bc8] sm:$0xff] }
 0x2ff   : > { %v3388_v4 = vld [vmem:[#allocation2 + $0x2d00] sm:$0xff]  ;;  %3590 = vmatpush.msrb.mxu1 %v3456_v62  ;;  %3629 = vmatpush.msrb.mxu3 %v3205_v2  ;;  %v3181_v62 = vld [vmem:[#allocation2 + $0x2688] sm:$0xff]  ;;  %v5708_v2 = vsel %vm404_vm0, %v5131_v63, %v3082_v52 }
 0x300   : > { %v3452_v37 = vld [vmem:[#allocation2 + $0x2f00] sm:$0xff]  ;;  %3571 = vmatpush.msrb.mxu0 %v3388_v4  ;;  %3611 = vmatpush.msrb.mxu2 %v3133_v6  ;;  %v5710_v4 = vpop.f32.mrf.mxu2  ;;  %v3165_v52 = vld [vmem:[#allocation2 + $0x2608] sm:$0xff] }
 0x301   : > { %v3384_v10 = vld [vmem:[#allocation2 + $0x2ce0] sm:$0xff]  ;;  %3591 = vmatpush.msrb.mxu1 %v3452_v37  ;;  %3630 = vmatpush.msrb.mxu3 %v3201_v5  ;;  %v3109_v5 = vld [vmem:[#allocation2 + $0x2448] sm:$0xff]  ;;  %v5718_v35 = vpop.f32.mrf.mxu0 }
 0x302   : > { %v3448_v9 = vld [vmem:[#allocation2 + $0x2ee0] sm:$0xff]  ;;  %3572 = vmatpush.msrb.mxu0 %v3384_v10  ;;  %3612 = vmatpush.msrb.mxu2 %v3129_v11  ;;  %v3177_v10 = vld [vmem:[#allocation2 + $0x2668] sm:$0xff] }
 0x303   : > { %v5124_v29 = vld [vmem:[%s5473_s23 + $0x40] sm:$0x1f]  ;;  %3592 = vmatpush.msrb.mxu1 %v3448_v9  ;;  %3631 = vmatpush.msrb.mxu3 %v3197_v15  ;;  %v5132_v9 = vld [vmem:[%s5473_s23 + $0x50] sm:$0x1f]  ;;  %v3345_v63 = vld [vmem:[#allocation2 + $0x2ba8] sm:$0xff] }
 0x304   : > { %v3083_v22 = vrot.slane %v5124_v29, 5  ;;  %v3380_v16 = vld [vmem:[#allocation2 + $0x2cc0] sm:$0xff]  ;;  %3613 = vmatpush.msrb.mxu2 %v3125_v19  ;;  %3500 = vmatmul.f32.vlgmr.msra.gmra.mxu0 %v5696_v50  ;;  %v3085_v11 = vrot.slane %v5132_v9, 5  ;;  %v5133_v19 = vld [vmem:[%s5473_s23 + $0x58] sm:$0x1f] }
 0x305   : > { %v3444_v18 = vld [vmem:[#allocation2 + $0x2ec0] sm:$0xff]  ;;  %3573 = vmatpush.msrb.mxu0 %v3380_v16  ;;  %3632 = vmatpush.msrb.mxu3 %v3193_v27  ;;  %v3105_v16 = vld [vmem:[#allocation2 + $0x2428] sm:$0xff]  ;;  %v3086_v27 = vrot.slane %v5133_v19, 5 }
 0x306   : > { %v3376_v43 = vld [vmem:[#allocation2 + $0x2ca0] sm:$0xff]  ;;  %3593 = vmatpush.msrb.mxu1 %v3444_v18  ;;  %3614 = vmatpush.msrb.mxu2 %v3121_v38  ;;  %v3173_v18 = vld [vmem:[#allocation2 + $0x2648] sm:$0xff]  ;;  %v5722_v38 = vsel %vm404_vm0, %v5134_v36, %v3085_v11 }
 0x307   : > { %v3440_v32 = vld [vmem:[#allocation2 + $0x2ea0] sm:$0xff]  ;;  %3574 = vmatpush.msrb.mxu0 %v3376_v43  ;;  %3633 = vmatpush.msrb.mxu3 %v3189_v39  ;;  %v3101_v43 = vld [vmem:[#allocation2 + $0x2408] sm:$0xff] }
 0x308   : > { %v5127_v41 = vld [vmem:[%s5473_s23 + $0xa0] sm:$0x1f]  ;;  %3594 = vmatpush.msrb.mxu1 %v3440_v32  ;;  %3615 = vmatpush.msrb.mxu2 %v3117_v3  ;;  %v3169_v32 = vld [vmem:[#allocation2 + $0x2628] sm:$0xff]  ;;  %v5724_v51 = vpop.f32.mrf.mxu2 }
 0x309   : > { %v5689_v44 = vsel %vm404_vm0, %v5127_v41, %v3083_v22  ;;  %v3372_v49 = vld [vmem:[#allocation2 + $0x2c80] sm:$0xff]  ;;  %3634 = vmatpush.msrb.mxu3 %v3185_v58  ;;  %3520 = vmatmul.f32.vlgmr.msra.gmra.mxu1 %v5708_v2  ;;  %v5715_v22 = vpop.f32.mrf.mxu3  ;;  %v3353_v39 = vld [vmem:[#allocation2 + $0x2be8] sm:$0xff]  ;;  %v5730_v58 = vpop.f32.mrf.mxu1 }
 0x30a   : > { %v3436_v53 = vld [vmem:[#allocation2 + $0x2e80] sm:$0xff]  ;;  %3540 = vmatmul.f32.vlgmr.msra.gmra.mxu2 %v5689_v44  ;;  %3575 = vmatpush.msrb.mxu0 %v3372_v49  ;;  %v3289_v41 = vld [vmem:[#allocation2 + $0x29e8] sm:$0xff]  ;;  %v5736_v9 = vpop.f32.mrf.mxu0 }
 0x30b   : > { %v3368_v8 = vld [vmem:[#allocation2 + $0x2c60] sm:$0xff]  ;;  %3595 = vmatpush.msrb.mxu1 %v3436_v53  ;;  %3560 = vmatmul.f32.vlgmr.msra.gmra.mxu3 %v5701_v34  ;;  %v3417_v49 = vld [vmem:[#allocation2 + $0x2de8] sm:$0xff]  ;;  %v5135_v53 = vld [vmem:[%s5473_s23 + $0xb8] sm:$0x1f] }
 0x30c   : > { %v3432_v60 = vld [vmem:[#allocation2 + $0x2e60] sm:$0xff]  ;;  %3576 = vmatpush.msrb.mxu0 %v3368_v8  ;;  %3616 = vmatpush.msrb.mxu2 %v3113_v54  ;;  %v5728_v3 = vsel %vm404_vm0, %v5135_v53, %v3086_v27  ;;  %v3413_v8 = vld [vmem:[#allocation2 + $0x2dc8] sm:$0xff]  ;;  %v1073_v27 = vadd.f32 %v5597_v0, %v5595_v57 }
 0x30d   : > { %v3364_v37 = vld [vmem:[#allocation2 + $0x2c40] sm:$0xff]  ;;  %3596 = vmatpush.msrb.mxu1 %v3432_v60  ;;  %3635 = vmatpush.msrb.mxu3 %v3181_v62  ;;  %v3481_v60 = vld [vmem:[#allocation2 + $0x2fe8] sm:$0xff] }
 0x30e   : > { %v3428_v6 = vld [vmem:[#allocation2 + $0x2e40] sm:$0xff]  ;;  %3577 = vmatpush.msrb.mxu0 %v3364_v37  ;;  %3617 = vmatpush.msrb.mxu2 %v3109_v5  ;;  %v3281_v62 = vld [vmem:[#allocation2 + $0x29a8] sm:$0xff]  ;;  %v1093_v0 = vadd.f32 %v5599_v7, %v1073_v27 }
 0x30f   : > { %v3360_v15 = vld [vmem:[#allocation2 + $0x2c20] sm:$0xff]  ;;  %3597 = vmatpush.msrb.mxu1 %v3428_v6  ;;  %3636 = vmatpush.msrb.mxu3 %v3177_v10  ;;  %v3409_v37 = vld [vmem:[#allocation2 + $0x2da8] sm:$0xff] }
 0x310   : > { %v3424_v29 = vld [vmem:[#allocation2 + $0x2e20] sm:$0xff]  ;;  %3578 = vmatpush.msrb.mxu0 %v3360_v15  ;;  %3618 = vmatpush.msrb.mxu2 %v3105_v16  ;;  %v3477_v6 = vld [vmem:[#allocation2 + $0x2fc8] sm:$0xff]  ;;  %v1113_v7 = vadd.f32 %v5601_v17, %v1093_v0 }
 0x311   : > { %v3356_v46 = vld [vmem:[#allocation2 + $0x2c00] sm:$0xff]  ;;  %3598 = vmatpush.msrb.mxu1 %v3424_v29  ;;  %3637 = vmatpush.msrb.mxu3 %v3173_v18  ;;  %v5733_v54 = vpop.f32.mrf.mxu3  ;;  %v3277_v5 = vld [vmem:[#allocation2 + $0x2988] sm:$0xff] }
 0x312   : > { %v3420_v28 = vld [vmem:[#allocation2 + $0x2e00] sm:$0xff]  ;;  %3579 = vmatpush.msrb.mxu0 %v3356_v46  ;;  %3619 = vmatpush.msrb.mxu2 %v3101_v43  ;;  %v3341_v10 = vld [vmem:[#allocation2 + $0x2b88] sm:$0xff]  ;;  %v5740_v46 = vpop.f32.mrf.mxu1 }
 0x313   : > { %3599 = vmatpush.msrb.mxu1 %v3420_v28  ;;  %3638 = vmatpush.msrb.mxu3 %v3169_v32  ;;  %v3405_v11 = vld [vmem:[#allocation2 + $0x2d88] sm:$0xff]  ;;  %v5742_v32 = vpop.f32.mrf.mxu2 }
 0x314   : > { %3580 = vmatmul.f32.vlgmr.msrb.gmra.mxu0 %v5722_v38  ;;  %3684 = vmatpush.msra.mxu2 %v3417_v49  ;;  %v3473_v15 = vld [vmem:[#allocation2 + $0x2fa8] sm:$0xff] }
 0x315   : > { %3664 = vmatpush.msra.mxu1 %v3353_v39  ;;  %3644 = vmatpush.msra.mxu0 %v3289_v41  ;;  %v3273_v29 = vld [vmem:[#allocation2 + $0x2968] sm:$0xff] }
 0x316   : > { %3639 = vmatpush.msrb.mxu3 %v3165_v52  ;;  %3600 = vmatmul.f32.vlgmr.msrb.gmra.mxu1 %v5728_v3  ;;  %v3337_v16 = vld [vmem:[#allocation2 + $0x2b68] sm:$0xff] }
 0x317   : > { %3645 = vmatpush.msra.mxu0 %v3285_v59  ;;  %3665 = vmatpush.msra.mxu1 %v3349_v30  ;;  %v3401_v18 = vld [vmem:[#allocation2 + $0x2d68] sm:$0xff] }
 0x318   : > { %3685 = vmatpush.msra.mxu2 %v3413_v8  ;;  %3704 = vmatpush.msra.mxu3 %v3481_v60  ;;  %v3469_v19 = vld [vmem:[#allocation2 + $0x2f88] sm:$0xff] }
 0x319   : > { %3646 = vmatpush.msra.mxu0 %v3281_v62  ;;  %3666 = vmatpush.msra.mxu1 %v3345_v63  ;;  %v3269_v28 = vld [vmem:[#allocation2 + $0x2948] sm:$0xff]  ;;  %v5745_v53 = vpop.f32.mrf.mxu3  ;;  %v2848_v62 = vpop.f32.mrf.mxu0 }
 0x31a   : > { %3686 = vmatpush.msra.mxu2 %v3409_v37  ;;  %3705 = vmatpush.msra.mxu3 %v3477_v6  ;;  %v3333_v43 = vld [vmem:[#allocation2 + $0x2b48] sm:$0xff] }
 0x31b   : > { %3647 = vmatpush.msra.mxu0 %v3277_v5  ;;  %3667 = vmatpush.msra.mxu1 %v3341_v10  ;;  %v3397_v36 = vld [vmem:[#allocation2 + $0x2d48] sm:$0xff] }
 0x31c   : > { %3687 = vmatpush.msra.mxu2 %v3405_v11  ;;  %3706 = vmatpush.msra.mxu3 %v3473_v15  ;;  %v3465_v39 = vld [vmem:[#allocation2 + $0x2f68] sm:$0xff]  ;;  %v2868_v15 = vpop.f32.mrf.mxu1 }
 0x31d   : > { %3648 = vmatpush.msra.mxu0 %v3273_v29  ;;  %3668 = vmatpush.msra.mxu1 %v3337_v16  ;;  %v3265_v41 = vld [vmem:[#allocation2 + $0x2928] sm:$0xff] }
 0x31e   : > { %3688 = vmatpush.msra.mxu2 %v3401_v18  ;;  %3707 = vmatpush.msra.mxu3 %v3469_v19  ;;  %v3329_v49 = vld [vmem:[#allocation2 + $0x2b28] sm:$0xff]  ;;  %v2869_v18 = vadd.f32 %v2868_v15, %v2848_v62  ;;  %v2888_v19 = vpop.f32.mrf.mxu2 }
 0x31f   : > { %3649 = vmatpush.msra.mxu0 %v3269_v28  ;;  %3669 = vmatpush.msra.mxu1 %v3333_v43  ;;  %v3393_v52 = vld [vmem:[#allocation2 + $0x2d28] sm:$0xff] }
 0x320   : > { %v3461_v57 = vld [vmem:[#allocation2 + $0x2f48] sm:$0xff]  ;;  %3689 = vmatpush.msra.mxu2 %v3397_v36  ;;  %3708 = vmatpush.msra.mxu3 %v3465_v39  ;;  %v2889_v17 = vadd.f32 %v2888_v19, %v2869_v18  ;;  %v1133_v39 = vadd.f32 %v5603_v24, %v1113_v7 }
 0x321   : > { %v3261_v59 = vld [vmem:[#allocation2 + $0x2908] sm:$0xff]  ;;  %3650 = vmatpush.msra.mxu0 %v3265_v41  ;;  %3670 = vmatpush.msra.mxu1 %v3329_v49  ;;  %v2928_v62 = vpop.f32.mrf.mxu0 }
 0x322   : > { %v3325_v30 = vld [vmem:[#allocation2 + $0x2b08] sm:$0xff]  ;;  %3690 = vmatpush.msra.mxu2 %v3393_v52  ;;  %3709 = vmatpush.msra.mxu3 %v3461_v57  ;;  %v2908_v52 = vpop.f32.mrf.mxu3  ;;  %v1153_v24 = vadd.f32 %v5605_v33, %v1133_v39  ;;  %v3226_v39 = vld [vmem:[#allocation2 + $0x27f0] sm:$0xff] }
 0x323   : > { %v3389_v8 = vld [vmem:[#allocation2 + $0x2d08] sm:$0xff]  ;;  %3651 = vmatpush.msra.mxu0 %v3261_v59  ;;  %3671 = vmatpush.msra.mxu1 %v3325_v30  ;;  %v2909_v59 = vadd.f32 %v2908_v52, %v2889_v17  ;;  %v3162_v17 = vld [vmem:[#allocation2 + $0x25f0] sm:$0xff] }
 0x324   : > { %v3457_v60 = vld [vmem:[#allocation2 + $0x2f28] sm:$0xff]  ;;  %3691 = vmatpush.msra.mxu2 %v3389_v8  ;;  %v2948_v7 = vpop.f32.mrf.mxu1  ;;  %3640 = vmatmul.f32.vlgmr.msrb.gmra.mxu3 %v5708_v2  ;;  %v3158_v52 = vld [vmem:[#allocation2 + $0x25d0] sm:$0xff] }
 0x325   : > { %v3257_v63 = vld [vmem:[#allocation2 + $0x28e8] sm:$0xff]  ;;  %3710 = vmatpush.msra.mxu3 %v3457_v60  ;;  %3620 = vmatmul.f32.vlgmr.msrb.gmra.mxu2 %v5696_v50 }
 0x326   : > { %v3321_v37 = vld [vmem:[#allocation2 + $0x2ae8] sm:$0xff]  ;;  %3652 = vmatpush.msra.mxu0 %v3257_v63 }
 0x327   : > { %v3385_v6 = vld [vmem:[#allocation2 + $0x2ce8] sm:$0xff]  ;;  %3672 = vmatpush.msra.mxu1 %v3321_v37 }
 0x328   : > { %v3453_v5 = vld [vmem:[#allocation2 + $0x2f08] sm:$0xff]  ;;  %3692 = vmatpush.msra.mxu2 %v3385_v6  ;;  %v2929_v6 = vadd.f32 %v2928_v62, %v2909_v59  ;;  %v3354_v59 = vld [vmem:[#allocation2 + $0x2bf0] sm:$0xff] }
 0x329   : > { %v3253_v10 = vld [vmem:[#allocation2 + $0x28c8] sm:$0xff]  ;;  %3711 = vmatpush.msra.mxu3 %v3453_v5  ;;  %v3350_v62 = vld [vmem:[#allocation2 + $0x2bd0] sm:$0xff] }
 0x32a   : > { %v3317_v11 = vld [vmem:[#allocation2 + $0x2ac8] sm:$0xff]  ;;  %3653 = vmatpush.msra.mxu0 %v3253_v10  ;;  %v2180_v10 = vadd.f32 %v5662_v45, %v1153_v24  ;;  %v3150_v24 = vld [vmem:[#allocation2 + $0x2590] sm:$0xff] }
 0x32b   : > { %v3381_v29 = vld [vmem:[#allocation2 + $0x2cc8] sm:$0xff]  ;;  %3673 = vmatpush.msra.mxu1 %v3317_v11 }
 0x32c   : > { %v3449_v16 = vld [vmem:[#allocation2 + $0x2ee8] sm:$0xff]  ;;  %3693 = vmatpush.msra.mxu2 %v3381_v29  ;;  %v2949_v29 = vadd.f32 %v2948_v7, %v2929_v6  ;;  %v3346_v6 = vld [vmem:[#allocation2 + $0x2bb0] sm:$0xff] }
 0x32d   : > { %v3249_v27 = vld [vmem:[#allocation2 + $0x28a8] sm:$0xff]  ;;  %3712 = vmatpush.msra.mxu3 %v3449_v16  ;;  %v3210_v7 = vld [vmem:[#allocation2 + $0x2770] sm:$0xff] }
 0x32e   : > { %v3313_v28 = vld [vmem:[#allocation2 + $0x2aa8] sm:$0xff]  ;;  %3654 = vmatpush.msra.mxu0 %v3249_v27  ;;  %v5753_v27 = vadd.f32 %v2949_v29, %v2180_v10  ;;  %v3274_v10 = vld [vmem:[#allocation2 + $0x2970] sm:$0xff] }
 0x32f   : > { %v3377_v43 = vld [vmem:[#allocation2 + $0x2ca8] sm:$0xff]  ;;  %3674 = vmatpush.msra.mxu1 %v3313_v28  ;;  %v3206_v29 = vld [vmem:[#allocation2 + $0x2750] sm:$0xff] }
 0x330   : > { %v3445_v36 = vld [vmem:[#allocation2 + $0x2ec8] sm:$0xff]  ;;  %3694 = vmatpush.msra.mxu2 %v3377_v43 }
 0x331   : > { %v3245_v41 = vld [vmem:[#allocation2 + $0x2888] sm:$0xff]  ;;  %3713 = vmatpush.msra.mxu3 %v3445_v36 }
 0x332   : > { %v3309_v49 = vld [vmem:[#allocation2 + $0x2a88] sm:$0xff]  ;;  %3655 = vmatpush.msra.mxu0 %v3245_v41  ;;  %v3290_v41 = vld [vmem:[#allocation2 + $0x29f0] sm:$0xff] }
 0x333   : > { %v3373_v57 = vld [vmem:[#allocation2 + $0x2c88] sm:$0xff]  ;;  %3675 = vmatpush.msra.mxu1 %v3309_v49 }
 0x334   : > { %v3441_v0 = vld [vmem:[#allocation2 + $0x2ea8] sm:$0xff]  ;;  %3695 = vmatpush.msra.mxu2 %v3373_v57  ;;  %v3222_v57 = vld [vmem:[#allocation2 + $0x27d0] sm:$0xff] }
 0x335   : > { %v3241_v30 = vld [vmem:[#allocation2 + $0x2868] sm:$0xff]  ;;  %3714 = vmatpush.msra.mxu3 %v3441_v0  ;;  %v3286_v0 = vld [vmem:[#allocation2 + $0x29d0] sm:$0xff] }
 0x336   : > { %v3305_v8 = vld [vmem:[#allocation2 + $0x2a68] sm:$0xff]  ;;  %3656 = vmatpush.msra.mxu0 %v3241_v30  ;;  %v3154_v30 = vld [vmem:[#allocation2 + $0x25b0] sm:$0xff] }
 0x337   : > { %v3369_v60 = vld [vmem:[#allocation2 + $0x2c68] sm:$0xff]  ;;  %3676 = vmatpush.msra.mxu1 %v3305_v8  ;;  %v3218_v8 = vld [vmem:[#allocation2 + $0x27b0] sm:$0xff] }
 0x338   : > { %v3437_v63 = vld [vmem:[#allocation2 + $0x2e88] sm:$0xff]  ;;  %3696 = vmatpush.msra.mxu2 %v3369_v60  ;;  %v3282_v60 = vld [vmem:[#allocation2 + $0x29b0] sm:$0xff] }
 0x339   : > { %v3237_v37 = vld [vmem:[#allocation2 + $0x2848] sm:$0xff]  ;;  %3715 = vmatpush.msra.mxu3 %v3437_v63  ;;  %v3214_v63 = vld [vmem:[#allocation2 + $0x2790] sm:$0xff] }
 0x33a   : > { %v3301_v5 = vld [vmem:[#allocation2 + $0x2a48] sm:$0xff]  ;;  %3657 = vmatpush.msra.mxu0 %v3237_v37  ;;  %v3278_v37 = vld [vmem:[#allocation2 + $0x2990] sm:$0xff] }
 0x33b   : > { %v3365_v11 = vld [vmem:[#allocation2 + $0x2c48] sm:$0xff]  ;;  %3677 = vmatpush.msra.mxu1 %v3301_v5  ;;  %v3146_v5 = vld [vmem:[#allocation2 + $0x2570] sm:$0xff] }
 0x33c   : > { %v3433_v15 = vld [vmem:[#allocation2 + $0x2e68] sm:$0xff]  ;;  %3697 = vmatpush.msra.mxu2 %v3365_v11  ;;  %v3342_v11 = vld [vmem:[#allocation2 + $0x2b90] sm:$0xff] }
 0x33d   : > { %v3233_v33 = vld [vmem:[#allocation2 + $0x2828] sm:$0xff]  ;;  %3716 = vmatpush.msra.mxu3 %v3433_v15  ;;  %v3142_v15 = vld [vmem:[#allocation2 + $0x2550] sm:$0xff] }
 0x33e   : > { %v3297_v16 = vld [vmem:[#allocation2 + $0x2a28] sm:$0xff]  ;;  %3658 = vmatpush.msra.mxu0 %v3233_v33  ;;  %v3270_v33 = vld [vmem:[#allocation2 + $0x2950] sm:$0xff] }
 0x33f   : > { %v3361_v18 = vld [vmem:[#allocation2 + $0x2c28] sm:$0xff]  ;;  %3678 = vmatpush.msra.mxu1 %v3297_v16  ;;  %v3338_v16 = vld [vmem:[#allocation2 + $0x2b70] sm:$0xff] }
 0x340   : > { %v3429_v19 = vld [vmem:[#allocation2 + $0x2e48] sm:$0xff]  ;;  %3698 = vmatpush.msra.mxu2 %v3361_v18  ;;  %v3138_v18 = vld [vmem:[#allocation2 + $0x2530] sm:$0xff] }
 0x341   : > { %v3229_v28 = vld [vmem:[#allocation2 + $0x2808] sm:$0xff]  ;;  %3717 = vmatpush.msra.mxu3 %v3429_v19  ;;  %v3202_v19 = vld [vmem:[#allocation2 + $0x2730] sm:$0xff] }
 0x342   : > { %v3293_v45 = vld [vmem:[#allocation2 + $0x2a08] sm:$0xff]  ;;  %3659 = vmatpush.msra.mxu0 %v3229_v28  ;;  %v3266_v28 = vld [vmem:[#allocation2 + $0x2930] sm:$0xff] }
 0x343   : > { %v3357_v43 = vld [vmem:[#allocation2 + $0x2c08] sm:$0xff]  ;;  %3679 = vmatpush.msra.mxu1 %v3293_v45  ;;  %3660 = vmatmul.f32.vlgmr.msra.gmra.mxu0 %v5689_v44  ;;  %v3334_v45 = vld [vmem:[#allocation2 + $0x2b50] sm:$0xff] }
 0x344   : > { %v3425_v36 = vld [vmem:[#allocation2 + $0x2e28] sm:$0xff]  ;;  %3699 = vmatpush.msra.mxu2 %v3357_v43  ;;  %3724 = vmatpush.msrb.mxu0 %v3162_v17  ;;  %v3134_v43 = vld [vmem:[#allocation2 + $0x2510] sm:$0xff] }
 0x345   : > { %3718 = vmatpush.msra.mxu3 %v3425_v36  ;;  %v3421_v49 = vld [vmem:[#allocation2 + $0x2e08] sm:$0xff]  ;;  %3700 = vmatmul.f32.vlgmr.msra.gmra.mxu2 %v5722_v38  ;;  %v3198_v36 = vld [vmem:[#allocation2 + $0x2710] sm:$0xff] }
 0x346   : > { %3744 = vmatpush.msrb.mxu1 %v3226_v39  ;;  %3764 = vmatpush.msrb.mxu2 %v3290_v41  ;;  %v3262_v17 = vld [vmem:[#allocation2 + $0x2910] sm:$0xff] }
 0x347   : > { %3719 = vmatpush.msra.mxu3 %v3421_v49  ;;  %3725 = vmatpush.msrb.mxu0 %v3158_v52  ;;  %v3330_v39 = vld [vmem:[#allocation2 + $0x2b30] sm:$0xff] }
 0x348   : > { %3720 = vmatmul.f32.vlgmr.msra.gmra.mxu3 %v5728_v3  ;;  %3745 = vmatpush.msrb.mxu1 %v3222_v57  ;;  %v3130_v41 = vld [vmem:[#allocation2 + $0x24f0] sm:$0xff] }
 0x349   : > { %3765 = vmatpush.msrb.mxu2 %v3286_v0  ;;  %3784 = vmatpush.msrb.mxu3 %v3354_v59  ;;  %v3194_v49 = vld [vmem:[#allocation2 + $0x26f0] sm:$0xff] }
 0x34a   : > { %3680 = vmatmul.f32.vlgmr.msra.gmra.mxu1 %v5701_v34  ;;  %3726 = vmatpush.msrb.mxu0 %v3154_v30  ;;  %v3258_v52 = vld [vmem:[#allocation2 + $0x28f0] sm:$0xff] }
 0x34b   : > { %3746 = vmatpush.msrb.mxu1 %v3218_v8  ;;  %3766 = vmatpush.msrb.mxu2 %v3282_v60  ;;  %v3326_v57 = vld [vmem:[#allocation2 + $0x2b10] sm:$0xff] }
 0x34c   : > { %3785 = vmatpush.msrb.mxu3 %v3350_v62  ;;  %3727 = vmatpush.msrb.mxu0 %v3150_v24  ;;  %v3126_v0 = vld [vmem:[#allocation2 + $0x24d0] sm:$0xff] }
 0x34d   : > { %3747 = vmatpush.msrb.mxu1 %v3214_v63  ;;  %3767 = vmatpush.msrb.mxu2 %v3278_v37  ;;  %v3190_v59 = vld [vmem:[#allocation2 + $0x26d0] sm:$0xff]  ;;  %v2968_v37 = vpop.f32.mrf.mxu2 }
 0x34e   : > { %3786 = vmatpush.msrb.mxu3 %v3346_v6  ;;  %3728 = vmatpush.msrb.mxu0 %v3146_v5  ;;  %v3254_v30 = vld [vmem:[#allocation2 + $0x28d0] sm:$0xff] }
 0x34f   : > { %3748 = vmatpush.msrb.mxu1 %v3210_v7  ;;  %3768 = vmatpush.msrb.mxu2 %v3274_v10  ;;  %v3322_v8 = vld [vmem:[#allocation2 + $0x2af0] sm:$0xff] }
 0x350   : > { %3787 = vmatpush.msrb.mxu3 %v3342_v11  ;;  %3729 = vmatpush.msrb.mxu0 %v3142_v15  ;;  %v3122_v60 = vld [vmem:[#allocation2 + $0x24b0] sm:$0xff] }
 0x351   : > { %3749 = vmatpush.msrb.mxu1 %v3206_v29  ;;  %3769 = vmatpush.msrb.mxu2 %v3270_v33  ;;  %v3186_v62 = vld [vmem:[#allocation2 + $0x26b0] sm:$0xff]  ;;  %v2988_v29 = vpop.f32.mrf.mxu3 }
 0x352   : > { %3788 = vmatpush.msrb.mxu3 %v3338_v16  ;;  %3730 = vmatpush.msrb.mxu0 %v3138_v18  ;;  %v3250_v24 = vld [vmem:[#allocation2 + $0x28b0] sm:$0xff]  ;;  %v2989_v18 = vadd.f32 %v2988_v29, %v2968_v37  ;;  %v3159_v29 = vld [vmem:[#allocation2 + $0x25d8] sm:$0xff] }
 0x353   : > { %3750 = vmatpush.msrb.mxu1 %v3202_v19  ;;  %3770 = vmatpush.msrb.mxu2 %v3266_v28  ;;  %v3318_v63 = vld [vmem:[#allocation2 + $0x2ad0] sm:$0xff] }
 0x354   : > { %3789 = vmatpush.msrb.mxu3 %v3334_v45  ;;  %3731 = vmatpush.msrb.mxu0 %v3134_v43  ;;  %v3118_v6 = vld [vmem:[#allocation2 + $0x2490] sm:$0xff]  ;;  %v3008_v45 = vpop.f32.mrf.mxu0 }
 0x355   : > { %3751 = vmatpush.msrb.mxu1 %v3198_v36  ;;  %3771 = vmatpush.msrb.mxu2 %v3262_v17  ;;  %v3182_v5 = vld [vmem:[#allocation2 + $0x2690] sm:$0xff]  ;;  %v3009_v17 = vadd.f32 %v3008_v45, %v2989_v18  ;;  %v3223_v45 = vld [vmem:[#allocation2 + $0x27d8] sm:$0xff] }
 0x356   : > { %3790 = vmatpush.msrb.mxu3 %v3330_v39  ;;  %3732 = vmatpush.msrb.mxu0 %v3130_v41  ;;  %v3246_v7 = vld [vmem:[#allocation2 + $0x2890] sm:$0xff] }
 0x357   : > { %3752 = vmatpush.msrb.mxu1 %v3194_v49  ;;  %3772 = vmatpush.msrb.mxu2 %v3258_v52  ;;  %v3314_v10 = vld [vmem:[#allocation2 + $0x2ab0] sm:$0xff] }
 0x358   : > { %3791 = vmatpush.msrb.mxu3 %v3326_v57  ;;  %3733 = vmatpush.msrb.mxu0 %v3126_v0  ;;  %v3114_v11 = vld [vmem:[#allocation2 + $0x2470] sm:$0xff]  ;;  %v3028_v57 = vpop.f32.mrf.mxu1 }
 0x359   : > { %3753 = vmatpush.msrb.mxu1 %v3190_v59  ;;  %3773 = vmatpush.msrb.mxu2 %v3254_v30  ;;  %v3178_v15 = vld [vmem:[#allocation2 + $0x2670] sm:$0xff]  ;;  %v3029_v30 = vadd.f32 %v3028_v57, %v3009_v17  ;;  %v3151_v17 = vld [vmem:[#allocation2 + $0x2598] sm:$0xff] }
 0x35a   : > { %3792 = vmatpush.msrb.mxu3 %v3322_v8  ;;  %3734 = vmatpush.msrb.mxu0 %v3122_v60  ;;  %v3242_v33 = vld [vmem:[#allocation2 + $0x2870] sm:$0xff]  ;;  %v3048_v8 = vpop.f32.mrf.mxu2 }
 0x35b   : > { %3754 = vmatpush.msrb.mxu1 %v3186_v62  ;;  %3774 = vmatpush.msrb.mxu2 %v3250_v24  ;;  %v3310_v16 = vld [vmem:[#allocation2 + $0x2a90] sm:$0xff]  ;;  %v3049_v37 = vadd.f32 %v3048_v8, %v3029_v30  ;;  %v3211_v30 = vld [vmem:[#allocation2 + $0x2778] sm:$0xff] }
 0x35c   : > { %3793 = vmatpush.msrb.mxu3 %v3318_v63  ;;  %3735 = vmatpush.msrb.mxu0 %v3118_v6  ;;  %v3110_v19 = vld [vmem:[#allocation2 + $0x2450] sm:$0xff]  ;;  %v3163_v6 = vld [vmem:[#allocation2 + $0x25f8] sm:$0xff] }
 0x35d   : > { %3755 = vmatpush.msrb.mxu1 %v3182_v5  ;;  %3775 = vmatpush.msrb.mxu2 %v3246_v7  ;;  %v3174_v28 = vld [vmem:[#allocation2 + $0x2650] sm:$0xff]  ;;  %v3068_v7 = vpop.f32.mrf.mxu3 }
 0x35e   : > { %3794 = vmatpush.msrb.mxu3 %v3314_v10  ;;  %3736 = vmatpush.msrb.mxu0 %v3114_v11  ;;  %v3238_v43 = vld [vmem:[#allocation2 + $0x2850] sm:$0xff] }
 0x35f   : > { %3756 = vmatpush.msrb.mxu1 %v3178_v15  ;;  %v3306_v36 = vld [vmem:[#allocation2 + $0x2a70] sm:$0xff]  ;;  %3776 = vmatpush.msrb.mxu2 %v3242_v33  ;;  %v3069_v15 = vadd.f32 %v3068_v7, %v3049_v37  ;;  %v3227_v33 = vld [vmem:[#allocation2 + $0x27f8] sm:$0xff] }
 0x360   : > { %3795 = vmatpush.msrb.mxu3 %v3310_v16  ;;  %v3106_v39 = vld [vmem:[#allocation2 + $0x2430] sm:$0xff]  ;;  %3737 = vmatpush.msrb.mxu0 %v3110_v19 }
 0x361   : > { %v3170_v41 = vld [vmem:[#allocation2 + $0x2630] sm:$0xff]  ;;  %3757 = vmatpush.msrb.mxu1 %v3174_v28  ;;  %3777 = vmatpush.msrb.mxu2 %v3238_v43  ;;  %v5760_v19 = vadd.f32 %v3069_v15, %v5670_v47  ;;  %v3155_v28 = vld [vmem:[#allocation2 + $0x25b8] sm:$0xff] }
 0x362   : > { %v3234_v49 = vld [vmem:[#allocation2 + $0x2830] sm:$0xff]  ;;  %3796 = vmatpush.msrb.mxu3 %v3306_v36  ;;  %3738 = vmatpush.msrb.mxu0 %v3106_v39  ;;  %v3219_v39 = vld [vmem:[#allocation2 + $0x27b8] sm:$0xff] }
 0x363   : > { %v3302_v52 = vld [vmem:[#allocation2 + $0x2a50] sm:$0xff]  ;;  %3758 = vmatpush.msrb.mxu1 %v3170_v41  ;;  %3778 = vmatpush.msrb.mxu2 %v3234_v49  ;;  %v3147_v47 = vld [vmem:[#allocation2 + $0x2578] sm:$0xff] }
 0x364   : > { %v3102_v0 = vld [vmem:[#allocation2 + $0x2410] sm:$0xff]  ;;  %3797 = vmatpush.msrb.mxu3 %v3302_v52  ;;  %v3215_v52 = vld [vmem:[#allocation2 + $0x2798] sm:$0xff] }
 0x365   : > { %v3166_v59 = vld [vmem:[#allocation2 + $0x2610] sm:$0xff]  ;;  %3739 = vmatpush.msrb.mxu0 %v3102_v0  ;;  %v3199_v15 = vld [vmem:[#allocation2 + $0x2718] sm:$0xff] }
 0x366   : > { %v3230_v60 = vld [vmem:[#allocation2 + $0x2810] sm:$0xff]  ;;  %3759 = vmatpush.msrb.mxu1 %v3166_v59  ;;  %v3143_v59 = vld [vmem:[#allocation2 + $0x2558] sm:$0xff]  ;;  %3740 = vmatmul.f32.vlgmr.msrb.gmra.mxu0 %v5696_v50 }
 0x367   : > { %v3298_v62 = vld [vmem:[#allocation2 + $0x2a30] sm:$0xff]  ;;  %3779 = vmatpush.msrb.mxu2 %v3230_v60  ;;  %3760 = vmatmul.f32.vlgmr.msrb.gmra.mxu1 %v5708_v2 }
 0x368   : > { %v3418_v24 = vld [vmem:[#allocation2 + $0x2df0] sm:$0xff]  ;;  %3798 = vmatpush.msrb.mxu3 %v3298_v62  ;;  %v3139_v62 = vld [vmem:[#allocation2 + $0x2538] sm:$0xff]  ;;  %3780 = vmatmul.f32.vlgmr.msrb.gmra.mxu2 %v5689_v44 }
 0x369   : > { %v3482_v63 = vld [vmem:[#allocation2 + $0x2ff0] sm:$0xff]  ;;  %3804 = vmatpush.msra.mxu0 %v3418_v24  ;;  %3844 = vmatpush.msra.mxu2 %v3163_v6  ;;  %v3207_v24 = vld [vmem:[#allocation2 + $0x2758] sm:$0xff] }
 0x36a   : > { %v3294_v5 = vld [vmem:[#allocation2 + $0x2a10] sm:$0xff]  ;;  %3824 = vmatpush.msra.mxu1 %v3482_v63  ;;  %v3135_v6 = vld [vmem:[#allocation2 + $0x2518] sm:$0xff] }
 0x36b   : > { %v3414_v10 = vld [vmem:[#allocation2 + $0x2dd0] sm:$0xff]  ;;  %3799 = vmatpush.msrb.mxu3 %v3294_v5  ;;  %3845 = vmatpush.msra.mxu2 %v3159_v29  ;;  %v3203_v5 = vld [vmem:[#allocation2 + $0x2738] sm:$0xff] }
 0x36c   : > { %v3478_v11 = vld [vmem:[#allocation2 + $0x2fd0] sm:$0xff]  ;;  %3805 = vmatpush.msra.mxu0 %v3414_v10  ;;  %3800 = vmatmul.f32.vlgmr.msrb.gmra.mxu3 %v5701_v34 }
 0x36d   : > { %v3410_v16 = vld [vmem:[#allocation2 + $0x2db0] sm:$0xff]  ;;  %3825 = vmatpush.msra.mxu1 %v3478_v11  ;;  %3864 = vmatpush.msra.mxu3 %v3227_v33  ;;  %v3131_v11 = vld [vmem:[#allocation2 + $0x24f8] sm:$0xff] }
 0x36e   : > { %v3474_v18 = vld [vmem:[#allocation2 + $0x2fb0] sm:$0xff]  ;;  %3806 = vmatpush.msra.mxu0 %v3410_v16  ;;  %3846 = vmatpush.msra.mxu2 %v3155_v28  ;;  %v3127_v16 = vld [vmem:[#allocation2 + $0x24d8] sm:$0xff] }
 0x36f   : > { %v3406_v43 = vld [vmem:[#allocation2 + $0x2d90] sm:$0xff]  ;;  %3826 = vmatpush.msra.mxu1 %v3474_v18  ;;  %3865 = vmatpush.msra.mxu3 %v3223_v45  ;;  %v3195_v18 = vld [vmem:[#allocation2 + $0x26f8] sm:$0xff] }
 0x370   : > { %v3470_v36 = vld [vmem:[#allocation2 + $0x2f90] sm:$0xff]  ;;  %3807 = vmatpush.msra.mxu0 %v3406_v43  ;;  %3847 = vmatpush.msra.mxu2 %v3151_v17  ;;  %v3123_v43 = vld [vmem:[#allocation2 + $0x24b8] sm:$0xff] }
 0x371   : > { %v3402_v41 = vld [vmem:[#allocation2 + $0x2d70] sm:$0xff]  ;;  %3827 = vmatpush.msra.mxu1 %v3470_v36  ;;  %3866 = vmatpush.msra.mxu3 %v3219_v39  ;;  %v3191_v36 = vld [vmem:[#allocation2 + $0x26d8] sm:$0xff] }
 0x372   : > { %v3466_v49 = vld [vmem:[#allocation2 + $0x2f70] sm:$0xff]  ;;  %3808 = vmatpush.msra.mxu0 %v3402_v41  ;;  %3848 = vmatpush.msra.mxu2 %v3147_v47  ;;  %v3119_v41 = vld [vmem:[#allocation2 + $0x2498] sm:$0xff] }
 0x373   : > { %v3398_v57 = vld [vmem:[#allocation2 + $0x2d50] sm:$0xff]  ;;  %3828 = vmatpush.msra.mxu1 %v3466_v49  ;;  %3867 = vmatpush.msra.mxu3 %v3215_v52  ;;  %v3187_v49 = vld [vmem:[#allocation2 + $0x26b8] sm:$0xff] }
 0x374   : > { %v3462_v0 = vld [vmem:[#allocation2 + $0x2f50] sm:$0xff]  ;;  %3809 = vmatpush.msra.mxu0 %v3398_v57  ;;  %3849 = vmatpush.msra.mxu2 %v3143_v59  ;;  %v3115_v57 = vld [vmem:[#allocation2 + $0x2478] sm:$0xff] }
 0x375   : > { %v3394_v8 = vld [vmem:[#allocation2 + $0x2d30] sm:$0xff]  ;;  %3829 = vmatpush.msra.mxu1 %v3462_v0  ;;  %3868 = vmatpush.msra.mxu3 %v3211_v30  ;;  %v3183_v0 = vld [vmem:[#allocation2 + $0x2698] sm:$0xff] }
 0x376   : > { %v3458_v60 = vld [vmem:[#allocation2 + $0x2f30] sm:$0xff]  ;;  %3810 = vmatpush.msra.mxu0 %v3394_v8  ;;  %3850 = vmatpush.msra.mxu2 %v3139_v62  ;;  %v3111_v8 = vld [vmem:[#allocation2 + $0x2458] sm:$0xff] }
 0x377   : > { %v3390_v63 = vld [vmem:[#allocation2 + $0x2d10] sm:$0xff]  ;;  %3830 = vmatpush.msra.mxu1 %v3458_v60  ;;  %3869 = vmatpush.msra.mxu3 %v3207_v24  ;;  %v3179_v60 = vld [vmem:[#allocation2 + $0x2678] sm:$0xff] }
 0x378   : > { %v3454_v37 = vld [vmem:[#allocation2 + $0x2f10] sm:$0xff]  ;;  %3811 = vmatpush.msra.mxu0 %v3390_v63  ;;  %3851 = vmatpush.msra.mxu2 %v3135_v6  ;;  %v3107_v63 = vld [vmem:[#allocation2 + $0x2438] sm:$0xff] }
 0x379   : > { %v3386_v7 = vld [vmem:[#allocation2 + $0x2cf0] sm:$0xff]  ;;  %3831 = vmatpush.msra.mxu1 %v3454_v37  ;;  %3870 = vmatpush.msra.mxu3 %v3203_v5  ;;  %v3175_v37 = vld [vmem:[#allocation2 + $0x2658] sm:$0xff] }
 0x37a   : > { %v3450_v10 = vld [vmem:[#allocation2 + $0x2ef0] sm:$0xff]  ;;  %3812 = vmatpush.msra.mxu0 %v3386_v7  ;;  %3852 = vmatpush.msra.mxu2 %v3131_v11  ;;  %v3103_v7 = vld [vmem:[#allocation2 + $0x2418] sm:$0xff] }
 0x37b   : > { %v3382_v29 = vld [vmem:[#allocation2 + $0x2cd0] sm:$0xff]  ;;  %3832 = vmatpush.msra.mxu1 %v3450_v10  ;;  %3871 = vmatpush.msra.mxu3 %v3199_v15  ;;  %v3171_v10 = vld [vmem:[#allocation2 + $0x2638] sm:$0xff] }
 0x37c   : > { %v3446_v33 = vld [vmem:[#allocation2 + $0x2ed0] sm:$0xff]  ;;  %3813 = vmatpush.msra.mxu0 %v3382_v29  ;;  %3853 = vmatpush.msra.mxu2 %v3127_v16  ;;  %v3355_v11 = vld [vmem:[#allocation2 + $0x2bf8] sm:$0xff] }
 0x37d   : > { %v3378_v28 = vld [vmem:[#allocation2 + $0x2cb0] sm:$0xff]  ;;  %3833 = vmatpush.msra.mxu1 %v3446_v33  ;;  %3872 = vmatpush.msra.mxu3 %v3195_v18  ;;  %v3291_v15 = vld [vmem:[#allocation2 + $0x29f8] sm:$0xff] }
 0x37e   : > { %v3442_v45 = vld [vmem:[#allocation2 + $0x2eb0] sm:$0xff]  ;;  %3814 = vmatpush.msra.mxu0 %v3378_v28  ;;  %3854 = vmatpush.msra.mxu2 %v3123_v43  ;;  %v3419_v29 = vld [vmem:[#allocation2 + $0x2df8] sm:$0xff] }
 0x37f   : > { %v3374_v17 = vld [vmem:[#allocation2 + $0x2c90] sm:$0xff]  ;;  %3834 = vmatpush.msra.mxu1 %v3442_v45  ;;  %3873 = vmatpush.msra.mxu3 %v3191_v36  ;;  %v3167_v33 = vld [vmem:[#allocation2 + $0x2618] sm:$0xff] }
 0x380   : > { %v3438_v39 = vld [vmem:[#allocation2 + $0x2e90] sm:$0xff]  ;;  %3815 = vmatpush.msra.mxu0 %v3374_v17  ;;  %3855 = vmatpush.msra.mxu2 %v3119_v41  ;;  %v3287_v16 = vld [vmem:[#allocation2 + $0x29d8] sm:$0xff] }
 0x381   : > { %v3370_v47 = vld [vmem:[#allocation2 + $0x2c70] sm:$0xff]  ;;  %3835 = vmatpush.msra.mxu1 %v3438_v39  ;;  %3874 = vmatpush.msra.mxu3 %v3187_v49  ;;  %v3351_v18 = vld [vmem:[#allocation2 + $0x2bd8] sm:$0xff] }
 0x382   : > { %v3434_v52 = vld [vmem:[#allocation2 + $0x2e70] sm:$0xff]  ;;  %3816 = vmatpush.msra.mxu0 %v3370_v47  ;;  %3856 = vmatpush.msra.mxu2 %v3115_v57  ;;  %v3415_v28 = vld [vmem:[#allocation2 + $0x2dd8] sm:$0xff] }
 0x383   : > { %v3366_v59 = vld [vmem:[#allocation2 + $0x2c50] sm:$0xff]  ;;  %3836 = vmatpush.msra.mxu1 %v3434_v52  ;;  %3875 = vmatpush.msra.mxu3 %v3183_v0  ;;  %v3483_v45 = vld [vmem:[#allocation2 + $0x2ff8] sm:$0xff] }
 0x384   : > { %v3430_v30 = vld [vmem:[#allocation2 + $0x2e50] sm:$0xff]  ;;  %3817 = vmatpush.msra.mxu0 %v3366_v59  ;;  %3857 = vmatpush.msra.mxu2 %v3111_v8  ;;  %v3283_v43 = vld [vmem:[#allocation2 + $0x29b8] sm:$0xff] }
 0x385   : > { %v3362_v62 = vld [vmem:[#allocation2 + $0x2c30] sm:$0xff]  ;;  %3837 = vmatpush.msra.mxu1 %v3430_v30  ;;  %3876 = vmatpush.msra.mxu3 %v3179_v60  ;;  %v3347_v36 = vld [vmem:[#allocation2 + $0x2bb8] sm:$0xff] }
 0x386   : > { %v3426_v24 = vld [vmem:[#allocation2 + $0x2e30] sm:$0xff]  ;;  %3818 = vmatpush.msra.mxu0 %v3362_v62  ;;  %3858 = vmatpush.msra.mxu2 %v3107_v63  ;;  %v3411_v17 = vld [vmem:[#allocation2 + $0x2db8] sm:$0xff] }
 0x387   : > { %v3358_v6 = vld [vmem:[#allocation2 + $0x2c10] sm:$0xff]  ;;  %3838 = vmatpush.msra.mxu1 %v3426_v24  ;;  %3877 = vmatpush.msra.mxu3 %v3175_v37  ;;  %v3479_v39 = vld [vmem:[#allocation2 + $0x2fd8] sm:$0xff] }
 0x388   : > { %v3422_v5 = vld [vmem:[#allocation2 + $0x2e10] sm:$0xff]  ;;  %3819 = vmatpush.msra.mxu0 %v3358_v6  ;;  %3859 = vmatpush.msra.mxu2 %v3103_v7  ;;  %v3279_v41 = vld [vmem:[#allocation2 + $0x2998] sm:$0xff] }
 0x389   : > { %3839 = vmatpush.msra.mxu1 %v3422_v5  ;;  %3878 = vmatpush.msra.mxu3 %v3171_v10  ;;  %v3343_v49 = vld [vmem:[#allocation2 + $0x2b98] sm:$0xff] }
 0x38a   : > { %3820 = vmatmul.f32.vlgmr.msra.gmra.mxu0 %v5722_v38  ;;  %3924 = vmatpush.msrb.mxu2 %v3419_v29  ;;  %v3407_v47 = vld [vmem:[#allocation2 + $0x2d98] sm:$0xff] }
 0x38b   : > { %3904 = vmatpush.msrb.mxu1 %v3355_v11  ;;  %3884 = vmatpush.msrb.mxu0 %v3291_v15  ;;  %v3475_v52 = vld [vmem:[#allocation2 + $0x2fb8] sm:$0xff] }
 0x38c   : > { %3879 = vmatpush.msra.mxu3 %v3167_v33  ;;  %3840 = vmatmul.f32.vlgmr.msra.gmra.mxu1 %v5728_v3  ;;  %v3275_v57 = vld [vmem:[#allocation2 + $0x2978] sm:$0xff] }
 0x38d   : > { %3885 = vmatpush.msrb.mxu0 %v3287_v16  ;;  %3905 = vmatpush.msrb.mxu1 %v3351_v18  ;;  %v3339_v0 = vld [vmem:[#allocation2 + $0x2b78] sm:$0xff] }
 0x38e   : > { %3925 = vmatpush.msrb.mxu2 %v3415_v28  ;;  %3944 = vmatpush.msrb.mxu3 %v3483_v45  ;;  %v3403_v59 = vld [vmem:[#allocation2 + $0x2d78] sm:$0xff] }
 0x38f   : > { %3886 = vmatpush.msrb.mxu0 %v3283_v43  ;;  %3906 = vmatpush.msrb.mxu1 %v3347_v36  ;;  %v3471_v30 = vld [vmem:[#allocation2 + $0x2f98] sm:$0xff] }
 0x390   : > { %3926 = vmatpush.msrb.mxu2 %v3411_v17  ;;  %3945 = vmatpush.msrb.mxu3 %v3479_v39  ;;  %v3271_v8 = vld [vmem:[#allocation2 + $0x2958] sm:$0xff] }
 0x391   : > { %3887 = vmatpush.msrb.mxu0 %v3279_v41  ;;  %3907 = vmatpush.msrb.mxu1 %v3343_v49  ;;  %v3335_v60 = vld [vmem:[#allocation2 + $0x2b58] sm:$0xff] }
 0x392   : > { %3927 = vmatpush.msrb.mxu2 %v3407_v47  ;;  %3946 = vmatpush.msrb.mxu3 %v3475_v52  ;;  %v3399_v62 = vld [vmem:[#allocation2 + $0x2d58] sm:$0xff] }
 0x393   : > { %3888 = vmatpush.msrb.mxu0 %v3275_v57  ;;  %3908 = vmatpush.msrb.mxu1 %v3339_v0  ;;  %v3467_v24 = vld [vmem:[#allocation2 + $0x2f78] sm:$0xff] }
 0x394   : > { %3928 = vmatpush.msrb.mxu2 %v3403_v59  ;;  %3947 = vmatpush.msrb.mxu3 %v3471_v30  ;;  %v3267_v63 = vld [vmem:[#allocation2 + $0x2938] sm:$0xff] }
 0x395   : > { %v3331_v37 = vld [vmem:[#allocation2 + $0x2b38] sm:$0xff]  ;;  %3889 = vmatpush.msrb.mxu0 %v3271_v8  ;;  %3909 = vmatpush.msrb.mxu1 %v3335_v60 }
 0x396   : > { %v3395_v6 = vld [vmem:[#allocation2 + $0x2d38] sm:$0xff]  ;;  %3929 = vmatpush.msrb.mxu2 %v3399_v62  ;;  %3948 = vmatpush.msrb.mxu3 %v3467_v24 }
 0x397   : > { %v3463_v5 = vld [vmem:[#allocation2 + $0x2f58] sm:$0xff]  ;;  %3890 = vmatpush.msrb.mxu0 %v3267_v63  ;;  %3910 = vmatpush.msrb.mxu1 %v3331_v37 }
 0x398   : > { %v3263_v7 = vld [vmem:[#allocation2 + $0x2918] sm:$0xff]  ;;  %3930 = vmatpush.msrb.mxu2 %v3395_v6  ;;  %3949 = vmatpush.msrb.mxu3 %v3463_v5 }
 0x399   : > { %v3327_v10 = vld [vmem:[#allocation2 + $0x2b18] sm:$0xff]  ;;  %3891 = vmatpush.msrb.mxu0 %v3263_v7  ;;  %3860 = vmatmul.f32.vlgmr.msra.gmra.mxu2 %v5696_v50 }
 0x39a   : > { %v3391_v11 = vld [vmem:[#allocation2 + $0x2d18] sm:$0xff]  ;;  %3911 = vmatpush.msrb.mxu1 %v3327_v10  ;;  %3880 = vmatmul.f32.vlgmr.msra.gmra.mxu3 %v5708_v2  ;;  %v833_v2 = vadd.f32 %v5567_v61, %v5565_v12 }
 0x39b   : > { %v3459_v15 = vld [vmem:[#allocation2 + $0x2f38] sm:$0xff]  ;;  %3931 = vmatpush.msrb.mxu2 %v3391_v11  ;;  %v3521_v11 = vpop.f32.mrf.mxu1 }
 0x39c   : > { %v3259_v29 = vld [vmem:[#allocation2 + $0x28f8] sm:$0xff]  ;;  %3950 = vmatpush.msrb.mxu3 %v3459_v15  ;;  %v853_v12 = vadd.f32 %v5570_v1, %v833_v2  ;;  %v4114_v1 = vld [vmem:[#allocation6 + $0x2e8] sm:$0xff] }
 0x39d   : > { %v3323_v33 = vld [vmem:[#allocation2 + $0x2af8] sm:$0xff]  ;;  %3892 = vmatpush.msrb.mxu0 %v3259_v29  ;;  %v2629_v29 = vadd.f32 %v5703_v13, %v5692_v55 }
 0x39e   : > { %v3387_v16 = vld [vmem:[#allocation2 + $0x2cf8] sm:$0xff]  ;;  %3912 = vmatpush.msrb.mxu1 %v3323_v33 }
 0x39f   : > { %v3455_v18 = vld [vmem:[#allocation2 + $0x2f18] sm:$0xff]  ;;  %3932 = vmatpush.msrb.mxu2 %v3387_v16  ;;  %v2649_v61 = vadd.f32 %v5710_v4, %v2629_v29  ;;  %v873_v4 = vadd.f32 %v5573_v42, %v853_v12 }
 0x3a0   : > { %v3255_v28 = vld [vmem:[#allocation2 + $0x28d8] sm:$0xff]  ;;  %3951 = vmatpush.msrb.mxu3 %v3455_v18  ;;  %v3501_v18 = vpop.f32.mrf.mxu0 }
 0x3a1   : > { %v3319_v45 = vld [vmem:[#allocation2 + $0x2ad8] sm:$0xff]  ;;  %3893 = vmatpush.msrb.mxu0 %v3255_v28  ;;  %v3522_v28 = vadd.f32 %v3521_v11, %v3501_v18  ;;  %v4129_v18 = vld [vmem:[#allocation6 + $0x360] sm:$0xff] }
 0x3a2   : > { %v3383_v43 = vld [vmem:[#allocation2 + $0x2cd8] sm:$0xff]  ;;  %3913 = vmatpush.msrb.mxu1 %v3319_v45 }
 0x3a3   : > { %v3451_v36 = vld [vmem:[#allocation2 + $0x2ef8] sm:$0xff]  ;;  %3933 = vmatpush.msrb.mxu2 %v3383_v43 }
 0x3a4   : > { %v3251_v17 = vld [vmem:[#allocation2 + $0x28b8] sm:$0xff]  ;;  %3952 = vmatpush.msrb.mxu3 %v3451_v36  ;;  %v3541_v36 = vpop.f32.mrf.mxu2 }
 0x3a5   : > { %v3315_v39 = vld [vmem:[#allocation2 + $0x2ab8] sm:$0xff]  ;;  %3894 = vmatpush.msrb.mxu0 %v3251_v17 }
 0x3a6   : > { %v3379_v41 = vld [vmem:[#allocation2 + $0x2cb8] sm:$0xff]  ;;  %3914 = vmatpush.msrb.mxu1 %v3315_v39  ;;  %v3542_v39 = vadd.f32 %v3541_v36, %v3522_v28  ;;  %v4089_v28 = vld [vmem:[#allocation6 + $0x220] sm:$0xff] }
 0x3a7   : > { %v3447_v49 = vld [vmem:[#allocation2 + $0x2ed8] sm:$0xff]  ;;  %3934 = vmatpush.msrb.mxu2 %v3379_v41  ;;  %v4098_v41 = vld [vmem:[#allocation6 + $0x268] sm:$0xff] }
 0x3a8   : > { %v3247_v47 = vld [vmem:[#allocation2 + $0x2898] sm:$0xff]  ;;  %3953 = vmatpush.msrb.mxu3 %v3447_v49  ;;  %v3561_v49 = vpop.f32.mrf.mxu3 }
 0x3a9   : > { %v3311_v52 = vld [vmem:[#allocation2 + $0x2a98] sm:$0xff]  ;;  %3895 = vmatpush.msrb.mxu0 %v3247_v47  ;;  %v4113_v47 = vld [vmem:[#allocation6 + $0x2e0] sm:$0xff] }
 0x3aa   : > { %v3375_v57 = vld [vmem:[#allocation2 + $0x2c98] sm:$0xff]  ;;  %3915 = vmatpush.msrb.mxu1 %v3311_v52  ;;  %v3562_v52 = vadd.f32 %v3561_v49, %v3542_v39 }
 0x3ab   : > { %v3443_v0 = vld [vmem:[#allocation2 + $0x2eb8] sm:$0xff]  ;;  %3935 = vmatpush.msrb.mxu2 %v3375_v57 }
 0x3ac   : > { %v3243_v59 = vld [vmem:[#allocation2 + $0x2878] sm:$0xff]  ;;  %3954 = vmatpush.msrb.mxu3 %v3443_v0  ;;  %v3581_v0 = vpop.f32.mrf.mxu0 }
 0x3ad   : > { %v3307_v30 = vld [vmem:[#allocation2 + $0x2a78] sm:$0xff]  ;;  %3896 = vmatpush.msrb.mxu0 %v3243_v59  ;;  %v893_v59 = vadd.f32 %v5575_v14, %v873_v4  ;;  %v953_v14 = vadd.f32 %v5583_v26, %v5579_v21  ;;  %v4126_v4 = vld [vmem:[#allocation6 + $0x348] sm:$0xff] }
 0x3ae   : > { %v3371_v8 = vld [vmem:[#allocation2 + $0x2c78] sm:$0xff]  ;;  %3916 = vmatpush.msrb.mxu1 %v3307_v30 }
 0x3af   : > { %v3439_v60 = vld [vmem:[#allocation2 + $0x2e98] sm:$0xff]  ;;  %3936 = vmatpush.msrb.mxu2 %v3371_v8  ;;  %v3582_v8 = vadd.f32 %v3581_v0, %v3562_v52  ;;  %v973_v26 = vadd.f32 %v5586_v31, %v953_v14  ;;  %v4102_v52 = vld [vmem:[#allocation6 + $0x288] sm:$0xff]  ;;  %v4085_v0 = vld [vmem:[#allocation6 + $0x200] sm:$0xff] }
 0x3b0   : > { %v3239_v62 = vld [vmem:[#allocation2 + $0x2858] sm:$0xff]  ;;  %3955 = vmatpush.msrb.mxu3 %v3439_v60  ;;  %v3601_v60 = vpop.f32.mrf.mxu1 }
 0x3b1   : > { %v3303_v24 = vld [vmem:[#allocation2 + $0x2a58] sm:$0xff]  ;;  %3897 = vmatpush.msrb.mxu0 %v3239_v62  ;;  %v4110_v62 = vld [vmem:[#allocation6 + $0x2c8] sm:$0xff]  ;;  %v993_v31 = vadd.f32 %v5589_v40, %v973_v26 }
 0x3b2   : > { %v3367_v63 = vld [vmem:[#allocation2 + $0x2c58] sm:$0xff]  ;;  %3917 = vmatpush.msrb.mxu1 %v3303_v24  ;;  %v913_v24 = vadd.f32 %v5577_v20, %v893_v59  ;;  %v5791_v20 = vld [vmem:[#allocation4] sm:$0xf]  ;;  %v4101_v59 = vld [vmem:[#allocation6 + $0x280] sm:$0xff] }
 0x3b3   : > { %v3435_v37 = vld [vmem:[#allocation2 + $0x2e78] sm:$0xff]  ;;  %3937 = vmatpush.msrb.mxu2 %v3367_v63  ;;  %v3970_v29 = vperm.slane %v5791_v20, 0  ;;  %v1013_v49 = vadd.f32 %v5591_v48, %v993_v31  ;;  %v4044_v31 = vld [vmem:[#allocation6 + $0xc0] sm:$0xff] }
 0x3b4   : > { %v3235_v6 = vld [vmem:[#allocation2 + $0x2838] sm:$0xff]  ;;  %3956 = vmatpush.msrb.mxu3 %v3435_v37  ;;  %v4093_v37 = vld [vmem:[#allocation6 + $0x240] sm:$0xff] }
 0x3b5   : > { %v3299_v5 = vld [vmem:[#allocation2 + $0x2a38] sm:$0xff]  ;;  %3898 = vmatpush.msrb.mxu0 %v3235_v6  ;;  %v4109_v6 = vld [vmem:[#allocation6 + $0x2c0] sm:$0xff]  ;;  %v1033_v48 = vadd.f32 %v5593_v56, %v1013_v49 }
 0x3b6   : > { %v3363_v7 = vld [vmem:[#allocation2 + $0x2c38] sm:$0xff]  ;;  %3918 = vmatpush.msrb.mxu1 %v3299_v5 }
 0x3b7   : > { %v3431_v10 = vld [vmem:[#allocation2 + $0x2e58] sm:$0xff]  ;;  %3938 = vmatpush.msrb.mxu2 %v3363_v7  ;;  %v2178_v7 = vadd.f32 %v5616_v23, %v913_v24  ;;  %v4130_v23 = vld [vmem:[#allocation6 + $0x368] sm:$0xff] }
 0x3b8   : > { %v3231_v50 = vld [vmem:[#allocation2 + $0x2818] sm:$0xff]  ;;  %3957 = vmatpush.msrb.mxu3 %v3431_v10  ;;  %v3602_v10 = vadd.f32 %v3601_v60, %v3582_v8 }
 0x3b9   : > { %v3295_v15 = vld [vmem:[#allocation2 + $0x2a18] sm:$0xff]  ;;  %3899 = vmatpush.msrb.mxu0 %v3231_v50 }
 0x3ba   : > { %v3359_v33 = vld [vmem:[#allocation2 + $0x2c18] sm:$0xff]  ;;  %3919 = vmatpush.msrb.mxu1 %v3295_v15  ;;  %3900 = vmatmul.f32.vlgmr.msrb.gmra.mxu0 %v5689_v44  ;;  %v2669_v44 = vadd.f32 %v5715_v22, %v2649_v61  ;;  %v4094_v22 = vld [vmem:[#allocation6 + $0x248] sm:$0xff] }
 0x3bb   : > { %v3427_v16 = vld [vmem:[#allocation2 + $0x2e38] sm:$0xff]  ;;  %3939 = vmatpush.msrb.mxu2 %v3359_v33  ;;  %3920 = vmatmul.f32.vlgmr.msrb.gmra.mxu1 %v5701_v34  ;;  %v4090_v33 = vld [vmem:[#allocation6 + $0x228] sm:$0xff] }
 0x3bc   : > { %v4100_v45 = vld [vmem:[#allocation6 + $0x278] sm:$0xff]  ;;  %3958 = vmatpush.msrb.mxu3 %v3427_v16  ;;  %3940 = vmatmul.f32.vlgmr.msrb.gmra.mxu2 %v5722_v38  ;;  %v4099_v55 = vld [vmem:[#allocation6 + $0x270] sm:$0xff]  ;;  %v4097_v38 = vld [vmem:[#allocation6 + $0x260] sm:$0xff] }
 0x3bd   : > { %v4116_v43 = vld [vmem:[#allocation6 + $0x2f8] sm:$0xff]  ;;  %4149 = vmatpush.msra.mxu0 %v4100_v45  ;;  %v4115_v13 = vld [vmem:[#allocation6 + $0x2f0] sm:$0xff]  ;;  %v4106_v16 = vld [vmem:[#allocation6 + $0x2a8] sm:$0xff]  ;;  %v3621_v45 = vpop.f32.mrf.mxu2 }
 0x3be   : > { %v3423_v17 = vld [vmem:[#allocation2 + $0x2e18] sm:$0xff]  ;;  %4169 = vmatpush.msra.mxu1 %v4116_v43  ;;  %v4105_v43 = vld [vmem:[#allocation6 + $0x2a0] sm:$0xff] }
 0x3bf   : > { %3959 = vmatpush.msrb.mxu3 %v3423_v17  ;;  %4150 = vmatpush.msra.mxu0 %v4099_v55  ;;  %v4096_v57 = vld [vmem:[#allocation6 + $0x258] sm:$0xff]  ;;  %v4095_v30 = vld [vmem:[#allocation6 + $0x250] sm:$0xff]  ;;  %v3641_v55 = vpop.f32.mrf.mxu3 }
 0x3c0   : > { %3960 = vmatmul.f32.vlgmr.msrb.gmra.mxu3 %v5728_v3  ;;  %4170 = vmatpush.msra.mxu1 %v4115_v13  ;;  %v4112_v34 = vld [vmem:[#allocation6 + $0x2d8] sm:$0xff]  ;;  %v2689_v3 = vadd.f32 %v5718_v35, %v2669_v44  ;;  %v4111_v42 = vld [vmem:[#allocation6 + $0x2d0] sm:$0xff]  ;;  %v2749_v35 = vadd.f32 %v5733_v54, %v5724_v51 }
 0x3c1   : > { %4151 = vmatpush.msra.mxu0 %v4098_v41  ;;  %v4132_v5 = vld [vmem:[#allocation6 + $0x378] sm:$0xff]  ;;  %v4131_v50 = vld [vmem:[#allocation6 + $0x370] sm:$0xff]  ;;  %v3642_v41 = vadd.f32 %v3641_v55, %v3621_v45  ;;  %v4028_v45 = vld [vmem:[#allocation6 + $0x40] sm:$0xff] }
 0x3c2   : > { %4171 = vmatpush.msra.mxu1 %v4114_v1  ;;  %v2709_v63 = vadd.f32 %v5730_v58, %v2689_v3  ;;  %v4092_v11 = vld [vmem:[#allocation6 + $0x238] sm:$0xff]  ;;  %4189 = vmatpush.msra.mxu2 %v4132_v5  ;;  %v4091_v21 = vld [vmem:[#allocation6 + $0x230] sm:$0xff]  ;;  %v2769_v51 = vadd.f32 %v5736_v9, %v2749_v35  ;;  %v3661_v1 = vpop.f32.mrf.mxu0  ;;  %v3971_v35 = vperm.slane %v5791_v20, 1  ;;  %v4033_v5 = vld [vmem:[#allocation6 + $0x68] sm:$0xff] }
 0x3c3   : > { %4152 = vmatpush.msra.mxu0 %v4097_v38  ;;  %v4108_v58 = vld [vmem:[#allocation6 + $0x2b8] sm:$0xff]  ;;  %v4107_v54 = vld [vmem:[#allocation6 + $0x2b0] sm:$0xff]  ;;  %v4086_v38 = vld [vmem:[#allocation6 + $0x208] sm:$0xff] }
 0x3c4   : > { %4172 = vmatpush.msra.mxu1 %v4113_v47  ;;  %v3071_v15 = vadd.f32 %v2709_v63, %v2178_v7  ;;  %4190 = vmatpush.msra.mxu2 %v4131_v50  ;;  %v2789_v9 = vadd.f32 %v5740_v46, %v2769_v51  ;;  %v4128_v36 = vld [vmem:[#allocation6 + $0x358] sm:$0xff]  ;;  %v4127_v13 = vld [vmem:[#allocation6 + $0x350] sm:$0xff]  ;;  %v3662_v47 = vadd.f32 %v3661_v1, %v3642_v41  ;;  %v4049_v7 = vld [vmem:[#allocation6 + $0xe8] sm:$0xff] }
 0x3c5   : > { %4153 = vmatpush.msra.mxu0 %v4096_v57  ;;  %v4088_v12 = vld [vmem:[#allocation6 + $0x218] sm:$0xff]  ;;  %v4087_v39 = vld [vmem:[#allocation6 + $0x210] sm:$0xff]  ;;  %v4125_v57 = vld [vmem:[#allocation6 + $0x340] sm:$0xff] }
 0x3c6   : > { %4173 = vmatpush.msra.mxu1 %v4112_v34  ;;  %v3964_v2 = vadd.f32 %v3602_v10, %v3071_v15  ;;  %4191 = vmatpush.msra.mxu2 %v4130_v23  ;;  %v4104_v61 = vld [vmem:[#allocation6 + $0x298] sm:$0xff]  ;;  %v2809_v40 = vadd.f32 %v5742_v32, %v2789_v9  ;;  %v4103_v46 = vld [vmem:[#allocation6 + $0x290] sm:$0xff]  ;;  %v4122_v10 = vld [vmem:[#allocation6 + $0x328] sm:$0xff] }
 0x3c7   : > { %4154 = vmatpush.msra.mxu0 %v4095_v30  ;;  %v3681_v34 = vpop.f32.mrf.mxu1  ;;  %v4051_v60 = vld [vmem:[#allocation6 + $0xf8] sm:$0xff]  ;;  %v4034_v56 = vld [vmem:[#allocation6 + $0x70] sm:$0xff]  ;;  %v4121_v15 = vld [vmem:[#allocation6 + $0x320] sm:$0xff] }
 0x3c8   : > { %4174 = vmatpush.msra.mxu1 %v4111_v42  ;;  %4192 = vmatpush.msra.mxu2 %v4129_v18  ;;  %v3978_v17 = vadd.f32 %v3970_v29, %v3964_v2  ;;  %v2829_v32 = vadd.f32 %v5745_v53, %v2809_v40  ;;  %v3682_v3 = vadd.f32 %v3681_v34, %v3662_v47  ;;  %v3701_v30 = vpop.f32.mrf.mxu2  ;;  %v4124_v42 = vld [vmem:[#allocation6 + $0x338] sm:$0xff]  ;;  %v4050_v53 = vld [vmem:[#allocation6 + $0xf0] sm:$0xff]  ;;  %v4045_v18 = vld [vmem:[#allocation6 + $0xc8] sm:$0xff] }
 0x3c9   : > { %4155 = vmatpush.msra.mxu0 %v4094_v22  ;;  %v4035_v22 = vld [vmem:[#allocation6 + $0x78] sm:$0xff]  ;;  %v4030_v23 = vld [vmem:[#allocation6 + $0x50] sm:$0xff]  ;;  %v4117_v9 = vld [vmem:[#allocation6 + $0x300] sm:$0xff] }
 0x3ca   : > { %4175 = vmatpush.msra.mxu1 %v4110_v62  ;;  %4193 = vmatpush.msra.mxu2 %v4128_v36  ;;  %v3982_v44 = vmax.f32 %v3978_v17, 0.0  ;;  %v2179_v62 = vadd.f32 %v5623_v25, %v1033_v48  ;;  %v3702_v24 = vadd.f32 %v3701_v30, %v3682_v3  ;;  %v4047_v26 = vld [vmem:[#allocation6 + $0xd8] sm:$0xff]  ;;  %v4046_v2 = vld [vmem:[#allocation6 + $0xd0] sm:$0xff]  ;;  %v4041_v41 = vld [vmem:[#allocation6 + $0xa8] sm:$0xff] }
 0x3cb   : > { %4156 = vmatpush.msra.mxu0 %v4093_v37  ;;  %v3721_v63 = vpop.f32.mrf.mxu3  ;;  %v4027_v36 = vld [vmem:[#allocation6 + $0x38] sm:$0xff]  ;;  %v4042_v55 = vld [vmem:[#allocation6 + $0xb0] sm:$0xff]  ;;  %v4064_v40 = vld [vmem:[#allocation6 + $0x160] sm:$0xff] }
 0x3cc   : > { %4176 = vmatpush.msra.mxu1 %v4109_v6  ;;  %4194 = vmatpush.msra.mxu2 %v4127_v13  ;;  %v5802_v8 = vmin.f32 %v3982_v44, 6.0  ;;  %v3072_v37 = vadd.f32 %v2829_v32, %v2179_v62  ;;  %v3722_v14 = vadd.f32 %v3721_v63, %v3702_v24  ;;  %v4123_v6 = vld [vmem:[#allocation6 + $0x330] sm:$0xff]  ;;  %v4043_v17 = vld [vmem:[#allocation6 + $0xb8] sm:$0xff]  ;;  %v4065_v13 = vld [vmem:[#allocation6 + $0x168] sm:$0xff] }
 0x3cd   : > { %4157 = vmatpush.msra.mxu0 %v4092_v11  ;;  %v4032_v11 = vld [vmem:[#allocation6 + $0x60] sm:$0xff]  ;;  %v4148_v49 = vld [vmem:[#allocation6 + $0x3f8] sm:$0xff]  ;;  %v4038_v34 = vld [vmem:[#allocation6 + $0x90] sm:$0xff] }
 0x3ce   : > { %4177 = vmatpush.msra.mxu1 %v4108_v58  ;;  %4195 = vmatpush.msra.mxu2 %v4126_v4  ;;  %v3965_v25 = vadd.f32 %v3722_v14, %v3072_v37  ;;  %v4048_v58 = vld [vmem:[#allocation6 + $0xe0] sm:$0xff]  ;;  %v4147_v4 = vld [vmem:[#allocation6 + $0x3f0] sm:$0xff]  ;;  %v4063_v44 = vld [vmem:[#allocation6 + $0x158] sm:$0xff] }
 0x3cf   : > { %4158 = vmatpush.msra.mxu0 %v4091_v21  ;;  %v4031_v21 = vld [vmem:[#allocation6 + $0x58] sm:$0xff]  ;;  %v4040_v1 = vld [vmem:[#allocation6 + $0xa0] sm:$0xff]  ;;  %4209 = vmatpush.msra.mxu3 %v4148_v49  ;;  %v4061_v32 = vld [vmem:[#allocation6 + $0x148] sm:$0xff] }
 0x3d0   : > { %4178 = vmatpush.msra.mxu1 %v4107_v54  ;;  %4196 = vmatpush.msra.mxu2 %v4125_v57  ;;  %v3979_v50 = vadd.f32 %v3971_v35, %v3965_v25  ;;  %v4120_v54 = vld [vmem:[#allocation6 + $0x318] sm:$0xff]  ;;  %v4062_v57 = vld [vmem:[#allocation6 + $0x150] sm:$0xff]  ;;  %v4145_v48 = vld [vmem:[#allocation6 + $0x3e0] sm:$0xff] }
 0x3d1   : > { %4159 = vmatpush.msra.mxu0 %v4090_v33  ;;  %v4119_v33 = vld [vmem:[#allocation6 + $0x310] sm:$0xff]  ;;  %v4039_v47 = vld [vmem:[#allocation6 + $0x98] sm:$0xff]  ;;  %4210 = vmatpush.msra.mxu3 %v4147_v4  ;;  %v4037_v3 = vld [vmem:[#allocation6 + $0x88] sm:$0xff] }
 0x3d2   : > { %4179 = vmatpush.msra.mxu1 %v4106_v16  ;;  %4197 = vmatpush.msra.mxu2 %v4124_v42  ;;  %v3983_v51 = vmax.f32 %v3979_v50, 0.0  ;;  %v4029_v16 = vld [vmem:[#allocation6 + $0x48] sm:$0xff]  ;;  %v4144_v30 = vld [vmem:[#allocation6 + $0x3d8] sm:$0xff]  ;;  %v4060_v42 = vld [vmem:[#allocation6 + $0x140] sm:$0xff] }
 0x3d3   : > { %4160 = vmatpush.msra.mxu0 %v4089_v28  ;;  %v4118_v28 = vld [vmem:[#allocation6 + $0x308] sm:$0xff]  ;;  %v4143_v24 = vld [vmem:[#allocation6 + $0x3d0] sm:$0xff]  ;;  %v4325_v63 = vld [vmem:[#allocation6 + $0x478] sm:$0xff] }
 0x3d4   : > { %4180 = vmatpush.msra.mxu1 %v4105_v43  ;;  %4198 = vmatpush.msra.mxu2 %v4123_v6  ;;  %v5807_v29 = vmin.f32 %v3983_v51, 6.0  ;;  %v4067_v43 = vld [vmem:[#allocation6 + $0x178] sm:$0xff]  ;;  %v4324_v35 = vld [vmem:[#allocation6 + $0x470] sm:$0xff]  ;;  %v4323_v25 = vld [vmem:[#allocation6 + $0x468] sm:$0xff] }
 0x3d5   : > { %4161 = vmatpush.msra.mxu0 %v4088_v12  ;;  %v4066_v12 = vld [vmem:[#allocation6 + $0x170] sm:$0xff]  ;;  %v4341_v37 = vld [vmem:[#allocation6 + $0x4f8] sm:$0xff]  ;;  %v4322_v50 = vld [vmem:[#allocation6 + $0x460] sm:$0xff] }
 0x3d6   : > { %4181 = vmatpush.msra.mxu1 %v4104_v61  ;;  %4199 = vmatpush.msra.mxu2 %v4122_v10  ;;  %v4026_v61 = vld [vmem:[#allocation6 + $0x30] sm:$0xff]  ;;  %v4059_v14 = vld [vmem:[#allocation6 + $0x138] sm:$0xff]  ;;  %v4339_v10 = vld [vmem:[#allocation6 + $0x4e8] sm:$0xff] }
 0x3d7   : > { %4162 = vmatpush.msra.mxu0 %v4087_v39  ;;  %v4025_v39 = vld [vmem:[#allocation6 + $0x28] sm:$0xff]  ;;  %v4340_v6 = vld [vmem:[#allocation6 + $0x4f0] sm:$0xff]  ;;  %v4321_v51 = vld [vmem:[#allocation6 + $0x458] sm:$0xff] }
 0x3d8   : > { %4182 = vmatpush.msra.mxu1 %v4103_v46  ;;  %4200 = vmatpush.msra.mxu2 %v4121_v15  ;;  %v4024_v46 = vld [vmem:[#allocation6 + $0x20] sm:$0xff]  ;;  %v4332_v49 = vld [vmem:[#allocation6 + $0x4b0] sm:$0xff]  ;;  %v4331_v4 = vld [vmem:[#allocation6 + $0x4a8] sm:$0xff] }
 0x3d9   : > { %4163 = vmatpush.msra.mxu0 %v4086_v38  ;;  %v4023_v38 = vld [vmem:[#allocation6 + $0x18] sm:$0xff]  ;;  %v4338_v15 = vld [vmem:[#allocation6 + $0x4e0] sm:$0xff] }
 0x3da   : > { %4183 = vmatpush.msra.mxu1 %v4102_v52  ;;  %4201 = vmatpush.msra.mxu2 %v4120_v54  ;;  %v4146_v52 = vld [vmem:[#allocation6 + $0x3e8] sm:$0xff]  ;;  %v4337_v54 = vld [vmem:[#allocation6 + $0x4d8] sm:$0xff] }
 0x3db   : > { %4164 = vmatpush.msra.mxu0 %v4085_v0  ;;  %v4022_v0 = vld [vmem:[#allocation6 + $0x10] sm:$0xff]  ;;  %4211 = vmatpush.msra.mxu3 %v4146_v52  ;;  %v4330_v52 = vld [vmem:[#allocation6 + $0x4a0] sm:$0xff] }
 0x3dc   : > { %4184 = vmatpush.msra.mxu1 %v4101_v59  ;;  %4165 = vmatmul.f32.vlgmr.msra.gmra.mxu0 %v5802_v8  ;;  %v4021_v59 = vld [vmem:[#allocation6 + $0x8] sm:$0xff] }
 0x3dd   : > { %4229 = vmatpush.msrb.mxu0 %v4035_v22  ;;  %4202 = vmatpush.msra.mxu2 %v4119_v33  ;;  %v4020_v22 = vld [vmem:[#allocation6] sm:$0xff]  ;;  %v4320_v33 = vld [vmem:[#allocation6 + $0x450] sm:$0xff] }
 0x3de   : > { %4249 = vmatpush.msrb.mxu1 %v4051_v60  ;;  %4212 = vmatpush.msra.mxu3 %v4145_v48  ;;  %v4036_v60 = vld [vmem:[#allocation6 + $0x80] sm:$0xff]  ;;  %v4082_v48 = vld [vmem:[#allocation6 + $0x1f0] sm:$0xff] }
 0x3df   : > { %4230 = vmatpush.msrb.mxu0 %v4034_v56  ;;  %4185 = vmatmul.f32.vlgmr.msra.gmra.mxu1 %v5807_v29  ;;  %v3994_v56 = vrot.slane %v5802_v8, 3 }
 0x3e0   : > { %4250 = vmatpush.msrb.mxu1 %v4050_v53  ;;  %4203 = vmatpush.msra.mxu2 %v4118_v28  ;;  %v3995_v53 = vrot.slane %v5807_v29, 3  ;;  %v4054_v28 = vld [vmem:[#allocation6 + $0x110] sm:$0xff] }
 0x3e1   : > { %4231 = vmatpush.msrb.mxu0 %v4033_v5  ;;  %4213 = vmatpush.msra.mxu3 %v4144_v30  ;;  %v4142_v5 = vld [vmem:[#allocation6 + $0x3c8] sm:$0xff] }
 0x3e2   : > { %4251 = vmatpush.msrb.mxu1 %v4049_v7  ;;  %4204 = vmatpush.msra.mxu2 %v4117_v9  ;;  %v4058_v7 = vld [vmem:[#allocation6 + $0x130] sm:$0xff]  ;;  %v4137_v9 = vld [vmem:[#allocation6 + $0x3a0] sm:$0xff]  ;;  %v4081_v30 = vld [vmem:[#allocation6 + $0x1e8] sm:$0xff] }
 0x3e3   : > { %4232 = vmatpush.msrb.mxu0 %v4032_v11  ;;  %4214 = vmatpush.msra.mxu3 %v4143_v24  ;;  %v4141_v11 = vld [vmem:[#allocation6 + $0x3c0] sm:$0xff] }
 0x3e4   : > { %4252 = vmatpush.msrb.mxu1 %v4048_v58  ;;  %4269 = vmatpush.msrb.mxu2 %v4067_v43  ;;  %v4057_v58 = vld [vmem:[#allocation6 + $0x128] sm:$0xff] }
 0x3e5   : > { %4233 = vmatpush.msrb.mxu0 %v4031_v21  ;;  %4215 = vmatpush.msra.mxu3 %v4142_v5  ;;  %v4140_v21 = vld [vmem:[#allocation6 + $0x3b8] sm:$0xff]  ;;  %v4053_v43 = vld [vmem:[#allocation6 + $0x108] sm:$0xff] }
 0x3e6   : > { %4253 = vmatpush.msrb.mxu1 %v4047_v26  ;;  %4270 = vmatpush.msrb.mxu2 %v4066_v12  ;;  %v4056_v26 = vld [vmem:[#allocation6 + $0x120] sm:$0xff]  ;;  %v4136_v12 = vld [vmem:[#allocation6 + $0x398] sm:$0xff] }
 0x3e7   : > { %4234 = vmatpush.msrb.mxu0 %v4030_v23  ;;  %4216 = vmatpush.msra.mxu3 %v4141_v11  ;;  %v4139_v23 = vld [vmem:[#allocation6 + $0x3b0] sm:$0xff]  ;;  %v4479_v11 = vld [vmem:[#allocation6 + $0x678] sm:$0xff] }
 0x3e8   : > { %4254 = vmatpush.msrb.mxu1 %v4046_v2  ;;  %4271 = vmatpush.msrb.mxu2 %v4065_v13  ;;  %v4055_v2 = vld [vmem:[#allocation6 + $0x118] sm:$0xff] }
 0x3e9   : > { %4235 = vmatpush.msrb.mxu0 %v4029_v16  ;;  %4217 = vmatpush.msra.mxu3 %v4140_v21  ;;  %v4336_v16 = vld [vmem:[#allocation6 + $0x4d0] sm:$0xff]  ;;  %v4333_v13 = vld [vmem:[#allocation6 + $0x4b8] sm:$0xff] }
 0x3ea   : > { %4255 = vmatpush.msrb.mxu1 %v4045_v18  ;;  %4272 = vmatpush.msrb.mxu2 %v4064_v40  ;;  %v4138_v18 = vld [vmem:[#allocation6 + $0x3a8] sm:$0xff]  ;;  %v3741_v40 = vpop.f32.mrf.mxu0  ;;  %v4078_v21 = vld [vmem:[#allocation6 + $0x1d0] sm:$0xff] }
 0x3eb   : > { %4236 = vmatpush.msrb.mxu0 %v4028_v45  ;;  %4218 = vmatpush.msra.mxu3 %v4139_v23  ;;  %v4319_v45 = vld [vmem:[#allocation6 + $0x448] sm:$0xff] }
 0x3ec   : > { %4256 = vmatpush.msrb.mxu1 %v4044_v31  ;;  %4273 = vmatpush.msrb.mxu2 %v4063_v44  ;;  %v4335_v31 = vld [vmem:[#allocation6 + $0x4c8] sm:$0xff]  ;;  %v4133_v44 = vld [vmem:[#allocation6 + $0x380] sm:$0xff] }
 0x3ed   : > { %4237 = vmatpush.msrb.mxu0 %v4027_v36  ;;  %4219 = vmatpush.msra.mxu3 %v4138_v18  ;;  %v4318_v36 = vld [vmem:[#allocation6 + $0x440] sm:$0xff]  ;;  %v4077_v23 = vld [vmem:[#allocation6 + $0x1c8] sm:$0xff] }
 0x3ee   : > { %4257 = vmatpush.msrb.mxu1 %v4043_v17  ;;  %4274 = vmatpush.msrb.mxu2 %v4062_v57  ;;  %v4334_v17 = vld [vmem:[#allocation6 + $0x4c0] sm:$0xff]  ;;  %v3761_v57 = vpop.f32.mrf.mxu1 }
 0x3ef   : > { %4238 = vmatpush.msrb.mxu0 %v4026_v61  ;;  %4220 = vmatpush.msra.mxu3 %v4137_v9  ;;  %v4052_v61 = vld [vmem:[#allocation6 + $0x100] sm:$0xff]  ;;  %v4075_v9 = vld [vmem:[#allocation6 + $0x1b8] sm:$0xff] }
 0x3f0   : > { %4258 = vmatpush.msrb.mxu1 %v4042_v55  ;;  %4275 = vmatpush.msrb.mxu2 %v4061_v32  ;;  %v4317_v55 = vld [vmem:[#allocation6 + $0x438] sm:$0xff]  ;;  %v4076_v18 = vld [vmem:[#allocation6 + $0x1c0] sm:$0xff] }
 0x3f1   : > { %4239 = vmatpush.msrb.mxu0 %v4025_v39  ;;  %4221 = vmatpush.msra.mxu3 %v4136_v12  ;;  %v4135_v39 = vld [vmem:[#allocation6 + $0x390] sm:$0xff]  ;;  %v4313_v32 = vld [vmem:[#allocation6 + $0x418] sm:$0xff] }
 0x3f2   : > { %4259 = vmatpush.msrb.mxu1 %v4041_v41  ;;  %4276 = vmatpush.msrb.mxu2 %v4060_v42  ;;  %v4316_v41 = vld [vmem:[#allocation6 + $0x430] sm:$0xff] }
 0x3f3   : > { %4240 = vmatpush.msrb.mxu0 %v4024_v46  ;;  %4222 = vmatpush.msra.mxu3 %v4135_v39  ;;  %v4134_v46 = vld [vmem:[#allocation6 + $0x388] sm:$0xff]  ;;  %v4312_v42 = vld [vmem:[#allocation6 + $0x410] sm:$0xff] }
 0x3f4   : > { %4260 = vmatpush.msrb.mxu1 %v4040_v1  ;;  %4277 = vmatpush.msrb.mxu2 %v4059_v14  ;;  %v4315_v1 = vld [vmem:[#allocation6 + $0x428] sm:$0xff]  ;;  %v4079_v14 = vld [vmem:[#allocation6 + $0x1d8] sm:$0xff]  ;;  %v4074_v12 = vld [vmem:[#allocation6 + $0x1b0] sm:$0xff] }
 0x3f5   : > { %4241 = vmatpush.msrb.mxu0 %v4023_v38  ;;  %4223 = vmatpush.msra.mxu3 %v4134_v46  ;;  %v4083_v38 = vld [vmem:[#allocation6 + $0x1f8] sm:$0xff]  ;;  %v4073_v39 = vld [vmem:[#allocation6 + $0x1a8] sm:$0xff]  ;;  %v4072_v46 = vld [vmem:[#allocation6 + $0x1a0] sm:$0xff] }
 0x3f6   : > { %4261 = vmatpush.msrb.mxu1 %v4039_v47  ;;  %4278 = vmatpush.msrb.mxu2 %v4058_v7  ;;  %v4314_v47 = vld [vmem:[#allocation6 + $0x420] sm:$0xff] }
 0x3f7   : > { %4242 = vmatpush.msrb.mxu0 %v4022_v0  ;;  %4224 = vmatpush.msra.mxu3 %v4133_v44  ;;  %v3762_v0 = vadd.f32 %v3761_v57, %v3741_v40  ;;  %v4355_v40 = vld [vmem:[#allocation6 + $0x568] sm:$0xff]  ;;  %v4354_v44 = vld [vmem:[#allocation6 + $0x560] sm:$0xff]  ;;  %v4070_v57 = vld [vmem:[#allocation6 + $0x190] sm:$0xff] }
 0x3f8   : > { %4262 = vmatpush.msrb.mxu1 %v4038_v34  ;;  %4279 = vmatpush.msrb.mxu2 %v4057_v58  ;;  %v3781_v34 = vpop.f32.mrf.mxu2  ;;  %v4495_v58 = vld [vmem:[#allocation6 + $0x6f8] sm:$0xff] }
 0x3f9   : > { %4243 = vmatpush.msrb.mxu0 %v4021_v59  ;;  %v4329_v59 = vld [vmem:[#allocation6 + $0x498] sm:$0xff]  ;;  %4289 = vmatpush.msrb.mxu3 %v4083_v38 }
 0x3fa   : > { %4263 = vmatpush.msrb.mxu1 %v4037_v3  ;;  %4280 = vmatpush.msrb.mxu2 %v4056_v26  ;;  %v3782_v3 = vadd.f32 %v3781_v34, %v3762_v0  ;;  %v4478_v26 = vld [vmem:[#allocation6 + $0x670] sm:$0xff]  ;;  %v4071_v38 = vld [vmem:[#allocation6 + $0x198] sm:$0xff] }
 0x3fb   : > { %4244 = vmatpush.msrb.mxu0 %v4020_v22  ;;  %v4328_v22 = vld [vmem:[#allocation6 + $0x490] sm:$0xff]  ;;  %4290 = vmatpush.msrb.mxu3 %v4082_v48 }
 0x3fc   : > { %4264 = vmatpush.msrb.mxu1 %v4036_v60  ;;  %5015 = vmatmul.msk.f32.vlgmr.msrb.gmra.mxu0 %vm5810_vm2, %v3994_v56  ;;  %v3801_v60 = vpop.f32.mrf.mxu3  ;;  %v4080_v56 = vld [vmem:[#allocation6 + $0x1e0] sm:$0xff]  ;;  %v4470_v34 = vld [vmem:[#allocation6 + $0x630] sm:$0xff] }
 0x3fd   : > { %5017 = vmatmul.msk.f32.vlgmr.msrb.gmra.mxu1 %vm5810_vm2, %v3995_v53  ;;  %4382 = vmatpush.msra.mxu0 %v4325_v63  ;;  %v3802_v24 = vadd.f32 %v3801_v60, %v3782_v3  ;;  %v4311_v53 = vld [vmem:[#allocation6 + $0x408] sm:$0xff]  ;;  %v4486_v48 = vld [vmem:[#allocation6 + $0x6b0] sm:$0xff]  ;;  %v4468_v60 = vld [vmem:[#allocation6 + $0x620] sm:$0xff] }
 0x3fe   : > { %4402 = vmatpush.msra.mxu1 %v4341_v37  ;;  %4281 = vmatpush.msrb.mxu2 %v4055_v2  ;;  %v4327_v63 = vld [vmem:[#allocation6 + $0x488] sm:$0xff] }
 0x3ff   : > { %4383 = vmatpush.msra.mxu0 %v4324_v35  ;;  %4291 = vmatpush.msrb.mxu3 %v4081_v30  ;;  %v4310_v35 = vld [vmem:[#allocation6 + $0x400] sm:$0xff]  ;;  %v4469_v3 = vld [vmem:[#allocation6 + $0x628] sm:$0xff] }
 0x400   : > { %4403 = vmatpush.msra.mxu1 %v4340_v6  ;;  %4282 = vmatpush.msrb.mxu2 %v4054_v28  ;;  %v4326_v6 = vld [vmem:[#allocation6 + $0x480] sm:$0xff]  ;;  %v4485_v30 = vld [vmem:[#allocation6 + $0x6a8] sm:$0xff] }
 0x401   : > { %4384 = vmatpush.msra.mxu0 %v4323_v25  ;;  %4292 = vmatpush.msrb.mxu3 %v4080_v56  ;;  %v4374_v25 = vrot.slane %v5802_v8, 4  ;;  %v4351_v56 = vld [vmem:[#allocation6 + $0x548] sm:$0xff] }
 0x402   : > { %4404 = vmatpush.msra.mxu1 %v4339_v10  ;;  %4283 = vmatpush.msrb.mxu2 %v4053_v43  ;;  %v4375_v10 = vrot.slane %v5807_v29, 4 }
 0x403   : > { %4385 = vmatpush.msra.mxu0 %v4322_v50  ;;  %4293 = vmatpush.msrb.mxu3 %v4079_v14  ;;  %v4466_v14 = vld [vmem:[#allocation6 + $0x610] sm:$0xff] }
 0x404   : > { %4405 = vmatpush.msra.mxu1 %v4338_v15  ;;  %4284 = vmatpush.msrb.mxu2 %v4052_v61  ;;  %v3972_v15 = vperm.slane %v5791_v20, 2  ;;  %v4474_v61 = vld [vmem:[#allocation6 + $0x650] sm:$0xff] }
 0x405   : > { %4386 = vmatpush.msra.mxu0 %v4321_v51  ;;  %v4494_v51 = vld [vmem:[#allocation6 + $0x6f0] sm:$0xff]  ;;  %4294 = vmatpush.msrb.mxu3 %v4078_v21 }
 0x406   : > { %4406 = vmatpush.msra.mxu1 %v4337_v54 }
 0x407   : > { %4387 = vmatpush.msra.mxu0 %v4320_v33  ;;  %v3821_v37 = vpop.f32.mrf.mxu0  ;;  %v4477_v33 = vld [vmem:[#allocation6 + $0x668] sm:$0xff]  ;;  %4295 = vmatpush.msrb.mxu3 %v4077_v23 }
 0x408   : > { %4407 = vmatpush.msra.mxu1 %v4336_v16  ;;  %v3822_v5 = vadd.f32 %v3821_v37, %v3802_v24  ;;  %v4493_v16 = vld [vmem:[#allocation6 + $0x6e8] sm:$0xff]  ;;  %v4484_v24 = vld [vmem:[#allocation6 + $0x6a0] sm:$0xff] }
 0x409   : > { %4388 = vmatpush.msra.mxu0 %v4319_v45  ;;  %v3841_v7 = vpop.f32.mrf.mxu1  ;;  %v4476_v45 = vld [vmem:[#allocation6 + $0x660] sm:$0xff]  ;;  %4296 = vmatpush.msrb.mxu3 %v4076_v18  ;;  %v4347_v23 = vld [vmem:[#allocation6 + $0x528] sm:$0xff]  ;;  %v4345_v18 = vld [vmem:[#allocation6 + $0x518] sm:$0xff] }
 0x40a   : > { %4408 = vmatpush.msra.mxu1 %v4335_v31  ;;  %v3842_v50 = vadd.f32 %v3841_v7, %v3822_v5  ;;  %v4492_v31 = vld [vmem:[#allocation6 + $0x6e0] sm:$0xff]  ;;  %v4465_v5 = vld [vmem:[#allocation6 + $0x608] sm:$0xff] }
 0x40b   : > { %4389 = vmatpush.msra.mxu0 %v4318_v36  ;;  %v4491_v36 = vld [vmem:[#allocation6 + $0x6d8] sm:$0xff]  ;;  %4297 = vmatpush.msrb.mxu3 %v4075_v9  ;;  %v4350_v37 = vld [vmem:[#allocation6 + $0x540] sm:$0xff]  ;;  %v4481_v7 = vld [vmem:[#allocation6 + $0x688] sm:$0xff] }
 0x40c   : > { %4409 = vmatpush.msra.mxu1 %v4334_v17  ;;  %v3966_v54 = vadd.f32 %v3842_v50, %v5753_v27  ;;  %v4475_v27 = vld [vmem:[#allocation6 + $0x658] sm:$0xff]  ;;  %v4464_v50 = vld [vmem:[#allocation6 + $0x600] sm:$0xff] }
 0x40d   : > { %4390 = vmatpush.msra.mxu0 %v4317_v55  ;;  %v4357_v17 = vld [vmem:[#allocation6 + $0x578] sm:$0xff]  ;;  %v4490_v55 = vld [vmem:[#allocation6 + $0x6d0] sm:$0xff]  ;;  %4298 = vmatpush.msrb.mxu3 %v4074_v12 }
 0x40e   : > { %4410 = vmatpush.msra.mxu1 %v4333_v13  ;;  %v3980_v2 = vadd.f32 %v3972_v15, %v3966_v54  ;;  %v4356_v13 = vld [vmem:[#allocation6 + $0x570] sm:$0xff]  ;;  %v4480_v15 = vld [vmem:[#allocation6 + $0x680] sm:$0xff] }
 0x40f   : > { %4391 = vmatpush.msra.mxu0 %v4316_v41  ;;  %v4473_v41 = vld [vmem:[#allocation6 + $0x648] sm:$0xff]  ;;  %4299 = vmatpush.msrb.mxu3 %v4073_v39 }
 0x410   : > { %4411 = vmatpush.msra.mxu1 %v4332_v49  ;;  %v3984_v28 = vmax.f32 %v3980_v2, 0.0  ;;  %v4489_v49 = vld [vmem:[#allocation6 + $0x6c8] sm:$0xff] }
 0x411   : > { %4392 = vmatpush.msra.mxu0 %v4315_v1  ;;  %v4472_v1 = vld [vmem:[#allocation6 + $0x640] sm:$0xff]  ;;  %4300 = vmatpush.msrb.mxu3 %v4072_v46  ;;  %v4507_v46 = vld [vmem:[#allocation6 + $0x758] sm:$0xff] }
 0x412   : > { %4412 = vmatpush.msra.mxu1 %v4331_v4  ;;  %v5824_v43 = vmin.f32 %v3984_v28, 6.0  ;;  %v4488_v4 = vld [vmem:[#allocation6 + $0x6c0] sm:$0xff] }
 0x413   : > { %4393 = vmatpush.msra.mxu0 %v4314_v47  ;;  %v4471_v47 = vld [vmem:[#allocation6 + $0x638] sm:$0xff]  ;;  %4301 = vmatpush.msrb.mxu3 %v4071_v38  ;;  %v4505_v38 = vld [vmem:[#allocation6 + $0x748] sm:$0xff] }
 0x414   : > { %4413 = vmatpush.msra.mxu1 %v4330_v52  ;;  %4205 = vmatmul.f32.vlgmr.msra.gmra.mxu2 %v5824_v43  ;;  %v4487_v52 = vld [vmem:[#allocation6 + $0x6b8] sm:$0xff]  ;;  %v3996_v0 = vrot.slane %v5824_v43, 3  ;;  %v4376_v12 = vrot.slane %v5824_v43, 4 }
 0x415   : > { %4394 = vmatpush.msra.mxu0 %v4313_v32  ;;  %4422 = vmatpush.msra.mxu2 %v4357_v17  ;;  %v4353_v32 = vld [vmem:[#allocation6 + $0x558] sm:$0xff] }
 0x416   : > { %4414 = vmatpush.msra.mxu1 %v4329_v59  ;;  %v4069_v59 = vld [vmem:[#allocation6 + $0x188] sm:$0xff]  ;;  %4302 = vmatpush.msrb.mxu3 %v4070_v57  ;;  %v4504_v57 = vld [vmem:[#allocation6 + $0x740] sm:$0xff] }
 0x417   : > { %4395 = vmatpush.msra.mxu0 %v4312_v42  ;;  %4423 = vmatpush.msra.mxu2 %v4356_v13  ;;  %v4352_v42 = vld [vmem:[#allocation6 + $0x550] sm:$0xff] }
 0x418   : > { %4415 = vmatpush.msra.mxu1 %v4328_v22  ;;  %v4068_v22 = vld [vmem:[#allocation6 + $0x180] sm:$0xff]  ;;  %4303 = vmatpush.msrb.mxu3 %v4069_v59  ;;  %v4510_v13 = vld [vmem:[#allocation6 + $0x770] sm:$0xff] }
 0x419   : > { %4396 = vmatpush.msra.mxu0 %v4311_v53  ;;  %4424 = vmatpush.msra.mxu2 %v4355_v40  ;;  %v4467_v53 = vld [vmem:[#allocation6 + $0x618] sm:$0xff]  ;;  %v4366_v59 = vld [vmem:[#allocation6 + $0x5c0] sm:$0xff] }
 0x41a   : > { %4416 = vmatpush.msra.mxu1 %v4327_v63  ;;  %v4483_v63 = vld [vmem:[#allocation6 + $0x698] sm:$0xff]  ;;  %4304 = vmatpush.msrb.mxu3 %v4068_v22  ;;  %v4364_v22 = vld [vmem:[#allocation6 + $0x5b0] sm:$0xff] }
 0x41b   : > { %4397 = vmatpush.msra.mxu0 %v4310_v35  ;;  %4425 = vmatpush.msra.mxu2 %v4354_v44  ;;  %v4482_v35 = vld [vmem:[#allocation6 + $0x690] sm:$0xff]  ;;  %v4373_v40 = vld [vmem:[#allocation6 + $0x5f8] sm:$0xff]  ;;  %v4370_v44 = vld [vmem:[#allocation6 + $0x5e0] sm:$0xff] }
 0x41c   : > { %4417 = vmatpush.msra.mxu1 %v4326_v6  ;;  %4398 = vmatmul.f32.vlgmr.msra.gmra.mxu0 %v4374_v25  ;;  %v4349_v6 = vld [vmem:[#allocation6 + $0x538] sm:$0xff]  ;;  %v3861_v25 = vpop.f32.mrf.mxu2 }
 0x41d   : > { %4418 = vmatmul.f32.vlgmr.msra.gmra.mxu1 %v4375_v10  ;;  %4528 = vmatpush.msrb.mxu0 %v4479_v11  ;;  %v3881_v10 = vpop.f32.mrf.mxu3 }
 0x41e   : > { %4548 = vmatpush.msrb.mxu1 %v4495_v58  ;;  %5019 = vmatmul.msk.f32.vlgmr.msrb.gmra.mxu2 %vm5810_vm2, %v3996_v0  ;;  %v3882_v11 = vadd.f32 %v3881_v10, %v3861_v25  ;;  %v4348_v58 = vld [vmem:[#allocation6 + $0x530] sm:$0xff]  ;;  %v4527_v10 = vld [vmem:[#allocation6 + $0x7f8] sm:$0xff] }
 0x41f   : > { %4529 = vmatpush.msrb.mxu0 %v4478_v26  ;;  %4426 = vmatpush.msra.mxu2 %v4353_v32  ;;  %v4007_v26 = vrot.slane %v5802_v8, 1  ;;  %v4344_v8 = vld [vmem:[#allocation6 + $0x510] sm:$0xff] }
 0x420   : > { %4549 = vmatpush.msrb.mxu1 %v4494_v51  ;;  %v4008_v51 = vrot.slane %v5807_v29, 1  ;;  %v4368_v0 = vld [vmem:[#allocation6 + $0x5d0] sm:$0xff] }
 0x421   : > { %4530 = vmatpush.msrb.mxu0 %v4477_v33  ;;  %4427 = vmatpush.msra.mxu2 %v4352_v42  ;;  %v4346_v33 = vld [vmem:[#allocation6 + $0x520] sm:$0xff]  ;;  %v4502_v32 = vld [vmem:[#allocation6 + $0x730] sm:$0xff] }
 0x422   : > { %4550 = vmatpush.msrb.mxu1 %v4493_v16  ;;  %v4500_v42 = vld [vmem:[#allocation6 + $0x720] sm:$0xff] }
 0x423   : > { %4531 = vmatpush.msrb.mxu0 %v4476_v45  ;;  %4428 = vmatpush.msra.mxu2 %v4351_v56  ;;  %v4498_v56 = vld [vmem:[#allocation6 + $0x710] sm:$0xff] }
 0x424   : > { %4551 = vmatpush.msrb.mxu1 %v4492_v31  ;;  %v4343_v31 = vld [vmem:[#allocation6 + $0x508] sm:$0xff] }
 0x425   : > { %4532 = vmatpush.msrb.mxu0 %v4475_v27  ;;  %4429 = vmatpush.msra.mxu2 %v4350_v37  ;;  %v3973_v27 = vperm.slane %v5791_v20, 3  ;;  %v4508_v20 = vld [vmem:[#allocation6 + $0x760] sm:$0xff]  ;;  %v4361_v37 = vld [vmem:[#allocation6 + $0x598] sm:$0xff] }
 0x426   : > { %4552 = vmatpush.msrb.mxu1 %v4491_v36  ;;  %v4342_v36 = vld [vmem:[#allocation6 + $0x500] sm:$0xff] }
 0x427   : > { %4533 = vmatpush.msrb.mxu0 %v4474_v61  ;;  %4430 = vmatpush.msra.mxu2 %v4349_v6  ;;  %v4511_v61 = vld [vmem:[#allocation6 + $0x778] sm:$0xff]  ;;  %v4009_v6 = vrot.slane %v5824_v43, 1 }
 0x428   : > { %4553 = vmatpush.msrb.mxu1 %v4490_v55  ;;  %v4523_v43 = vld [vmem:[#allocation6 + $0x7d8] sm:$0xff] }
 0x429   : > { %4534 = vmatpush.msrb.mxu0 %v4473_v41  ;;  %4431 = vmatpush.msra.mxu2 %v4348_v58  ;;  %v4509_v41 = vld [vmem:[#allocation6 + $0x768] sm:$0xff] }
 0x42a   : > { %4554 = vmatpush.msrb.mxu1 %v4489_v49  ;;  %v4525_v58 = vld [vmem:[#allocation6 + $0x7e8] sm:$0xff] }
 0x42b   : > { %4535 = vmatpush.msrb.mxu0 %v4472_v1  ;;  %4432 = vmatpush.msra.mxu2 %v4347_v23  ;;  %v4371_v1 = vld [vmem:[#allocation6 + $0x5e8] sm:$0xff] }
 0x42c   : > { %4555 = vmatpush.msrb.mxu1 %v4488_v4  ;;  %v4506_v4 = vld [vmem:[#allocation6 + $0x750] sm:$0xff]  ;;  %v4517_v23 = vld [vmem:[#allocation6 + $0x7a8] sm:$0xff] }
 0x42d   : > { %4536 = vmatpush.msrb.mxu0 %v4471_v47  ;;  %4433 = vmatpush.msra.mxu2 %v4346_v33  ;;  %v4515_v33 = vld [vmem:[#allocation6 + $0x798] sm:$0xff] }
 0x42e   : > { %4556 = vmatpush.msrb.mxu1 %v4487_v52  ;;  %v4369_v52 = vld [vmem:[#allocation6 + $0x5d8] sm:$0xff] }
 0x42f   : > { %4537 = vmatpush.msrb.mxu0 %v4470_v34  ;;  %4434 = vmatpush.msra.mxu2 %v4345_v18  ;;  %v4503_v34 = vld [vmem:[#allocation6 + $0x738] sm:$0xff]  ;;  %v4513_v18 = vld [vmem:[#allocation6 + $0x788] sm:$0xff] }
 0x430   : > { %4557 = vmatpush.msrb.mxu1 %v4486_v48  ;;  %v4367_v48 = vld [vmem:[#allocation6 + $0x5c8] sm:$0xff] }
 0x431   : > { %4538 = vmatpush.msrb.mxu0 %v4469_v3  ;;  %4435 = vmatpush.msra.mxu2 %v4344_v8  ;;  %v4501_v3 = vld [vmem:[#allocation6 + $0x728] sm:$0xff]  ;;  %v4686_v8 = vld [vmem:[#allocation9 + $0x1f0] sm:$0xff] }
 0x432   : > { %4558 = vmatpush.msrb.mxu1 %v4485_v30  ;;  %v4365_v30 = vld [vmem:[#allocation6 + $0x5b8] sm:$0xff] }
 0x433   : > { %4539 = vmatpush.msrb.mxu0 %v4468_v60  ;;  %4436 = vmatpush.msra.mxu2 %v4343_v31  ;;  %v4499_v60 = vld [vmem:[#allocation6 + $0x718] sm:$0xff]  ;;  %v4684_v31 = vld [vmem:[#allocation9 + $0x1e0] sm:$0xff] }
 0x434   : > { %4559 = vmatpush.msrb.mxu1 %v4484_v24  ;;  %v4363_v24 = vld [vmem:[#allocation6 + $0x5a8] sm:$0xff] }
 0x435   : > { %4540 = vmatpush.msrb.mxu0 %v4467_v53  ;;  %4437 = vmatpush.msra.mxu2 %v4342_v36  ;;  %v4362_v53 = vld [vmem:[#allocation6 + $0x5a0] sm:$0xff] }
 0x436   : > { %4560 = vmatpush.msrb.mxu1 %v4483_v63  ;;  %4438 = vmatmul.f32.vlgmr.msra.gmra.mxu2 %v4376_v12  ;;  %v4497_v63 = vld [vmem:[#allocation6 + $0x708] sm:$0xff]  ;;  %v4683_v36 = vld [vmem:[#allocation9 + $0x1d8] sm:$0xff] }
 0x437   : > { %4541 = vmatpush.msrb.mxu0 %v4466_v14  ;;  %v3901_v21 = vpop.f32.mrf.mxu0  ;;  %4568 = vmatpush.msrb.mxu2 %v4511_v61  ;;  %v4496_v14 = vld [vmem:[#allocation6 + $0x700] sm:$0xff]  ;;  %v4681_v12 = vld [vmem:[#allocation9 + $0x1c8] sm:$0xff]  ;;  %v4678_v61 = vld [vmem:[#allocation9 + $0x1b0] sm:$0xff] }
 0x438   : > { %4561 = vmatpush.msrb.mxu1 %v4482_v35  ;;  %v3902_v54 = vadd.f32 %v3901_v21, %v3882_v11  ;;  %v3921_v2 = vpop.f32.mrf.mxu1  ;;  %v4360_v35 = vld [vmem:[#allocation6 + $0x590] sm:$0xff]  ;;  %v4521_v21 = vld [vmem:[#allocation6 + $0x7c8] sm:$0xff] }
 0x439   : > { %4542 = vmatpush.msrb.mxu0 %v4465_v5  ;;  %4569 = vmatpush.msrb.mxu2 %v4510_v13  ;;  %v4359_v5 = vld [vmem:[#allocation6 + $0x588] sm:$0xff]  ;;  %v4526_v11 = vld [vmem:[#allocation6 + $0x7f0] sm:$0xff] }
 0x43a   : > { %4562 = vmatpush.msrb.mxu1 %v4481_v7  ;;  %v3922_v16 = vadd.f32 %v3921_v2, %v3902_v54  ;;  %v4358_v7 = vld [vmem:[#allocation6 + $0x580] sm:$0xff]  ;;  %v4518_v54 = vld [vmem:[#allocation6 + $0x7b0] sm:$0xff] }
 0x43b   : > { %4543 = vmatpush.msrb.mxu0 %v4464_v50  ;;  %4570 = vmatpush.msrb.mxu2 %v4509_v41  ;;  %v4524_v50 = vld [vmem:[#allocation6 + $0x7e0] sm:$0xff]  ;;  %v4674_v41 = vld [vmem:[#allocation9 + $0x190] sm:$0xff] }
 0x43c   : > { %4563 = vmatpush.msrb.mxu1 %v4480_v15  ;;  %5022 = vmatmul.msk.f32.vlgmr.msrb.gmra.mxu0 %vm4015_vm3, %v4007_v26  ;;  %v4522_v15 = vld [vmem:[#allocation6 + $0x7d0] sm:$0xff]  ;;  %v4520_v26 = vld [vmem:[#allocation6 + $0x7c0] sm:$0xff] }
 0x43d   : > { %5023 = vmatmul.msk.f32.vlgmr.msrb.gmra.mxu1 %vm4015_vm3, %v4008_v51  ;;  %4571 = vmatpush.msrb.mxu2 %v4508_v20  ;;  %v4519_v51 = vld [vmem:[#allocation6 + $0x7b8] sm:$0xff]  ;;  %v4516_v2 = vld [vmem:[#allocation6 + $0x7a0] sm:$0xff]  ;;  %v4673_v20 = vld [vmem:[#allocation9 + $0x188] sm:$0xff] }
 0x43e   : > { %4688 = vmatpush.msra.mxu0 %v4686_v8  ;;  %v4676_v13 = vld [vmem:[#allocation9 + $0x1a0] sm:$0xff]  ;;  %v4636_v8 = vld [vmem:[#allocation9 + $0x68] sm:$0xff] }
 0x43f   : > { %v3941_v28 = vpop.f32.mrf.mxu2  ;;  %4572 = vmatpush.msrb.mxu2 %v4507_v46  ;;  %v4671_v46 = vld [vmem:[#allocation9 + $0x178] sm:$0xff] }
 0x440   : > { %v3942_v45 = vadd.f32 %v3941_v28, %v3922_v16  ;;  %v4514_v16 = vld [vmem:[#allocation6 + $0x790] sm:$0xff]  ;;  %v4512_v28 = vld [vmem:[#allocation6 + $0x780] sm:$0xff]  ;;  %4689 = vmatpush.msra.mxu0 %v4684_v31 }
 0x441   : > { %4573 = vmatpush.msrb.mxu2 %v4506_v4  ;;  %v4669_v4 = vld [vmem:[#allocation9 + $0x168] sm:$0xff] }
 0x443   : > { %v3961_v29 = vpop.f32.mrf.mxu3  ;;  %4574 = vmatpush.msrb.mxu2 %v4505_v38  ;;  %v4667_v38 = vld [vmem:[#allocation9 + $0x158] sm:$0xff] }
 0x444   : > { %v3962_v9 = vadd.f32 %v3961_v29, %v3942_v45  ;;  %v4687_v29 = vld [vmem:[#allocation9 + $0x1f8] sm:$0xff] }
 0x445   : > { %4575 = vmatpush.msrb.mxu2 %v4504_v57  ;;  %4708 = vmatpush.msra.mxu1 %v4687_v29  ;;  %v4651_v57 = vld [vmem:[#allocation9 + $0xe0] sm:$0xff]  ;;  %v4787_v29 = vld [vmem:[#allocation9 + $0x290] sm:$0xff] }
 0x446   : > { %v3967_v17 = vadd.f32 %v3962_v9, %v5760_v19  ;;  %v4372_v19 = vld [vmem:[#allocation6 + $0x5f0] sm:$0xff] }
 0x447   : > { %4576 = vmatpush.msrb.mxu2 %v4503_v34  ;;  %v4685_v9 = vld [vmem:[#allocation9 + $0x1e8] sm:$0xff]  ;;  %v4664_v34 = vld [vmem:[#allocation9 + $0x140] sm:$0xff] }
 0x448   : > { %v3981_v55 = vadd.f32 %v3973_v27, %v3967_v17  ;;  %v4682_v27 = vld [vmem:[#allocation9 + $0x1d0] sm:$0xff]  ;;  %4709 = vmatpush.msra.mxu1 %v4685_v9  ;;  %v4680_v17 = vld [vmem:[#allocation9 + $0x1c0] sm:$0xff]  ;;  %v4788_v9 = vld [vmem:[#allocation9 + $0x298] sm:$0xff] }
 0x449   : > { %4577 = vmatpush.msrb.mxu2 %v4502_v32  ;;  %4690 = vmatpush.msra.mxu0 %v4682_v27  ;;  %v4649_v32 = vld [vmem:[#allocation9 + $0xd0] sm:$0xff] }
 0x44a   : > { %v3985_v39 = vmax.f32 %v3981_v55, 0.0  ;;  %4710 = vmatpush.msra.mxu1 %v4683_v36  ;;  %v4679_v55 = vld [vmem:[#allocation9 + $0x1b8] sm:$0xff] }
 0x44b   : > { %4578 = vmatpush.msrb.mxu2 %v4501_v3  ;;  %4691 = vmatpush.msra.mxu0 %v4680_v17  ;;  %v4662_v3 = vld [vmem:[#allocation9 + $0x130] sm:$0xff] }
 0x44c   : > { %v5837_v49 = vmin.f32 %v3985_v39, 6.0  ;;  %4711 = vmatpush.msra.mxu1 %v4681_v12  ;;  %v4677_v39 = vld [vmem:[#allocation9 + $0x1a8] sm:$0xff]  ;;  %v4633_v17 = vld [vmem:[#allocation9 + $0x50] sm:$0xff]  ;;  %v4634_v12 = vld [vmem:[#allocation9 + $0x58] sm:$0xff] }
 0x44d   : > { %4579 = vmatpush.msrb.mxu2 %v4500_v42  ;;  %4692 = vmatpush.msra.mxu0 %v4678_v61  ;;  %v4647_v42 = vld [vmem:[#allocation9 + $0xc0] sm:$0xff] }
 0x44e   : > { %4225 = vmatmul.f32.vlgmr.msra.gmra.mxu3 %v5837_v49  ;;  %v3997_v47 = vrot.slane %v5837_v49, 3  ;;  %v4377_v25 = vrot.slane %v5837_v49, 4  ;;  %v4010_v45 = vrot.slane %v5837_v49, 1  ;;  %4712 = vmatpush.msra.mxu1 %v4679_v55  ;;  %v4675_v49 = vld [vmem:[#allocation9 + $0x198] sm:$0xff]  ;;  %v4785_v61 = vld [vmem:[#allocation9 + $0x280] sm:$0xff]  ;;  %v4786_v55 = vld [vmem:[#allocation9 + $0x288] sm:$0xff] }
 0x44f   : > { %4442 = vmatpush.msra.mxu3 %v4373_v40  ;;  %4580 = vmatpush.msrb.mxu2 %v4499_v60  ;;  %v4672_v40 = vld [vmem:[#allocation9 + $0x180] sm:$0xff] }
 0x450   : > { %4693 = vmatpush.msra.mxu0 %v4676_v13  ;;  %4713 = vmatpush.msra.mxu1 %v4677_v39  ;;  %v4660_v60 = vld [vmem:[#allocation9 + $0x120] sm:$0xff]  ;;  %v4632_v39 = vld [vmem:[#allocation9 + $0x48] sm:$0xff] }
 0x451   : > { %4443 = vmatpush.msra.mxu3 %v4372_v19  ;;  %4581 = vmatpush.msrb.mxu2 %v4498_v56  ;;  %v4670_v19 = vld [vmem:[#allocation9 + $0x170] sm:$0xff]  ;;  %v4631_v13 = vld [vmem:[#allocation9 + $0x40] sm:$0xff] }
 0x452   : > { %4694 = vmatpush.msra.mxu0 %v4674_v41  ;;  %4714 = vmatpush.msra.mxu1 %v4675_v49  ;;  %v4645_v56 = vld [vmem:[#allocation9 + $0xb0] sm:$0xff]  ;;  %v4784_v49 = vld [vmem:[#allocation9 + $0x278] sm:$0xff] }
 0x453   : > { %4444 = vmatpush.msra.mxu3 %v4371_v1  ;;  %4582 = vmatpush.msrb.mxu2 %v4497_v63  ;;  %v4668_v1 = vld [vmem:[#allocation9 + $0x160] sm:$0xff]  ;;  %v4658_v63 = vld [vmem:[#allocation9 + $0x110] sm:$0xff] }
 0x454   : > { %4695 = vmatpush.msra.mxu0 %v4672_v40  ;;  %4715 = vmatpush.msra.mxu1 %v4673_v20  ;;  %v4783_v41 = vld [vmem:[#allocation9 + $0x270] sm:$0xff] }
 0x455   : > { %4445 = vmatpush.msra.mxu3 %v4370_v44  ;;  %4583 = vmatpush.msrb.mxu2 %v4496_v14  ;;  %v4666_v44 = vld [vmem:[#allocation9 + $0x150] sm:$0xff]  ;;  %v4643_v14 = vld [vmem:[#allocation9 + $0xa0] sm:$0xff] }
 0x456   : > { %5021 = vmatmul.msk.f32.vlgmr.msrb.gmra.mxu3 %vm5810_vm2, %v3997_v47  ;;  %5024 = vmatmul.msk.f32.vlgmr.msrb.gmra.mxu2 %vm4015_vm3, %v4009_v6  ;;  %v4653_v47 = vld [vmem:[#allocation9 + $0xf0] sm:$0xff]  ;;  %v4656_v6 = vld [vmem:[#allocation9 + $0x100] sm:$0xff] }
 0x457   : > { %4446 = vmatpush.msra.mxu3 %v4369_v52  ;;  %4696 = vmatpush.msra.mxu0 %v4670_v19  ;;  %v4654_v52 = vld [vmem:[#allocation9 + $0xf8] sm:$0xff]  ;;  %v4629_v20 = vld [vmem:[#allocation9 + $0x30] sm:$0xff] }
 0x458   : > { %4716 = vmatpush.msra.mxu1 %v4671_v46  ;;  %4728 = vmatpush.msra.mxu2 %v4653_v47  ;;  %v4630_v19 = vld [vmem:[#allocation9 + $0x38] sm:$0xff]  ;;  %v4781_v46 = vld [vmem:[#allocation9 + $0x260] sm:$0xff] }
 0x459   : > { %4447 = vmatpush.msra.mxu3 %v4368_v0  ;;  %4697 = vmatpush.msra.mxu0 %v4668_v1  ;;  %v4652_v0 = vld [vmem:[#allocation9 + $0xe8] sm:$0xff]  ;;  %v4166_v31 = vpop.f32.mrf.mxu0  ;;  %v4780_v47 = vld [vmem:[#allocation9 + $0x258] sm:$0xff] }
 0x45a   : > { %4717 = vmatpush.msra.mxu1 %v4669_v4  ;;  %4729 = vmatpush.msra.mxu2 %v4651_v57  ;;  %v4782_v1 = vld [vmem:[#allocation9 + $0x268] sm:$0xff]  ;;  %v4627_v4 = vld [vmem:[#allocation9 + $0x20] sm:$0xff] }
 0x45b   : > { %4448 = vmatpush.msra.mxu3 %v4367_v48  ;;  %v4665_v48 = vld [vmem:[#allocation9 + $0x148] sm:$0xff]  ;;  %4698 = vmatpush.msra.mxu0 %v4666_v44 }
 0x45c   : > { %4718 = vmatpush.msra.mxu1 %v4667_v38  ;;  %4730 = vmatpush.msra.mxu2 %v4649_v32  ;;  %v4186_v27 = vpop.f32.mrf.mxu1  ;;  %v4628_v44 = vld [vmem:[#allocation9 + $0x28] sm:$0xff]  ;;  %v4779_v38 = vld [vmem:[#allocation9 + $0x250] sm:$0xff] }
 0x45d   : > { %4449 = vmatpush.msra.mxu3 %v4366_v59  ;;  %v4650_v59 = vld [vmem:[#allocation9 + $0xd8] sm:$0xff]  ;;  %4699 = vmatpush.msra.mxu0 %v4664_v34  ;;  %v4187_v32 = vadd.f32 %v4186_v27, %v4166_v31 }
 0x45e   : > { %4719 = vmatpush.msra.mxu1 %v4665_v48  ;;  %4731 = vmatpush.msra.mxu2 %v4647_v42  ;;  %v4626_v34 = vld [vmem:[#allocation9 + $0x18] sm:$0xff]  ;;  %v4777_v48 = vld [vmem:[#allocation9 + $0x240] sm:$0xff] }
 0x45f   : > { %4450 = vmatpush.msra.mxu3 %v4365_v30  ;;  %v4663_v30 = vld [vmem:[#allocation9 + $0x138] sm:$0xff]  ;;  %4700 = vmatpush.msra.mxu0 %v4662_v3  ;;  %v4623_v3 = vld [vmem:[#allocation9] sm:$0xff] }
 0x460   : > { %4720 = vmatpush.msra.mxu1 %v4663_v30  ;;  %4732 = vmatpush.msra.mxu2 %v4645_v56  ;;  %v4624_v30 = vld [vmem:[#allocation9 + $0x8] sm:$0xff]  ;;  %v4773_v56 = vld [vmem:[#allocation9 + $0x220] sm:$0xff] }
 0x461   : > { %4451 = vmatpush.msra.mxu3 %v4364_v22  ;;  %v4648_v22 = vld [vmem:[#allocation9 + $0xc8] sm:$0xff]  ;;  %4701 = vmatpush.msra.mxu0 %v4660_v60  ;;  %v4776_v60 = vld [vmem:[#allocation9 + $0x238] sm:$0xff] }
 0x462   : > { %4733 = vmatpush.msra.mxu2 %v4643_v14  ;;  %v4772_v14 = vld [vmem:[#allocation9 + $0x218] sm:$0xff] }
 0x463   : > { %4452 = vmatpush.msra.mxu3 %v4363_v24  ;;  %v4661_v24 = vld [vmem:[#allocation9 + $0x128] sm:$0xff]  ;;  %4702 = vmatpush.msra.mxu0 %v4658_v63 }
 0x464   : > { %4721 = vmatpush.msra.mxu1 %v4661_v24 }
 0x465   : > { %4453 = vmatpush.msra.mxu3 %v4362_v53  ;;  %v4646_v53 = vld [vmem:[#allocation9 + $0xb8] sm:$0xff]  ;;  %4703 = vmatpush.msra.mxu0 %v4656_v6  ;;  %v4769_v6 = vld [vmem:[#allocation9 + $0x200] sm:$0xff] }
 0x467   : > { %4454 = vmatpush.msra.mxu3 %v4361_v37  ;;  %v4659_v37 = vld [vmem:[#allocation9 + $0x118] sm:$0xff] }
 0x468   : > { %4722 = vmatpush.msra.mxu1 %v4659_v37  ;;  %v4771_v37 = vld [vmem:[#allocation9 + $0x210] sm:$0xff] }
 0x469   : > { %4455 = vmatpush.msra.mxu3 %v4360_v35  ;;  %v4644_v35 = vld [vmem:[#allocation9 + $0xa8] sm:$0xff] }
 0x46b   : > { %4456 = vmatpush.msra.mxu3 %v4359_v5  ;;  %v4657_v5 = vld [vmem:[#allocation9 + $0x108] sm:$0xff] }
 0x46c   : > { %4723 = vmatpush.msra.mxu1 %v4657_v5  ;;  %v4770_v5 = vld [vmem:[#allocation9 + $0x208] sm:$0xff] }
 0x46d   : > { %4457 = vmatpush.msra.mxu3 %v4358_v7  ;;  %v4799_v7 = vld [vmem:[#allocation9 + $0x2f0] sm:$0xff] }
 0x46e   : > { %4458 = vmatmul.f32.vlgmr.msra.gmra.mxu3 %v4377_v25  ;;  %v4800_v25 = vld [vmem:[#allocation9 + $0x2f8] sm:$0xff]  ;;  %4801 = vmatpush.msrb.mxu0 %v4799_v7 }
 0x46f   : > { %4588 = vmatpush.msrb.mxu3 %v4527_v10  ;;  %v4641_v10 = vld [vmem:[#allocation9 + $0x90] sm:$0xff]  ;;  %4821 = vmatpush.msrb.mxu1 %v4800_v25 }
 0x470   : > { %4734 = vmatpush.msra.mxu2 %v4641_v10 }
 0x471   : > { %4589 = vmatpush.msrb.mxu3 %v4526_v11  ;;  %v4642_v11 = vld [vmem:[#allocation9 + $0x98] sm:$0xff] }
 0x473   : > { %4590 = vmatpush.msrb.mxu3 %v4525_v58  ;;  %v4797_v58 = vld [vmem:[#allocation9 + $0x2e0] sm:$0xff] }
 0x474   : > { %4802 = vmatpush.msrb.mxu0 %v4797_v58 }
 0x475   : > { %4591 = vmatpush.msrb.mxu3 %v4524_v50  ;;  %v4798_v50 = vld [vmem:[#allocation9 + $0x2e8] sm:$0xff] }
 0x476   : > { %4822 = vmatpush.msrb.mxu1 %v4798_v50 }
 0x477   : > { %4592 = vmatpush.msrb.mxu3 %v4523_v43  ;;  %v4639_v43 = vld [vmem:[#allocation9 + $0x80] sm:$0xff] }
 0x478   : > { %4735 = vmatpush.msra.mxu2 %v4639_v43 }
 0x479   : > { %4593 = vmatpush.msrb.mxu3 %v4522_v15  ;;  %v4640_v15 = vld [vmem:[#allocation9 + $0x88] sm:$0xff] }
 0x47a   : > { %v4266_v57 = vpop.f32.mrf.mxu1 }
 0x47b   : > { %4594 = vmatpush.msrb.mxu3 %v4521_v21  ;;  %v4795_v21 = vld [vmem:[#allocation9 + $0x2d0] sm:$0xff] }
 0x47c   : > { %4803 = vmatpush.msrb.mxu0 %v4795_v21 }
 0x47d   : > { %4595 = vmatpush.msrb.mxu3 %v4520_v26  ;;  %v4796_v26 = vld [vmem:[#allocation9 + $0x2d8] sm:$0xff] }
 0x47e   : > { %4823 = vmatpush.msrb.mxu1 %v4796_v26 }
 0x47f   : > { %4596 = vmatpush.msrb.mxu3 %v4519_v51  ;;  %v4637_v51 = vld [vmem:[#allocation9 + $0x70] sm:$0xff] }
 0x480   : > { %4736 = vmatpush.msra.mxu2 %v4637_v51 }
 0x481   : > { %4597 = vmatpush.msrb.mxu3 %v4518_v54  ;;  %v4638_v54 = vld [vmem:[#allocation9 + $0x78] sm:$0xff] }
 0x483   : > { %4598 = vmatpush.msrb.mxu3 %v4517_v23  ;;  %v4793_v23 = vld [vmem:[#allocation9 + $0x2c0] sm:$0xff] }
 0x484   : > { %4804 = vmatpush.msrb.mxu0 %v4793_v23 }
 0x485   : > { %4599 = vmatpush.msrb.mxu3 %v4516_v2  ;;  %v4794_v2 = vld [vmem:[#allocation9 + $0x2c8] sm:$0xff] }
 0x486   : > { %4824 = vmatpush.msrb.mxu1 %v4794_v2 }
 0x487   : > { %4600 = vmatpush.msrb.mxu3 %v4515_v33  ;;  %v4791_v33 = vld [vmem:[#allocation9 + $0x2b0] sm:$0xff] }
 0x488   : > { %4805 = vmatpush.msrb.mxu0 %v4791_v33 }
 0x489   : > { %4601 = vmatpush.msrb.mxu3 %v4514_v16  ;;  %v4792_v16 = vld [vmem:[#allocation9 + $0x2b8] sm:$0xff] }
 0x48a   : > { %4825 = vmatpush.msrb.mxu1 %v4792_v16 }
 0x48b   : > { %4602 = vmatpush.msrb.mxu3 %v4513_v18  ;;  %v4789_v18 = vld [vmem:[#allocation9 + $0x2a0] sm:$0xff] }
 0x48c   : > { %4806 = vmatpush.msrb.mxu0 %v4789_v18 }
 0x48d   : > { %4603 = vmatpush.msrb.mxu3 %v4512_v28  ;;  %v4790_v28 = vld [vmem:[#allocation9 + $0x2a8] sm:$0xff] }
 0x48e   : > { %5025 = vmatmul.msk.f32.vlgmr.msrb.gmra.mxu3 %vm4015_vm3, %v4010_v45  ;;  %4826 = vmatpush.msrb.mxu1 %v4790_v28  ;;  %v4635_v45 = vld [vmem:[#allocation9 + $0x60] sm:$0xff] }
 0x48f   : > { %4748 = vmatpush.msra.mxu3 %v4654_v52  ;;  %4737 = vmatpush.msra.mxu2 %v4635_v45  ;;  %v4246_v52 = vpop.f32.mrf.mxu0 }
 0x490   : > { %4807 = vmatpush.msrb.mxu0 %v4787_v29  ;;  %4827 = vmatpush.msrb.mxu1 %v4788_v9 }
 0x491   : > { %4749 = vmatpush.msra.mxu3 %v4652_v0  ;;  %4738 = vmatpush.msra.mxu2 %v4633_v17  ;;  %v4625_v0 = vld [vmem:[#allocation9 + $0x10] sm:$0xff] }
 0x492   : > { %4808 = vmatpush.msrb.mxu0 %v4785_v61  ;;  %4828 = vmatpush.msrb.mxu1 %v4786_v55  ;;  %v4843_v55 = vld [vmem:[#allocation10] sm:$0x3] }
 0x493   : > { %4750 = vmatpush.msra.mxu3 %v4650_v59  ;;  %4739 = vmatpush.msra.mxu2 %v4631_v13  ;;  %v4778_v59 = vld [vmem:[#allocation9 + $0x248] sm:$0xff] }
 0x494   : > { %4809 = vmatpush.msrb.mxu0 %v4783_v41  ;;  %4829 = vmatpush.msrb.mxu1 %v4784_v49 }
 0x495   : > { %4751 = vmatpush.msra.mxu3 %v4648_v22  ;;  %4740 = vmatpush.msra.mxu2 %v4629_v20  ;;  %v4775_v22 = vld [vmem:[#allocation9 + $0x230] sm:$0xff]  ;;  %v4846_v20 = vperm.slane %v4843_v55, 1 }
 0x496   : > { %4810 = vmatpush.msrb.mxu0 %v4781_v46  ;;  %4830 = vmatpush.msrb.mxu1 %v4782_v1 }
 0x497   : > { %4752 = vmatpush.msra.mxu3 %v4646_v53  ;;  %v4206_v36 = vpop.f32.mrf.mxu2  ;;  %4741 = vmatpush.msra.mxu2 %v4627_v4  ;;  %v4774_v53 = vld [vmem:[#allocation9 + $0x228] sm:$0xff] }
 0x498   : > { %4811 = vmatpush.msrb.mxu0 %v4779_v38  ;;  %4831 = vmatpush.msrb.mxu1 %v4780_v47  ;;  %v4207_v24 = vadd.f32 %v4206_v36, %v4187_v32 }
 0x499   : > { %4753 = vmatpush.msra.mxu3 %v4644_v35  ;;  %4742 = vmatpush.msra.mxu2 %v4625_v0  ;;  %v4399_v7 = vpop.f32.mrf.mxu0 }
 0x49a   : > { %4812 = vmatpush.msrb.mxu0 %v4777_v48  ;;  %4832 = vmatpush.msrb.mxu1 %v4778_v59  ;;  %v4419_v25 = vpop.f32.mrf.mxu1 }
 0x49b   : > { %4754 = vmatpush.msra.mxu3 %v4642_v11  ;;  %4743 = vmatpush.msra.mxu2 %v4623_v3  ;;  %v4420_v43 = vadd.f32 %v4419_v25, %v4399_v7 }
 0x49c   : > { %4813 = vmatpush.msrb.mxu0 %v4775_v22  ;;  %4833 = vmatpush.msrb.mxu1 %v4776_v60 }
 0x49d   : > { %4755 = vmatpush.msra.mxu3 %v4640_v15 }
 0x49e   : > { %4814 = vmatpush.msrb.mxu0 %v4773_v56  ;;  %4834 = vmatpush.msrb.mxu1 %v4774_v53 }
 0x49f   : > { %4756 = vmatpush.msra.mxu3 %v4638_v54 }
 0x4a0   : > { %4815 = vmatpush.msrb.mxu0 %v4771_v37  ;;  %4835 = vmatpush.msrb.mxu1 %v4772_v14 }
 0x4a1   : > { %4757 = vmatpush.msra.mxu3 %v4636_v8  ;;  %v4286_v42 = vpop.f32.mrf.mxu2  ;;  %v5111_v8 = vld [vmem:[#allocation7] ss:$0 sm:$0xff] }
 0x4a2   : > { %4816 = vmatpush.msrb.mxu0 %v4769_v6  ;;  %4836 = vmatpush.msrb.mxu1 %v4770_v5 }
 0x4a3   : > { %4758 = vmatpush.msra.mxu3 %v4634_v12 }
 0x4a5   : > { %4759 = vmatpush.msra.mxu3 %v4632_v39 }
 0x4a7   : > { %4760 = vmatpush.msra.mxu3 %v4630_v19 }
 0x4a9   : > { %4761 = vmatpush.msra.mxu3 %v4628_v44 }
 0x4ab   : > { %4762 = vmatpush.msra.mxu3 %v4626_v34 }
 0x4ad   : > { %4763 = vmatpush.msra.mxu3 %v4624_v30 }
 0x4b9   : > { %v4439_v11 = vpop.f32.mrf.mxu2  ;;  %v4545_v15 = vpop.f32.mrf.mxu0 }
 0x4ba   : > { %v4565_v21 = vpop.f32.mrf.mxu1  ;;  %v4440_v26 = vadd.f32 %v4439_v11, %v4420_v43 }
 0x4bb   : > { %v4566_v23 = vadd.f32 %v4565_v21, %v4545_v15 }
 0x4d1   : > { %v4226_v40 = vpop.f32.mrf.mxu3 }
 0x4d2   : > { %v4227_v63 = vadd.f32 %v4226_v40, %v4207_v24  ;;  %v4845_v40 = vperm.slane %v4843_v55, 0 }
 0x4d4   : > { %v4247_v10 = vadd.f32 %v4246_v52, %v4227_v63 }
 0x4d6   : > { %v4267_v58 = vadd.f32 %v4266_v57, %v4247_v10 }
 0x4d8   : > { %v4287_v51 = vadd.f32 %v4286_v42, %v4267_v58 }
 0x4d9   : > { %v4306_v35 = vpop.f32.mrf.mxu3  ;;  %v4585_v54 = vpop.f32.mrf.mxu2 }
 0x4da   : > { %v4307_v33 = vadd.f32 %v4306_v35, %v4287_v51  ;;  %v4586_v16 = vadd.f32 %v4585_v54, %v4566_v23 }
 0x4f1   : > { %v4459_v50 = vpop.f32.mrf.mxu3 }
 0x4f2   : > { %v4460_v2 = vadd.f32 %v4459_v50, %v4440_v26 }
 0x4f4   : > { %v4462_v28 = vadd.f32 %v4460_v2, %v4307_v33 }
 0x511   : > { %v4605_v18 = vpop.f32.mrf.mxu3 }
 0x512   : > { %v4606_v45 = vadd.f32 %v4605_v18, %v4586_v16 }
 0x514   : > { %v4608_v29 = vadd.f32 %v4606_v45, %v4462_v28 }
 0x516   : > { %v4613_v31 = vadd.f32 %v5111_v8, %v4608_v29 }
 0x518   : > { %v4614_v9 = vmax.f32 %v4613_v31, 0.0 }
 0x51a   : > { %v4615_v27 = vmin.f32 %v4614_v9, 6.0 }
 0x51c   : > { %v4617_v36 = vrot.slane %v4615_v27, 7  ;;  %4704 = vmatmul.f32.vlgmr.msra.gmra.mxu0 %v4615_v27  ;;  %4724 = vmatmul.f32.vlgmr.msra.gmra.mxu1 %v4615_v27  ;;  %v4620_v17 = vrot.slane %v4615_v27, 1 }
 0x51e   : > { %5027 = vmatmul.msk.f32.vlgmr.msra.gmra.mxu2 %vm5810_vm2, %v4617_v36  ;;  %5029 = vmatmul.msk.f32.vlgmr.msra.gmra.mxu3 %vm5810_vm2, %v4617_v36 }
 0x524   : > { %5030 = vmatmul.msk.f32.vlgmr.msrb.gmra.mxu0 %vm4015_vm3, %v4620_v17  ;;  %5031 = vmatmul.msk.f32.vlgmr.msrb.gmra.mxu1 %vm4015_vm3, %v4620_v17 }
 0x599   : > { %v4705_v12 = vpop.f32.mrf.mxu0  ;;  %v4725_v61 = vpop.f32.mrf.mxu1 }
 0x5a1   : > { %v4745_v13 = vpop.f32.mrf.mxu2  ;;  %v4765_v39 = vpop.f32.mrf.mxu3 }
 0x5a2   : > { %v4746_v41 = vadd.f32 %v4745_v13, %v4705_v12  ;;  %v4766_v49 = vadd.f32 %v4765_v39, %v4725_v61  ;;  %v4818_v19 = vpop.f32.mrf.mxu0  ;;  %v4838_v46 = vpop.f32.mrf.mxu1 }
 0x5a4   : > { %v4841_v1 = vadd.f32 %v4818_v19, %v4746_v41  ;;  %v4842_v62 = vadd.f32 %v4838_v46, %v4766_v49 }
 0x5a6   : > { %v4849_v4 = vadd.f32 %v4845_v40, %v4841_v1  ;;  %v4850_v44 = vadd.f32 %v4846_v20, %v4842_v62 }
 0x5a8   : > { %v4851_v38 = vmax.f32 %v4849_v4, 0.0  ;;  %v4852_v47 = vmax.f32 %v4850_v44, 0.0 }
 0x5aa   : > { %v4854_v52 = vmin.f32 %v4852_v47, 6.0  ;;  %v4853_v57 = vmin.f32 %v4851_v38, 6.0 }
 0x5ac   : > { %v4857_v0 = vrot.slane %v4854_v52, 4 }
 0x5ae   : > { %v4858_v34 = vsel %vm404_vm0, %v4853_v57, %v4857_v0 }
 0x5af   : > { %4860 = vst [vmem:[%s372_s27] sm:$0xff] %v4858_v34 }
 0x5b0 PF: > { %s21_s24 = sadd.s32 1, %s5338_s24  }
 0x5b1   : > { %p18_p7 = scmp.ge.s32.totalorder %s21_s24, 4  }
 0x5b3   :  { %20 = sbr.rel (!%p18_p7) target bundleno = 4 (0x4), region = 114 }
 0x5b8   :  { %4882 = vsyncpa [#allocation3], 1 }
 0x5b9   :  { %4884 = vsyncpa [#allocation3 + $0x1], 1 }
 0x5ba   :  { %4885 = vsyncpa [#allocation5], 1 }
 0x5bb   :  { %4886 = vsyncpa [#allocation8], 1 }
 0x5bc   :  { %4887 = vsyncpa [#allocation11], 1 }

</bundles_post_ra>
